<compile_context>
chip_gen: v7x
topology: tpu7x:2x2x1
jax: 0.10.0
libtpu: 0.0.40
codegen_flags: <defaults>
</compile_context>

<pallas_src>
import functools

import jax
import jax.numpy as jnp
from jax.experimental import pallas as pl
from jax.experimental.pallas import tpu as pltpu


def _round_up(v, m):
    return (v + m - 1) // m * m


def _pick_vmem_limit():
    """Generation-aware scoped-VMEM budget (review item); safe fallback."""
    try:
        info = pltpu.get_tpu_info()
        for attr in ("vmem_capacity_bytes", "vmem_bytes", "vmem_size_bytes"):
            v = getattr(info, attr, None)
            if v:
                return min(int(v) * 3 // 4, 96 * 1024 * 1024)
    except Exception:
        pass
    return 32 * 1024 * 1024


_VMEM_LIMIT = _pick_vmem_limit()


# ---------------------------------------------------------------------------
# 1. Tiled GEMM + bias + optional ReLU (MXU, f32 accumulator, bf16 output)
# ---------------------------------------------------------------------------
def _matmul_kernel(x_ref, w_ref, b_ref, o_ref, acc_ref, *, relu):
    @pl.when(pl.program_id(2) == 0)
    def _init():
        acc_ref[...] = jnp.zeros_like(acc_ref)

    acc_ref[...] += jnp.dot(x_ref[...], w_ref[...],
                            preferred_element_type=jnp.float32)

    @pl.when(pl.program_id(2) == pl.num_programs(2) - 1)
    def _finalize():
        r = acc_ref[...] + b_ref[...]
        if relu:
            r = jnp.maximum(r, 0.0)
        o_ref[...] = r.astype(o_ref.dtype)


def matmul_bias_act(x, w, b, relu=True, out_dtype=jnp.bfloat16):
    """act((M,K) @ (K,N) + b): bf16 MXU operands, f32 accumulator, bf16 out."""
    M, K = x.shape
    K2, N = w.shape
    assert K == K2
    tm = 512 if M >= 512 else _round_up(max(M, 1), 8)
    kk = _round_up(K, 128)
    if kk <= 1024:
        tk = kk
    else:  # pick tk so there are no dead all-zero K tiles
        nkt = -(-kk // 1024)
        tk = _round_up(-(-kk // nkt), 128)
    nn = _round_up(N, 128)
    tn = nn if nn <= 256 else 256
    Mp, Kp, Np = _round_up(M, tm), _round_up(K, tk), _round_up(N, tn)

    xb = jnp.pad(x.astype(jnp.bfloat16), ((0, Mp - M), (0, Kp - K)))
    wb = jnp.pad(w.astype(jnp.bfloat16), ((0, Kp - K), (0, Np - N)))
    bb = jnp.pad(b.astype(jnp.float32), (0, Np - N)).reshape(1, Np)

    out = pl.pallas_call(
        functools.partial(_matmul_kernel, relu=relu),
        out_shape=jax.ShapeDtypeStruct((Mp, Np), out_dtype),
        grid=(Mp // tm, Np // tn, Kp // tk),
        in_specs=[pl.BlockSpec((tm, tk), lambda i, j, k: (i, k)),
                  pl.BlockSpec((tk, tn), lambda i, j, k: (k, j)),
                  pl.BlockSpec((1, tn), lambda i, j, k: (0, j))],
        out_specs=pl.BlockSpec((tm, tn), lambda i, j, k: (i, j)),
        scratch_shapes=[pltpu.VMEM((tm, tn), jnp.float32)],
        compiler_params=pltpu.CompilerParams(
            dimension_semantics=("parallel", "parallel", "arbitrary"),
            vmem_limit_bytes=_VMEM_LIMIT),
    )(xb, wb, bb)
    return out[:M, :N]


# ---------------------------------------------------------------------------
# 2. Depthwise 3x3 (+ fused dilated branch) — taps formed in-kernel (VPU)
#    Single padded input shared by both branches (review item).
# ---------------------------------------------------------------------------
def _dw_branch(xp_ref, w_ref, b_ref, H, W, dil, off):
    acc = None
    for ky in range(3):
        for kx in range(3):
            tap = xp_ref[:, off + ky * dil: off + ky * dil + H,
                         off + kx * dil: off + kx * dil + W, :]
            term = tap.astype(jnp.float32) * w_ref[ky * 3 + kx]
            acc = term if acc is None else acc + term
    return jnp.maximum(acc + b_ref[...], 0.0)


def _dw_kernel(xp_ref, w_ref, b_ref, o_ref, *, H, W):
    o_ref[...] = _dw_branch(xp_ref, w_ref, b_ref, H, W, 1, 0).astype(o_ref.dtype)


def _dw_dilated_kernel(xp_ref, w_ref, b_ref, wd_ref, bd_ref, o_ref, *, H, W, d):
    r = (_dw_branch(xp_ref, w_ref, b_ref, H, W, 1, d - 1)     # undilated, pad 1
         + _dw_branch(xp_ref, wd_ref, bd_ref, H, W, d, 0))    # dilated, pad d
    o_ref[...] = r.astype(o_ref.dtype)


def dw_bn_relu(x, p1, pd=None, dilation=1):
    """Depthwise 3x3 (pad=1) + BN + ReLU, optionally fused with the dilated
    depthwise branch of MultiDilationDSConv (relu(dw) + relu(ddw))."""
    N, H, W, C = x.shape
    tc = 128 if C % 128 == 0 else C

    def fold(p):
        return ((p['w'] * p['scale']).reshape(9, 1, C).astype(jnp.float32),
                p['bias'].reshape(1, C).astype(jnp.float32))

    w1, b1 = fold(p1)
    w_spec = pl.BlockSpec((9, 1, tc), lambda n, c: (0, 0, c))
    b_spec = pl.BlockSpec((1, tc), lambda n, c: (0, c))

    if pd is None:
        pad = 1
        args = [jnp.pad(x, ((0, 0), (1, 1), (1, 1), (0, 0))), w1, b1]
        extra_specs = []
        kern = functools.partial(_dw_kernel, H=H, W=W)
    else:
        pad = dilation
        wd, bd = fold(pd)
        # single pad by d; both branches slice the same ref (review item)
        args = [jnp.pad(x, ((0, 0), (pad, pad), (pad, pad), (0, 0))),
                w1, b1, wd, bd]
        extra_specs = [w_spec, b_spec]
        kern = functools.partial(_dw_dilated_kernel, H=H, W=W, d=dilation)

    in_specs = [pl.BlockSpec((1, H + 2 * pad, W + 2 * pad, tc),
                             lambda n, c: (n, 0, 0, c)),
                w_spec, b_spec] + extra_specs

    # TODO(synk): row-band halo tiling + batch-pair lane packing for large
    # images / C=64; currently tiled over (batch, channel) with full blocks.
    return pl.pallas_call(
        kern,
        out_shape=jax.ShapeDtypeStruct((N, H, W, C), x.dtype),
        grid=(N, C // tc),
        in_specs=in_specs,
        out_specs=pl.BlockSpec((1, H, W, tc), lambda n, c: (n, 0, 0, c)),
        compiler_params=pltpu.CompilerParams(
            dimension_semantics=("parallel", "parallel"),
            vmem_limit_bytes=_VMEM_LIMIT),
    )(*args)


# ---------------------------------------------------------------------------
# 3. MaxPool 3x3 / stride 2 / pad 1 — 4-phase split (bf16), taps in-kernel
# ---------------------------------------------------------------------------
def _maxpool_kernel(p00_ref, p01_ref, p10_ref, p11_ref, o_ref, *, Ho, Wo):
    refs = ((p00_ref, p01_ref), (p10_ref, p11_ref))
    acc = None
    for ky in range(3):
        for kx in range(3):
            r = refs[ky % 2][kx % 2]
            tap = r[:, ky // 2:ky // 2 + Ho, kx // 2:kx // 2 + Wo, :]
            acc = tap if acc is None else jnp.maximum(acc, tap)
    o_ref[...] = acc


def maxpool3x3_s2(x):
    # TODO(synk): form the decimated taps fully in-kernel (strided loads) so
    # the phase split does not round-trip HBM.
    N, H, W, C = x.shape
    Ho, Wo = H // 2, W // 2
    tc = 128 if C % 128 == 0 else C
    xp = jnp.pad(x, ((0, 0), (1, 1), (1, 1), (0, 0)), constant_values=-1e30)
    phases = [xp[:, a::2, b::2, :] for a in (0, 1) for b in (0, 1)]
    in_spec = pl.BlockSpec((1, Ho + 1, Wo + 1, tc), lambda n, c: (n, 0, 0, c))
    return pl.pallas_call(
        functools.partial(_maxpool_kernel, Ho=Ho, Wo=Wo),
        out_shape=jax.ShapeDtypeStruct((N, Ho, Wo, C), x.dtype),
        grid=(N, C // tc),
        in_specs=[in_spec] * 4,
        out_specs=pl.BlockSpec((1, Ho, Wo, tc), lambda n, c: (n, 0, 0, c)),
        compiler_params=pltpu.CompilerParams(
            dimension_semantics=("parallel", "parallel"),
            vmem_limit_bytes=_VMEM_LIMIT),
    )(*phases)


# ---------------------------------------------------------------------------
# 4. Bilinear resize (align_corners=True) as a separable matrix resize:
#    out[m] = R_h @ x[m] @ R_w^T  — lane-dense (W on lanes), MXU, f32 out.
# ---------------------------------------------------------------------------
def _resize_kernel(rh_ref, x_ref, rwt_ref, o_ref):
    t = jnp.dot(rh_ref[...], x_ref[...].astype(jnp.float32),
                preferred_element_type=jnp.float32)
    o_ref[...] = jnp.dot(t, rwt_ref[...], preferred_element_type=jnp.float32)


def _resize_matrix(out_size, in_size):
    """(out_size, in_size) interpolation matrix, align_corners=True."""
    if in_size == 1:
        return jnp.ones((out_size, 1), jnp.float32)
    if out_size == 1:
        return jnp.zeros((1, in_size), jnp.float32).at[0, 0].set(1.0)
    src = jnp.arange(out_size, dtype=jnp.float32) * ((in_size - 1.0) / (out_size - 1.0))
    lo = jnp.clip(jnp.floor(src), 0, in_size - 2).astype(jnp.int32)
    frac = src - lo.astype(jnp.float32)
    oh_lo = jax.nn.one_hot(lo, in_size, dtype=jnp.float32)
    oh_hi = jax.nn.one_hot(lo + 1, in_size, dtype=jnp.float32)
    return oh_lo * (1.0 - frac)[:, None] + oh_hi * frac[:, None]


def bilinear_align_corners_to_nchw(x, out_h, out_w):
    """NHWC bf16 -> bilinear(align_corners=True) -> NCHW f32."""
    N, H, W, C = x.shape
    if C == 1:
        xm = x.reshape(N, 1, H, W)
    else:
        xm = jnp.transpose(x, (0, 3, 1, 2))
    xm = xm.reshape(N * C, H, W)
    rh = _resize_matrix(out_h, H)                 # (out_h, H)
    rwt = _resize_matrix(out_w, W).T              # (W, out_w)

    tho = 256 if (out_h % 256 == 0 and out_h > 256) else out_h
    out = pl.pallas_call(
        _resize_kernel,
        out_shape=jax.ShapeDtypeStruct((N * C, out_h, out_w), jnp.float32),
        grid=(N * C, out_h // tho),
        in_specs=[pl.BlockSpec((tho, H), lambda m, hb: (hb, 0)),
                  pl.BlockSpec((None, H, W), lambda m, hb: (m, 0, 0)),
                  pl.BlockSpec((H, out_w), lambda m, hb: (0, 0))],
        out_specs=pl.BlockSpec((None, tho, out_w), lambda m, hb: (m, hb, 0)),
        compiler_params=pltpu.CompilerParams(
            dimension_semantics=("parallel", "parallel"),
            vmem_limit_bytes=_VMEM_LIMIT),
    )(rh, xm, rwt)
    return out.reshape(N, C, out_h, out_w)


# ---------------------------- layer wrappers -------------------------------
def conv3x3_s2_bn_relu(x, p):
    """ConvBNAct: 3x3 conv, stride 2, pad 1, BN folded, ReLU (decimated-tap
    im2col in bf16 fed to the tiled GEMM kernel).
    TODO(synk): form the decimated taps inside the GEMM pipeline to avoid the
    im2col materialization entirely."""
    N, H, W, Cin = x.shape
    Ho, Wo = H // 2, W // 2
    Cout = p['w'].shape[-1]
    xp = jnp.pad(x, ((0, 0), (1, 1), (1, 1), (0, 0)))
    taps = [xp[:, ky:ky + 2 * Ho - 1:2, kx:kx + 2 * Wo - 1:2, :]
            for ky in range(3) for kx in range(3)]
    col = jnp.concatenate(taps, axis=-1).reshape(-1, 9 * Cin)   # bf16
    w2 = (p['w'] * p['scale']).reshape(9 * Cin, Cout)
    y = matmul_bias_act(col, w2, p['bias'], relu=True)
    return y.reshape(N, Ho, Wo, Cout)


def downsampling_unit(x, p):
    conv_branch = conv3x3_s2_bn_relu(x, p['conv'])
    pool_branch = maxpool3x3_s2(x)
    return jnp.concatenate([conv_branch, pool_branch], axis=-1)


def pw_bn_relu(x, p):
    N, H, W, Cin = x.shape
    Cout = p['w'].shape[-1]
    y = matmul_bias_act(x.reshape(-1, Cin), p['w'] * p['scale'], p['bias'],
                        relu=True)
    return y.reshape(N, H, W, Cout)


def multi_dilation_dsconv(x, p):
    if p['dilation'] > 1:
        x_dw = dw_bn_relu(x, p['dw'], p['ddw'], p['dilation'])
    else:
        x_dw = dw_bn_relu(x, p['dw'])
    # TODO(synk): fuse the pointwise GEMM into the depthwise kernel epilogue
    # (needs an in-kernel (1,H,W,C)->(H*W,C) reshape); kept as two bf16 calls.
    return pw_bn_relu(x_dw, p['pw'])


def deconv3x3_s2_bn_relu(x, p):
    """DeConvBNAct: ConvTranspose2d(k=3,s=2,p=1,op=1)+BN+ReLU via sub-pixel
    phase decomposition -> a single dense GEMM (no zero-stuffing)."""
    N, H, W, Cin = x.shape
    wt = p['w']                                    # (Cin, Cout, 3, 3) PyTorch layout
    Cout = wt.shape[1]
    scale = p['scale']

    xpad = jnp.pad(x, ((0, 0), (0, 1), (0, 1), (0, 0)))
    x00 = x
    x01 = xpad[:, :H, 1:W + 1, :]
    x10 = xpad[:, 1:H + 1, :W, :]
    x11 = xpad[:, 1:H + 1, 1:W + 1, :]
    X4 = jnp.concatenate([x00, x01, x10, x11], axis=-1).reshape(-1, 4 * Cin)

    def wk(a, b):
        return wt[:, :, a, b] * scale              # (Cin, Cout), BN scale folded

    Z = jnp.zeros((Cin, Cout), jnp.float32)
    # output columns grouped by phase: [even/even | even/odd | odd/even | odd/odd]
    # TODO(synk): per-phase GEMMs that skip the zero blocks and write the
    # interleaved output directly through the out BlockSpec.
    Wbig = jnp.concatenate([
        jnp.concatenate([wk(1, 1), wk(1, 2), wk(2, 1), wk(2, 2)], axis=1),  # x00
        jnp.concatenate([Z,        wk(1, 0), Z,        wk(2, 0)], axis=1),  # x01
        jnp.concatenate([Z,        Z,        wk(0, 1), wk(0, 2)], axis=1),  # x10
        jnp.concatenate([Z,        Z,        Z,        wk(0, 0)], axis=1),  # x11
    ], axis=0)                                     # (4*Cin, 4*Cout)
    bias4 = jnp.concatenate([p['bias']] * 4, axis=0)

    y4 = matmul_bias_act(X4, Wbig, bias4, relu=True)          # (N*H*W, 4*Cout) bf16
    y = y4.reshape(N, H, W, 2, 2, Cout)
    y = jnp.transpose(y, (0, 1, 3, 2, 4, 5)).reshape(N, 2 * H, 2 * W, Cout)
    return y


# ------------------------------- parameters --------------------------------
FEAT_DT = [1, 2, 1, 4, 1, 8, 1, 16, 1, 1, 1, 2, 1, 4, 1, 8]


def make_params(key, n_channel=3, num_class=1, feat_dt=FEAT_DT):
    keys = iter(jax.random.split(key, 512))

    def conv_p(cin, cout, k=3):
        k1, k2, k3 = jax.random.split(next(keys), 3)
        return dict(w=0.1 * jax.random.normal(k1, (k, k, cin, cout), jnp.float32),
                    scale=1.0 + 0.1 * jax.random.normal(k2, (cout,), jnp.float32),
                    bias=0.1 * jax.random.normal(k3, (cout,), jnp.float32))

    def dw_p(c):
        k1, k2, k3 = jax.random.split(next(keys), 3)
        return dict(w=0.2 * jax.random.normal(k1, (3, 3, c), jnp.float32),
                    scale=1.0 + 0.1 * jax.random.normal(k2, (c,), jnp.float32),
                    bias=0.1 * jax.random.normal(k3, (c,), jnp.float32))

    def pw_p(cin, cout):
        k1, k2, k3 = jax.random.split(next(keys), 3)
        return dict(w=(1.0 / cin ** 0.5) * jax.random.normal(k1, (cin, cout), jnp.float32),
                    scale=1.0 + 0.1 * jax.random.normal(k2, (cout,), jnp.float32),
                    bias=0.1 * jax.random.normal(k3, (cout,), jnp.float32))

    def deconv_p(cin, cout):
        k1, k2, k3 = jax.random.split(next(keys), 3)
        return dict(w=(1.0 / (9 * cin) ** 0.5) * jax.random.normal(k1, (cin, cout, 3, 3), jnp.float32),
                    scale=1.0 + 0.1 * jax.random.normal(k2, (cout,), jnp.float32),
                    bias=0.1 * jax.random.normal(k3, (cout,), jnp.float32))

    def ds_p(cin, cout):
        return dict(conv=conv_p(cin, cout - cin))

    def block_p(c, dilation):
        p = dict(dilation=dilation, dw=dw_p(c), pw=pw_p(c, c))
        if dilation > 1:
            p['ddw'] = dw_p(c)
        return p

    return dict(
        ref=[ds_p(n_channel, 16), ds_p(16, 64)],
        d1_2=[ds_p(n_channel, 16), ds_p(16, 64)],
        m1_10=[block_p(64, 1) for _ in range(10)],
        d3=ds_p(64, 128),
        feat=[block_p(128, d) for d in feat_dt],
        up1=deconv_p(128, 64),
        m26_29=[block_p(64, 1) for _ in range(4)],
        output=deconv_p(64, num_class),
    )


# --------------------------------- model -----------------------------------
def mininetv2_forward(params, x_nchw):
    size = x_nchw.shape[2:]
    # NCHW -> NHWC, bf16 activations end-to-end (f32 compute inside kernels).
    x = jnp.transpose(x_nchw, (0, 2, 3, 1)).astype(jnp.bfloat16)

    x_ref = x
    for p in params['ref']:
        x_ref = downsampling_unit(x_ref, p)

    y = x
    for p in params['d1_2']:
        y = downsampling_unit(y, p)
    for p in params['m1_10']:
        y = multi_dilation_dsconv(y, p)
    y = downsampling_unit(y, params['d3'])
    for p in params['feat']:
        y = multi_dilation_dsconv(y, p)
    y = deconv3x3_s2_bn_relu(y, params['up1'])
    y = y + x_ref
    for p in params['m26_29']:
        y = multi_dilation_dsconv(y, p)
    y = deconv3x3_s2_bn_relu(y, params['output'])
    # separable matrix bilinear resize; emits NCHW f32 directly.
    return bilinear_align_corners_to_nchw(y, size[0], size[1])


if __name__ == "__main__":
    key = jax.random.PRNGKey(0)
    pkey, xkey = jax.random.split(key)
    params = make_params(pkey)
    x = jax.random.normal(xkey, (2, 3, 16, 16), jnp.float32)       # NCHW like PyTorch
    fwd = jax.jit(lambda inp: mininetv2_forward(params, inp))
    out = fwd(x)
    jax.block_until_ready(out)
    assert out.shape == (2, 1, 16, 16), out.shape
    assert bool(jnp.all(jnp.isfinite(out)))
    print("KERNEL_OK")
</pallas_src>

<mosaic_0001>
module attributes {stable_mosaic.version = 11 : i64} {
  func.func @_matmul_kernel(%arg0: i32, %arg1: i32, %arg2: i32, %arg3: memref<128x128xbf16, #tpu.memory_space<vmem>>, %arg4: memref<128x128xbf16, #tpu.memory_space<vmem>>, %arg5: memref<1x128xf32, #tpu.memory_space<vmem>>, %arg6: memref<128x128xbf16, #tpu.memory_space<vmem>>, %arg7: memref<128x128xf32, #tpu.memory_space<vmem>>) attributes {dimension_semantics = [#tpu.dimension_semantics<parallel>, #tpu.dimension_semantics<parallel>, #tpu.dimension_semantics<arbitrary>], iteration_bounds = array<i64: 1, 1, 1>, scalar_prefetch = 0 : i64, scratch_operands = 1 : i64, tpu.core_type = #tpu.core_type<tc>, window_params = [{transform_indices = @transform_0, window_bounds = array<i64: 128, 128>}, {transform_indices = @transform_1, window_bounds = array<i64: 128, 128>}, {transform_indices = @transform_2, window_bounds = array<i64: 1, 128>}, {transform_indices = @transform_3, window_bounds = array<i64: 128, 128>}]} {
    %c0_i32 = arith.constant 0 : i32
    %0 = arith.cmpi eq, %arg2, %c0_i32 : i32
    %1 = arith.extui %0 : i1 to i32
    %c0_i32_0 = arith.constant 0 : i32
    %2 = arith.cmpi ne, %1, %c0_i32_0 : i32
    scf.if %2 {
      %cst_10 = arith.constant 0.000000e+00 : f32
      %12 = vector.broadcast %cst_10 : f32 to vector<128x128xf32>
      %c0_11 = arith.constant 0 : index
      %c0_12 = arith.constant 0 : index
      %13 = vector.load %arg7[%c0_11, %c0_12] : memref<128x128xf32, #tpu.memory_space<vmem>>, vector<128x128xf32>
      tpu.vector_store %arg7[%c0_11, %c0_12], %12 {strides = array<i32>} : memref<128x128xf32, #tpu.memory_space<vmem>>, vector<128x128xf32>,
    } else {
    }
    %c0 = arith.constant 0 : index
    %c0_1 = arith.constant 0 : index
    %3 = vector.load %arg7[%c0, %c0_1] : memref<128x128xf32, #tpu.memory_space<vmem>>, vector<128x128xf32>
    %c0_2 = arith.constant 0 : index
    %c0_3 = arith.constant 0 : index
    %4 = vector.load %arg3[%c0_2, %c0_3] : memref<128x128xbf16, #tpu.memory_space<vmem>>, vector<128x128xbf16>
    %c0_4 = arith.constant 0 : index
    %c0_5 = arith.constant 0 : index
    %5 = vector.load %arg4[%c0_4, %c0_5] : memref<128x128xbf16, #tpu.memory_space<vmem>>, vector<128x128xbf16>
    %cst = arith.constant dense<0.000000e+00> : vector<128x128xf32>
    %6 = tpu.matmul %4, %5, %cst {dimension_numbers = #tpu.dot_dimension_numbers<[1], [0], [0], [1], [0, 0, 1, 1], [], []>} : vector<128x128xbf16>, vector<128x128xbf16>, vector<128x128xf32> -> vector<128x128xf32>
    %7 = arith.addf %3, %6 : vector<128x128xf32>
    %c0_6 = arith.constant 0 : index
    %c0_7 = arith.constant 0 : index
    %8 = vector.load %arg7[%c0_6, %c0_7] : memref<128x128xf32, #tpu.memory_space<vmem>>, vector<128x128xf32>
    tpu.vector_store %arg7[%c0_6, %c0_7], %7 {strides = array<i32>} : memref<128x128xf32, #tpu.memory_space<vmem>>, vector<128x128xf32>,
    %c0_i32_8 = arith.constant 0 : i32
    %9 = arith.cmpi eq, %arg2, %c0_i32_8 : i32
    %10 = arith.extui %9 : i1 to i32
    %c0_i32_9 = arith.constant 0 : i32
    %11 = arith.cmpi ne, %10, %c0_i32_9 : i32
    scf.if %11 {
      %c0_10 = arith.constant 0 : index
      %c0_11 = arith.constant 0 : index
      %12 = vector.load %arg7[%c0_10, %c0_11] : memref<128x128xf32, #tpu.memory_space<vmem>>, vector<128x128xf32>
      %c0_12 = arith.constant 0 : index
      %c0_13 = arith.constant 0 : index
      %13 = vector.load %arg5[%c0_12, %c0_13] : memref<1x128xf32, #tpu.memory_space<vmem>>, vector<1x128xf32>
      %14 = vector.broadcast %13 : vector<1x128xf32> to vector<128x128xf32>
      %15 = arith.addf %12, %14 : vector<128x128xf32>
      %cst_14 = arith.constant 0.000000e+00 : f32
      %16 = vector.broadcast %cst_14 : f32 to vector<128x128xf32>
      %17 = arith.maximumf %15, %16 : vector<128x128xf32>
      %18 = arith.truncf %17 : vector<128x128xf32> to vector<128x128xbf16>
      %c0_15 = arith.constant 0 : index
      %c0_16 = arith.constant 0 : index
      %19 = vector.load %arg6[%c0_15, %c0_16] : memref<128x128xbf16, #tpu.memory_space<vmem>>, vector<128x128xbf16>
      tpu.vector_store %arg6[%c0_15, %c0_16], %18 {strides = array<i32>} : memref<128x128xbf16, #tpu.memory_space<vmem>>, vector<128x128xbf16>,
    } else {
    }
    return
  }
  func.func @transform_0(%arg0: i32, %arg1: i32, %arg2: i32) -> (i32, i32) {
    %c0_i32 = arith.constant 0 : i32
    return %arg0, %arg2 : i32, i32
  }
  func.func @transform_1(%arg0: i32, %arg1: i32, %arg2: i32) -> (i32, i32) {
    %c0_i32 = arith.constant 0 : i32
    return %arg2, %arg1 : i32, i32
  }
  func.func @transform_2(%arg0: i32, %arg1: i32, %arg2: i32) -> (i32, i32) {
    %c0_i32 = arith.constant 0 : i32
    %c0_i32_0 = arith.constant 0 : i32
    return %c0_i32, %arg1 : i32, i32
  }
  func.func @transform_3(%arg0: i32, %arg1: i32, %arg2: i32) -> (i32, i32) {
    %c0_i32 = arith.constant 0 : i32
    return %arg0, %arg1 : i32, i32
  }
}

module attributes {stable_mosaic.version = 11 : i64} {
  func.func @_maxpool_kernel(%arg0: i32, %arg1: i32, %arg2: memref<1x9x9x3xbf16, #tpu.memory_space<vmem>>, %arg3: memref<1x9x9x3xbf16, #tpu.memory_space<vmem>>, %arg4: memref<1x9x9x3xbf16, #tpu.memory_space<vmem>>, %arg5: memref<1x9x9x3xbf16, #tpu.memory_space<vmem>>, %arg6: memref<1x8x8x3xbf16, #tpu.memory_space<vmem>>) attributes {dimension_semantics = [#tpu.dimension_semantics<parallel>, #tpu.dimension_semantics<parallel>], iteration_bounds = array<i64: 2, 1>, scalar_prefetch = 0 : i64, scratch_operands = 0 : i64, tpu.core_type = #tpu.core_type<tc>, window_params = [{transform_indices = @transform_0, window_bounds = array<i64: 1, 9, 9, 3>}, {transform_indices = @transform_1, window_bounds = array<i64: 1, 9, 9, 3>}, {transform_indices = @transform_2, window_bounds = array<i64: 1, 9, 9, 3>}, {transform_indices = @transform_3, window_bounds = array<i64: 1, 9, 9, 3>}, {transform_indices = @transform_4, window_bounds = array<i64: 1, 8, 8, 3>}]} {
    %c0 = arith.constant 0 : index
    %c0_0 = arith.constant 0 : index
    %c0_1 = arith.constant 0 : index
    %c0_2 = arith.constant 0 : index
    %0 = vector.load %arg2[%c0, %c0_0, %c0_1, %c0_2] : memref<1x9x9x3xbf16, #tpu.memory_space<vmem>>, vector<1x8x8x3xbf16>
    %c0_3 = arith.constant 0 : index
    %c0_4 = arith.constant 0 : index
    %c0_5 = arith.constant 0 : index
    %c0_6 = arith.constant 0 : index
    %1 = vector.load %arg3[%c0_3, %c0_4, %c0_5, %c0_6] : memref<1x9x9x3xbf16, #tpu.memory_space<vmem>>, vector<1x8x8x3xbf16>
    %2 = arith.maximumf %0, %1 : vector<1x8x8x3xbf16>
    %c0_7 = arith.constant 0 : index
    %c0_8 = arith.constant 0 : index
    %c1 = arith.constant 1 : index
    %c0_9 = arith.constant 0 : index
    %3 = vector.load %arg2[%c0_7, %c0_8, %c1, %c0_9] : memref<1x9x9x3xbf16, #tpu.memory_space<vmem>>, vector<1x8x8x3xbf16>
    %4 = arith.maximumf %2, %3 : vector<1x8x8x3xbf16>
    %c0_10 = arith.constant 0 : index
    %c0_11 = arith.constant 0 : index
    %c0_12 = arith.constant 0 : index
    %c0_13 = arith.constant 0 : index
    %5 = vector.load %arg4[%c0_10, %c0_11, %c0_12, %c0_13] : memref<1x9x9x3xbf16, #tpu.memory_space<vmem>>, vector<1x8x8x3xbf16>
    %6 = arith.maximumf %4, %5 : vector<1x8x8x3xbf16>
    %c0_14 = arith.constant 0 : index
    %c0_15 = arith.constant 0 : index
    %c0_16 = arith.constant 0 : index
    %c0_17 = arith.constant 0 : index
    %7 = vector.load %arg5[%c0_14, %c0_15, %c0_16, %c0_17] : memref<1x9x9x3xbf16, #tpu.memory_space<vmem>>, vector<1x8x8x3xbf16>
    %8 = arith.maximumf %6, %7 : vector<1x8x8x3xbf16>
    %c0_18 = arith.constant 0 : index
    %c0_19 = arith.constant 0 : index
    %c1_20 = arith.constant 1 : index
    %c0_21 = arith.constant 0 : index
    %9 = vector.load %arg4[%c0_18, %c0_19, %c1_20, %c0_21] : memref<1x9x9x3xbf16, #tpu.memory_space<vmem>>, vector<1x8x8x3xbf16>
    %10 = arith.maximumf %8, %9 : vector<1x8x8x3xbf16>
    %c0_22 = arith.constant 0 : index
    %c1_23 = arith.constant 1 : index
    %c0_24 = arith.constant 0 : index
    %c0_25 = arith.constant 0 : index
    %11 = vector.load %arg2[%c0_22, %c1_23, %c0_24, %c0_25] : memref<1x9x9x3xbf16, #tpu.memory_space<vmem>>, vector<1x8x8x3xbf16>
    %12 = arith.maximumf %10, %11 : vector<1x8x8x3xbf16>
    %c0_26 = arith.constant 0 : index
    %c1_27 = arith.constant 1 : index
    %c0_28 = arith.constant 0 : index
    %c0_29 = arith.constant 0 : index
    %13 = vector.load %arg3[%c0_26, %c1_27, %c0_28, %c0_29] : memref<1x9x9x3xbf16, #tpu.memory_space<vmem>>, vector<1x8x8x3xbf16>
    %14 = arith.maximumf %12, %13 : vector<1x8x8x3xbf16>
    %c0_30 = arith.constant 0 : index
    %c1_31 = arith.constant 1 : index
    %c1_32 = arith.constant 1 : index
    %c0_33 = arith.constant 0 : index
    %15 = vector.load %arg2[%c0_30, %c1_31, %c1_32, %c0_33] : memref<1x9x9x3xbf16, #tpu.memory_space<vmem>>, vector<1x8x8x3xbf16>
    %16 = arith.maximumf %14, %15 : vector<1x8x8x3xbf16>
    %c0_34 = arith.constant 0 : index
    %c0_35 = arith.constant 0 : index
    %c0_36 = arith.constant 0 : index
    %c0_37 = arith.constant 0 : index
    %17 = vector.load %arg6[%c0_34, %c0_35, %c0_36, %c0_37] : memref<1x8x8x3xbf16, #tpu.memory_space<vmem>>, vector<1x8x8x3xbf16>
    tpu.vector_store %arg6[%c0_34, %c0_35, %c0_36, %c0_37], %16 {strides = array<i32>} : memref<1x8x8x3xbf16, #tpu.memory_space<vmem>>, vector<1x8x8x3xbf16>,
    return
  }
  func.func @transform_0(%arg0: i32, %arg1: i32) -> (i32, i32, i32, i32) {
    %c0_i32 = arith.constant 0 : i32
    %c0_i32_0 = arith.constant 0 : i32
    %c0_i32_1 = arith.constant 0 : i32
    return %arg0, %c0_i32, %c0_i32_0, %arg1 : i32, i32, i32, i32
  }
  func.func @transform_1(%arg0: i32, %arg1: i32) -> (i32, i32, i32, i32) {
    %c0_i32 = arith.constant 0 : i32
    %c0_i32_0 = arith.constant 0 : i32
    %c0_i32_1 = arith.constant 0 : i32
    return %arg0, %c0_i32, %c0_i32_0, %arg1 : i32, i32, i32, i32
  }
  func.func @transform_2(%arg0: i32, %arg1: i32) -> (i32, i32, i32, i32) {
    %c0_i32 = arith.constant 0 : i32
    %c0_i32_0 = arith.constant 0 : i32
    %c0_i32_1 = arith.constant 0 : i32
    return %arg0, %c0_i32, %c0_i32_0, %arg1 : i32, i32, i32, i32
  }
  func.func @transform_3(%arg0: i32, %arg1: i32) -> (i32, i32, i32, i32) {
    %c0_i32 = arith.constant 0 : i32
    %c0_i32_0 = arith.constant 0 : i32
    %c0_i32_1 = arith.constant 0 : i32
    return %arg0, %c0_i32, %c0_i32_0, %arg1 : i32, i32, i32, i32
  }
  func.func @transform_4(%arg0: i32, %arg1: i32) -> (i32, i32, i32, i32) {
    %c0_i32 = arith.constant 0 : i32
    %c0_i32_0 = arith.constant 0 : i32
    %c0_i32_1 = arith.constant 0 : i32
    return %arg0, %c0_i32, %c0_i32_0, %arg1 : i32, i32, i32, i32
  }
}

module attributes {stable_mosaic.version = 11 : i64} {
  func.func @_matmul_kernel(%arg0: i32, %arg1: i32, %arg2: i32, %arg3: memref<32x256xbf16, #tpu.memory_space<vmem>>, %arg4: memref<256x128xbf16, #tpu.memory_space<vmem>>, %arg5: memref<1x128xf32, #tpu.memory_space<vmem>>, %arg6: memref<32x128xbf16, #tpu.memory_space<vmem>>, %arg7: memref<32x128xf32, #tpu.memory_space<vmem>>) attributes {dimension_semantics = [#tpu.dimension_semantics<parallel>, #tpu.dimension_semantics<parallel>, #tpu.dimension_semantics<arbitrary>], iteration_bounds = array<i64: 1, 1, 1>, scalar_prefetch = 0 : i64, scratch_operands = 1 : i64, tpu.core_type = #tpu.core_type<tc>, window_params = [{transform_indices = @transform_0, window_bounds = array<i64: 32, 256>}, {transform_indices = @transform_1, window_bounds = array<i64: 256, 128>}, {transform_indices = @transform_2, window_bounds = array<i64: 1, 128>}, {transform_indices = @transform_3, window_bounds = array<i64: 32, 128>}]} {
    %c0_i32 = arith.constant 0 : i32
    %0 = arith.cmpi eq, %arg2, %c0_i32 : i32
    %1 = arith.extui %0 : i1 to i32
    %c0_i32_0 = arith.constant 0 : i32
    %2 = arith.cmpi ne, %1, %c0_i32_0 : i32
    scf.if %2 {
      %cst_10 = arith.constant 0.000000e+00 : f32
      %12 = vector.broadcast %cst_10 : f32 to vector<32x128xf32>
      %c0_11 = arith.constant 0 : index
      %c0_12 = arith.constant 0 : index
      %13 = vector.load %arg7[%c0_11, %c0_12] : memref<32x128xf32, #tpu.memory_space<vmem>>, vector<32x128xf32>
      tpu.vector_store %arg7[%c0_11, %c0_12], %12 {strides = array<i32>} : memref<32x128xf32, #tpu.memory_space<vmem>>, vector<32x128xf32>,
    } else {
    }
    %c0 = arith.constant 0 : index
    %c0_1 = arith.constant 0 : index
    %3 = vector.load %arg7[%c0, %c0_1] : memref<32x128xf32, #tpu.memory_space<vmem>>, vector<32x128xf32>
    %c0_2 = arith.constant 0 : index
    %c0_3 = arith.constant 0 : index
    %4 = vector.load %arg3[%c0_2, %c0_3] : memref<32x256xbf16, #tpu.memory_space<vmem>>, vector<32x256xbf16>
    %c0_4 = arith.constant 0 : index
    %c0_5 = arith.constant 0 : index
    %5 = vector.load %arg4[%c0_4, %c0_5] : memref<256x128xbf16, #tpu.memory_space<vmem>>, vector<256x128xbf16>
    %cst = arith.constant dense<0.000000e+00> : vector<32x128xf32>
    %6 = tpu.matmul %4, %5, %cst {dimension_numbers = #tpu.dot_dimension_numbers<[1], [0], [0], [1], [0, 0, 1, 1], [], []>} : vector<32x256xbf16>, vector<256x128xbf16>, vector<32x128xf32> -> vector<32x128xf32>
    %7 = arith.addf %3, %6 : vector<32x128xf32>
    %c0_6 = arith.constant 0 : index
    %c0_7 = arith.constant 0 : index
    %8 = vector.load %arg7[%c0_6, %c0_7] : memref<32x128xf32, #tpu.memory_space<vmem>>, vector<32x128xf32>
    tpu.vector_store %arg7[%c0_6, %c0_7], %7 {strides = array<i32>} : memref<32x128xf32, #tpu.memory_space<vmem>>, vector<32x128xf32>,
    %c0_i32_8 = arith.constant 0 : i32
    %9 = arith.cmpi eq, %arg2, %c0_i32_8 : i32
    %10 = arith.extui %9 : i1 to i32
    %c0_i32_9 = arith.constant 0 : i32
    %11 = arith.cmpi ne, %10, %c0_i32_9 : i32
    scf.if %11 {
      %c0_10 = arith.constant 0 : index
      %c0_11 = arith.constant 0 : index
      %12 = vector.load %arg7[%c0_10, %c0_11] : memref<32x128xf32, #tpu.memory_space<vmem>>, vector<32x128xf32>
      %c0_12 = arith.constant 0 : index
      %c0_13 = arith.constant 0 : index
      %13 = vector.load %arg5[%c0_12, %c0_13] : memref<1x128xf32, #tpu.memory_space<vmem>>, vector<1x128xf32>
      %14 = vector.broadcast %13 : vector<1x128xf32> to vector<32x128xf32>
      %15 = arith.addf %12, %14 : vector<32x128xf32>
      %cst_14 = arith.constant 0.000000e+00 : f32
      %16 = vector.broadcast %cst_14 : f32 to vector<32x128xf32>
      %17 = arith.maximumf %15, %16 : vector<32x128xf32>
      %18 = arith.truncf %17 : vector<32x128xf32> to vector<32x128xbf16>
      %c0_15 = arith.constant 0 : index
      %c0_16 = arith.constant 0 : index
      %19 = vector.load %arg6[%c0_15, %c0_16] : memref<32x128xbf16, #tpu.memory_space<vmem>>, vector<32x128xbf16>
      tpu.vector_store %arg6[%c0_15, %c0_16], %18 {strides = array<i32>} : memref<32x128xbf16, #tpu.memory_space<vmem>>, vector<32x128xbf16>,
    } else {
    }
    return
  }
  func.func @transform_0(%arg0: i32, %arg1: i32, %arg2: i32) -> (i32, i32) {
    %c0_i32 = arith.constant 0 : i32
    return %arg0, %arg2 : i32, i32
  }
  func.func @transform_1(%arg0: i32, %arg1: i32, %arg2: i32) -> (i32, i32) {
    %c0_i32 = arith.constant 0 : i32
    return %arg2, %arg1 : i32, i32
  }
  func.func @transform_2(%arg0: i32, %arg1: i32, %arg2: i32) -> (i32, i32) {
    %c0_i32 = arith.constant 0 : i32
    %c0_i32_0 = arith.constant 0 : i32
    return %c0_i32, %arg1 : i32, i32
  }
  func.func @transform_3(%arg0: i32, %arg1: i32, %arg2: i32) -> (i32, i32) {
    %c0_i32 = arith.constant 0 : i32
    return %arg0, %arg1 : i32, i32
  }
}

module attributes {stable_mosaic.version = 11 : i64} {
  func.func @_maxpool_kernel(%arg0: i32, %arg1: i32, %arg2: memref<1x5x5x16xbf16, #tpu.memory_space<vmem>>, %arg3: memref<1x5x5x16xbf16, #tpu.memory_space<vmem>>, %arg4: memref<1x5x5x16xbf16, #tpu.memory_space<vmem>>, %arg5: memref<1x5x5x16xbf16, #tpu.memory_space<vmem>>, %arg6: memref<1x4x4x16xbf16, #tpu.memory_space<vmem>>) attributes {dimension_semantics = [#tpu.dimension_semantics<parallel>, #tpu.dimension_semantics<parallel>], iteration_bounds = array<i64: 2, 1>, scalar_prefetch = 0 : i64, scratch_operands = 0 : i64, tpu.core_type = #tpu.core_type<tc>, window_params = [{transform_indices = @transform_0, window_bounds = array<i64: 1, 5, 5, 16>}, {transform_indices = @transform_1, window_bounds = array<i64: 1, 5, 5, 16>}, {transform_indices = @transform_2, window_bounds = array<i64: 1, 5, 5, 16>}, {transform_indices = @transform_3, window_bounds = array<i64: 1, 5, 5, 16>}, {transform_indices = @transform_4, window_bounds = array<i64: 1, 4, 4, 16>}]} {
    %c0 = arith.constant 0 : index
    %c0_0 = arith.constant 0 : index
    %c0_1 = arith.constant 0 : index
    %c0_2 = arith.constant 0 : index
    %0 = vector.load %arg2[%c0, %c0_0, %c0_1, %c0_2] : memref<1x5x5x16xbf16, #tpu.memory_space<vmem>>, vector<1x4x4x16xbf16>
    %c0_3 = arith.constant 0 : index
    %c0_4 = arith.constant 0 : index
    %c0_5 = arith.constant 0 : index
    %c0_6 = arith.constant 0 : index
    %1 = vector.load %arg3[%c0_3, %c0_4, %c0_5, %c0_6] : memref<1x5x5x16xbf16, #tpu.memory_space<vmem>>, vector<1x4x4x16xbf16>
    %2 = arith.maximumf %0, %1 : vector<1x4x4x16xbf16>
    %c0_7 = arith.constant 0 : index
    %c0_8 = arith.constant 0 : index
    %c1 = arith.constant 1 : index
    %c0_9 = arith.constant 0 : index
    %3 = vector.load %arg2[%c0_7, %c0_8, %c1, %c0_9] : memref<1x5x5x16xbf16, #tpu.memory_space<vmem>>, vector<1x4x4x16xbf16>
    %4 = arith.maximumf %2, %3 : vector<1x4x4x16xbf16>
    %c0_10 = arith.constant 0 : index
    %c0_11 = arith.constant 0 : index
    %c0_12 = arith.constant 0 : index
    %c0_13 = arith.constant 0 : index
    %5 = vector.load %arg4[%c0_10, %c0_11, %c0_12, %c0_13] : memref<1x5x5x16xbf16, #tpu.memory_space<vmem>>, vector<1x4x4x16xbf16>
    %6 = arith.maximumf %4, %5 : vector<1x4x4x16xbf16>
    %c0_14 = arith.constant 0 : index
    %c0_15 = arith.constant 0 : index
    %c0_16 = arith.constant 0 : index
    %c0_17 = arith.constant 0 : index
    %7 = vector.load %arg5[%c0_14, %c0_15, %c0_16, %c0_17] : memref<1x5x5x16xbf16, #tpu.memory_space<vmem>>, vector<1x4x4x16xbf16>
    %8 = arith.maximumf %6, %7 : vector<1x4x4x16xbf16>
    %c0_18 = arith.constant 0 : index
    %c0_19 = arith.constant 0 : index
    %c1_20 = arith.constant 1 : index
    %c0_21 = arith.constant 0 : index
    %9 = vector.load %arg4[%c0_18, %c0_19, %c1_20, %c0_21] : memref<1x5x5x16xbf16, #tpu.memory_space<vmem>>, vector<1x4x4x16xbf16>
    %10 = arith.maximumf %8, %9 : vector<1x4x4x16xbf16>
    %c0_22 = arith.constant 0 : index
    %c1_23 = arith.constant 1 : index
    %c0_24 = arith.constant 0 : index
    %c0_25 = arith.constant 0 : index
    %11 = vector.load %arg2[%c0_22, %c1_23, %c0_24, %c0_25] : memref<1x5x5x16xbf16, #tpu.memory_space<vmem>>, vector<1x4x4x16xbf16>
    %12 = arith.maximumf %10, %11 : vector<1x4x4x16xbf16>
    %c0_26 = arith.constant 0 : index
    %c1_27 = arith.constant 1 : index
    %c0_28 = arith.constant 0 : index
    %c0_29 = arith.constant 0 : index
    %13 = vector.load %arg3[%c0_26, %c1_27, %c0_28, %c0_29] : memref<1x5x5x16xbf16, #tpu.memory_space<vmem>>, vector<1x4x4x16xbf16>
    %14 = arith.maximumf %12, %13 : vector<1x4x4x16xbf16>
    %c0_30 = arith.constant 0 : index
    %c1_31 = arith.constant 1 : index
    %c1_32 = arith.constant 1 : index
    %c0_33 = arith.constant 0 : index
    %15 = vector.load %arg2[%c0_30, %c1_31, %c1_32, %c0_33] : memref<1x5x5x16xbf16, #tpu.memory_space<vmem>>, vector<1x4x4x16xbf16>
    %16 = arith.maximumf %14, %15 : vector<1x4x4x16xbf16>
    %c0_34 = arith.constant 0 : index
    %c0_35 = arith.constant 0 : index
    %c0_36 = arith.constant 0 : index
    %c0_37 = arith.constant 0 : index
    %17 = vector.load %arg6[%c0_34, %c0_35, %c0_36, %c0_37] : memref<1x4x4x16xbf16, #tpu.memory_space<vmem>>, vector<1x4x4x16xbf16>
    tpu.vector_store %arg6[%c0_34, %c0_35, %c0_36, %c0_37], %16 {strides = array<i32>} : memref<1x4x4x16xbf16, #tpu.memory_space<vmem>>, vector<1x4x4x16xbf16>,
    return
  }
  func.func @transform_0(%arg0: i32, %arg1: i32) -> (i32, i32, i32, i32) {
    %c0_i32 = arith.constant 0 : i32
    %c0_i32_0 = arith.constant 0 : i32
    %c0_i32_1 = arith.constant 0 : i32
    return %arg0, %c0_i32, %c0_i32_0, %arg1 : i32, i32, i32, i32
  }
  func.func @transform_1(%arg0: i32, %arg1: i32) -> (i32, i32, i32, i32) {
    %c0_i32 = arith.constant 0 : i32
    %c0_i32_0 = arith.constant 0 : i32
    %c0_i32_1 = arith.constant 0 : i32
    return %arg0, %c0_i32, %c0_i32_0, %arg1 : i32, i32, i32, i32
  }
  func.func @transform_2(%arg0: i32, %arg1: i32) -> (i32, i32, i32, i32) {
    %c0_i32 = arith.constant 0 : i32
    %c0_i32_0 = arith.constant 0 : i32
    %c0_i32_1 = arith.constant 0 : i32
    return %arg0, %c0_i32, %c0_i32_0, %arg1 : i32, i32, i32, i32
  }
  func.func @transform_3(%arg0: i32, %arg1: i32) -> (i32, i32, i32, i32) {
    %c0_i32 = arith.constant 0 : i32
    %c0_i32_0 = arith.constant 0 : i32
    %c0_i32_1 = arith.constant 0 : i32
    return %arg0, %c0_i32, %c0_i32_0, %arg1 : i32, i32, i32, i32
  }
  func.func @transform_4(%arg0: i32, %arg1: i32) -> (i32, i32, i32, i32) {
    %c0_i32 = arith.constant 0 : i32
    %c0_i32_0 = arith.constant 0 : i32
    %c0_i32_1 = arith.constant 0 : i32
    return %arg0, %c0_i32, %c0_i32_0, %arg1 : i32, i32, i32, i32
  }
}

module attributes {stable_mosaic.version = 11 : i64} {
  func.func @_matmul_kernel(%arg0: i32, %arg1: i32, %arg2: i32, %arg3: memref<32x128xbf16, #tpu.memory_space<vmem>>, %arg4: memref<128x128xbf16, #tpu.memory_space<vmem>>, %arg5: memref<1x128xf32, #tpu.memory_space<vmem>>, %arg6: memref<32x128xbf16, #tpu.memory_space<vmem>>, %arg7: memref<32x128xf32, #tpu.memory_space<vmem>>) attributes {dimension_semantics = [#tpu.dimension_semantics<parallel>, #tpu.dimension_semantics<parallel>, #tpu.dimension_semantics<arbitrary>], iteration_bounds = array<i64: 1, 1, 1>, scalar_prefetch = 0 : i64, scratch_operands = 1 : i64, tpu.core_type = #tpu.core_type<tc>, window_params = [{transform_indices = @transform_0, window_bounds = array<i64: 32, 128>}, {transform_indices = @transform_1, window_bounds = array<i64: 128, 128>}, {transform_indices = @transform_2, window_bounds = array<i64: 1, 128>}, {transform_indices = @transform_3, window_bounds = array<i64: 32, 128>}]} {
    %c0_i32 = arith.constant 0 : i32
    %0 = arith.cmpi eq, %arg2, %c0_i32 : i32
    %1 = arith.extui %0 : i1 to i32
    %c0_i32_0 = arith.constant 0 : i32
    %2 = arith.cmpi ne, %1, %c0_i32_0 : i32
    scf.if %2 {
      %cst_10 = arith.constant 0.000000e+00 : f32
      %12 = vector.broadcast %cst_10 : f32 to vector<32x128xf32>
      %c0_11 = arith.constant 0 : index
      %c0_12 = arith.constant 0 : index
      %13 = vector.load %arg7[%c0_11, %c0_12] : memref<32x128xf32, #tpu.memory_space<vmem>>, vector<32x128xf32>
      tpu.vector_store %arg7[%c0_11, %c0_12], %12 {strides = array<i32>} : memref<32x128xf32, #tpu.memory_space<vmem>>, vector<32x128xf32>,
    } else {
    }
    %c0 = arith.constant 0 : index
    %c0_1 = arith.constant 0 : index
    %3 = vector.load %arg7[%c0, %c0_1] : memref<32x128xf32, #tpu.memory_space<vmem>>, vector<32x128xf32>
    %c0_2 = arith.constant 0 : index
    %c0_3 = arith.constant 0 : index
    %4 = vector.load %arg3[%c0_2, %c0_3] : memref<32x128xbf16, #tpu.memory_space<vmem>>, vector<32x128xbf16>
    %c0_4 = arith.constant 0 : index
    %c0_5 = arith.constant 0 : index
    %5 = vector.load %arg4[%c0_4, %c0_5] : memref<128x128xbf16, #tpu.memory_space<vmem>>, vector<128x128xbf16>
    %cst = arith.constant dense<0.000000e+00> : vector<32x128xf32>
    %6 = tpu.matmul %4, %5, %cst {dimension_numbers = #tpu.dot_dimension_numbers<[1], [0], [0], [1], [0, 0, 1, 1], [], []>} : vector<32x128xbf16>, vector<128x128xbf16>, vector<32x128xf32> -> vector<32x128xf32>
    %7 = arith.addf %3, %6 : vector<32x128xf32>
    %c0_6 = arith.constant 0 : index
    %c0_7 = arith.constant 0 : index
    %8 = vector.load %arg7[%c0_6, %c0_7] : memref<32x128xf32, #tpu.memory_space<vmem>>, vector<32x128xf32>
    tpu.vector_store %arg7[%c0_6, %c0_7], %7 {strides = array<i32>} : memref<32x128xf32, #tpu.memory_space<vmem>>, vector<32x128xf32>,
    %c0_i32_8 = arith.constant 0 : i32
    %9 = arith.cmpi eq, %arg2, %c0_i32_8 : i32
    %10 = arith.extui %9 : i1 to i32
    %c0_i32_9 = arith.constant 0 : i32
    %11 = arith.cmpi ne, %10, %c0_i32_9 : i32
    scf.if %11 {
      %c0_10 = arith.constant 0 : index
      %c0_11 = arith.constant 0 : index
      %12 = vector.load %arg7[%c0_10, %c0_11] : memref<32x128xf32, #tpu.memory_space<vmem>>, vector<32x128xf32>
      %c0_12 = arith.constant 0 : index
      %c0_13 = arith.constant 0 : index
      %13 = vector.load %arg5[%c0_12, %c0_13] : memref<1x128xf32, #tpu.memory_space<vmem>>, vector<1x128xf32>
      %14 = vector.broadcast %13 : vector<1x128xf32> to vector<32x128xf32>
      %15 = arith.addf %12, %14 : vector<32x128xf32>
      %cst_14 = arith.constant 0.000000e+00 : f32
      %16 = vector.broadcast %cst_14 : f32 to vector<32x128xf32>
      %17 = arith.maximumf %15, %16 : vector<32x128xf32>
      %18 = arith.truncf %17 : vector<32x128xf32> to vector<32x128xbf16>
      %c0_15 = arith.constant 0 : index
      %c0_16 = arith.constant 0 : index
      %19 = vector.load %arg6[%c0_15, %c0_16] : memref<32x128xbf16, #tpu.memory_space<vmem>>, vector<32x128xbf16>
      tpu.vector_store %arg6[%c0_15, %c0_16], %18 {strides = array<i32>} : memref<32x128xbf16, #tpu.memory_space<vmem>>, vector<32x128xbf16>,
    } else {
    }
    return
  }
  func.func @transform_0(%arg0: i32, %arg1: i32, %arg2: i32) -> (i32, i32) {
    %c0_i32 = arith.constant 0 : i32
    return %arg0, %arg2 : i32, i32
  }
  func.func @transform_1(%arg0: i32, %arg1: i32, %arg2: i32) -> (i32, i32) {
    %c0_i32 = arith.constant 0 : i32
    return %arg2, %arg1 : i32, i32
  }
  func.func @transform_2(%arg0: i32, %arg1: i32, %arg2: i32) -> (i32, i32) {
    %c0_i32 = arith.constant 0 : i32
    %c0_i32_0 = arith.constant 0 : i32
    return %c0_i32, %arg1 : i32, i32
  }
  func.func @transform_3(%arg0: i32, %arg1: i32, %arg2: i32) -> (i32, i32) {
    %c0_i32 = arith.constant 0 : i32
    return %arg0, %arg1 : i32, i32
  }
}

module attributes {stable_mosaic.version = 11 : i64} {
  func.func @_dw_kernel(%arg0: i32, %arg1: i32, %arg2: memref<1x6x6x64xbf16, #tpu.memory_space<vmem>>, %arg3: memref<9x1x64xf32, #tpu.memory_space<vmem>>, %arg4: memref<1x64xf32, #tpu.memory_space<vmem>>, %arg5: memref<1x4x4x64xbf16, #tpu.memory_space<vmem>>) attributes {dimension_semantics = [#tpu.dimension_semantics<parallel>, #tpu.dimension_semantics<parallel>], iteration_bounds = array<i64: 2, 1>, scalar_prefetch = 0 : i64, scratch_operands = 0 : i64, tpu.core_type = #tpu.core_type<tc>, window_params = [{transform_indices = @transform_0, window_bounds = array<i64: 1, 6, 6, 64>}, {transform_indices = @transform_1, window_bounds = array<i64: 9, 1, 64>}, {transform_indices = @transform_2, window_bounds = array<i64: 1, 64>}, {transform_indices = @transform_3, window_bounds = array<i64: 1, 4, 4, 64>}]} {
    %c0 = arith.constant 0 : index
    %c0_0 = arith.constant 0 : index
    %c0_1 = arith.constant 0 : index
    %c0_2 = arith.constant 0 : index
    %0 = vector.load %arg2[%c0, %c0_0, %c0_1, %c0_2] : memref<1x6x6x64xbf16, #tpu.memory_space<vmem>>, vector<1x4x4x64xbf16>
    %1 = arith.extf %0 : vector<1x4x4x64xbf16> to vector<1x4x4x64xf32>
    %c0_3 = arith.constant 0 : index
    %c0_4 = arith.constant 0 : index
    %c0_5 = arith.constant 0 : index
    %2 = vector.load %arg3[%c0_3, %c0_4, %c0_5] : memref<9x1x64xf32, #tpu.memory_space<vmem>>, vector<1x1x64xf32>
    %3 = vector.shape_cast %2 : vector<1x1x64xf32> to vector<1x64xf32>
    %4 = vector.shape_cast %3 : vector<1x64xf32> to vector<1x1x1x64xf32>
    %5 = vector.broadcast %4 : vector<1x1x1x64xf32> to vector<1x4x4x64xf32>
    %6 = arith.mulf %1, %5 : vector<1x4x4x64xf32>
    %c0_6 = arith.constant 0 : index
    %c0_7 = arith.constant 0 : index
    %c1 = arith.constant 1 : index
    %c0_8 = arith.constant 0 : index
    %7 = vector.load %arg2[%c0_6, %c0_7, %c1, %c0_8] : memref<1x6x6x64xbf16, #tpu.memory_space<vmem>>, vector<1x4x4x64xbf16>
    %8 = arith.extf %7 : vector<1x4x4x64xbf16> to vector<1x4x4x64xf32>
    %c1_9 = arith.constant 1 : index
    %c0_10 = arith.constant 0 : index
    %c0_11 = arith.constant 0 : index
    %9 = vector.load %arg3[%c1_9, %c0_10, %c0_11] : memref<9x1x64xf32, #tpu.memory_space<vmem>>, vector<1x1x64xf32>
    %10 = vector.shape_cast %9 : vector<1x1x64xf32> to vector<1x64xf32>
    %11 = vector.shape_cast %10 : vector<1x64xf32> to vector<1x1x1x64xf32>
    %12 = vector.broadcast %11 : vector<1x1x1x64xf32> to vector<1x4x4x64xf32>
    %13 = arith.mulf %8, %12 : vector<1x4x4x64xf32>
    %14 = arith.addf %6, %13 : vector<1x4x4x64xf32>
    %c0_12 = arith.constant 0 : index
    %c0_13 = arith.constant 0 : index
    %c2 = arith.constant 2 : index
    %c0_14 = arith.constant 0 : index
    %15 = vector.load %arg2[%c0_12, %c0_13, %c2, %c0_14] : memref<1x6x6x64xbf16, #tpu.memory_space<vmem>>, vector<1x4x4x64xbf16>
    %16 = arith.extf %15 : vector<1x4x4x64xbf16> to vector<1x4x4x64xf32>
    %c2_15 = arith.constant 2 : index
    %c0_16 = arith.constant 0 : index
    %c0_17 = arith.constant 0 : index
    %17 = vector.load %arg3[%c2_15, %c0_16, %c0_17] : memref<9x1x64xf32, #tpu.memory_space<vmem>>, vector<1x1x64xf32>
    %18 = vector.shape_cast %17 : vector<1x1x64xf32> to vector<1x64xf32>
    %19 = vector.shape_cast %18 : vector<1x64xf32> to vector<1x1x1x64xf32>
    %20 = vector.broadcast %19 : vector<1x1x1x64xf32> to vector<1x4x4x64xf32>
    %21 = arith.mulf %16, %20 : vector<1x4x4x64xf32>
    %22 = arith.addf %14, %21 : vector<1x4x4x64xf32>
    %c0_18 = arith.constant 0 : index
    %c1_19 = arith.constant 1 : index
    %c0_20 = arith.constant 0 : index
    %c0_21 = arith.constant 0 : index
    %23 = vector.load %arg2[%c0_18, %c1_19, %c0_20, %c0_21] : memref<1x6x6x64xbf16, #tpu.memory_space<vmem>>, vector<1x4x4x64xbf16>
    %24 = arith.extf %23 : vector<1x4x4x64xbf16> to vector<1x4x4x64xf32>
    %c3 = arith.constant 3 : index
    %c0_22 = arith.constant 0 : index
    %c0_23 = arith.constant 0 : index
    %25 = vector.load %arg3[%c3, %c0_22, %c0_23] : memref<9x1x64xf32, #tpu.memory_space<vmem>>, vector<1x1x64xf32>
    %26 = vector.shape_cast %25 : vector<1x1x64xf32> to vector<1x64xf32>
    %27 = vector.shape_cast %26 : vector<1x64xf32> to vector<1x1x1x64xf32>
    %28 = vector.broadcast %27 : vector<1x1x1x64xf32> to vector<1x4x4x64xf32>
    %29 = arith.mulf %24, %28 : vector<1x4x4x64xf32>
    %30 = arith.addf %22, %29 : vector<1x4x4x64xf32>
    %c0_24 = arith.constant 0 : index
    %c1_25 = arith.constant 1 : index
    %c1_26 = arith.constant 1 : index
    %c0_27 = arith.constant 0 : index
    %31 = vector.load %arg2[%c0_24, %c1_25, %c1_26, %c0_27] : memref<1x6x6x64xbf16, #tpu.memory_space<vmem>>, vector<1x4x4x64xbf16>
    %32 = arith.extf %31 : vector<1x4x4x64xbf16> to vector<1x4x4x64xf32>
    %c4 = arith.constant 4 : index
    %c0_28 = arith.constant 0 : index
    %c0_29 = arith.constant 0 : index
    %33 = vector.load %arg3[%c4, %c0_28, %c0_29] : memref<9x1x64xf32, #tpu.memory_space<vmem>>, vector<1x1x64xf32>
    %34 = vector.shape_cast %33 : vector<1x1x64xf32> to vector<1x64xf32>
    %35 = vector.shape_cast %34 : vector<1x64xf32> to vector<1x1x1x64xf32>
    %36 = vector.broadcast %35 : vector<1x1x1x64xf32> to vector<1x4x4x64xf32>
    %37 = arith.mulf %32, %36 : vector<1x4x4x64xf32>
    %38 = arith.addf %30, %37 : vector<1x4x4x64xf32>
    %c0_30 = arith.constant 0 : index
    %c1_31 = arith.constant 1 : index
    %c2_32 = arith.constant 2 : index
    %c0_33 = arith.constant 0 : index
    %39 = vector.load %arg2[%c0_30, %c1_31, %c2_32, %c0_33] : memref<1x6x6x64xbf16, #tpu.memory_space<vmem>>, vector<1x4x4x64xbf16>
    %40 = arith.extf %39 : vector<1x4x4x64xbf16> to vector<1x4x4x64xf32>
    %c5 = arith.constant 5 : index
    %c0_34 = arith.constant 0 : index
    %c0_35 = arith.constant 0 : index
    %41 = vector.load %arg3[%c5, %c0_34, %c0_35] : memref<9x1x64xf32, #tpu.memory_space<vmem>>, vector<1x1x64xf32>
    %42 = vector.shape_cast %41 : vector<1x1x64xf32> to vector<1x64xf32>
    %43 = vector.shape_cast %42 : vector<1x64xf32> to vector<1x1x1x64xf32>
    %44 = vector.broadcast %43 : vector<1x1x1x64xf32> to vector<1x4x4x64xf32>
    %45 = arith.mulf %40, %44 : vector<1x4x4x64xf32>
    %46 = arith.addf %38, %45 : vector<1x4x4x64xf32>
    %c0_36 = arith.constant 0 : index
    %c2_37 = arith.constant 2 : index
    %c0_38 = arith.constant 0 : index
    %c0_39 = arith.constant 0 : index
    %47 = vector.load %arg2[%c0_36, %c2_37, %c0_38, %c0_39] : memref<1x6x6x64xbf16, #tpu.memory_space<vmem>>, vector<1x4x4x64xbf16>
    %48 = arith.extf %47 : vector<1x4x4x64xbf16> to vector<1x4x4x64xf32>
    %c6 = arith.constant 6 : index
    %c0_40 = arith.constant 0 : index
    %c0_41 = arith.constant 0 : index
    %49 = vector.load %arg3[%c6, %c0_40, %c0_41] : memref<9x1x64xf32, #tpu.memory_space<vmem>>, vector<1x1x64xf32>
    %50 = vector.shape_cast %49 : vector<1x1x64xf32> to vector<1x64xf32>
    %51 = vector.shape_cast %50 : vector<1x64xf32> to vector<1x1x1x64xf32>
    %52 = vector.broadcast %51 : vector<1x1x1x64xf32> to vector<1x4x4x64xf32>
    %53 = arith.mulf %48, %52 : vector<1x4x4x64xf32>
    %54 = arith.addf %46, %53 : vector<1x4x4x64xf32>
    %c0_42 = arith.constant 0 : index
    %c2_43 = arith.constant 2 : index
    %c1_44 = arith.constant 1 : index
    %c0_45 = arith.constant 0 : index
    %55 = vector.load %arg2[%c0_42, %c2_43, %c1_44, %c0_45] : memref<1x6x6x64xbf16, #tpu.memory_space<vmem>>, vector<1x4x4x64xbf16>
    %56 = arith.extf %55 : vector<1x4x4x64xbf16> to vector<1x4x4x64xf32>
    %c7 = arith.constant 7 : index
    %c0_46 = arith.constant 0 : index
    %c0_47 = arith.constant 0 : index
    %57 = vector.load %arg3[%c7, %c0_46, %c0_47] : memref<9x1x64xf32, #tpu.memory_space<vmem>>, vector<1x1x64xf32>
    %58 = vector.shape_cast %57 : vector<1x1x64xf32> to vector<1x64xf32>
    %59 = vector.shape_cast %58 : vector<1x64xf32> to vector<1x1x1x64xf32>
    %60 = vector.broadcast %59 : vector<1x1x1x64xf32> to vector<1x4x4x64xf32>
    %61 = arith.mulf %56, %60 : vector<1x4x4x64xf32>
    %62 = arith.addf %54, %61 : vector<1x4x4x64xf32>
    %c0_48 = arith.constant 0 : index
    %c2_49 = arith.constant 2 : index
    %c2_50 = arith.constant 2 : index
    %c0_51 = arith.constant 0 : index
    %63 = vector.load %arg2[%c0_48, %c2_49, %c2_50, %c0_51] : memref<1x6x6x64xbf16, #tpu.memory_space<vmem>>, vector<1x4x4x64xbf16>
    %64 = arith.extf %63 : vector<1x4x4x64xbf16> to vector<1x4x4x64xf32>
    %c8 = arith.constant 8 : index
    %c0_52 = arith.constant 0 : index
    %c0_53 = arith.constant 0 : index
    %65 = vector.load %arg3[%c8, %c0_52, %c0_53] : memref<9x1x64xf32, #tpu.memory_space<vmem>>, vector<1x1x64xf32>
    %66 = vector.shape_cast %65 : vector<1x1x64xf32> to vector<1x64xf32>
    %67 = vector.shape_cast %66 : vector<1x64xf32> to vector<1x1x1x64xf32>
    %68 = vector.broadcast %67 : vector<1x1x1x64xf32> to vector<1x4x4x64xf32>
    %69 = arith.mulf %64, %68 : vector<1x4x4x64xf32>
    %70 = arith.addf %62, %69 : vector<1x4x4x64xf32>
    %c0_54 = arith.constant 0 : index
    %c0_55 = arith.constant 0 : index
    %71 = vector.load %arg4[%c0_54, %c0_55] : memref<1x64xf32, #tpu.memory_space<vmem>>, vector<1x64xf32>
    %72 = vector.shape_cast %71 : vector<1x64xf32> to vector<1x1x1x64xf32>
    %73 = vector.broadcast %72 : vector<1x1x1x64xf32> to vector<1x4x4x64xf32>
    %74 = arith.addf %70, %73 : vector<1x4x4x64xf32>
    %cst = arith.constant 0.000000e+00 : f32
    %75 = vector.broadcast %cst : f32 to vector<1x4x4x64xf32>
    %76 = arith.maximumf %74, %75 : vector<1x4x4x64xf32>
    %77 = arith.truncf %76 : vector<1x4x4x64xf32> to vector<1x4x4x64xbf16>
    %c0_56 = arith.constant 0 : index
    %c0_57 = arith.constant 0 : index
    %c0_58 = arith.constant 0 : index
    %c0_59 = arith.constant 0 : index
    %78 = vector.load %arg5[%c0_56, %c0_57, %c0_58, %c0_59] : memref<1x4x4x64xbf16, #tpu.memory_space<vmem>>, vector<1x4x4x64xbf16>
    tpu.vector_store %arg5[%c0_56, %c0_57, %c0_58, %c0_59], %77 {strides = array<i32>} : memref<1x4x4x64xbf16, #tpu.memory_space<vmem>>, vector<1x4x4x64xbf16>,
    return
  }
  func.func @transform_0(%arg0: i32, %arg1: i32) -> (i32, i32, i32, i32) {
    %c0_i32 = arith.constant 0 : i32
    %c0_i32_0 = arith.constant 0 : i32
    %c0_i32_1 = arith.constant 0 : i32
    return %arg0, %c0_i32, %c0_i32_0, %arg1 : i32, i32, i32, i32
  }
  func.func @transform_1(%arg0: i32, %arg1: i32) -> (i32, i32, i32) {
    %c0_i32 = arith.constant 0 : i32
    %c0_i32_0 = arith.constant 0 : i32
    %c0_i32_1 = arith.constant 0 : i32
    return %c0_i32, %c0_i32_0, %arg1 : i32, i32, i32
  }
  func.func @transform_2(%arg0: i32, %arg1: i32) -> (i32, i32) {
    %c0_i32 = arith.constant 0 : i32
    %c0_i32_0 = arith.constant 0 : i32
    return %c0_i32, %arg1 : i32, i32
  }
  func.func @transform_3(%arg0: i32, %arg1: i32) -> (i32, i32, i32, i32) {
    %c0_i32 = arith.constant 0 : i32
    %c0_i32_0 = arith.constant 0 : i32
    %c0_i32_1 = arith.constant 0 : i32
    return %arg0, %c0_i32, %c0_i32_0, %arg1 : i32, i32, i32, i32
  }
}

module attributes {stable_mosaic.version = 11 : i64} {
  func.func @_matmul_kernel(%arg0: i32, %arg1: i32, %arg2: i32, %arg3: memref<8x128xbf16, #tpu.memory_space<vmem>>, %arg4: memref<128x128xbf16, #tpu.memory_space<vmem>>, %arg5: memref<1x128xf32, #tpu.memory_space<vmem>>, %arg6: memref<8x128xbf16, #tpu.memory_space<vmem>>, %arg7: memref<8x128xf32, #tpu.memory_space<vmem>>) attributes {dimension_semantics = [#tpu.dimension_semantics<parallel>, #tpu.dimension_semantics<parallel>, #tpu.dimension_semantics<arbitrary>], iteration_bounds = array<i64: 1, 1, 1>, scalar_prefetch = 0 : i64, scratch_operands = 1 : i64, tpu.core_type = #tpu.core_type<tc>, window_params = [{transform_indices = @transform_0, window_bounds = array<i64: 8, 128>}, {transform_indices = @transform_1, window_bounds = array<i64: 128, 128>}, {transform_indices = @transform_2, window_bounds = array<i64: 1, 128>}, {transform_indices = @transform_3, window_bounds = array<i64: 8, 128>}]} {
    %c0_i32 = arith.constant 0 : i32
    %0 = arith.cmpi eq, %arg2, %c0_i32 : i32
    %1 = arith.extui %0 : i1 to i32
    %c0_i32_0 = arith.constant 0 : i32
    %2 = arith.cmpi ne, %1, %c0_i32_0 : i32
    scf.if %2 {
      %cst_10 = arith.constant 0.000000e+00 : f32
      %12 = vector.broadcast %cst_10 : f32 to vector<8x128xf32>
      %c0_11 = arith.constant 0 : index
      %c0_12 = arith.constant 0 : index
      %13 = vector.load %arg7[%c0_11, %c0_12] : memref<8x128xf32, #tpu.memory_space<vmem>>, vector<8x128xf32>
      tpu.vector_store %arg7[%c0_11, %c0_12], %12 {strides = array<i32>} : memref<8x128xf32, #tpu.memory_space<vmem>>, vector<8x128xf32>,
    } else {
    }
    %c0 = arith.constant 0 : index
    %c0_1 = arith.constant 0 : index
    %3 = vector.load %arg7[%c0, %c0_1] : memref<8x128xf32, #tpu.memory_space<vmem>>, vector<8x128xf32>
    %c0_2 = arith.constant 0 : index
    %c0_3 = arith.constant 0 : index
    %4 = vector.load %arg3[%c0_2, %c0_3] : memref<8x128xbf16, #tpu.memory_space<vmem>>, vector<8x128xbf16>
    %c0_4 = arith.constant 0 : index
    %c0_5 = arith.constant 0 : index
    %5 = vector.load %arg4[%c0_4, %c0_5] : memref<128x128xbf16, #tpu.memory_space<vmem>>, vector<128x128xbf16>
    %cst = arith.constant dense<0.000000e+00> : vector<8x128xf32>
    %6 = tpu.matmul %4, %5, %cst {dimension_numbers = #tpu.dot_dimension_numbers<[1], [0], [0], [1], [0, 0, 1, 1], [], []>} : vector<8x128xbf16>, vector<128x128xbf16>, vector<8x128xf32> -> vector<8x128xf32>
    %7 = arith.addf %3, %6 : vector<8x128xf32>
    %c0_6 = arith.constant 0 : index
    %c0_7 = arith.constant 0 : index
    %8 = vector.load %arg7[%c0_6, %c0_7] : memref<8x128xf32, #tpu.memory_space<vmem>>, vector<8x128xf32>
    tpu.vector_store %arg7[%c0_6, %c0_7], %7 {strides = array<i32>} : memref<8x128xf32, #tpu.memory_space<vmem>>, vector<8x128xf32>,
    %c0_i32_8 = arith.constant 0 : i32
    %9 = arith.cmpi eq, %arg2, %c0_i32_8 : i32
    %10 = arith.extui %9 : i1 to i32
    %c0_i32_9 = arith.constant 0 : i32
    %11 = arith.cmpi ne, %10, %c0_i32_9 : i32
    scf.if %11 {
      %c0_10 = arith.constant 0 : index
      %c0_11 = arith.constant 0 : index
      %12 = vector.load %arg7[%c0_10, %c0_11] : memref<8x128xf32, #tpu.memory_space<vmem>>, vector<8x128xf32>
      %c0_12 = arith.constant 0 : index
      %c0_13 = arith.constant 0 : index
      %13 = vector.load %arg5[%c0_12, %c0_13] : memref<1x128xf32, #tpu.memory_space<vmem>>, vector<1x128xf32>
      %14 = vector.broadcast %13 : vector<1x128xf32> to vector<8x128xf32>
      %15 = arith.addf %12, %14 : vector<8x128xf32>
      %cst_14 = arith.constant 0.000000e+00 : f32
      %16 = vector.broadcast %cst_14 : f32 to vector<8x128xf32>
      %17 = arith.maximumf %15, %16 : vector<8x128xf32>
      %18 = arith.truncf %17 : vector<8x128xf32> to vector<8x128xbf16>
      %c0_15 = arith.constant 0 : index
      %c0_16 = arith.constant 0 : index
      %19 = vector.load %arg6[%c0_15, %c0_16] : memref<8x128xbf16, #tpu.memory_space<vmem>>, vector<8x128xbf16>
      tpu.vector_store %arg6[%c0_15, %c0_16], %18 {strides = array<i32>} : memref<8x128xbf16, #tpu.memory_space<vmem>>, vector<8x128xbf16>,
    } else {
    }
    return
  }
  func.func @transform_0(%arg0: i32, %arg1: i32, %arg2: i32) -> (i32, i32) {
    %c0_i32 = arith.constant 0 : i32
    return %arg0, %arg2 : i32, i32
  }
  func.func @transform_1(%arg0: i32, %arg1: i32, %arg2: i32) -> (i32, i32) {
    %c0_i32 = arith.constant 0 : i32
    return %arg2, %arg1 : i32, i32
  }
  func.func @transform_2(%arg0: i32, %arg1: i32, %arg2: i32) -> (i32, i32) {
    %c0_i32 = arith.constant 0 : i32
    %c0_i32_0 = arith.constant 0 : i32
    return %c0_i32, %arg1 : i32, i32
  }
  func.func @transform_3(%arg0: i32, %arg1: i32, %arg2: i32) -> (i32, i32) {
    %c0_i32 = arith.constant 0 : i32
    return %arg0, %arg1 : i32, i32
  }
}

module attributes {stable_mosaic.version = 11 : i64} {
  func.func @_matmul_kernel(%arg0: i32, %arg1: i32, %arg2: i32, %arg3: memref<8x640xbf16, #tpu.memory_space<vmem>>, %arg4: memref<640x128xbf16, #tpu.memory_space<vmem>>, %arg5: memref<1x128xf32, #tpu.memory_space<vmem>>, %arg6: memref<8x128xbf16, #tpu.memory_space<vmem>>, %arg7: memref<8x128xf32, #tpu.memory_space<vmem>>) attributes {dimension_semantics = [#tpu.dimension_semantics<parallel>, #tpu.dimension_semantics<parallel>, #tpu.dimension_semantics<arbitrary>], iteration_bounds = array<i64: 1, 1, 1>, scalar_prefetch = 0 : i64, scratch_operands = 1 : i64, tpu.core_type = #tpu.core_type<tc>, window_params = [{transform_indices = @transform_0, window_bounds = array<i64: 8, 640>}, {transform_indices = @transform_1, window_bounds = array<i64: 640, 128>}, {transform_indices = @transform_2, window_bounds = array<i64: 1, 128>}, {transform_indices = @transform_3, window_bounds = array<i64: 8, 128>}]} {
    %c0_i32 = arith.constant 0 : i32
    %0 = arith.cmpi eq, %arg2, %c0_i32 : i32
    %1 = arith.extui %0 : i1 to i32
    %c0_i32_0 = arith.constant 0 : i32
    %2 = arith.cmpi ne, %1, %c0_i32_0 : i32
    scf.if %2 {
      %cst_10 = arith.constant 0.000000e+00 : f32
      %12 = vector.broadcast %cst_10 : f32 to vector<8x128xf32>
      %c0_11 = arith.constant 0 : index
      %c0_12 = arith.constant 0 : index
      %13 = vector.load %arg7[%c0_11, %c0_12] : memref<8x128xf32, #tpu.memory_space<vmem>>, vector<8x128xf32>
      tpu.vector_store %arg7[%c0_11, %c0_12], %12 {strides = array<i32>} : memref<8x128xf32, #tpu.memory_space<vmem>>, vector<8x128xf32>,
    } else {
    }
    %c0 = arith.constant 0 : index
    %c0_1 = arith.constant 0 : index
    %3 = vector.load %arg7[%c0, %c0_1] : memref<8x128xf32, #tpu.memory_space<vmem>>, vector<8x128xf32>
    %c0_2 = arith.constant 0 : index
    %c0_3 = arith.constant 0 : index
    %4 = vector.load %arg3[%c0_2, %c0_3] : memref<8x640xbf16, #tpu.memory_space<vmem>>, vector<8x640xbf16>
    %c0_4 = arith.constant 0 : index
    %c0_5 = arith.constant 0 : index
    %5 = vector.load %arg4[%c0_4, %c0_5] : memref<640x128xbf16, #tpu.memory_space<vmem>>, vector<640x128xbf16>
    %cst = arith.constant dense<0.000000e+00> : vector<8x128xf32>
    %6 = tpu.matmul %4, %5, %cst {dimension_numbers = #tpu.dot_dimension_numbers<[1], [0], [0], [1], [0, 0, 1, 1], [], []>} : vector<8x640xbf16>, vector<640x128xbf16>, vector<8x128xf32> -> vector<8x128xf32>
    %7 = arith.addf %3, %6 : vector<8x128xf32>
    %c0_6 = arith.constant 0 : index
    %c0_7 = arith.constant 0 : index
    %8 = vector.load %arg7[%c0_6, %c0_7] : memref<8x128xf32, #tpu.memory_space<vmem>>, vector<8x128xf32>
    tpu.vector_store %arg7[%c0_6, %c0_7], %7 {strides = array<i32>} : memref<8x128xf32, #tpu.memory_space<vmem>>, vector<8x128xf32>,
    %c0_i32_8 = arith.constant 0 : i32
    %9 = arith.cmpi eq, %arg2, %c0_i32_8 : i32
    %10 = arith.extui %9 : i1 to i32
    %c0_i32_9 = arith.constant 0 : i32
    %11 = arith.cmpi ne, %10, %c0_i32_9 : i32
    scf.if %11 {
      %c0_10 = arith.constant 0 : index
      %c0_11 = arith.constant 0 : index
      %12 = vector.load %arg7[%c0_10, %c0_11] : memref<8x128xf32, #tpu.memory_space<vmem>>, vector<8x128xf32>
      %c0_12 = arith.constant 0 : index
      %c0_13 = arith.constant 0 : index
      %13 = vector.load %arg5[%c0_12, %c0_13] : memref<1x128xf32, #tpu.memory_space<vmem>>, vector<1x128xf32>
      %14 = vector.broadcast %13 : vector<1x128xf32> to vector<8x128xf32>
      %15 = arith.addf %12, %14 : vector<8x128xf32>
      %cst_14 = arith.constant 0.000000e+00 : f32
      %16 = vector.broadcast %cst_14 : f32 to vector<8x128xf32>
      %17 = arith.maximumf %15, %16 : vector<8x128xf32>
      %18 = arith.truncf %17 : vector<8x128xf32> to vector<8x128xbf16>
      %c0_15 = arith.constant 0 : index
      %c0_16 = arith.constant 0 : index
      %19 = vector.load %arg6[%c0_15, %c0_16] : memref<8x128xbf16, #tpu.memory_space<vmem>>, vector<8x128xbf16>
      tpu.vector_store %arg6[%c0_15, %c0_16], %18 {strides = array<i32>} : memref<8x128xbf16, #tpu.memory_space<vmem>>, vector<8x128xbf16>,
    } else {
    }
    return
  }
  func.func @transform_0(%arg0: i32, %arg1: i32, %arg2: i32) -> (i32, i32) {
    %c0_i32 = arith.constant 0 : i32
    return %arg0, %arg2 : i32, i32
  }
  func.func @transform_1(%arg0: i32, %arg1: i32, %arg2: i32) -> (i32, i32) {
    %c0_i32 = arith.constant 0 : i32
    return %arg2, %arg1 : i32, i32
  }
  func.func @transform_2(%arg0: i32, %arg1: i32, %arg2: i32) -> (i32, i32) {
    %c0_i32 = arith.constant 0 : i32
    %c0_i32_0 = arith.constant 0 : i32
    return %c0_i32, %arg1 : i32, i32
  }
  func.func @transform_3(%arg0: i32, %arg1: i32, %arg2: i32) -> (i32, i32) {
    %c0_i32 = arith.constant 0 : i32
    return %arg0, %arg1 : i32, i32
  }
}

module attributes {stable_mosaic.version = 11 : i64} {
  func.func @_maxpool_kernel(%arg0: i32, %arg1: i32, %arg2: memref<1x3x3x64xbf16, #tpu.memory_space<vmem>>, %arg3: memref<1x3x3x64xbf16, #tpu.memory_space<vmem>>, %arg4: memref<1x3x3x64xbf16, #tpu.memory_space<vmem>>, %arg5: memref<1x3x3x64xbf16, #tpu.memory_space<vmem>>, %arg6: memref<1x2x2x64xbf16, #tpu.memory_space<vmem>>) attributes {dimension_semantics = [#tpu.dimension_semantics<parallel>, #tpu.dimension_semantics<parallel>], iteration_bounds = array<i64: 2, 1>, scalar_prefetch = 0 : i64, scratch_operands = 0 : i64, tpu.core_type = #tpu.core_type<tc>, window_params = [{transform_indices = @transform_0, window_bounds = array<i64: 1, 3, 3, 64>}, {transform_indices = @transform_1, window_bounds = array<i64: 1, 3, 3, 64>}, {transform_indices = @transform_2, window_bounds = array<i64: 1, 3, 3, 64>}, {transform_indices = @transform_3, window_bounds = array<i64: 1, 3, 3, 64>}, {transform_indices = @transform_4, window_bounds = array<i64: 1, 2, 2, 64>}]} {
    %c0 = arith.constant 0 : index
    %c0_0 = arith.constant 0 : index
    %c0_1 = arith.constant 0 : index
    %c0_2 = arith.constant 0 : index
    %0 = vector.load %arg2[%c0, %c0_0, %c0_1, %c0_2] : memref<1x3x3x64xbf16, #tpu.memory_space<vmem>>, vector<1x2x2x64xbf16>
    %c0_3 = arith.constant 0 : index
    %c0_4 = arith.constant 0 : index
    %c0_5 = arith.constant 0 : index
    %c0_6 = arith.constant 0 : index
    %1 = vector.load %arg3[%c0_3, %c0_4, %c0_5, %c0_6] : memref<1x3x3x64xbf16, #tpu.memory_space<vmem>>, vector<1x2x2x64xbf16>
    %2 = arith.maximumf %0, %1 : vector<1x2x2x64xbf16>
    %c0_7 = arith.constant 0 : index
    %c0_8 = arith.constant 0 : index
    %c1 = arith.constant 1 : index
    %c0_9 = arith.constant 0 : index
    %3 = vector.load %arg2[%c0_7, %c0_8, %c1, %c0_9] : memref<1x3x3x64xbf16, #tpu.memory_space<vmem>>, vector<1x2x2x64xbf16>
    %4 = arith.maximumf %2, %3 : vector<1x2x2x64xbf16>
    %c0_10 = arith.constant 0 : index
    %c0_11 = arith.constant 0 : index
    %c0_12 = arith.constant 0 : index
    %c0_13 = arith.constant 0 : index
    %5 = vector.load %arg4[%c0_10, %c0_11, %c0_12, %c0_13] : memref<1x3x3x64xbf16, #tpu.memory_space<vmem>>, vector<1x2x2x64xbf16>
    %6 = arith.maximumf %4, %5 : vector<1x2x2x64xbf16>
    %c0_14 = arith.constant 0 : index
    %c0_15 = arith.constant 0 : index
    %c0_16 = arith.constant 0 : index
    %c0_17 = arith.constant 0 : index
    %7 = vector.load %arg5[%c0_14, %c0_15, %c0_16, %c0_17] : memref<1x3x3x64xbf16, #tpu.memory_space<vmem>>, vector<1x2x2x64xbf16>
    %8 = arith.maximumf %6, %7 : vector<1x2x2x64xbf16>
    %c0_18 = arith.constant 0 : index
    %c0_19 = arith.constant 0 : index
    %c1_20 = arith.constant 1 : index
    %c0_21 = arith.constant 0 : index
    %9 = vector.load %arg4[%c0_18, %c0_19, %c1_20, %c0_21] : memref<1x3x3x64xbf16, #tpu.memory_space<vmem>>, vector<1x2x2x64xbf16>
    %10 = arith.maximumf %8, %9 : vector<1x2x2x64xbf16>
    %c0_22 = arith.constant 0 : index
    %c1_23 = arith.constant 1 : index
    %c0_24 = arith.constant 0 : index
    %c0_25 = arith.constant 0 : index
    %11 = vector.load %arg2[%c0_22, %c1_23, %c0_24, %c0_25] : memref<1x3x3x64xbf16, #tpu.memory_space<vmem>>, vector<1x2x2x64xbf16>
    %12 = arith.maximumf %10, %11 : vector<1x2x2x64xbf16>
    %c0_26 = arith.constant 0 : index
    %c1_27 = arith.constant 1 : index
    %c0_28 = arith.constant 0 : index
    %c0_29 = arith.constant 0 : index
    %13 = vector.load %arg3[%c0_26, %c1_27, %c0_28, %c0_29] : memref<1x3x3x64xbf16, #tpu.memory_space<vmem>>, vector<1x2x2x64xbf16>
    %14 = arith.maximumf %12, %13 : vector<1x2x2x64xbf16>
    %c0_30 = arith.constant 0 : index
    %c1_31 = arith.constant 1 : index
    %c1_32 = arith.constant 1 : index
    %c0_33 = arith.constant 0 : index
    %15 = vector.load %arg2[%c0_30, %c1_31, %c1_32, %c0_33] : memref<1x3x3x64xbf16, #tpu.memory_space<vmem>>, vector<1x2x2x64xbf16>
    %16 = arith.maximumf %14, %15 : vector<1x2x2x64xbf16>
    %c0_34 = arith.constant 0 : index
    %c0_35 = arith.constant 0 : index
    %c0_36 = arith.constant 0 : index
    %c0_37 = arith.constant 0 : index
    %17 = vector.load %arg6[%c0_34, %c0_35, %c0_36, %c0_37] : memref<1x2x2x64xbf16, #tpu.memory_space<vmem>>, vector<1x2x2x64xbf16>
    tpu.vector_store %arg6[%c0_34, %c0_35, %c0_36, %c0_37], %16 {strides = array<i32>} : memref<1x2x2x64xbf16, #tpu.memory_space<vmem>>, vector<1x2x2x64xbf16>,
    return
  }
  func.func @transform_0(%arg0: i32, %arg1: i32) -> (i32, i32, i32, i32) {
    %c0_i32 = arith.constant 0 : i32
    %c0_i32_0 = arith.constant 0 : i32
    %c0_i32_1 = arith.constant 0 : i32
    return %arg0, %c0_i32, %c0_i32_0, %arg1 : i32, i32, i32, i32
  }
  func.func @transform_1(%arg0: i32, %arg1: i32) -> (i32, i32, i32, i32) {
    %c0_i32 = arith.constant 0 : i32
    %c0_i32_0 = arith.constant 0 : i32
    %c0_i32_1 = arith.constant 0 : i32
    return %arg0, %c0_i32, %c0_i32_0, %arg1 : i32, i32, i32, i32
  }
  func.func @transform_2(%arg0: i32, %arg1: i32) -> (i32, i32, i32, i32) {
    %c0_i32 = arith.constant 0 : i32
    %c0_i32_0 = arith.constant 0 : i32
    %c0_i32_1 = arith.constant 0 : i32
    return %arg0, %c0_i32, %c0_i32_0, %arg1 : i32, i32, i32, i32
  }
  func.func @transform_3(%arg0: i32, %arg1: i32) -> (i32, i32, i32, i32) {
    %c0_i32 = arith.constant 0 : i32
    %c0_i32_0 = arith.constant 0 : i32
    %c0_i32_1 = arith.constant 0 : i32
    return %arg0, %c0_i32, %c0_i32_0, %arg1 : i32, i32, i32, i32
  }
  func.func @transform_4(%arg0: i32, %arg1: i32) -> (i32, i32, i32, i32) {
    %c0_i32 = arith.constant 0 : i32
    %c0_i32_0 = arith.constant 0 : i32
    %c0_i32_1 = arith.constant 0 : i32
    return %arg0, %c0_i32, %c0_i32_0, %arg1 : i32, i32, i32, i32
  }
}

module attributes {stable_mosaic.version = 11 : i64} {
  func.func @_dw_kernel(%arg0: i32, %arg1: i32, %arg2: memref<1x4x4x128xbf16, #tpu.memory_space<vmem>>, %arg3: memref<9x1x128xf32, #tpu.memory_space<vmem>>, %arg4: memref<1x128xf32, #tpu.memory_space<vmem>>, %arg5: memref<1x2x2x128xbf16, #tpu.memory_space<vmem>>) attributes {dimension_semantics = [#tpu.dimension_semantics<parallel>, #tpu.dimension_semantics<parallel>], iteration_bounds = array<i64: 2, 1>, scalar_prefetch = 0 : i64, scratch_operands = 0 : i64, tpu.core_type = #tpu.core_type<tc>, window_params = [{transform_indices = @transform_0, window_bounds = array<i64: 1, 4, 4, 128>}, {transform_indices = @transform_1, window_bounds = array<i64: 9, 1, 128>}, {transform_indices = @transform_2, window_bounds = array<i64: 1, 128>}, {transform_indices = @transform_3, window_bounds = array<i64: 1, 2, 2, 128>}]} {
    %c0 = arith.constant 0 : index
    %c0_0 = arith.constant 0 : index
    %c0_1 = arith.constant 0 : index
    %c0_2 = arith.constant 0 : index
    %0 = vector.load %arg2[%c0, %c0_0, %c0_1, %c0_2] : memref<1x4x4x128xbf16, #tpu.memory_space<vmem>>, vector<1x2x2x128xbf16>
    %1 = arith.extf %0 : vector<1x2x2x128xbf16> to vector<1x2x2x128xf32>
    %c0_3 = arith.constant 0 : index
    %c0_4 = arith.constant 0 : index
    %c0_5 = arith.constant 0 : index
    %2 = vector.load %arg3[%c0_3, %c0_4, %c0_5] : memref<9x1x128xf32, #tpu.memory_space<vmem>>, vector<1x1x128xf32>
    %3 = vector.shape_cast %2 : vector<1x1x128xf32> to vector<1x128xf32>
    %4 = vector.shape_cast %3 : vector<1x128xf32> to vector<1x1x1x128xf32>
    %5 = vector.broadcast %4 : vector<1x1x1x128xf32> to vector<1x2x2x128xf32>
    %6 = arith.mulf %1, %5 : vector<1x2x2x128xf32>
    %c0_6 = arith.constant 0 : index
    %c0_7 = arith.constant 0 : index
    %c1 = arith.constant 1 : index
    %c0_8 = arith.constant 0 : index
    %7 = vector.load %arg2[%c0_6, %c0_7, %c1, %c0_8] : memref<1x4x4x128xbf16, #tpu.memory_space<vmem>>, vector<1x2x2x128xbf16>
    %8 = arith.extf %7 : vector<1x2x2x128xbf16> to vector<1x2x2x128xf32>
    %c1_9 = arith.constant 1 : index
    %c0_10 = arith.constant 0 : index
    %c0_11 = arith.constant 0 : index
    %9 = vector.load %arg3[%c1_9, %c0_10, %c0_11] : memref<9x1x128xf32, #tpu.memory_space<vmem>>, vector<1x1x128xf32>
    %10 = vector.shape_cast %9 : vector<1x1x128xf32> to vector<1x128xf32>
    %11 = vector.shape_cast %10 : vector<1x128xf32> to vector<1x1x1x128xf32>
    %12 = vector.broadcast %11 : vector<1x1x1x128xf32> to vector<1x2x2x128xf32>
    %13 = arith.mulf %8, %12 : vector<1x2x2x128xf32>
    %14 = arith.addf %6, %13 : vector<1x2x2x128xf32>
    %c0_12 = arith.constant 0 : index
    %c0_13 = arith.constant 0 : index
    %c2 = arith.constant 2 : index
    %c0_14 = arith.constant 0 : index
    %15 = vector.load %arg2[%c0_12, %c0_13, %c2, %c0_14] : memref<1x4x4x128xbf16, #tpu.memory_space<vmem>>, vector<1x2x2x128xbf16>
    %16 = arith.extf %15 : vector<1x2x2x128xbf16> to vector<1x2x2x128xf32>
    %c2_15 = arith.constant 2 : index
    %c0_16 = arith.constant 0 : index
    %c0_17 = arith.constant 0 : index
    %17 = vector.load %arg3[%c2_15, %c0_16, %c0_17] : memref<9x1x128xf32, #tpu.memory_space<vmem>>, vector<1x1x128xf32>
    %18 = vector.shape_cast %17 : vector<1x1x128xf32> to vector<1x128xf32>
    %19 = vector.shape_cast %18 : vector<1x128xf32> to vector<1x1x1x128xf32>
    %20 = vector.broadcast %19 : vector<1x1x1x128xf32> to vector<1x2x2x128xf32>
    %21 = arith.mulf %16, %20 : vector<1x2x2x128xf32>
    %22 = arith.addf %14, %21 : vector<1x2x2x128xf32>
    %c0_18 = arith.constant 0 : index
    %c1_19 = arith.constant 1 : index
    %c0_20 = arith.constant 0 : index
    %c0_21 = arith.constant 0 : index
    %23 = vector.load %arg2[%c0_18, %c1_19, %c0_20, %c0_21] : memref<1x4x4x128xbf16, #tpu.memory_space<vmem>>, vector<1x2x2x128xbf16>
    %24 = arith.extf %23 : vector<1x2x2x128xbf16> to vector<1x2x2x128xf32>
    %c3 = arith.constant 3 : index
    %c0_22 = arith.constant 0 : index
    %c0_23 = arith.constant 0 : index
    %25 = vector.load %arg3[%c3, %c0_22, %c0_23] : memref<9x1x128xf32, #tpu.memory_space<vmem>>, vector<1x1x128xf32>
    %26 = vector.shape_cast %25 : vector<1x1x128xf32> to vector<1x128xf32>
    %27 = vector.shape_cast %26 : vector<1x128xf32> to vector<1x1x1x128xf32>
    %28 = vector.broadcast %27 : vector<1x1x1x128xf32> to vector<1x2x2x128xf32>
    %29 = arith.mulf %24, %28 : vector<1x2x2x128xf32>
    %30 = arith.addf %22, %29 : vector<1x2x2x128xf32>
    %c0_24 = arith.constant 0 : index
    %c1_25 = arith.constant 1 : index
    %c1_26 = arith.constant 1 : index
    %c0_27 = arith.constant 0 : index
    %31 = vector.load %arg2[%c0_24, %c1_25, %c1_26, %c0_27] : memref<1x4x4x128xbf16, #tpu.memory_space<vmem>>, vector<1x2x2x128xbf16>
    %32 = arith.extf %31 : vector<1x2x2x128xbf16> to vector<1x2x2x128xf32>
    %c4 = arith.constant 4 : index
    %c0_28 = arith.constant 0 : index
    %c0_29 = arith.constant 0 : index
    %33 = vector.load %arg3[%c4, %c0_28, %c0_29] : memref<9x1x128xf32, #tpu.memory_space<vmem>>, vector<1x1x128xf32>
    %34 = vector.shape_cast %33 : vector<1x1x128xf32> to vector<1x128xf32>
    %35 = vector.shape_cast %34 : vector<1x128xf32> to vector<1x1x1x128xf32>
    %36 = vector.broadcast %35 : vector<1x1x1x128xf32> to vector<1x2x2x128xf32>
    %37 = arith.mulf %32, %36 : vector<1x2x2x128xf32>
    %38 = arith.addf %30, %37 : vector<1x2x2x128xf32>
    %c0_30 = arith.constant 0 : index
    %c1_31 = arith.constant 1 : index
    %c2_32 = arith.constant 2 : index
    %c0_33 = arith.constant 0 : index
    %39 = vector.load %arg2[%c0_30, %c1_31, %c2_32, %c0_33] : memref<1x4x4x128xbf16, #tpu.memory_space<vmem>>, vector<1x2x2x128xbf16>
    %40 = arith.extf %39 : vector<1x2x2x128xbf16> to vector<1x2x2x128xf32>
    %c5 = arith.constant 5 : index
    %c0_34 = arith.constant 0 : index
    %c0_35 = arith.constant 0 : index
    %41 = vector.load %arg3[%c5, %c0_34, %c0_35] : memref<9x1x128xf32, #tpu.memory_space<vmem>>, vector<1x1x128xf32>
    %42 = vector.shape_cast %41 : vector<1x1x128xf32> to vector<1x128xf32>
    %43 = vector.shape_cast %42 : vector<1x128xf32> to vector<1x1x1x128xf32>
    %44 = vector.broadcast %43 : vector<1x1x1x128xf32> to vector<1x2x2x128xf32>
    %45 = arith.mulf %40, %44 : vector<1x2x2x128xf32>
    %46 = arith.addf %38, %45 : vector<1x2x2x128xf32>
    %c0_36 = arith.constant 0 : index
    %c2_37 = arith.constant 2 : index
    %c0_38 = arith.constant 0 : index
    %c0_39 = arith.constant 0 : index
    %47 = vector.load %arg2[%c0_36, %c2_37, %c0_38, %c0_39] : memref<1x4x4x128xbf16, #tpu.memory_space<vmem>>, vector<1x2x2x128xbf16>
    %48 = arith.extf %47 : vector<1x2x2x128xbf16> to vector<1x2x2x128xf32>
    %c6 = arith.constant 6 : index
    %c0_40 = arith.constant 0 : index
    %c0_41 = arith.constant 0 : index
    %49 = vector.load %arg3[%c6, %c0_40, %c0_41] : memref<9x1x128xf32, #tpu.memory_space<vmem>>, vector<1x1x128xf32>
    %50 = vector.shape_cast %49 : vector<1x1x128xf32> to vector<1x128xf32>
    %51 = vector.shape_cast %50 : vector<1x128xf32> to vector<1x1x1x128xf32>
    %52 = vector.broadcast %51 : vector<1x1x1x128xf32> to vector<1x2x2x128xf32>
    %53 = arith.mulf %48, %52 : vector<1x2x2x128xf32>
    %54 = arith.addf %46, %53 : vector<1x2x2x128xf32>
    %c0_42 = arith.constant 0 : index
    %c2_43 = arith.constant 2 : index
    %c1_44 = arith.constant 1 : index
    %c0_45 = arith.constant 0 : index
    %55 = vector.load %arg2[%c0_42, %c2_43, %c1_44, %c0_45] : memref<1x4x4x128xbf16, #tpu.memory_space<vmem>>, vector<1x2x2x128xbf16>
    %56 = arith.extf %55 : vector<1x2x2x128xbf16> to vector<1x2x2x128xf32>
    %c7 = arith.constant 7 : index
    %c0_46 = arith.constant 0 : index
    %c0_47 = arith.constant 0 : index
    %57 = vector.load %arg3[%c7, %c0_46, %c0_47] : memref<9x1x128xf32, #tpu.memory_space<vmem>>, vector<1x1x128xf32>
    %58 = vector.shape_cast %57 : vector<1x1x128xf32> to vector<1x128xf32>
    %59 = vector.shape_cast %58 : vector<1x128xf32> to vector<1x1x1x128xf32>
    %60 = vector.broadcast %59 : vector<1x1x1x128xf32> to vector<1x2x2x128xf32>
    %61 = arith.mulf %56, %60 : vector<1x2x2x128xf32>
    %62 = arith.addf %54, %61 : vector<1x2x2x128xf32>
    %c0_48 = arith.constant 0 : index
    %c2_49 = arith.constant 2 : index
    %c2_50 = arith.constant 2 : index
    %c0_51 = arith.constant 0 : index
    %63 = vector.load %arg2[%c0_48, %c2_49, %c2_50, %c0_51] : memref<1x4x4x128xbf16, #tpu.memory_space<vmem>>, vector<1x2x2x128xbf16>
    %64 = arith.extf %63 : vector<1x2x2x128xbf16> to vector<1x2x2x128xf32>
    %c8 = arith.constant 8 : index
    %c0_52 = arith.constant 0 : index
    %c0_53 = arith.constant 0 : index
    %65 = vector.load %arg3[%c8, %c0_52, %c0_53] : memref<9x1x128xf32, #tpu.memory_space<vmem>>, vector<1x1x128xf32>
    %66 = vector.shape_cast %65 : vector<1x1x128xf32> to vector<1x128xf32>
    %67 = vector.shape_cast %66 : vector<1x128xf32> to vector<1x1x1x128xf32>
    %68 = vector.broadcast %67 : vector<1x1x1x128xf32> to vector<1x2x2x128xf32>
    %69 = arith.mulf %64, %68 : vector<1x2x2x128xf32>
    %70 = arith.addf %62, %69 : vector<1x2x2x128xf32>
    %c0_54 = arith.constant 0 : index
    %c0_55 = arith.constant 0 : index
    %71 = vector.load %arg4[%c0_54, %c0_55] : memref<1x128xf32, #tpu.memory_space<vmem>>, vector<1x128xf32>
    %72 = vector.shape_cast %71 : vector<1x128xf32> to vector<1x1x1x128xf32>
    %73 = vector.broadcast %72 : vector<1x1x1x128xf32> to vector<1x2x2x128xf32>
    %74 = arith.addf %70, %73 : vector<1x2x2x128xf32>
    %cst = arith.constant 0.000000e+00 : f32
    %75 = vector.broadcast %cst : f32 to vector<1x2x2x128xf32>
    %76 = arith.maximumf %74, %75 : vector<1x2x2x128xf32>
    %77 = arith.truncf %76 : vector<1x2x2x128xf32> to vector<1x2x2x128xbf16>
    %c0_56 = arith.constant 0 : index
    %c0_57 = arith.constant 0 : index
    %c0_58 = arith.constant 0 : index
    %c0_59 = arith.constant 0 : index
    %78 = vector.load %arg5[%c0_56, %c0_57, %c0_58, %c0_59] : memref<1x2x2x128xbf16, #tpu.memory_space<vmem>>, vector<1x2x2x128xbf16>
    tpu.vector_store %arg5[%c0_56, %c0_57, %c0_58, %c0_59], %77 {strides = array<i32>} : memref<1x2x2x128xbf16, #tpu.memory_space<vmem>>, vector<1x2x2x128xbf16>,
    return
  }
  func.func @transform_0(%arg0: i32, %arg1: i32) -> (i32, i32, i32, i32) {
    %c0_i32 = arith.constant 0 : i32
    %c0_i32_0 = arith.constant 0 : i32
    %c0_i32_1 = arith.constant 0 : i32
    return %arg0, %c0_i32, %c0_i32_0, %arg1 : i32, i32, i32, i32
  }
  func.func @transform_1(%arg0: i32, %arg1: i32) -> (i32, i32, i32) {
    %c0_i32 = arith.constant 0 : i32
    %c0_i32_0 = arith.constant 0 : i32
    %c0_i32_1 = arith.constant 0 : i32
    return %c0_i32, %c0_i32_0, %arg1 : i32, i32, i32
  }
  func.func @transform_2(%arg0: i32, %arg1: i32) -> (i32, i32) {
    %c0_i32 = arith.constant 0 : i32
    %c0_i32_0 = arith.constant 0 : i32
    return %c0_i32, %arg1 : i32, i32
  }
  func.func @transform_3(%arg0: i32, %arg1: i32) -> (i32, i32, i32, i32) {
    %c0_i32 = arith.constant 0 : i32
    %c0_i32_0 = arith.constant 0 : i32
    %c0_i32_1 = arith.constant 0 : i32
    return %arg0, %c0_i32, %c0_i32_0, %arg1 : i32, i32, i32, i32
  }
}

module attributes {stable_mosaic.version = 11 : i64} {
  func.func @_dw_dilated_kernel(%arg0: i32, %arg1: i32, %arg2: memref<1x6x6x128xbf16, #tpu.memory_space<vmem>>, %arg3: memref<9x1x128xf32, #tpu.memory_space<vmem>>, %arg4: memref<1x128xf32, #tpu.memory_space<vmem>>, %arg5: memref<9x1x128xf32, #tpu.memory_space<vmem>>, %arg6: memref<1x128xf32, #tpu.memory_space<vmem>>, %arg7: memref<1x2x2x128xbf16, #tpu.memory_space<vmem>>) attributes {dimension_semantics = [#tpu.dimension_semantics<parallel>, #tpu.dimension_semantics<parallel>], iteration_bounds = array<i64: 2, 1>, scalar_prefetch = 0 : i64, scratch_operands = 0 : i64, tpu.core_type = #tpu.core_type<tc>, window_params = [{transform_indices = @transform_0, window_bounds = array<i64: 1, 6, 6, 128>}, {transform_indices = @transform_1, window_bounds = array<i64: 9, 1, 128>}, {transform_indices = @transform_2, window_bounds = array<i64: 1, 128>}, {transform_indices = @transform_3, window_bounds = array<i64: 9, 1, 128>}, {transform_indices = @transform_4, window_bounds = array<i64: 1, 128>}, {transform_indices = @transform_5, window_bounds = array<i64: 1, 2, 2, 128>}]} {
    %c0 = arith.constant 0 : index
    %c1 = arith.constant 1 : index
    %c1_0 = arith.constant 1 : index
    %c0_1 = arith.constant 0 : index
    %0 = vector.load %arg2[%c0, %c1, %c1_0, %c0_1] : memref<1x6x6x128xbf16, #tpu.memory_space<vmem>>, vector<1x2x2x128xbf16>
    %1 = arith.extf %0 : vector<1x2x2x128xbf16> to vector<1x2x2x128xf32>
    %c0_2 = arith.constant 0 : index
    %c0_3 = arith.constant 0 : index
    %c0_4 = arith.constant 0 : index
    %2 = vector.load %arg3[%c0_2, %c0_3, %c0_4] : memref<9x1x128xf32, #tpu.memory_space<vmem>>, vector<1x1x128xf32>
    %3 = vector.shape_cast %2 : vector<1x1x128xf32> to vector<1x128xf32>
    %4 = vector.shape_cast %3 : vector<1x128xf32> to vector<1x1x1x128xf32>
    %5 = vector.broadcast %4 : vector<1x1x1x128xf32> to vector<1x2x2x128xf32>
    %6 = arith.mulf %1, %5 : vector<1x2x2x128xf32>
    %c0_5 = arith.constant 0 : index
    %c1_6 = arith.constant 1 : index
    %c2 = arith.constant 2 : index
    %c0_7 = arith.constant 0 : index
    %7 = vector.load %arg2[%c0_5, %c1_6, %c2, %c0_7] : memref<1x6x6x128xbf16, #tpu.memory_space<vmem>>, vector<1x2x2x128xbf16>
    %8 = arith.extf %7 : vector<1x2x2x128xbf16> to vector<1x2x2x128xf32>
    %c1_8 = arith.constant 1 : index
    %c0_9 = arith.constant 0 : index
    %c0_10 = arith.constant 0 : index
    %9 = vector.load %arg3[%c1_8, %c0_9, %c0_10] : memref<9x1x128xf32, #tpu.memory_space<vmem>>, vector<1x1x128xf32>
    %10 = vector.shape_cast %9 : vector<1x1x128xf32> to vector<1x128xf32>
    %11 = vector.shape_cast %10 : vector<1x128xf32> to vector<1x1x1x128xf32>
    %12 = vector.broadcast %11 : vector<1x1x1x128xf32> to vector<1x2x2x128xf32>
    %13 = arith.mulf %8, %12 : vector<1x2x2x128xf32>
    %14 = arith.addf %6, %13 : vector<1x2x2x128xf32>
    %c0_11 = arith.constant 0 : index
    %c1_12 = arith.constant 1 : index
    %c3 = arith.constant 3 : index
    %c0_13 = arith.constant 0 : index
    %15 = vector.load %arg2[%c0_11, %c1_12, %c3, %c0_13] : memref<1x6x6x128xbf16, #tpu.memory_space<vmem>>, vector<1x2x2x128xbf16>
    %16 = arith.extf %15 : vector<1x2x2x128xbf16> to vector<1x2x2x128xf32>
    %c2_14 = arith.constant 2 : index
    %c0_15 = arith.constant 0 : index
    %c0_16 = arith.constant 0 : index
    %17 = vector.load %arg3[%c2_14, %c0_15, %c0_16] : memref<9x1x128xf32, #tpu.memory_space<vmem>>, vector<1x1x128xf32>
    %18 = vector.shape_cast %17 : vector<1x1x128xf32> to vector<1x128xf32>
    %19 = vector.shape_cast %18 : vector<1x128xf32> to vector<1x1x1x128xf32>
    %20 = vector.broadcast %19 : vector<1x1x1x128xf32> to vector<1x2x2x128xf32>
    %21 = arith.mulf %16, %20 : vector<1x2x2x128xf32>
    %22 = arith.addf %14, %21 : vector<1x2x2x128xf32>
    %c0_17 = arith.constant 0 : index
    %c2_18 = arith.constant 2 : index
    %c1_19 = arith.constant 1 : index
    %c0_20 = arith.constant 0 : index
    %23 = vector.load %arg2[%c0_17, %c2_18, %c1_19, %c0_20] : memref<1x6x6x128xbf16, #tpu.memory_space<vmem>>, vector<1x2x2x128xbf16>
    %24 = arith.extf %23 : vector<1x2x2x128xbf16> to vector<1x2x2x128xf32>
    %c3_21 = arith.constant 3 : index
    %c0_22 = arith.constant 0 : index
    %c0_23 = arith.constant 0 : index
    %25 = vector.load %arg3[%c3_21, %c0_22, %c0_23] : memref<9x1x128xf32, #tpu.memory_space<vmem>>, vector<1x1x128xf32>
    %26 = vector.shape_cast %25 : vector<1x1x128xf32> to vector<1x128xf32>
    %27 = vector.shape_cast %26 : vector<1x128xf32> to vector<1x1x1x128xf32>
    %28 = vector.broadcast %27 : vector<1x1x1x128xf32> to vector<1x2x2x128xf32>
    %29 = arith.mulf %24, %28 : vector<1x2x2x128xf32>
    %30 = arith.addf %22, %29 : vector<1x2x2x128xf32>
    %c0_24 = arith.constant 0 : index
    %c2_25 = arith.constant 2 : index
    %c2_26 = arith.constant 2 : index
    %c0_27 = arith.constant 0 : index
    %31 = vector.load %arg2[%c0_24, %c2_25, %c2_26, %c0_27] : memref<1x6x6x128xbf16, #tpu.memory_space<vmem>>, vector<1x2x2x128xbf16>
    %32 = arith.extf %31 : vector<1x2x2x128xbf16> to vector<1x2x2x128xf32>
    %c4 = arith.constant 4 : index
    %c0_28 = arith.constant 0 : index
    %c0_29 = arith.constant 0 : index
    %33 = vector.load %arg3[%c4, %c0_28, %c0_29] : memref<9x1x128xf32, #tpu.memory_space<vmem>>, vector<1x1x128xf32>
    %34 = vector.shape_cast %33 : vector<1x1x128xf32> to vector<1x128xf32>
    %35 = vector.shape_cast %34 : vector<1x128xf32> to vector<1x1x1x128xf32>
    %36 = vector.broadcast %35 : vector<1x1x1x128xf32> to vector<1x2x2x128xf32>
    %37 = arith.mulf %32, %36 : vector<1x2x2x128xf32>
    %38 = arith.addf %30, %37 : vector<1x2x2x128xf32>
    %c0_30 = arith.constant 0 : index
    %c2_31 = arith.constant 2 : index
    %c3_32 = arith.constant 3 : index
    %c0_33 = arith.constant 0 : index
    %39 = vector.load %arg2[%c0_30, %c2_31, %c3_32, %c0_33] : memref<1x6x6x128xbf16, #tpu.memory_space<vmem>>, vector<1x2x2x128xbf16>
    %40 = arith.extf %39 : vector<1x2x2x128xbf16> to vector<1x2x2x128xf32>
    %c5 = arith.constant 5 : index
    %c0_34 = arith.constant 0 : index
    %c0_35 = arith.constant 0 : index
    %41 = vector.load %arg3[%c5, %c0_34, %c0_35] : memref<9x1x128xf32, #tpu.memory_space<vmem>>, vector<1x1x128xf32>
    %42 = vector.shape_cast %41 : vector<1x1x128xf32> to vector<1x128xf32>
    %43 = vector.shape_cast %42 : vector<1x128xf32> to vector<1x1x1x128xf32>
    %44 = vector.broadcast %43 : vector<1x1x1x128xf32> to vector<1x2x2x128xf32>
    %45 = arith.mulf %40, %44 : vector<1x2x2x128xf32>
    %46 = arith.addf %38, %45 : vector<1x2x2x128xf32>
    %c0_36 = arith.constant 0 : index
    %c3_37 = arith.constant 3 : index
    %c1_38 = arith.constant 1 : index
    %c0_39 = arith.constant 0 : index
    %47 = vector.load %arg2[%c0_36, %c3_37, %c1_38, %c0_39] : memref<1x6x6x128xbf16, #tpu.memory_space<vmem>>, vector<1x2x2x128xbf16>
    %48 = arith.extf %47 : vector<1x2x2x128xbf16> to vector<1x2x2x128xf32>
    %c6 = arith.constant 6 : index
    %c0_40 = arith.constant 0 : index
    %c0_41 = arith.constant 0 : index
    %49 = vector.load %arg3[%c6, %c0_40, %c0_41] : memref<9x1x128xf32, #tpu.memory_space<vmem>>, vector<1x1x128xf32>
    %50 = vector.shape_cast %49 : vector<1x1x128xf32> to vector<1x128xf32>
    %51 = vector.shape_cast %50 : vector<1x128xf32> to vector<1x1x1x128xf32>
    %52 = vector.broadcast %51 : vector<1x1x1x128xf32> to vector<1x2x2x128xf32>
    %53 = arith.mulf %48, %52 : vector<1x2x2x128xf32>
    %54 = arith.addf %46, %53 : vector<1x2x2x128xf32>
    %c0_42 = arith.constant 0 : index
    %c3_43 = arith.constant 3 : index
    %c2_44 = arith.constant 2 : index
    %c0_45 = arith.constant 0 : index
    %55 = vector.load %arg2[%c0_42, %c3_43, %c2_44, %c0_45] : memref<1x6x6x128xbf16, #tpu.memory_space<vmem>>, vector<1x2x2x128xbf16>
    %56 = arith.extf %55 : vector<1x2x2x128xbf16> to vector<1x2x2x128xf32>
    %c7 = arith.constant 7 : index
    %c0_46 = arith.constant 0 : index
    %c0_47 = arith.constant 0 : index
    %57 = vector.load %arg3[%c7, %c0_46, %c0_47] : memref<9x1x128xf32, #tpu.memory_space<vmem>>, vector<1x1x128xf32>
    %58 = vector.shape_cast %57 : vector<1x1x128xf32> to vector<1x128xf32>
    %59 = vector.shape_cast %58 : vector<1x128xf32> to vector<1x1x1x128xf32>
    %60 = vector.broadcast %59 : vector<1x1x1x128xf32> to vector<1x2x2x128xf32>
    %61 = arith.mulf %56, %60 : vector<1x2x2x128xf32>
    %62 = arith.addf %54, %61 : vector<1x2x2x128xf32>
    %c0_48 = arith.constant 0 : index
    %c3_49 = arith.constant 3 : index
    %c3_50 = arith.constant 3 : index
    %c0_51 = arith.constant 0 : index
    %63 = vector.load %arg2[%c0_48, %c3_49, %c3_50, %c0_51] : memref<1x6x6x128xbf16, #tpu.memory_space<vmem>>, vector<1x2x2x128xbf16>
    %64 = arith.extf %63 : vector<1x2x2x128xbf16> to vector<1x2x2x128xf32>
    %c8 = arith.constant 8 : index
    %c0_52 = arith.constant 0 : index
    %c0_53 = arith.constant 0 : index
    %65 = vector.load %arg3[%c8, %c0_52, %c0_53] : memref<9x1x128xf32, #tpu.memory_space<vmem>>, vector<1x1x128xf32>
    %66 = vector.shape_cast %65 : vector<1x1x128xf32> to vector<1x128xf32>
    %67 = vector.shape_cast %66 : vector<1x128xf32> to vector<1x1x1x128xf32>
    %68 = vector.broadcast %67 : vector<1x1x1x128xf32> to vector<1x2x2x128xf32>
    %69 = arith.mulf %64, %68 : vector<1x2x2x128xf32>
    %70 = arith.addf %62, %69 : vector<1x2x2x128xf32>
    %c0_54 = arith.constant 0 : index
    %c0_55 = arith.constant 0 : index
    %71 = vector.load %arg4[%c0_54, %c0_55] : memref<1x128xf32, #tpu.memory_space<vmem>>, vector<1x128xf32>
    %72 = vector.shape_cast %71 : vector<1x128xf32> to vector<1x1x1x128xf32>
    %73 = vector.broadcast %72 : vector<1x1x1x128xf32> to vector<1x2x2x128xf32>
    %74 = arith.addf %70, %73 : vector<1x2x2x128xf32>
    %cst = arith.constant 0.000000e+00 : f32
    %75 = vector.broadcast %cst : f32 to vector<1x2x2x128xf32>
    %76 = arith.maximumf %74, %75 : vector<1x2x2x128xf32>
    %c0_56 = arith.constant 0 : index
    %c0_57 = arith.constant 0 : index
    %c0_58 = arith.constant 0 : index
    %c0_59 = arith.constant 0 : index
    %77 = vector.load %arg2[%c0_56, %c0_57, %c0_58, %c0_59] : memref<1x6x6x128xbf16, #tpu.memory_space<vmem>>, vector<1x2x2x128xbf16>
    %78 = arith.extf %77 : vector<1x2x2x128xbf16> to vector<1x2x2x128xf32>
    %c0_60 = arith.constant 0 : index
    %c0_61 = arith.constant 0 : index
    %c0_62 = arith.constant 0 : index
    %79 = vector.load %arg5[%c0_60, %c0_61, %c0_62] : memref<9x1x128xf32, #tpu.memory_space<vmem>>, vector<1x1x128xf32>
    %80 = vector.shape_cast %79 : vector<1x1x128xf32> to vector<1x128xf32>
    %81 = vector.shape_cast %80 : vector<1x128xf32> to vector<1x1x1x128xf32>
    %82 = vector.broadcast %81 : vector<1x1x1x128xf32> to vector<1x2x2x128xf32>
    %83 = arith.mulf %78, %82 : vector<1x2x2x128xf32>
    %c0_63 = arith.constant 0 : index
    %c0_64 = arith.constant 0 : index
    %c2_65 = arith.constant 2 : index
    %c0_66 = arith.constant 0 : index
    %84 = vector.load %arg2[%c0_63, %c0_64, %c2_65, %c0_66] : memref<1x6x6x128xbf16, #tpu.memory_space<vmem>>, vector<1x2x2x128xbf16>
    %85 = arith.extf %84 : vector<1x2x2x128xbf16> to vector<1x2x2x128xf32>
    %c1_67 = arith.constant 1 : index
    %c0_68 = arith.constant 0 : index
    %c0_69 = arith.constant 0 : index
    %86 = vector.load %arg5[%c1_67, %c0_68, %c0_69] : memref<9x1x128xf32, #tpu.memory_space<vmem>>, vector<1x1x128xf32>
    %87 = vector.shape_cast %86 : vector<1x1x128xf32> to vector<1x128xf32>
    %88 = vector.shape_cast %87 : vector<1x128xf32> to vector<1x1x1x128xf32>
    %89 = vector.broadcast %88 : vector<1x1x1x128xf32> to vector<1x2x2x128xf32>
    %90 = arith.mulf %85, %89 : vector<1x2x2x128xf32>
    %91 = arith.addf %83, %90 : vector<1x2x2x128xf32>
    %c0_70 = arith.constant 0 : index
    %c0_71 = arith.constant 0 : index
    %c4_72 = arith.constant 4 : index
    %c0_73 = arith.constant 0 : index
    %92 = vector.load %arg2[%c0_70, %c0_71, %c4_72, %c0_73] : memref<1x6x6x128xbf16, #tpu.memory_space<vmem>>, vector<1x2x2x128xbf16>
    %93 = arith.extf %92 : vector<1x2x2x128xbf16> to vector<1x2x2x128xf32>
    %c2_74 = arith.constant 2 : index
    %c0_75 = arith.constant 0 : index
    %c0_76 = arith.constant 0 : index
    %94 = vector.load %arg5[%c2_74, %c0_75, %c0_76] : memref<9x1x128xf32, #tpu.memory_space<vmem>>, vector<1x1x128xf32>
    %95 = vector.shape_cast %94 : vector<1x1x128xf32> to vector<1x128xf32>
    %96 = vector.shape_cast %95 : vector<1x128xf32> to vector<1x1x1x128xf32>
    %97 = vector.broadcast %96 : vector<1x1x1x128xf32> to vector<1x2x2x128xf32>
    %98 = arith.mulf %93, %97 : vector<1x2x2x128xf32>
    %99 = arith.addf %91, %98 : vector<1x2x2x128xf32>
    %c0_77 = arith.constant 0 : index
    %c2_78 = arith.constant 2 : index
    %c0_79 = arith.constant 0 : index
    %c0_80 = arith.constant 0 : index
    %100 = vector.load %arg2[%c0_77, %c2_78, %c0_79, %c0_80] : memref<1x6x6x128xbf16, #tpu.memory_space<vmem>>, vector<1x2x2x128xbf16>
    %101 = arith.extf %100 : vector<1x2x2x128xbf16> to vector<1x2x2x128xf32>
    %c3_81 = arith.constant 3 : index
    %c0_82 = arith.constant 0 : index
    %c0_83 = arith.constant 0 : index
    %102 = vector.load %arg5[%c3_81, %c0_82, %c0_83] : memref<9x1x128xf32, #tpu.memory_space<vmem>>, vector<1x1x128xf32>
    %103 = vector.shape_cast %102 : vector<1x1x128xf32> to vector<1x128xf32>
    %104 = vector.shape_cast %103 : vector<1x128xf32> to vector<1x1x1x128xf32>
    %105 = vector.broadcast %104 : vector<1x1x1x128xf32> to vector<1x2x2x128xf32>
    %106 = arith.mulf %101, %105 : vector<1x2x2x128xf32>
    %107 = arith.addf %99, %106 : vector<1x2x2x128xf32>
    %c0_84 = arith.constant 0 : index
    %c2_85 = arith.constant 2 : index
    %c2_86 = arith.constant 2 : index
    %c0_87 = arith.constant 0 : index
    %108 = vector.load %arg2[%c0_84, %c2_85, %c2_86, %c0_87] : memref<1x6x6x128xbf16, #tpu.memory_space<vmem>>, vector<1x2x2x128xbf16>
    %109 = arith.extf %108 : vector<1x2x2x128xbf16> to vector<1x2x2x128xf32>
    %c4_88 = arith.constant 4 : index
    %c0_89 = arith.constant 0 : index
    %c0_90 = arith.constant 0 : index
    %110 = vector.load %arg5[%c4_88, %c0_89, %c0_90] : memref<9x1x128xf32, #tpu.memory_space<vmem>>, vector<1x1x128xf32>
    %111 = vector.shape_cast %110 : vector<1x1x128xf32> to vector<1x128xf32>
    %112 = vector.shape_cast %111 : vector<1x128xf32> to vector<1x1x1x128xf32>
    %113 = vector.broadcast %112 : vector<1x1x1x128xf32> to vector<1x2x2x128xf32>
    %114 = arith.mulf %109, %113 : vector<1x2x2x128xf32>
    %115 = arith.addf %107, %114 : vector<1x2x2x128xf32>
    %c0_91 = arith.constant 0 : index
    %c2_92 = arith.constant 2 : index
    %c4_93 = arith.constant 4 : index
    %c0_94 = arith.constant 0 : index
    %116 = vector.load %arg2[%c0_91, %c2_92, %c4_93, %c0_94] : memref<1x6x6x128xbf16, #tpu.memory_space<vmem>>, vector<1x2x2x128xbf16>
    %117 = arith.extf %116 : vector<1x2x2x128xbf16> to vector<1x2x2x128xf32>
    %c5_95 = arith.constant 5 : index
    %c0_96 = arith.constant 0 : index
    %c0_97 = arith.constant 0 : index
    %118 = vector.load %arg5[%c5_95, %c0_96, %c0_97] : memref<9x1x128xf32, #tpu.memory_space<vmem>>, vector<1x1x128xf32>
    %119 = vector.shape_cast %118 : vector<1x1x128xf32> to vector<1x128xf32>
    %120 = vector.shape_cast %119 : vector<1x128xf32> to vector<1x1x1x128xf32>
    %121 = vector.broadcast %120 : vector<1x1x1x128xf32> to vector<1x2x2x128xf32>
    %122 = arith.mulf %117, %121 : vector<1x2x2x128xf32>
    %123 = arith.addf %115, %122 : vector<1x2x2x128xf32>
    %c0_98 = arith.constant 0 : index
    %c4_99 = arith.constant 4 : index
    %c0_100 = arith.constant 0 : index
    %c0_101 = arith.constant 0 : index
    %124 = vector.load %arg2[%c0_98, %c4_99, %c0_100, %c0_101] : memref<1x6x6x128xbf16, #tpu.memory_space<vmem>>, vector<1x2x2x128xbf16>
    %125 = arith.extf %124 : vector<1x2x2x128xbf16> to vector<1x2x2x128xf32>
    %c6_102 = arith.constant 6 : index
    %c0_103 = arith.constant 0 : index
    %c0_104 = arith.constant 0 : index
    %126 = vector.load %arg5[%c6_102, %c0_103, %c0_104] : memref<9x1x128xf32, #tpu.memory_space<vmem>>, vector<1x1x128xf32>
    %127 = vector.shape_cast %126 : vector<1x1x128xf32> to vector<1x128xf32>
    %128 = vector.shape_cast %127 : vector<1x128xf32> to vector<1x1x1x128xf32>
    %129 = vector.broadcast %128 : vector<1x1x1x128xf32> to vector<1x2x2x128xf32>
    %130 = arith.mulf %125, %129 : vector<1x2x2x128xf32>
    %131 = arith.addf %123, %130 : vector<1x2x2x128xf32>
    %c0_105 = arith.constant 0 : index
    %c4_106 = arith.constant 4 : index
    %c2_107 = arith.constant 2 : index
    %c0_108 = arith.constant 0 : index
    %132 = vector.load %arg2[%c0_105, %c4_106, %c2_107, %c0_108] : memref<1x6x6x128xbf16, #tpu.memory_space<vmem>>, vector<1x2x2x128xbf16>
    %133 = arith.extf %132 : vector<1x2x2x128xbf16> to vector<1x2x2x128xf32>
    %c7_109 = arith.constant 7 : index
    %c0_110 = arith.constant 0 : index
    %c0_111 = arith.constant 0 : index
    %134 = vector.load %arg5[%c7_109, %c0_110, %c0_111] : memref<9x1x128xf32, #tpu.memory_space<vmem>>, vector<1x1x128xf32>
    %135 = vector.shape_cast %134 : vector<1x1x128xf32> to vector<1x128xf32>
    %136 = vector.shape_cast %135 : vector<1x128xf32> to vector<1x1x1x128xf32>
    %137 = vector.broadcast %136 : vector<1x1x1x128xf32> to vector<1x2x2x128xf32>
    %138 = arith.mulf %133, %137 : vector<1x2x2x128xf32>
    %139 = arith.addf %131, %138 : vector<1x2x2x128xf32>
    %c0_112 = arith.constant 0 : index
    %c4_113 = arith.constant 4 : index
    %c4_114 = arith.constant 4 : index
    %c0_115 = arith.constant 0 : index
    %140 = vector.load %arg2[%c0_112, %c4_113, %c4_114, %c0_115] : memref<1x6x6x128xbf16, #tpu.memory_space<vmem>>, vector<1x2x2x128xbf16>
    %141 = arith.extf %140 : vector<1x2x2x128xbf16> to vector<1x2x2x128xf32>
    %c8_116 = arith.constant 8 : index
    %c0_117 = arith.constant 0 : index
    %c0_118 = arith.constant 0 : index
    %142 = vector.load %arg5[%c8_116, %c0_117, %c0_118] : memref<9x1x128xf32, #tpu.memory_space<vmem>>, vector<1x1x128xf32>
    %143 = vector.shape_cast %142 : vector<1x1x128xf32> to vector<1x128xf32>
    %144 = vector.shape_cast %143 : vector<1x128xf32> to vector<1x1x1x128xf32>
    %145 = vector.broadcast %144 : vector<1x1x1x128xf32> to vector<1x2x2x128xf32>
    %146 = arith.mulf %141, %145 : vector<1x2x2x128xf32>
    %147 = arith.addf %139, %146 : vector<1x2x2x128xf32>
    %c0_119 = arith.constant 0 : index
    %c0_120 = arith.constant 0 : index
    %148 = vector.load %arg6[%c0_119, %c0_120] : memref<1x128xf32, #tpu.memory_space<vmem>>, vector<1x128xf32>
    %149 = vector.shape_cast %148 : vector<1x128xf32> to vector<1x1x1x128xf32>
    %150 = vector.broadcast %149 : vector<1x1x1x128xf32> to vector<1x2x2x128xf32>
    %151 = arith.addf %147, %150 : vector<1x2x2x128xf32>
    %cst_121 = arith.constant 0.000000e+00 : f32
    %152 = vector.broadcast %cst_121 : f32 to vector<1x2x2x128xf32>
    %153 = arith.maximumf %151, %152 : vector<1x2x2x128xf32>
    %154 = arith.addf %76, %153 : vector<1x2x2x128xf32>
    %155 = arith.truncf %154 : vector<1x2x2x128xf32> to vector<1x2x2x128xbf16>
    %c0_122 = arith.constant 0 : index
    %c0_123 = arith.constant 0 : index
    %c0_124 = arith.constant 0 : index
    %c0_125 = arith.constant 0 : index
    %156 = vector.load %arg7[%c0_122, %c0_123, %c0_124, %c0_125] : memref<1x2x2x128xbf16, #tpu.memory_space<vmem>>, vector<1x2x2x128xbf16>
    tpu.vector_store %arg7[%c0_122, %c0_123, %c0_124, %c0_125], %155 {strides = array<i32>} : memref<1x2x2x128xbf16, #tpu.memory_space<vmem>>, vector<1x2x2x128xbf16>,
    return
  }
  func.func @transform_0(%arg0: i32, %arg1: i32) -> (i32, i32, i32, i32) {
    %c0_i32 = arith.constant 0 : i32
    %c0_i32_0 = arith.constant 0 : i32
    %c0_i32_1 = arith.constant 0 : i32
    return %arg0, %c0_i32, %c0_i32_0, %arg1 : i32, i32, i32, i32
  }
  func.func @transform_1(%arg0: i32, %arg1: i32) -> (i32, i32, i32) {
    %c0_i32 = arith.constant 0 : i32
    %c0_i32_0 = arith.constant 0 : i32
    %c0_i32_1 = arith.constant 0 : i32
    return %c0_i32, %c0_i32_0, %arg1 : i32, i32, i32
  }
  func.func @transform_2(%arg0: i32, %arg1: i32) -> (i32, i32) {
    %c0_i32 = arith.constant 0 : i32
    %c0_i32_0 = arith.constant 0 : i32
    return %c0_i32, %arg1 : i32, i32
  }
  func.func @transform_3(%arg0: i32, %arg1: i32) -> (i32, i32, i32) {
    %c0_i32 = arith.constant 0 : i32
    %c0_i32_0 = arith.constant 0 : i32
    %c0_i32_1 = arith.constant 0 : i32
    return %c0_i32, %c0_i32_0, %arg1 : i32, i32, i32
  }
  func.func @transform_4(%arg0: i32, %arg1: i32) -> (i32, i32) {
    %c0_i32 = arith.constant 0 : i32
    %c0_i32_0 = arith.constant 0 : i32
    return %c0_i32, %arg1 : i32, i32
  }
  func.func @transform_5(%arg0: i32, %arg1: i32) -> (i32, i32, i32, i32) {
    %c0_i32 = arith.constant 0 : i32
    %c0_i32_0 = arith.constant 0 : i32
    %c0_i32_1 = arith.constant 0 : i32
    return %arg0, %c0_i32, %c0_i32_0, %arg1 : i32, i32, i32, i32
  }
}

module attributes {stable_mosaic.version = 11 : i64} {
  func.func @_dw_dilated_kernel(%arg0: i32, %arg1: i32, %arg2: memref<1x10x10x128xbf16, #tpu.memory_space<vmem>>, %arg3: memref<9x1x128xf32, #tpu.memory_space<vmem>>, %arg4: memref<1x128xf32, #tpu.memory_space<vmem>>, %arg5: memref<9x1x128xf32, #tpu.memory_space<vmem>>, %arg6: memref<1x128xf32, #tpu.memory_space<vmem>>, %arg7: memref<1x2x2x128xbf16, #tpu.memory_space<vmem>>) attributes {dimension_semantics = [#tpu.dimension_semantics<parallel>, #tpu.dimension_semantics<parallel>], iteration_bounds = array<i64: 2, 1>, scalar_prefetch = 0 : i64, scratch_operands = 0 : i64, tpu.core_type = #tpu.core_type<tc>, window_params = [{transform_indices = @transform_0, window_bounds = array<i64: 1, 10, 10, 128>}, {transform_indices = @transform_1, window_bounds = array<i64: 9, 1, 128>}, {transform_indices = @transform_2, window_bounds = array<i64: 1, 128>}, {transform_indices = @transform_3, window_bounds = array<i64: 9, 1, 128>}, {transform_indices = @transform_4, window_bounds = array<i64: 1, 128>}, {transform_indices = @transform_5, window_bounds = array<i64: 1, 2, 2, 128>}]} {
    %c0 = arith.constant 0 : index
    %c3 = arith.constant 3 : index
    %c3_0 = arith.constant 3 : index
    %c0_1 = arith.constant 0 : index
    %0 = vector.load %arg2[%c0, %c3, %c3_0, %c0_1] : memref<1x10x10x128xbf16, #tpu.memory_space<vmem>>, vector<1x2x2x128xbf16>
    %1 = arith.extf %0 : vector<1x2x2x128xbf16> to vector<1x2x2x128xf32>
    %c0_2 = arith.constant 0 : index
    %c0_3 = arith.constant 0 : index
    %c0_4 = arith.constant 0 : index
    %2 = vector.load %arg3[%c0_2, %c0_3, %c0_4] : memref<9x1x128xf32, #tpu.memory_space<vmem>>, vector<1x1x128xf32>
    %3 = vector.shape_cast %2 : vector<1x1x128xf32> to vector<1x128xf32>
    %4 = vector.shape_cast %3 : vector<1x128xf32> to vector<1x1x1x128xf32>
    %5 = vector.broadcast %4 : vector<1x1x1x128xf32> to vector<1x2x2x128xf32>
    %6 = arith.mulf %1, %5 : vector<1x2x2x128xf32>
    %c0_5 = arith.constant 0 : index
    %c3_6 = arith.constant 3 : index
    %c4 = arith.constant 4 : index
    %c0_7 = arith.constant 0 : index
    %7 = vector.load %arg2[%c0_5, %c3_6, %c4, %c0_7] : memref<1x10x10x128xbf16, #tpu.memory_space<vmem>>, vector<1x2x2x128xbf16>
    %8 = arith.extf %7 : vector<1x2x2x128xbf16> to vector<1x2x2x128xf32>
    %c1 = arith.constant 1 : index
    %c0_8 = arith.constant 0 : index
    %c0_9 = arith.constant 0 : index
    %9 = vector.load %arg3[%c1, %c0_8, %c0_9] : memref<9x1x128xf32, #tpu.memory_space<vmem>>, vector<1x1x128xf32>
    %10 = vector.shape_cast %9 : vector<1x1x128xf32> to vector<1x128xf32>
    %11 = vector.shape_cast %10 : vector<1x128xf32> to vector<1x1x1x128xf32>
    %12 = vector.broadcast %11 : vector<1x1x1x128xf32> to vector<1x2x2x128xf32>
    %13 = arith.mulf %8, %12 : vector<1x2x2x128xf32>
    %14 = arith.addf %6, %13 : vector<1x2x2x128xf32>
    %c0_10 = arith.constant 0 : index
    %c3_11 = arith.constant 3 : index
    %c5 = arith.constant 5 : index
    %c0_12 = arith.constant 0 : index
    %15 = vector.load %arg2[%c0_10, %c3_11, %c5, %c0_12] : memref<1x10x10x128xbf16, #tpu.memory_space<vmem>>, vector<1x2x2x128xbf16>
    %16 = arith.extf %15 : vector<1x2x2x128xbf16> to vector<1x2x2x128xf32>
    %c2 = arith.constant 2 : index
    %c0_13 = arith.constant 0 : index
    %c0_14 = arith.constant 0 : index
    %17 = vector.load %arg3[%c2, %c0_13, %c0_14] : memref<9x1x128xf32, #tpu.memory_space<vmem>>, vector<1x1x128xf32>
    %18 = vector.shape_cast %17 : vector<1x1x128xf32> to vector<1x128xf32>
    %19 = vector.shape_cast %18 : vector<1x128xf32> to vector<1x1x1x128xf32>
    %20 = vector.broadcast %19 : vector<1x1x1x128xf32> to vector<1x2x2x128xf32>
    %21 = arith.mulf %16, %20 : vector<1x2x2x128xf32>
    %22 = arith.addf %14, %21 : vector<1x2x2x128xf32>
    %c0_15 = arith.constant 0 : index
    %c4_16 = arith.constant 4 : index
    %c3_17 = arith.constant 3 : index
    %c0_18 = arith.constant 0 : index
    %23 = vector.load %arg2[%c0_15, %c4_16, %c3_17, %c0_18] : memref<1x10x10x128xbf16, #tpu.memory_space<vmem>>, vector<1x2x2x128xbf16>
    %24 = arith.extf %23 : vector<1x2x2x128xbf16> to vector<1x2x2x128xf32>
    %c3_19 = arith.constant 3 : index
    %c0_20 = arith.constant 0 : index
    %c0_21 = arith.constant 0 : index
    %25 = vector.load %arg3[%c3_19, %c0_20, %c0_21] : memref<9x1x128xf32, #tpu.memory_space<vmem>>, vector<1x1x128xf32>
    %26 = vector.shape_cast %25 : vector<1x1x128xf32> to vector<1x128xf32>
    %27 = vector.shape_cast %26 : vector<1x128xf32> to vector<1x1x1x128xf32>
    %28 = vector.broadcast %27 : vector<1x1x1x128xf32> to vector<1x2x2x128xf32>
    %29 = arith.mulf %24, %28 : vector<1x2x2x128xf32>
    %30 = arith.addf %22, %29 : vector<1x2x2x128xf32>
    %c0_22 = arith.constant 0 : index
    %c4_23 = arith.constant 4 : index
    %c4_24 = arith.constant 4 : index
    %c0_25 = arith.constant 0 : index
    %31 = vector.load %arg2[%c0_22, %c4_23, %c4_24, %c0_25] : memref<1x10x10x128xbf16, #tpu.memory_space<vmem>>, vector<1x2x2x128xbf16>
    %32 = arith.extf %31 : vector<1x2x2x128xbf16> to vector<1x2x2x128xf32>
    %c4_26 = arith.constant 4 : index
    %c0_27 = arith.constant 0 : index
    %c0_28 = arith.constant 0 : index
    %33 = vector.load %arg3[%c4_26, %c0_27, %c0_28] : memref<9x1x128xf32, #tpu.memory_space<vmem>>, vector<1x1x128xf32>
    %34 = vector.shape_cast %33 : vector<1x1x128xf32> to vector<1x128xf32>
    %35 = vector.shape_cast %34 : vector<1x128xf32> to vector<1x1x1x128xf32>
    %36 = vector.broadcast %35 : vector<1x1x1x128xf32> to vector<1x2x2x128xf32>
    %37 = arith.mulf %32, %36 : vector<1x2x2x128xf32>
    %38 = arith.addf %30, %37 : vector<1x2x2x128xf32>
    %c0_29 = arith.constant 0 : index
    %c4_30 = arith.constant 4 : index
    %c5_31 = arith.constant 5 : index
    %c0_32 = arith.constant 0 : index
    %39 = vector.load %arg2[%c0_29, %c4_30, %c5_31, %c0_32] : memref<1x10x10x128xbf16, #tpu.memory_space<vmem>>, vector<1x2x2x128xbf16>
    %40 = arith.extf %39 : vector<1x2x2x128xbf16> to vector<1x2x2x128xf32>
    %c5_33 = arith.constant 5 : index
    %c0_34 = arith.constant 0 : index
    %c0_35 = arith.constant 0 : index
    %41 = vector.load %arg3[%c5_33, %c0_34, %c0_35] : memref<9x1x128xf32, #tpu.memory_space<vmem>>, vector<1x1x128xf32>
    %42 = vector.shape_cast %41 : vector<1x1x128xf32> to vector<1x128xf32>
    %43 = vector.shape_cast %42 : vector<1x128xf32> to vector<1x1x1x128xf32>
    %44 = vector.broadcast %43 : vector<1x1x1x128xf32> to vector<1x2x2x128xf32>
    %45 = arith.mulf %40, %44 : vector<1x2x2x128xf32>
    %46 = arith.addf %38, %45 : vector<1x2x2x128xf32>
    %c0_36 = arith.constant 0 : index
    %c5_37 = arith.constant 5 : index
    %c3_38 = arith.constant 3 : index
    %c0_39 = arith.constant 0 : index
    %47 = vector.load %arg2[%c0_36, %c5_37, %c3_38, %c0_39] : memref<1x10x10x128xbf16, #tpu.memory_space<vmem>>, vector<1x2x2x128xbf16>
    %48 = arith.extf %47 : vector<1x2x2x128xbf16> to vector<1x2x2x128xf32>
    %c6 = arith.constant 6 : index
    %c0_40 = arith.constant 0 : index
    %c0_41 = arith.constant 0 : index
    %49 = vector.load %arg3[%c6, %c0_40, %c0_41] : memref<9x1x128xf32, #tpu.memory_space<vmem>>, vector<1x1x128xf32>
    %50 = vector.shape_cast %49 : vector<1x1x128xf32> to vector<1x128xf32>
    %51 = vector.shape_cast %50 : vector<1x128xf32> to vector<1x1x1x128xf32>
    %52 = vector.broadcast %51 : vector<1x1x1x128xf32> to vector<1x2x2x128xf32>
    %53 = arith.mulf %48, %52 : vector<1x2x2x128xf32>
    %54 = arith.addf %46, %53 : vector<1x2x2x128xf32>
    %c0_42 = arith.constant 0 : index
    %c5_43 = arith.constant 5 : index
    %c4_44 = arith.constant 4 : index
    %c0_45 = arith.constant 0 : index
    %55 = vector.load %arg2[%c0_42, %c5_43, %c4_44, %c0_45] : memref<1x10x10x128xbf16, #tpu.memory_space<vmem>>, vector<1x2x2x128xbf16>
    %56 = arith.extf %55 : vector<1x2x2x128xbf16> to vector<1x2x2x128xf32>
    %c7 = arith.constant 7 : index
    %c0_46 = arith.constant 0 : index
    %c0_47 = arith.constant 0 : index
    %57 = vector.load %arg3[%c7, %c0_46, %c0_47] : memref<9x1x128xf32, #tpu.memory_space<vmem>>, vector<1x1x128xf32>
    %58 = vector.shape_cast %57 : vector<1x1x128xf32> to vector<1x128xf32>
    %59 = vector.shape_cast %58 : vector<1x128xf32> to vector<1x1x1x128xf32>
    %60 = vector.broadcast %59 : vector<1x1x1x128xf32> to vector<1x2x2x128xf32>
    %61 = arith.mulf %56, %60 : vector<1x2x2x128xf32>
    %62 = arith.addf %54, %61 : vector<1x2x2x128xf32>
    %c0_48 = arith.constant 0 : index
    %c5_49 = arith.constant 5 : index
    %c5_50 = arith.constant 5 : index
    %c0_51 = arith.constant 0 : index
    %63 = vector.load %arg2[%c0_48, %c5_49, %c5_50, %c0_51] : memref<1x10x10x128xbf16, #tpu.memory_space<vmem>>, vector<1x2x2x128xbf16>
    %64 = arith.extf %63 : vector<1x2x2x128xbf16> to vector<1x2x2x128xf32>
    %c8 = arith.constant 8 : index
    %c0_52 = arith.constant 0 : index
    %c0_53 = arith.constant 0 : index
    %65 = vector.load %arg3[%c8, %c0_52, %c0_53] : memref<9x1x128xf32, #tpu.memory_space<vmem>>, vector<1x1x128xf32>
    %66 = vector.shape_cast %65 : vector<1x1x128xf32> to vector<1x128xf32>
    %67 = vector.shape_cast %66 : vector<1x128xf32> to vector<1x1x1x128xf32>
    %68 = vector.broadcast %67 : vector<1x1x1x128xf32> to vector<1x2x2x128xf32>
    %69 = arith.mulf %64, %68 : vector<1x2x2x128xf32>
    %70 = arith.addf %62, %69 : vector<1x2x2x128xf32>
    %c0_54 = arith.constant 0 : index
    %c0_55 = arith.constant 0 : index
    %71 = vector.load %arg4[%c0_54, %c0_55] : memref<1x128xf32, #tpu.memory_space<vmem>>, vector<1x128xf32>
    %72 = vector.shape_cast %71 : vector<1x128xf32> to vector<1x1x1x128xf32>
    %73 = vector.broadcast %72 : vector<1x1x1x128xf32> to vector<1x2x2x128xf32>
    %74 = arith.addf %70, %73 : vector<1x2x2x128xf32>
    %cst = arith.constant 0.000000e+00 : f32
    %75 = vector.broadcast %cst : f32 to vector<1x2x2x128xf32>
    %76 = arith.maximumf %74, %75 : vector<1x2x2x128xf32>
    %c0_56 = arith.constant 0 : index
    %c0_57 = arith.constant 0 : index
    %c0_58 = arith.constant 0 : index
    %c0_59 = arith.constant 0 : index
    %77 = vector.load %arg2[%c0_56, %c0_57, %c0_58, %c0_59] : memref<1x10x10x128xbf16, #tpu.memory_space<vmem>>, vector<1x2x2x128xbf16>
    %78 = arith.extf %77 : vector<1x2x2x128xbf16> to vector<1x2x2x128xf32>
    %c0_60 = arith.constant 0 : index
    %c0_61 = arith.constant 0 : index
    %c0_62 = arith.constant 0 : index
    %79 = vector.load %arg5[%c0_60, %c0_61, %c0_62] : memref<9x1x128xf32, #tpu.memory_space<vmem>>, vector<1x1x128xf32>
    %80 = vector.shape_cast %79 : vector<1x1x128xf32> to vector<1x128xf32>
    %81 = vector.shape_cast %80 : vector<1x128xf32> to vector<1x1x1x128xf32>
    %82 = vector.broadcast %81 : vector<1x1x1x128xf32> to vector<1x2x2x128xf32>
    %83 = arith.mulf %78, %82 : vector<1x2x2x128xf32>
    %c0_63 = arith.constant 0 : index
    %c0_64 = arith.constant 0 : index
    %c4_65 = arith.constant 4 : index
    %c0_66 = arith.constant 0 : index
    %84 = vector.load %arg2[%c0_63, %c0_64, %c4_65, %c0_66] : memref<1x10x10x128xbf16, #tpu.memory_space<vmem>>, vector<1x2x2x128xbf16>
    %85 = arith.extf %84 : vector<1x2x2x128xbf16> to vector<1x2x2x128xf32>
    %c1_67 = arith.constant 1 : index
    %c0_68 = arith.constant 0 : index
    %c0_69 = arith.constant 0 : index
    %86 = vector.load %arg5[%c1_67, %c0_68, %c0_69] : memref<9x1x128xf32, #tpu.memory_space<vmem>>, vector<1x1x128xf32>
    %87 = vector.shape_cast %86 : vector<1x1x128xf32> to vector<1x128xf32>
    %88 = vector.shape_cast %87 : vector<1x128xf32> to vector<1x1x1x128xf32>
    %89 = vector.broadcast %88 : vector<1x1x1x128xf32> to vector<1x2x2x128xf32>
    %90 = arith.mulf %85, %89 : vector<1x2x2x128xf32>
    %91 = arith.addf %83, %90 : vector<1x2x2x128xf32>
    %c0_70 = arith.constant 0 : index
    %c0_71 = arith.constant 0 : index
    %c8_72 = arith.constant 8 : index
    %c0_73 = arith.constant 0 : index
    %92 = vector.load %arg2[%c0_70, %c0_71, %c8_72, %c0_73] : memref<1x10x10x128xbf16, #tpu.memory_space<vmem>>, vector<1x2x2x128xbf16>
    %93 = arith.extf %92 : vector<1x2x2x128xbf16> to vector<1x2x2x128xf32>
    %c2_74 = arith.constant 2 : index
    %c0_75 = arith.constant 0 : index
    %c0_76 = arith.constant 0 : index
    %94 = vector.load %arg5[%c2_74, %c0_75, %c0_76] : memref<9x1x128xf32, #tpu.memory_space<vmem>>, vector<1x1x128xf32>
    %95 = vector.shape_cast %94 : vector<1x1x128xf32> to vector<1x128xf32>
    %96 = vector.shape_cast %95 : vector<1x128xf32> to vector<1x1x1x128xf32>
    %97 = vector.broadcast %96 : vector<1x1x1x128xf32> to vector<1x2x2x128xf32>
    %98 = arith.mulf %93, %97 : vector<1x2x2x128xf32>
    %99 = arith.addf %91, %98 : vector<1x2x2x128xf32>
    %c0_77 = arith.constant 0 : index
    %c4_78 = arith.constant 4 : index
    %c0_79 = arith.constant 0 : index
    %c0_80 = arith.constant 0 : index
    %100 = vector.load %arg2[%c0_77, %c4_78, %c0_79, %c0_80] : memref<1x10x10x128xbf16, #tpu.memory_space<vmem>>, vector<1x2x2x128xbf16>
    %101 = arith.extf %100 : vector<1x2x2x128xbf16> to vector<1x2x2x128xf32>
    %c3_81 = arith.constant 3 : index
    %c0_82 = arith.constant 0 : index
    %c0_83 = arith.constant 0 : index
    %102 = vector.load %arg5[%c3_81, %c0_82, %c0_83] : memref<9x1x128xf32, #tpu.memory_space<vmem>>, vector<1x1x128xf32>
    %103 = vector.shape_cast %102 : vector<1x1x128xf32> to vector<1x128xf32>
    %104 = vector.shape_cast %103 : vector<1x128xf32> to vector<1x1x1x128xf32>
    %105 = vector.broadcast %104 : vector<1x1x1x128xf32> to vector<1x2x2x128xf32>
    %106 = arith.mulf %101, %105 : vector<1x2x2x128xf32>
    %107 = arith.addf %99, %106 : vector<1x2x2x128xf32>
    %c0_84 = arith.constant 0 : index
    %c4_85 = arith.constant 4 : index
    %c4_86 = arith.constant 4 : index
    %c0_87 = arith.constant 0 : index
    %108 = vector.load %arg2[%c0_84, %c4_85, %c4_86, %c0_87] : memref<1x10x10x128xbf16, #tpu.memory_space<vmem>>, vector<1x2x2x128xbf16>
    %109 = arith.extf %108 : vector<1x2x2x128xbf16> to vector<1x2x2x128xf32>
    %c4_88 = arith.constant 4 : index
    %c0_89 = arith.constant 0 : index
    %c0_90 = arith.constant 0 : index
    %110 = vector.load %arg5[%c4_88, %c0_89, %c0_90] : memref<9x1x128xf32, #tpu.memory_space<vmem>>, vector<1x1x128xf32>
    %111 = vector.shape_cast %110 : vector<1x1x128xf32> to vector<1x128xf32>
    %112 = vector.shape_cast %111 : vector<1x128xf32> to vector<1x1x1x128xf32>
    %113 = vector.broadcast %112 : vector<1x1x1x128xf32> to vector<1x2x2x128xf32>
    %114 = arith.mulf %109, %113 : vector<1x2x2x128xf32>
    %115 = arith.addf %107, %114 : vector<1x2x2x128xf32>
    %c0_91 = arith.constant 0 : index
    %c4_92 = arith.constant 4 : index
    %c8_93 = arith.constant 8 : index
    %c0_94 = arith.constant 0 : index
    %116 = vector.load %arg2[%c0_91, %c4_92, %c8_93, %c0_94] : memref<1x10x10x128xbf16, #tpu.memory_space<vmem>>, vector<1x2x2x128xbf16>
    %117 = arith.extf %116 : vector<1x2x2x128xbf16> to vector<1x2x2x128xf32>
    %c5_95 = arith.constant 5 : index
    %c0_96 = arith.constant 0 : index
    %c0_97 = arith.constant 0 : index
    %118 = vector.load %arg5[%c5_95, %c0_96, %c0_97] : memref<9x1x128xf32, #tpu.memory_space<vmem>>, vector<1x1x128xf32>
    %119 = vector.shape_cast %118 : vector<1x1x128xf32> to vector<1x128xf32>
    %120 = vector.shape_cast %119 : vector<1x128xf32> to vector<1x1x1x128xf32>
    %121 = vector.broadcast %120 : vector<1x1x1x128xf32> to vector<1x2x2x128xf32>
    %122 = arith.mulf %117, %121 : vector<1x2x2x128xf32>
    %123 = arith.addf %115, %122 : vector<1x2x2x128xf32>
    %c0_98 = arith.constant 0 : index
    %c8_99 = arith.constant 8 : index
    %c0_100 = arith.constant 0 : index
    %c0_101 = arith.constant 0 : index
    %124 = vector.load %arg2[%c0_98, %c8_99, %c0_100, %c0_101] : memref<1x10x10x128xbf16, #tpu.memory_space<vmem>>, vector<1x2x2x128xbf16>
    %125 = arith.extf %124 : vector<1x2x2x128xbf16> to vector<1x2x2x128xf32>
    %c6_102 = arith.constant 6 : index
    %c0_103 = arith.constant 0 : index
    %c0_104 = arith.constant 0 : index
    %126 = vector.load %arg5[%c6_102, %c0_103, %c0_104] : memref<9x1x128xf32, #tpu.memory_space<vmem>>, vector<1x1x128xf32>
    %127 = vector.shape_cast %126 : vector<1x1x128xf32> to vector<1x128xf32>
    %128 = vector.shape_cast %127 : vector<1x128xf32> to vector<1x1x1x128xf32>
    %129 = vector.broadcast %128 : vector<1x1x1x128xf32> to vector<1x2x2x128xf32>
    %130 = arith.mulf %125, %129 : vector<1x2x2x128xf32>
    %131 = arith.addf %123, %130 : vector<1x2x2x128xf32>
    %c0_105 = arith.constant 0 : index
    %c8_106 = arith.constant 8 : index
    %c4_107 = arith.constant 4 : index
    %c0_108 = arith.constant 0 : index
    %132 = vector.load %arg2[%c0_105, %c8_106, %c4_107, %c0_108] : memref<1x10x10x128xbf16, #tpu.memory_space<vmem>>, vector<1x2x2x128xbf16>
    %133 = arith.extf %132 : vector<1x2x2x128xbf16> to vector<1x2x2x128xf32>
    %c7_109 = arith.constant 7 : index
    %c0_110 = arith.constant 0 : index
    %c0_111 = arith.constant 0 : index
    %134 = vector.load %arg5[%c7_109, %c0_110, %c0_111] : memref<9x1x128xf32, #tpu.memory_space<vmem>>, vector<1x1x128xf32>
    %135 = vector.shape_cast %134 : vector<1x1x128xf32> to vector<1x128xf32>
    %136 = vector.shape_cast %135 : vector<1x128xf32> to vector<1x1x1x128xf32>
    %137 = vector.broadcast %136 : vector<1x1x1x128xf32> to vector<1x2x2x128xf32>
    %138 = arith.mulf %133, %137 : vector<1x2x2x128xf32>
    %139 = arith.addf %131, %138 : vector<1x2x2x128xf32>
    %c0_112 = arith.constant 0 : index
    %c8_113 = arith.constant 8 : index
    %c8_114 = arith.constant 8 : index
    %c0_115 = arith.constant 0 : index
    %140 = vector.load %arg2[%c0_112, %c8_113, %c8_114, %c0_115] : memref<1x10x10x128xbf16, #tpu.memory_space<vmem>>, vector<1x2x2x128xbf16>
    %141 = arith.extf %140 : vector<1x2x2x128xbf16> to vector<1x2x2x128xf32>
    %c8_116 = arith.constant 8 : index
    %c0_117 = arith.constant 0 : index
    %c0_118 = arith.constant 0 : index
    %142 = vector.load %arg5[%c8_116, %c0_117, %c0_118] : memref<9x1x128xf32, #tpu.memory_space<vmem>>, vector<1x1x128xf32>
    %143 = vector.shape_cast %142 : vector<1x1x128xf32> to vector<1x128xf32>
    %144 = vector.shape_cast %143 : vector<1x128xf32> to vector<1x1x1x128xf32>
    %145 = vector.broadcast %144 : vector<1x1x1x128xf32> to vector<1x2x2x128xf32>
    %146 = arith.mulf %141, %145 : vector<1x2x2x128xf32>
    %147 = arith.addf %139, %146 : vector<1x2x2x128xf32>
    %c0_119 = arith.constant 0 : index
    %c0_120 = arith.constant 0 : index
    %148 = vector.load %arg6[%c0_119, %c0_120] : memref<1x128xf32, #tpu.memory_space<vmem>>, vector<1x128xf32>
    %149 = vector.shape_cast %148 : vector<1x128xf32> to vector<1x1x1x128xf32>
    %150 = vector.broadcast %149 : vector<1x1x1x128xf32> to vector<1x2x2x128xf32>
    %151 = arith.addf %147, %150 : vector<1x2x2x128xf32>
    %cst_121 = arith.constant 0.000000e+00 : f32
    %152 = vector.broadcast %cst_121 : f32 to vector<1x2x2x128xf32>
    %153 = arith.maximumf %151, %152 : vector<1x2x2x128xf32>
    %154 = arith.addf %76, %153 : vector<1x2x2x128xf32>
    %155 = arith.truncf %154 : vector<1x2x2x128xf32> to vector<1x2x2x128xbf16>
    %c0_122 = arith.constant 0 : index
    %c0_123 = arith.constant 0 : index
    %c0_124 = arith.constant 0 : index
    %c0_125 = arith.constant 0 : index
    %156 = vector.load %arg7[%c0_122, %c0_123, %c0_124, %c0_125] : memref<1x2x2x128xbf16, #tpu.memory_space<vmem>>, vector<1x2x2x128xbf16>
    tpu.vector_store %arg7[%c0_122, %c0_123, %c0_124, %c0_125], %155 {strides = array<i32>} : memref<1x2x2x128xbf16, #tpu.memory_space<vmem>>, vector<1x2x2x128xbf16>,
    return
  }
  func.func @transform_0(%arg0: i32, %arg1: i32) -> (i32, i32, i32, i32) {
    %c0_i32 = arith.constant 0 : i32
    %c0_i32_0 = arith.constant 0 : i32
    %c0_i32_1 = arith.constant 0 : i32
    return %arg0, %c0_i32, %c0_i32_0, %arg1 : i32, i32, i32, i32
  }
  func.func @transform_1(%arg0: i32, %arg1: i32) -> (i32, i32, i32) {
    %c0_i32 = arith.constant 0 : i32
    %c0_i32_0 = arith.constant 0 : i32
    %c0_i32_1 = arith.constant 0 : i32
    return %c0_i32, %c0_i32_0, %arg1 : i32, i32, i32
  }
  func.func @transform_2(%arg0: i32, %arg1: i32) -> (i32, i32) {
    %c0_i32 = arith.constant 0 : i32
    %c0_i32_0 = arith.constant 0 : i32
    return %c0_i32, %arg1 : i32, i32
  }
  func.func @transform_3(%arg0: i32, %arg1: i32) -> (i32, i32, i32) {
    %c0_i32 = arith.constant 0 : i32
    %c0_i32_0 = arith.constant 0 : i32
    %c0_i32_1 = arith.constant 0 : i32
    return %c0_i32, %c0_i32_0, %arg1 : i32, i32, i32
  }
  func.func @transform_4(%arg0: i32, %arg1: i32) -> (i32, i32) {
    %c0_i32 = arith.constant 0 : i32
    %c0_i32_0 = arith.constant 0 : i32
    return %c0_i32, %arg1 : i32, i32
  }
  func.func @transform_5(%arg0: i32, %arg1: i32) -> (i32, i32, i32, i32) {
    %c0_i32 = arith.constant 0 : i32
    %c0_i32_0 = arith.constant 0 : i32
    %c0_i32_1 = arith.constant 0 : i32
    return %arg0, %c0_i32, %c0_i32_0, %arg1 : i32, i32, i32, i32
  }
}

module attributes {stable_mosaic.version = 11 : i64} {
  func.func @_dw_dilated_kernel(%arg0: i32, %arg1: i32, %arg2: memref<1x18x18x128xbf16, #tpu.memory_space<vmem>>, %arg3: memref<9x1x128xf32, #tpu.memory_space<vmem>>, %arg4: memref<1x128xf32, #tpu.memory_space<vmem>>, %arg5: memref<9x1x128xf32, #tpu.memory_space<vmem>>, %arg6: memref<1x128xf32, #tpu.memory_space<vmem>>, %arg7: memref<1x2x2x128xbf16, #tpu.memory_space<vmem>>) attributes {dimension_semantics = [#tpu.dimension_semantics<parallel>, #tpu.dimension_semantics<parallel>], iteration_bounds = array<i64: 2, 1>, scalar_prefetch = 0 : i64, scratch_operands = 0 : i64, tpu.core_type = #tpu.core_type<tc>, window_params = [{transform_indices = @transform_0, window_bounds = array<i64: 1, 18, 18, 128>}, {transform_indices = @transform_1, window_bounds = array<i64: 9, 1, 128>}, {transform_indices = @transform_2, window_bounds = array<i64: 1, 128>}, {transform_indices = @transform_3, window_bounds = array<i64: 9, 1, 128>}, {transform_indices = @transform_4, window_bounds = array<i64: 1, 128>}, {transform_indices = @transform_5, window_bounds = array<i64: 1, 2, 2, 128>}]} {
    %c0 = arith.constant 0 : index
    %c7 = arith.constant 7 : index
    %c7_0 = arith.constant 7 : index
    %c0_1 = arith.constant 0 : index
    %0 = vector.load %arg2[%c0, %c7, %c7_0, %c0_1] : memref<1x18x18x128xbf16, #tpu.memory_space<vmem>>, vector<1x2x2x128xbf16>
    %1 = arith.extf %0 : vector<1x2x2x128xbf16> to vector<1x2x2x128xf32>
    %c0_2 = arith.constant 0 : index
    %c0_3 = arith.constant 0 : index
    %c0_4 = arith.constant 0 : index
    %2 = vector.load %arg3[%c0_2, %c0_3, %c0_4] : memref<9x1x128xf32, #tpu.memory_space<vmem>>, vector<1x1x128xf32>
    %3 = vector.shape_cast %2 : vector<1x1x128xf32> to vector<1x128xf32>
    %4 = vector.shape_cast %3 : vector<1x128xf32> to vector<1x1x1x128xf32>
    %5 = vector.broadcast %4 : vector<1x1x1x128xf32> to vector<1x2x2x128xf32>
    %6 = arith.mulf %1, %5 : vector<1x2x2x128xf32>
    %c0_5 = arith.constant 0 : index
    %c7_6 = arith.constant 7 : index
    %c8 = arith.constant 8 : index
    %c0_7 = arith.constant 0 : index
    %7 = vector.load %arg2[%c0_5, %c7_6, %c8, %c0_7] : memref<1x18x18x128xbf16, #tpu.memory_space<vmem>>, vector<1x2x2x128xbf16>
    %8 = arith.extf %7 : vector<1x2x2x128xbf16> to vector<1x2x2x128xf32>
    %c1 = arith.constant 1 : index
    %c0_8 = arith.constant 0 : index
    %c0_9 = arith.constant 0 : index
    %9 = vector.load %arg3[%c1, %c0_8, %c0_9] : memref<9x1x128xf32, #tpu.memory_space<vmem>>, vector<1x1x128xf32>
    %10 = vector.shape_cast %9 : vector<1x1x128xf32> to vector<1x128xf32>
    %11 = vector.shape_cast %10 : vector<1x128xf32> to vector<1x1x1x128xf32>
    %12 = vector.broadcast %11 : vector<1x1x1x128xf32> to vector<1x2x2x128xf32>
    %13 = arith.mulf %8, %12 : vector<1x2x2x128xf32>
    %14 = arith.addf %6, %13 : vector<1x2x2x128xf32>
    %c0_10 = arith.constant 0 : index
    %c7_11 = arith.constant 7 : index
    %c9 = arith.constant 9 : index
    %c0_12 = arith.constant 0 : index
    %15 = vector.load %arg2[%c0_10, %c7_11, %c9, %c0_12] : memref<1x18x18x128xbf16, #tpu.memory_space<vmem>>, vector<1x2x2x128xbf16>
    %16 = arith.extf %15 : vector<1x2x2x128xbf16> to vector<1x2x2x128xf32>
    %c2 = arith.constant 2 : index
    %c0_13 = arith.constant 0 : index
    %c0_14 = arith.constant 0 : index
    %17 = vector.load %arg3[%c2, %c0_13, %c0_14] : memref<9x1x128xf32, #tpu.memory_space<vmem>>, vector<1x1x128xf32>
    %18 = vector.shape_cast %17 : vector<1x1x128xf32> to vector<1x128xf32>
    %19 = vector.shape_cast %18 : vector<1x128xf32> to vector<1x1x1x128xf32>
    %20 = vector.broadcast %19 : vector<1x1x1x128xf32> to vector<1x2x2x128xf32>
    %21 = arith.mulf %16, %20 : vector<1x2x2x128xf32>
    %22 = arith.addf %14, %21 : vector<1x2x2x128xf32>
    %c0_15 = arith.constant 0 : index
    %c8_16 = arith.constant 8 : index
    %c7_17 = arith.constant 7 : index
    %c0_18 = arith.constant 0 : index
    %23 = vector.load %arg2[%c0_15, %c8_16, %c7_17, %c0_18] : memref<1x18x18x128xbf16, #tpu.memory_space<vmem>>, vector<1x2x2x128xbf16>
    %24 = arith.extf %23 : vector<1x2x2x128xbf16> to vector<1x2x2x128xf32>
    %c3 = arith.constant 3 : index
    %c0_19 = arith.constant 0 : index
    %c0_20 = arith.constant 0 : index
    %25 = vector.load %arg3[%c3, %c0_19, %c0_20] : memref<9x1x128xf32, #tpu.memory_space<vmem>>, vector<1x1x128xf32>
    %26 = vector.shape_cast %25 : vector<1x1x128xf32> to vector<1x128xf32>
    %27 = vector.shape_cast %26 : vector<1x128xf32> to vector<1x1x1x128xf32>
    %28 = vector.broadcast %27 : vector<1x1x1x128xf32> to vector<1x2x2x128xf32>
    %29 = arith.mulf %24, %28 : vector<1x2x2x128xf32>
    %30 = arith.addf %22, %29 : vector<1x2x2x128xf32>
    %c0_21 = arith.constant 0 : index
    %c8_22 = arith.constant 8 : index
    %c8_23 = arith.constant 8 : index
    %c0_24 = arith.constant 0 : index
    %31 = vector.load %arg2[%c0_21, %c8_22, %c8_23, %c0_24] : memref<1x18x18x128xbf16, #tpu.memory_space<vmem>>, vector<1x2x2x128xbf16>
    %32 = arith.extf %31 : vector<1x2x2x128xbf16> to vector<1x2x2x128xf32>
    %c4 = arith.constant 4 : index
    %c0_25 = arith.constant 0 : index
    %c0_26 = arith.constant 0 : index
    %33 = vector.load %arg3[%c4, %c0_25, %c0_26] : memref<9x1x128xf32, #tpu.memory_space<vmem>>, vector<1x1x128xf32>
    %34 = vector.shape_cast %33 : vector<1x1x128xf32> to vector<1x128xf32>
    %35 = vector.shape_cast %34 : vector<1x128xf32> to vector<1x1x1x128xf32>
    %36 = vector.broadcast %35 : vector<1x1x1x128xf32> to vector<1x2x2x128xf32>
    %37 = arith.mulf %32, %36 : vector<1x2x2x128xf32>
    %38 = arith.addf %30, %37 : vector<1x2x2x128xf32>
    %c0_27 = arith.constant 0 : index
    %c8_28 = arith.constant 8 : index
    %c9_29 = arith.constant 9 : index
    %c0_30 = arith.constant 0 : index
    %39 = vector.load %arg2[%c0_27, %c8_28, %c9_29, %c0_30] : memref<1x18x18x128xbf16, #tpu.memory_space<vmem>>, vector<1x2x2x128xbf16>
    %40 = arith.extf %39 : vector<1x2x2x128xbf16> to vector<1x2x2x128xf32>
    %c5 = arith.constant 5 : index
    %c0_31 = arith.constant 0 : index
    %c0_32 = arith.constant 0 : index
    %41 = vector.load %arg3[%c5, %c0_31, %c0_32] : memref<9x1x128xf32, #tpu.memory_space<vmem>>, vector<1x1x128xf32>
    %42 = vector.shape_cast %41 : vector<1x1x128xf32> to vector<1x128xf32>
    %43 = vector.shape_cast %42 : vector<1x128xf32> to vector<1x1x1x128xf32>
    %44 = vector.broadcast %43 : vector<1x1x1x128xf32> to vector<1x2x2x128xf32>
    %45 = arith.mulf %40, %44 : vector<1x2x2x128xf32>
    %46 = arith.addf %38, %45 : vector<1x2x2x128xf32>
    %c0_33 = arith.constant 0 : index
    %c9_34 = arith.constant 9 : index
    %c7_35 = arith.constant 7 : index
    %c0_36 = arith.constant 0 : index
    %47 = vector.load %arg2[%c0_33, %c9_34, %c7_35, %c0_36] : memref<1x18x18x128xbf16, #tpu.memory_space<vmem>>, vector<1x2x2x128xbf16>
    %48 = arith.extf %47 : vector<1x2x2x128xbf16> to vector<1x2x2x128xf32>
    %c6 = arith.constant 6 : index
    %c0_37 = arith.constant 0 : index
    %c0_38 = arith.constant 0 : index
    %49 = vector.load %arg3[%c6, %c0_37, %c0_38] : memref<9x1x128xf32, #tpu.memory_space<vmem>>, vector<1x1x128xf32>
    %50 = vector.shape_cast %49 : vector<1x1x128xf32> to vector<1x128xf32>
    %51 = vector.shape_cast %50 : vector<1x128xf32> to vector<1x1x1x128xf32>
    %52 = vector.broadcast %51 : vector<1x1x1x128xf32> to vector<1x2x2x128xf32>
    %53 = arith.mulf %48, %52 : vector<1x2x2x128xf32>
    %54 = arith.addf %46, %53 : vector<1x2x2x128xf32>
    %c0_39 = arith.constant 0 : index
    %c9_40 = arith.constant 9 : index
    %c8_41 = arith.constant 8 : index
    %c0_42 = arith.constant 0 : index
    %55 = vector.load %arg2[%c0_39, %c9_40, %c8_41, %c0_42] : memref<1x18x18x128xbf16, #tpu.memory_space<vmem>>, vector<1x2x2x128xbf16>
    %56 = arith.extf %55 : vector<1x2x2x128xbf16> to vector<1x2x2x128xf32>
    %c7_43 = arith.constant 7 : index
    %c0_44 = arith.constant 0 : index
    %c0_45 = arith.constant 0 : index
    %57 = vector.load %arg3[%c7_43, %c0_44, %c0_45] : memref<9x1x128xf32, #tpu.memory_space<vmem>>, vector<1x1x128xf32>
    %58 = vector.shape_cast %57 : vector<1x1x128xf32> to vector<1x128xf32>
    %59 = vector.shape_cast %58 : vector<1x128xf32> to vector<1x1x1x128xf32>
    %60 = vector.broadcast %59 : vector<1x1x1x128xf32> to vector<1x2x2x128xf32>
    %61 = arith.mulf %56, %60 : vector<1x2x2x128xf32>
    %62 = arith.addf %54, %61 : vector<1x2x2x128xf32>
    %c0_46 = arith.constant 0 : index
    %c9_47 = arith.constant 9 : index
    %c9_48 = arith.constant 9 : index
    %c0_49 = arith.constant 0 : index
    %63 = vector.load %arg2[%c0_46, %c9_47, %c9_48, %c0_49] : memref<1x18x18x128xbf16, #tpu.memory_space<vmem>>, vector<1x2x2x128xbf16>
    %64 = arith.extf %63 : vector<1x2x2x128xbf16> to vector<1x2x2x128xf32>
    %c8_50 = arith.constant 8 : index
    %c0_51 = arith.constant 0 : index
    %c0_52 = arith.constant 0 : index
    %65 = vector.load %arg3[%c8_50, %c0_51, %c0_52] : memref<9x1x128xf32, #tpu.memory_space<vmem>>, vector<1x1x128xf32>
    %66 = vector.shape_cast %65 : vector<1x1x128xf32> to vector<1x128xf32>
    %67 = vector.shape_cast %66 : vector<1x128xf32> to vector<1x1x1x128xf32>
    %68 = vector.broadcast %67 : vector<1x1x1x128xf32> to vector<1x2x2x128xf32>
    %69 = arith.mulf %64, %68 : vector<1x2x2x128xf32>
    %70 = arith.addf %62, %69 : vector<1x2x2x128xf32>
    %c0_53 = arith.constant 0 : index
    %c0_54 = arith.constant 0 : index
    %71 = vector.load %arg4[%c0_53, %c0_54] : memref<1x128xf32, #tpu.memory_space<vmem>>, vector<1x128xf32>
    %72 = vector.shape_cast %71 : vector<1x128xf32> to vector<1x1x1x128xf32>
    %73 = vector.broadcast %72 : vector<1x1x1x128xf32> to vector<1x2x2x128xf32>
    %74 = arith.addf %70, %73 : vector<1x2x2x128xf32>
    %cst = arith.constant 0.000000e+00 : f32
    %75 = vector.broadcast %cst : f32 to vector<1x2x2x128xf32>
    %76 = arith.maximumf %74, %75 : vector<1x2x2x128xf32>
    %c0_55 = arith.constant 0 : index
    %c0_56 = arith.constant 0 : index
    %c0_57 = arith.constant 0 : index
    %c0_58 = arith.constant 0 : index
    %77 = vector.load %arg2[%c0_55, %c0_56, %c0_57, %c0_58] : memref<1x18x18x128xbf16, #tpu.memory_space<vmem>>, vector<1x2x2x128xbf16>
    %78 = arith.extf %77 : vector<1x2x2x128xbf16> to vector<1x2x2x128xf32>
    %c0_59 = arith.constant 0 : index
    %c0_60 = arith.constant 0 : index
    %c0_61 = arith.constant 0 : index
    %79 = vector.load %arg5[%c0_59, %c0_60, %c0_61] : memref<9x1x128xf32, #tpu.memory_space<vmem>>, vector<1x1x128xf32>
    %80 = vector.shape_cast %79 : vector<1x1x128xf32> to vector<1x128xf32>
    %81 = vector.shape_cast %80 : vector<1x128xf32> to vector<1x1x1x128xf32>
    %82 = vector.broadcast %81 : vector<1x1x1x128xf32> to vector<1x2x2x128xf32>
    %83 = arith.mulf %78, %82 : vector<1x2x2x128xf32>
    %c0_62 = arith.constant 0 : index
    %c0_63 = arith.constant 0 : index
    %c8_64 = arith.constant 8 : index
    %c0_65 = arith.constant 0 : index
    %84 = vector.load %arg2[%c0_62, %c0_63, %c8_64, %c0_65] : memref<1x18x18x128xbf16, #tpu.memory_space<vmem>>, vector<1x2x2x128xbf16>
    %85 = arith.extf %84 : vector<1x2x2x128xbf16> to vector<1x2x2x128xf32>
    %c1_66 = arith.constant 1 : index
    %c0_67 = arith.constant 0 : index
    %c0_68 = arith.constant 0 : index
    %86 = vector.load %arg5[%c1_66, %c0_67, %c0_68] : memref<9x1x128xf32, #tpu.memory_space<vmem>>, vector<1x1x128xf32>
    %87 = vector.shape_cast %86 : vector<1x1x128xf32> to vector<1x128xf32>
    %88 = vector.shape_cast %87 : vector<1x128xf32> to vector<1x1x1x128xf32>
    %89 = vector.broadcast %88 : vector<1x1x1x128xf32> to vector<1x2x2x128xf32>
    %90 = arith.mulf %85, %89 : vector<1x2x2x128xf32>
    %91 = arith.addf %83, %90 : vector<1x2x2x128xf32>
    %c0_69 = arith.constant 0 : index
    %c0_70 = arith.constant 0 : index
    %c16 = arith.constant 16 : index
    %c0_71 = arith.constant 0 : index
    %92 = vector.load %arg2[%c0_69, %c0_70, %c16, %c0_71] : memref<1x18x18x128xbf16, #tpu.memory_space<vmem>>, vector<1x2x2x128xbf16>
    %93 = arith.extf %92 : vector<1x2x2x128xbf16> to vector<1x2x2x128xf32>
    %c2_72 = arith.constant 2 : index
    %c0_73 = arith.constant 0 : index
    %c0_74 = arith.constant 0 : index
    %94 = vector.load %arg5[%c2_72, %c0_73, %c0_74] : memref<9x1x128xf32, #tpu.memory_space<vmem>>, vector<1x1x128xf32>
    %95 = vector.shape_cast %94 : vector<1x1x128xf32> to vector<1x128xf32>
    %96 = vector.shape_cast %95 : vector<1x128xf32> to vector<1x1x1x128xf32>
    %97 = vector.broadcast %96 : vector<1x1x1x128xf32> to vector<1x2x2x128xf32>
    %98 = arith.mulf %93, %97 : vector<1x2x2x128xf32>
    %99 = arith.addf %91, %98 : vector<1x2x2x128xf32>
    %c0_75 = arith.constant 0 : index
    %c8_76 = arith.constant 8 : index
    %c0_77 = arith.constant 0 : index
    %c0_78 = arith.constant 0 : index
    %100 = vector.load %arg2[%c0_75, %c8_76, %c0_77, %c0_78] : memref<1x18x18x128xbf16, #tpu.memory_space<vmem>>, vector<1x2x2x128xbf16>
    %101 = arith.extf %100 : vector<1x2x2x128xbf16> to vector<1x2x2x128xf32>
    %c3_79 = arith.constant 3 : index
    %c0_80 = arith.constant 0 : index
    %c0_81 = arith.constant 0 : index
    %102 = vector.load %arg5[%c3_79, %c0_80, %c0_81] : memref<9x1x128xf32, #tpu.memory_space<vmem>>, vector<1x1x128xf32>
    %103 = vector.shape_cast %102 : vector<1x1x128xf32> to vector<1x128xf32>
    %104 = vector.shape_cast %103 : vector<1x128xf32> to vector<1x1x1x128xf32>
    %105 = vector.broadcast %104 : vector<1x1x1x128xf32> to vector<1x2x2x128xf32>
    %106 = arith.mulf %101, %105 : vector<1x2x2x128xf32>
    %107 = arith.addf %99, %106 : vector<1x2x2x128xf32>
    %c0_82 = arith.constant 0 : index
    %c8_83 = arith.constant 8 : index
    %c8_84 = arith.constant 8 : index
    %c0_85 = arith.constant 0 : index
    %108 = vector.load %arg2[%c0_82, %c8_83, %c8_84, %c0_85] : memref<1x18x18x128xbf16, #tpu.memory_space<vmem>>, vector<1x2x2x128xbf16>
    %109 = arith.extf %108 : vector<1x2x2x128xbf16> to vector<1x2x2x128xf32>
    %c4_86 = arith.constant 4 : index
    %c0_87 = arith.constant 0 : index
    %c0_88 = arith.constant 0 : index
    %110 = vector.load %arg5[%c4_86, %c0_87, %c0_88] : memref<9x1x128xf32, #tpu.memory_space<vmem>>, vector<1x1x128xf32>
    %111 = vector.shape_cast %110 : vector<1x1x128xf32> to vector<1x128xf32>
    %112 = vector.shape_cast %111 : vector<1x128xf32> to vector<1x1x1x128xf32>
    %113 = vector.broadcast %112 : vector<1x1x1x128xf32> to vector<1x2x2x128xf32>
    %114 = arith.mulf %109, %113 : vector<1x2x2x128xf32>
    %115 = arith.addf %107, %114 : vector<1x2x2x128xf32>
    %c0_89 = arith.constant 0 : index
    %c8_90 = arith.constant 8 : index
    %c16_91 = arith.constant 16 : index
    %c0_92 = arith.constant 0 : index
    %116 = vector.load %arg2[%c0_89, %c8_90, %c16_91, %c0_92] : memref<1x18x18x128xbf16, #tpu.memory_space<vmem>>, vector<1x2x2x128xbf16>
    %117 = arith.extf %116 : vector<1x2x2x128xbf16> to vector<1x2x2x128xf32>
    %c5_93 = arith.constant 5 : index
    %c0_94 = arith.constant 0 : index
    %c0_95 = arith.constant 0 : index
    %118 = vector.load %arg5[%c5_93, %c0_94, %c0_95] : memref<9x1x128xf32, #tpu.memory_space<vmem>>, vector<1x1x128xf32>
    %119 = vector.shape_cast %118 : vector<1x1x128xf32> to vector<1x128xf32>
    %120 = vector.shape_cast %119 : vector<1x128xf32> to vector<1x1x1x128xf32>
    %121 = vector.broadcast %120 : vector<1x1x1x128xf32> to vector<1x2x2x128xf32>
    %122 = arith.mulf %117, %121 : vector<1x2x2x128xf32>
    %123 = arith.addf %115, %122 : vector<1x2x2x128xf32>
    %c0_96 = arith.constant 0 : index
    %c16_97 = arith.constant 16 : index
    %c0_98 = arith.constant 0 : index
    %c0_99 = arith.constant 0 : index
    %124 = vector.load %arg2[%c0_96, %c16_97, %c0_98, %c0_99] : memref<1x18x18x128xbf16, #tpu.memory_space<vmem>>, vector<1x2x2x128xbf16>
    %125 = arith.extf %124 : vector<1x2x2x128xbf16> to vector<1x2x2x128xf32>
    %c6_100 = arith.constant 6 : index
    %c0_101 = arith.constant 0 : index
    %c0_102 = arith.constant 0 : index
    %126 = vector.load %arg5[%c6_100, %c0_101, %c0_102] : memref<9x1x128xf32, #tpu.memory_space<vmem>>, vector<1x1x128xf32>
    %127 = vector.shape_cast %126 : vector<1x1x128xf32> to vector<1x128xf32>
    %128 = vector.shape_cast %127 : vector<1x128xf32> to vector<1x1x1x128xf32>
    %129 = vector.broadcast %128 : vector<1x1x1x128xf32> to vector<1x2x2x128xf32>
    %130 = arith.mulf %125, %129 : vector<1x2x2x128xf32>
    %131 = arith.addf %123, %130 : vector<1x2x2x128xf32>
    %c0_103 = arith.constant 0 : index
    %c16_104 = arith.constant 16 : index
    %c8_105 = arith.constant 8 : index
    %c0_106 = arith.constant 0 : index
    %132 = vector.load %arg2[%c0_103, %c16_104, %c8_105, %c0_106] : memref<1x18x18x128xbf16, #tpu.memory_space<vmem>>, vector<1x2x2x128xbf16>
    %133 = arith.extf %132 : vector<1x2x2x128xbf16> to vector<1x2x2x128xf32>
    %c7_107 = arith.constant 7 : index
    %c0_108 = arith.constant 0 : index
    %c0_109 = arith.constant 0 : index
    %134 = vector.load %arg5[%c7_107, %c0_108, %c0_109] : memref<9x1x128xf32, #tpu.memory_space<vmem>>, vector<1x1x128xf32>
    %135 = vector.shape_cast %134 : vector<1x1x128xf32> to vector<1x128xf32>
    %136 = vector.shape_cast %135 : vector<1x128xf32> to vector<1x1x1x128xf32>
    %137 = vector.broadcast %136 : vector<1x1x1x128xf32> to vector<1x2x2x128xf32>
    %138 = arith.mulf %133, %137 : vector<1x2x2x128xf32>
    %139 = arith.addf %131, %138 : vector<1x2x2x128xf32>
    %c0_110 = arith.constant 0 : index
    %c16_111 = arith.constant 16 : index
    %c16_112 = arith.constant 16 : index
    %c0_113 = arith.constant 0 : index
    %140 = vector.load %arg2[%c0_110, %c16_111, %c16_112, %c0_113] : memref<1x18x18x128xbf16, #tpu.memory_space<vmem>>, vector<1x2x2x128xbf16>
    %141 = arith.extf %140 : vector<1x2x2x128xbf16> to vector<1x2x2x128xf32>
    %c8_114 = arith.constant 8 : index
    %c0_115 = arith.constant 0 : index
    %c0_116 = arith.constant 0 : index
    %142 = vector.load %arg5[%c8_114, %c0_115, %c0_116] : memref<9x1x128xf32, #tpu.memory_space<vmem>>, vector<1x1x128xf32>
    %143 = vector.shape_cast %142 : vector<1x1x128xf32> to vector<1x128xf32>
    %144 = vector.shape_cast %143 : vector<1x128xf32> to vector<1x1x1x128xf32>
    %145 = vector.broadcast %144 : vector<1x1x1x128xf32> to vector<1x2x2x128xf32>
    %146 = arith.mulf %141, %145 : vector<1x2x2x128xf32>
    %147 = arith.addf %139, %146 : vector<1x2x2x128xf32>
    %c0_117 = arith.constant 0 : index
    %c0_118 = arith.constant 0 : index
    %148 = vector.load %arg6[%c0_117, %c0_118] : memref<1x128xf32, #tpu.memory_space<vmem>>, vector<1x128xf32>
    %149 = vector.shape_cast %148 : vector<1x128xf32> to vector<1x1x1x128xf32>
    %150 = vector.broadcast %149 : vector<1x1x1x128xf32> to vector<1x2x2x128xf32>
    %151 = arith.addf %147, %150 : vector<1x2x2x128xf32>
    %cst_119 = arith.constant 0.000000e+00 : f32
    %152 = vector.broadcast %cst_119 : f32 to vector<1x2x2x128xf32>
    %153 = arith.maximumf %151, %152 : vector<1x2x2x128xf32>
    %154 = arith.addf %76, %153 : vector<1x2x2x128xf32>
    %155 = arith.truncf %154 : vector<1x2x2x128xf32> to vector<1x2x2x128xbf16>
    %c0_120 = arith.constant 0 : index
    %c0_121 = arith.constant 0 : index
    %c0_122 = arith.constant 0 : index
    %c0_123 = arith.constant 0 : index
    %156 = vector.load %arg7[%c0_120, %c0_121, %c0_122, %c0_123] : memref<1x2x2x128xbf16, #tpu.memory_space<vmem>>, vector<1x2x2x128xbf16>
    tpu.vector_store %arg7[%c0_120, %c0_121, %c0_122, %c0_123], %155 {strides = array<i32>} : memref<1x2x2x128xbf16, #tpu.memory_space<vmem>>, vector<1x2x2x128xbf16>,
    return
  }
  func.func @transform_0(%arg0: i32, %arg1: i32) -> (i32, i32, i32, i32) {
    %c0_i32 = arith.constant 0 : i32
    %c0_i32_0 = arith.constant 0 : i32
    %c0_i32_1 = arith.constant 0 : i32
    return %arg0, %c0_i32, %c0_i32_0, %arg1 : i32, i32, i32, i32
  }
  func.func @transform_1(%arg0: i32, %arg1: i32) -> (i32, i32, i32) {
    %c0_i32 = arith.constant 0 : i32
    %c0_i32_0 = arith.constant 0 : i32
    %c0_i32_1 = arith.constant 0 : i32
    return %c0_i32, %c0_i32_0, %arg1 : i32, i32, i32
  }
  func.func @transform_2(%arg0: i32, %arg1: i32) -> (i32, i32) {
    %c0_i32 = arith.constant 0 : i32
    %c0_i32_0 = arith.constant 0 : i32
    return %c0_i32, %arg1 : i32, i32
  }
  func.func @transform_3(%arg0: i32, %arg1: i32) -> (i32, i32, i32) {
    %c0_i32 = arith.constant 0 : i32
    %c0_i32_0 = arith.constant 0 : i32
    %c0_i32_1 = arith.constant 0 : i32
    return %c0_i32, %c0_i32_0, %arg1 : i32, i32, i32
  }
  func.func @transform_4(%arg0: i32, %arg1: i32) -> (i32, i32) {
    %c0_i32 = arith.constant 0 : i32
    %c0_i32_0 = arith.constant 0 : i32
    return %c0_i32, %arg1 : i32, i32
  }
  func.func @transform_5(%arg0: i32, %arg1: i32) -> (i32, i32, i32, i32) {
    %c0_i32 = arith.constant 0 : i32
    %c0_i32_0 = arith.constant 0 : i32
    %c0_i32_1 = arith.constant 0 : i32
    return %arg0, %c0_i32, %c0_i32_0, %arg1 : i32, i32, i32, i32
  }
}

module attributes {stable_mosaic.version = 11 : i64} {
  func.func @_dw_dilated_kernel(%arg0: i32, %arg1: i32, %arg2: memref<1x34x34x128xbf16, #tpu.memory_space<vmem>>, %arg3: memref<9x1x128xf32, #tpu.memory_space<vmem>>, %arg4: memref<1x128xf32, #tpu.memory_space<vmem>>, %arg5: memref<9x1x128xf32, #tpu.memory_space<vmem>>, %arg6: memref<1x128xf32, #tpu.memory_space<vmem>>, %arg7: memref<1x2x2x128xbf16, #tpu.memory_space<vmem>>) attributes {dimension_semantics = [#tpu.dimension_semantics<parallel>, #tpu.dimension_semantics<parallel>], iteration_bounds = array<i64: 2, 1>, scalar_prefetch = 0 : i64, scratch_operands = 0 : i64, tpu.core_type = #tpu.core_type<tc>, window_params = [{transform_indices = @transform_0, window_bounds = array<i64: 1, 34, 34, 128>}, {transform_indices = @transform_1, window_bounds = array<i64: 9, 1, 128>}, {transform_indices = @transform_2, window_bounds = array<i64: 1, 128>}, {transform_indices = @transform_3, window_bounds = array<i64: 9, 1, 128>}, {transform_indices = @transform_4, window_bounds = array<i64: 1, 128>}, {transform_indices = @transform_5, window_bounds = array<i64: 1, 2, 2, 128>}]} {
    %c0 = arith.constant 0 : index
    %c15 = arith.constant 15 : index
    %c15_0 = arith.constant 15 : index
    %c0_1 = arith.constant 0 : index
    %0 = vector.load %arg2[%c0, %c15, %c15_0, %c0_1] : memref<1x34x34x128xbf16, #tpu.memory_space<vmem>>, vector<1x2x2x128xbf16>
    %1 = arith.extf %0 : vector<1x2x2x128xbf16> to vector<1x2x2x128xf32>
    %c0_2 = arith.constant 0 : index
    %c0_3 = arith.constant 0 : index
    %c0_4 = arith.constant 0 : index
    %2 = vector.load %arg3[%c0_2, %c0_3, %c0_4] : memref<9x1x128xf32, #tpu.memory_space<vmem>>, vector<1x1x128xf32>
    %3 = vector.shape_cast %2 : vector<1x1x128xf32> to vector<1x128xf32>
    %4 = vector.shape_cast %3 : vector<1x128xf32> to vector<1x1x1x128xf32>
    %5 = vector.broadcast %4 : vector<1x1x1x128xf32> to vector<1x2x2x128xf32>
    %6 = arith.mulf %1, %5 : vector<1x2x2x128xf32>
    %c0_5 = arith.constant 0 : index
    %c15_6 = arith.constant 15 : index
    %c16 = arith.constant 16 : index
    %c0_7 = arith.constant 0 : index
    %7 = vector.load %arg2[%c0_5, %c15_6, %c16, %c0_7] : memref<1x34x34x128xbf16, #tpu.memory_space<vmem>>, vector<1x2x2x128xbf16>
    %8 = arith.extf %7 : vector<1x2x2x128xbf16> to vector<1x2x2x128xf32>
    %c1 = arith.constant 1 : index
    %c0_8 = arith.constant 0 : index
    %c0_9 = arith.constant 0 : index
    %9 = vector.load %arg3[%c1, %c0_8, %c0_9] : memref<9x1x128xf32, #tpu.memory_space<vmem>>, vector<1x1x128xf32>
    %10 = vector.shape_cast %9 : vector<1x1x128xf32> to vector<1x128xf32>
    %11 = vector.shape_cast %10 : vector<1x128xf32> to vector<1x1x1x128xf32>
    %12 = vector.broadcast %11 : vector<1x1x1x128xf32> to vector<1x2x2x128xf32>
    %13 = arith.mulf %8, %12 : vector<1x2x2x128xf32>
    %14 = arith.addf %6, %13 : vector<1x2x2x128xf32>
    %c0_10 = arith.constant 0 : index
    %c15_11 = arith.constant 15 : index
    %c17 = arith.constant 17 : index
    %c0_12 = arith.constant 0 : index
    %15 = vector.load %arg2[%c0_10, %c15_11, %c17, %c0_12] : memref<1x34x34x128xbf16, #tpu.memory_space<vmem>>, vector<1x2x2x128xbf16>
    %16 = arith.extf %15 : vector<1x2x2x128xbf16> to vector<1x2x2x128xf32>
    %c2 = arith.constant 2 : index
    %c0_13 = arith.constant 0 : index
    %c0_14 = arith.constant 0 : index
    %17 = vector.load %arg3[%c2, %c0_13, %c0_14] : memref<9x1x128xf32, #tpu.memory_space<vmem>>, vector<1x1x128xf32>
    %18 = vector.shape_cast %17 : vector<1x1x128xf32> to vector<1x128xf32>
    %19 = vector.shape_cast %18 : vector<1x128xf32> to vector<1x1x1x128xf32>
    %20 = vector.broadcast %19 : vector<1x1x1x128xf32> to vector<1x2x2x128xf32>
    %21 = arith.mulf %16, %20 : vector<1x2x2x128xf32>
    %22 = arith.addf %14, %21 : vector<1x2x2x128xf32>
    %c0_15 = arith.constant 0 : index
    %c16_16 = arith.constant 16 : index
    %c15_17 = arith.constant 15 : index
    %c0_18 = arith.constant 0 : index
    %23 = vector.load %arg2[%c0_15, %c16_16, %c15_17, %c0_18] : memref<1x34x34x128xbf16, #tpu.memory_space<vmem>>, vector<1x2x2x128xbf16>
    %24 = arith.extf %23 : vector<1x2x2x128xbf16> to vector<1x2x2x128xf32>
    %c3 = arith.constant 3 : index
    %c0_19 = arith.constant 0 : index
    %c0_20 = arith.constant 0 : index
    %25 = vector.load %arg3[%c3, %c0_19, %c0_20] : memref<9x1x128xf32, #tpu.memory_space<vmem>>, vector<1x1x128xf32>
    %26 = vector.shape_cast %25 : vector<1x1x128xf32> to vector<1x128xf32>
    %27 = vector.shape_cast %26 : vector<1x128xf32> to vector<1x1x1x128xf32>
    %28 = vector.broadcast %27 : vector<1x1x1x128xf32> to vector<1x2x2x128xf32>
    %29 = arith.mulf %24, %28 : vector<1x2x2x128xf32>
    %30 = arith.addf %22, %29 : vector<1x2x2x128xf32>
    %c0_21 = arith.constant 0 : index
    %c16_22 = arith.constant 16 : index
    %c16_23 = arith.constant 16 : index
    %c0_24 = arith.constant 0 : index
    %31 = vector.load %arg2[%c0_21, %c16_22, %c16_23, %c0_24] : memref<1x34x34x128xbf16, #tpu.memory_space<vmem>>, vector<1x2x2x128xbf16>
    %32 = arith.extf %31 : vector<1x2x2x128xbf16> to vector<1x2x2x128xf32>
    %c4 = arith.constant 4 : index
    %c0_25 = arith.constant 0 : index
    %c0_26 = arith.constant 0 : index
    %33 = vector.load %arg3[%c4, %c0_25, %c0_26] : memref<9x1x128xf32, #tpu.memory_space<vmem>>, vector<1x1x128xf32>
    %34 = vector.shape_cast %33 : vector<1x1x128xf32> to vector<1x128xf32>
    %35 = vector.shape_cast %34 : vector<1x128xf32> to vector<1x1x1x128xf32>
    %36 = vector.broadcast %35 : vector<1x1x1x128xf32> to vector<1x2x2x128xf32>
    %37 = arith.mulf %32, %36 : vector<1x2x2x128xf32>
    %38 = arith.addf %30, %37 : vector<1x2x2x128xf32>
    %c0_27 = arith.constant 0 : index
    %c16_28 = arith.constant 16 : index
    %c17_29 = arith.constant 17 : index
    %c0_30 = arith.constant 0 : index
    %39 = vector.load %arg2[%c0_27, %c16_28, %c17_29, %c0_30] : memref<1x34x34x128xbf16, #tpu.memory_space<vmem>>, vector<1x2x2x128xbf16>
    %40 = arith.extf %39 : vector<1x2x2x128xbf16> to vector<1x2x2x128xf32>
    %c5 = arith.constant 5 : index
    %c0_31 = arith.constant 0 : index
    %c0_32 = arith.constant 0 : index
    %41 = vector.load %arg3[%c5, %c0_31, %c0_32] : memref<9x1x128xf32, #tpu.memory_space<vmem>>, vector<1x1x128xf32>
    %42 = vector.shape_cast %41 : vector<1x1x128xf32> to vector<1x128xf32>
    %43 = vector.shape_cast %42 : vector<1x128xf32> to vector<1x1x1x128xf32>
    %44 = vector.broadcast %43 : vector<1x1x1x128xf32> to vector<1x2x2x128xf32>
    %45 = arith.mulf %40, %44 : vector<1x2x2x128xf32>
    %46 = arith.addf %38, %45 : vector<1x2x2x128xf32>
    %c0_33 = arith.constant 0 : index
    %c17_34 = arith.constant 17 : index
    %c15_35 = arith.constant 15 : index
    %c0_36 = arith.constant 0 : index
    %47 = vector.load %arg2[%c0_33, %c17_34, %c15_35, %c0_36] : memref<1x34x34x128xbf16, #tpu.memory_space<vmem>>, vector<1x2x2x128xbf16>
    %48 = arith.extf %47 : vector<1x2x2x128xbf16> to vector<1x2x2x128xf32>
    %c6 = arith.constant 6 : index
    %c0_37 = arith.constant 0 : index
    %c0_38 = arith.constant 0 : index
    %49 = vector.load %arg3[%c6, %c0_37, %c0_38] : memref<9x1x128xf32, #tpu.memory_space<vmem>>, vector<1x1x128xf32>
    %50 = vector.shape_cast %49 : vector<1x1x128xf32> to vector<1x128xf32>
    %51 = vector.shape_cast %50 : vector<1x128xf32> to vector<1x1x1x128xf32>
    %52 = vector.broadcast %51 : vector<1x1x1x128xf32> to vector<1x2x2x128xf32>
    %53 = arith.mulf %48, %52 : vector<1x2x2x128xf32>
    %54 = arith.addf %46, %53 : vector<1x2x2x128xf32>
    %c0_39 = arith.constant 0 : index
    %c17_40 = arith.constant 17 : index
    %c16_41 = arith.constant 16 : index
    %c0_42 = arith.constant 0 : index
    %55 = vector.load %arg2[%c0_39, %c17_40, %c16_41, %c0_42] : memref<1x34x34x128xbf16, #tpu.memory_space<vmem>>, vector<1x2x2x128xbf16>
    %56 = arith.extf %55 : vector<1x2x2x128xbf16> to vector<1x2x2x128xf32>
    %c7 = arith.constant 7 : index
    %c0_43 = arith.constant 0 : index
    %c0_44 = arith.constant 0 : index
    %57 = vector.load %arg3[%c7, %c0_43, %c0_44] : memref<9x1x128xf32, #tpu.memory_space<vmem>>, vector<1x1x128xf32>
    %58 = vector.shape_cast %57 : vector<1x1x128xf32> to vector<1x128xf32>
    %59 = vector.shape_cast %58 : vector<1x128xf32> to vector<1x1x1x128xf32>
    %60 = vector.broadcast %59 : vector<1x1x1x128xf32> to vector<1x2x2x128xf32>
    %61 = arith.mulf %56, %60 : vector<1x2x2x128xf32>
    %62 = arith.addf %54, %61 : vector<1x2x2x128xf32>
    %c0_45 = arith.constant 0 : index
    %c17_46 = arith.constant 17 : index
    %c17_47 = arith.constant 17 : index
    %c0_48 = arith.constant 0 : index
    %63 = vector.load %arg2[%c0_45, %c17_46, %c17_47, %c0_48] : memref<1x34x34x128xbf16, #tpu.memory_space<vmem>>, vector<1x2x2x128xbf16>
    %64 = arith.extf %63 : vector<1x2x2x128xbf16> to vector<1x2x2x128xf32>
    %c8 = arith.constant 8 : index
    %c0_49 = arith.constant 0 : index
    %c0_50 = arith.constant 0 : index
    %65 = vector.load %arg3[%c8, %c0_49, %c0_50] : memref<9x1x128xf32, #tpu.memory_space<vmem>>, vector<1x1x128xf32>
    %66 = vector.shape_cast %65 : vector<1x1x128xf32> to vector<1x128xf32>
    %67 = vector.shape_cast %66 : vector<1x128xf32> to vector<1x1x1x128xf32>
    %68 = vector.broadcast %67 : vector<1x1x1x128xf32> to vector<1x2x2x128xf32>
    %69 = arith.mulf %64, %68 : vector<1x2x2x128xf32>
    %70 = arith.addf %62, %69 : vector<1x2x2x128xf32>
    %c0_51 = arith.constant 0 : index
    %c0_52 = arith.constant 0 : index
    %71 = vector.load %arg4[%c0_51, %c0_52] : memref<1x128xf32, #tpu.memory_space<vmem>>, vector<1x128xf32>
    %72 = vector.shape_cast %71 : vector<1x128xf32> to vector<1x1x1x128xf32>
    %73 = vector.broadcast %72 : vector<1x1x1x128xf32> to vector<1x2x2x128xf32>
    %74 = arith.addf %70, %73 : vector<1x2x2x128xf32>
    %cst = arith.constant 0.000000e+00 : f32
    %75 = vector.broadcast %cst : f32 to vector<1x2x2x128xf32>
    %76 = arith.maximumf %74, %75 : vector<1x2x2x128xf32>
    %c0_53 = arith.constant 0 : index
    %c0_54 = arith.constant 0 : index
    %c0_55 = arith.constant 0 : index
    %c0_56 = arith.constant 0 : index
    %77 = vector.load %arg2[%c0_53, %c0_54, %c0_55, %c0_56] : memref<1x34x34x128xbf16, #tpu.memory_space<vmem>>, vector<1x2x2x128xbf16>
    %78 = arith.extf %77 : vector<1x2x2x128xbf16> to vector<1x2x2x128xf32>
    %c0_57 = arith.constant 0 : index
    %c0_58 = arith.constant 0 : index
    %c0_59 = arith.constant 0 : index
    %79 = vector.load %arg5[%c0_57, %c0_58, %c0_59] : memref<9x1x128xf32, #tpu.memory_space<vmem>>, vector<1x1x128xf32>
    %80 = vector.shape_cast %79 : vector<1x1x128xf32> to vector<1x128xf32>
    %81 = vector.shape_cast %80 : vector<1x128xf32> to vector<1x1x1x128xf32>
    %82 = vector.broadcast %81 : vector<1x1x1x128xf32> to vector<1x2x2x128xf32>
    %83 = arith.mulf %78, %82 : vector<1x2x2x128xf32>
    %c0_60 = arith.constant 0 : index
    %c0_61 = arith.constant 0 : index
    %c16_62 = arith.constant 16 : index
    %c0_63 = arith.constant 0 : index
    %84 = vector.load %arg2[%c0_60, %c0_61, %c16_62, %c0_63] : memref<1x34x34x128xbf16, #tpu.memory_space<vmem>>, vector<1x2x2x128xbf16>
    %85 = arith.extf %84 : vector<1x2x2x128xbf16> to vector<1x2x2x128xf32>
    %c1_64 = arith.constant 1 : index
    %c0_65 = arith.constant 0 : index
    %c0_66 = arith.constant 0 : index
    %86 = vector.load %arg5[%c1_64, %c0_65, %c0_66] : memref<9x1x128xf32, #tpu.memory_space<vmem>>, vector<1x1x128xf32>
    %87 = vector.shape_cast %86 : vector<1x1x128xf32> to vector<1x128xf32>
    %88 = vector.shape_cast %87 : vector<1x128xf32> to vector<1x1x1x128xf32>
    %89 = vector.broadcast %88 : vector<1x1x1x128xf32> to vector<1x2x2x128xf32>
    %90 = arith.mulf %85, %89 : vector<1x2x2x128xf32>
    %91 = arith.addf %83, %90 : vector<1x2x2x128xf32>
    %c0_67 = arith.constant 0 : index
    %c0_68 = arith.constant 0 : index
    %c32 = arith.constant 32 : index
    %c0_69 = arith.constant 0 : index
    %92 = vector.load %arg2[%c0_67, %c0_68, %c32, %c0_69] : memref<1x34x34x128xbf16, #tpu.memory_space<vmem>>, vector<1x2x2x128xbf16>
    %93 = arith.extf %92 : vector<1x2x2x128xbf16> to vector<1x2x2x128xf32>
    %c2_70 = arith.constant 2 : index
    %c0_71 = arith.constant 0 : index
    %c0_72 = arith.constant 0 : index
    %94 = vector.load %arg5[%c2_70, %c0_71, %c0_72] : memref<9x1x128xf32, #tpu.memory_space<vmem>>, vector<1x1x128xf32>
    %95 = vector.shape_cast %94 : vector<1x1x128xf32> to vector<1x128xf32>
    %96 = vector.shape_cast %95 : vector<1x128xf32> to vector<1x1x1x128xf32>
    %97 = vector.broadcast %96 : vector<1x1x1x128xf32> to vector<1x2x2x128xf32>
    %98 = arith.mulf %93, %97 : vector<1x2x2x128xf32>
    %99 = arith.addf %91, %98 : vector<1x2x2x128xf32>
    %c0_73 = arith.constant 0 : index
    %c16_74 = arith.constant 16 : index
    %c0_75 = arith.constant 0 : index
    %c0_76 = arith.constant 0 : index
    %100 = vector.load %arg2[%c0_73, %c16_74, %c0_75, %c0_76] : memref<1x34x34x128xbf16, #tpu.memory_space<vmem>>, vector<1x2x2x128xbf16>
    %101 = arith.extf %100 : vector<1x2x2x128xbf16> to vector<1x2x2x128xf32>
    %c3_77 = arith.constant 3 : index
    %c0_78 = arith.constant 0 : index
    %c0_79 = arith.constant 0 : index
    %102 = vector.load %arg5[%c3_77, %c0_78, %c0_79] : memref<9x1x128xf32, #tpu.memory_space<vmem>>, vector<1x1x128xf32>
    %103 = vector.shape_cast %102 : vector<1x1x128xf32> to vector<1x128xf32>
    %104 = vector.shape_cast %103 : vector<1x128xf32> to vector<1x1x1x128xf32>
    %105 = vector.broadcast %104 : vector<1x1x1x128xf32> to vector<1x2x2x128xf32>
    %106 = arith.mulf %101, %105 : vector<1x2x2x128xf32>
    %107 = arith.addf %99, %106 : vector<1x2x2x128xf32>
    %c0_80 = arith.constant 0 : index
    %c16_81 = arith.constant 16 : index
    %c16_82 = arith.constant 16 : index
    %c0_83 = arith.constant 0 : index
    %108 = vector.load %arg2[%c0_80, %c16_81, %c16_82, %c0_83] : memref<1x34x34x128xbf16, #tpu.memory_space<vmem>>, vector<1x2x2x128xbf16>
    %109 = arith.extf %108 : vector<1x2x2x128xbf16> to vector<1x2x2x128xf32>
    %c4_84 = arith.constant 4 : index
    %c0_85 = arith.constant 0 : index
    %c0_86 = arith.constant 0 : index
    %110 = vector.load %arg5[%c4_84, %c0_85, %c0_86] : memref<9x1x128xf32, #tpu.memory_space<vmem>>, vector<1x1x128xf32>
    %111 = vector.shape_cast %110 : vector<1x1x128xf32> to vector<1x128xf32>
    %112 = vector.shape_cast %111 : vector<1x128xf32> to vector<1x1x1x128xf32>
    %113 = vector.broadcast %112 : vector<1x1x1x128xf32> to vector<1x2x2x128xf32>
    %114 = arith.mulf %109, %113 : vector<1x2x2x128xf32>
    %115 = arith.addf %107, %114 : vector<1x2x2x128xf32>
    %c0_87 = arith.constant 0 : index
    %c16_88 = arith.constant 16 : index
    %c32_89 = arith.constant 32 : index
    %c0_90 = arith.constant 0 : index
    %116 = vector.load %arg2[%c0_87, %c16_88, %c32_89, %c0_90] : memref<1x34x34x128xbf16, #tpu.memory_space<vmem>>, vector<1x2x2x128xbf16>
    %117 = arith.extf %116 : vector<1x2x2x128xbf16> to vector<1x2x2x128xf32>
    %c5_91 = arith.constant 5 : index
    %c0_92 = arith.constant 0 : index
    %c0_93 = arith.constant 0 : index
    %118 = vector.load %arg5[%c5_91, %c0_92, %c0_93] : memref<9x1x128xf32, #tpu.memory_space<vmem>>, vector<1x1x128xf32>
    %119 = vector.shape_cast %118 : vector<1x1x128xf32> to vector<1x128xf32>
    %120 = vector.shape_cast %119 : vector<1x128xf32> to vector<1x1x1x128xf32>
    %121 = vector.broadcast %120 : vector<1x1x1x128xf32> to vector<1x2x2x128xf32>
    %122 = arith.mulf %117, %121 : vector<1x2x2x128xf32>
    %123 = arith.addf %115, %122 : vector<1x2x2x128xf32>
    %c0_94 = arith.constant 0 : index
    %c32_95 = arith.constant 32 : index
    %c0_96 = arith.constant 0 : index
    %c0_97 = arith.constant 0 : index
    %124 = vector.load %arg2[%c0_94, %c32_95, %c0_96, %c0_97] : memref<1x34x34x128xbf16, #tpu.memory_space<vmem>>, vector<1x2x2x128xbf16>
    %125 = arith.extf %124 : vector<1x2x2x128xbf16> to vector<1x2x2x128xf32>
    %c6_98 = arith.constant 6 : index
    %c0_99 = arith.constant 0 : index
    %c0_100 = arith.constant 0 : index
    %126 = vector.load %arg5[%c6_98, %c0_99, %c0_100] : memref<9x1x128xf32, #tpu.memory_space<vmem>>, vector<1x1x128xf32>
    %127 = vector.shape_cast %126 : vector<1x1x128xf32> to vector<1x128xf32>
    %128 = vector.shape_cast %127 : vector<1x128xf32> to vector<1x1x1x128xf32>
    %129 = vector.broadcast %128 : vector<1x1x1x128xf32> to vector<1x2x2x128xf32>
    %130 = arith.mulf %125, %129 : vector<1x2x2x128xf32>
    %131 = arith.addf %123, %130 : vector<1x2x2x128xf32>
    %c0_101 = arith.constant 0 : index
    %c32_102 = arith.constant 32 : index
    %c16_103 = arith.constant 16 : index
    %c0_104 = arith.constant 0 : index
    %132 = vector.load %arg2[%c0_101, %c32_102, %c16_103, %c0_104] : memref<1x34x34x128xbf16, #tpu.memory_space<vmem>>, vector<1x2x2x128xbf16>
    %133 = arith.extf %132 : vector<1x2x2x128xbf16> to vector<1x2x2x128xf32>
    %c7_105 = arith.constant 7 : index
    %c0_106 = arith.constant 0 : index
    %c0_107 = arith.constant 0 : index
    %134 = vector.load %arg5[%c7_105, %c0_106, %c0_107] : memref<9x1x128xf32, #tpu.memory_space<vmem>>, vector<1x1x128xf32>
    %135 = vector.shape_cast %134 : vector<1x1x128xf32> to vector<1x128xf32>
    %136 = vector.shape_cast %135 : vector<1x128xf32> to vector<1x1x1x128xf32>
    %137 = vector.broadcast %136 : vector<1x1x1x128xf32> to vector<1x2x2x128xf32>
    %138 = arith.mulf %133, %137 : vector<1x2x2x128xf32>
    %139 = arith.addf %131, %138 : vector<1x2x2x128xf32>
    %c0_108 = arith.constant 0 : index
    %c32_109 = arith.constant 32 : index
    %c32_110 = arith.constant 32 : index
    %c0_111 = arith.constant 0 : index
    %140 = vector.load %arg2[%c0_108, %c32_109, %c32_110, %c0_111] : memref<1x34x34x128xbf16, #tpu.memory_space<vmem>>, vector<1x2x2x128xbf16>
    %141 = arith.extf %140 : vector<1x2x2x128xbf16> to vector<1x2x2x128xf32>
    %c8_112 = arith.constant 8 : index
    %c0_113 = arith.constant 0 : index
    %c0_114 = arith.constant 0 : index
    %142 = vector.load %arg5[%c8_112, %c0_113, %c0_114] : memref<9x1x128xf32, #tpu.memory_space<vmem>>, vector<1x1x128xf32>
    %143 = vector.shape_cast %142 : vector<1x1x128xf32> to vector<1x128xf32>
    %144 = vector.shape_cast %143 : vector<1x128xf32> to vector<1x1x1x128xf32>
    %145 = vector.broadcast %144 : vector<1x1x1x128xf32> to vector<1x2x2x128xf32>
    %146 = arith.mulf %141, %145 : vector<1x2x2x128xf32>
    %147 = arith.addf %139, %146 : vector<1x2x2x128xf32>
    %c0_115 = arith.constant 0 : index
    %c0_116 = arith.constant 0 : index
    %148 = vector.load %arg6[%c0_115, %c0_116] : memref<1x128xf32, #tpu.memory_space<vmem>>, vector<1x128xf32>
    %149 = vector.shape_cast %148 : vector<1x128xf32> to vector<1x1x1x128xf32>
    %150 = vector.broadcast %149 : vector<1x1x1x128xf32> to vector<1x2x2x128xf32>
    %151 = arith.addf %147, %150 : vector<1x2x2x128xf32>
    %cst_117 = arith.constant 0.000000e+00 : f32
    %152 = vector.broadcast %cst_117 : f32 to vector<1x2x2x128xf32>
    %153 = arith.maximumf %151, %152 : vector<1x2x2x128xf32>
    %154 = arith.addf %76, %153 : vector<1x2x2x128xf32>
    %155 = arith.truncf %154 : vector<1x2x2x128xf32> to vector<1x2x2x128xbf16>
    %c0_118 = arith.constant 0 : index
    %c0_119 = arith.constant 0 : index
    %c0_120 = arith.constant 0 : index
    %c0_121 = arith.constant 0 : index
    %156 = vector.load %arg7[%c0_118, %c0_119, %c0_120, %c0_121] : memref<1x2x2x128xbf16, #tpu.memory_space<vmem>>, vector<1x2x2x128xbf16>
    tpu.vector_store %arg7[%c0_118, %c0_119, %c0_120, %c0_121], %155 {strides = array<i32>} : memref<1x2x2x128xbf16, #tpu.memory_space<vmem>>, vector<1x2x2x128xbf16>,
    return
  }
  func.func @transform_0(%arg0: i32, %arg1: i32) -> (i32, i32, i32, i32) {
    %c0_i32 = arith.constant 0 : i32
    %c0_i32_0 = arith.constant 0 : i32
    %c0_i32_1 = arith.constant 0 : i32
    return %arg0, %c0_i32, %c0_i32_0, %arg1 : i32, i32, i32, i32
  }
  func.func @transform_1(%arg0: i32, %arg1: i32) -> (i32, i32, i32) {
    %c0_i32 = arith.constant 0 : i32
    %c0_i32_0 = arith.constant 0 : i32
    %c0_i32_1 = arith.constant 0 : i32
    return %c0_i32, %c0_i32_0, %arg1 : i32, i32, i32
  }
  func.func @transform_2(%arg0: i32, %arg1: i32) -> (i32, i32) {
    %c0_i32 = arith.constant 0 : i32
    %c0_i32_0 = arith.constant 0 : i32
    return %c0_i32, %arg1 : i32, i32
  }
  func.func @transform_3(%arg0: i32, %arg1: i32) -> (i32, i32, i32) {
    %c0_i32 = arith.constant 0 : i32
    %c0_i32_0 = arith.constant 0 : i32
    %c0_i32_1 = arith.constant 0 : i32
    return %c0_i32, %c0_i32_0, %arg1 : i32, i32, i32
  }
  func.func @transform_4(%arg0: i32, %arg1: i32) -> (i32, i32) {
    %c0_i32 = arith.constant 0 : i32
    %c0_i32_0 = arith.constant 0 : i32
    return %c0_i32, %arg1 : i32, i32
  }
  func.func @transform_5(%arg0: i32, %arg1: i32) -> (i32, i32, i32, i32) {
    %c0_i32 = arith.constant 0 : i32
    %c0_i32_0 = arith.constant 0 : i32
    %c0_i32_1 = arith.constant 0 : i32
    return %arg0, %c0_i32, %c0_i32_0, %arg1 : i32, i32, i32, i32
  }
}

module attributes {stable_mosaic.version = 11 : i64} {
  func.func @_matmul_kernel(%arg0: i32, %arg1: i32, %arg2: i32, %arg3: memref<8x512xbf16, #tpu.memory_space<vmem>>, %arg4: memref<512x256xbf16, #tpu.memory_space<vmem>>, %arg5: memref<1x256xf32, #tpu.memory_space<vmem>>, %arg6: memref<8x256xbf16, #tpu.memory_space<vmem>>, %arg7: memref<8x256xf32, #tpu.memory_space<vmem>>) attributes {dimension_semantics = [#tpu.dimension_semantics<parallel>, #tpu.dimension_semantics<parallel>, #tpu.dimension_semantics<arbitrary>], iteration_bounds = array<i64: 1, 1, 1>, scalar_prefetch = 0 : i64, scratch_operands = 1 : i64, tpu.core_type = #tpu.core_type<tc>, window_params = [{transform_indices = @transform_0, window_bounds = array<i64: 8, 512>}, {transform_indices = @transform_1, window_bounds = array<i64: 512, 256>}, {transform_indices = @transform_2, window_bounds = array<i64: 1, 256>}, {transform_indices = @transform_3, window_bounds = array<i64: 8, 256>}]} {
    %c0_i32 = arith.constant 0 : i32
    %0 = arith.cmpi eq, %arg2, %c0_i32 : i32
    %1 = arith.extui %0 : i1 to i32
    %c0_i32_0 = arith.constant 0 : i32
    %2 = arith.cmpi ne, %1, %c0_i32_0 : i32
    scf.if %2 {
      %cst_10 = arith.constant 0.000000e+00 : f32
      %12 = vector.broadcast %cst_10 : f32 to vector<8x256xf32>
      %c0_11 = arith.constant 0 : index
      %c0_12 = arith.constant 0 : index
      %13 = vector.load %arg7[%c0_11, %c0_12] : memref<8x256xf32, #tpu.memory_space<vmem>>, vector<8x256xf32>
      tpu.vector_store %arg7[%c0_11, %c0_12], %12 {strides = array<i32>} : memref<8x256xf32, #tpu.memory_space<vmem>>, vector<8x256xf32>,
    } else {
    }
    %c0 = arith.constant 0 : index
    %c0_1 = arith.constant 0 : index
    %3 = vector.load %arg7[%c0, %c0_1] : memref<8x256xf32, #tpu.memory_space<vmem>>, vector<8x256xf32>
    %c0_2 = arith.constant 0 : index
    %c0_3 = arith.constant 0 : index
    %4 = vector.load %arg3[%c0_2, %c0_3] : memref<8x512xbf16, #tpu.memory_space<vmem>>, vector<8x512xbf16>
    %c0_4 = arith.constant 0 : index
    %c0_5 = arith.constant 0 : index
    %5 = vector.load %arg4[%c0_4, %c0_5] : memref<512x256xbf16, #tpu.memory_space<vmem>>, vector<512x256xbf16>
    %cst = arith.constant dense<0.000000e+00> : vector<8x256xf32>
    %6 = tpu.matmul %4, %5, %cst {dimension_numbers = #tpu.dot_dimension_numbers<[1], [0], [0], [1], [0, 0, 1, 1], [], []>} : vector<8x512xbf16>, vector<512x256xbf16>, vector<8x256xf32> -> vector<8x256xf32>
    %7 = arith.addf %3, %6 : vector<8x256xf32>
    %c0_6 = arith.constant 0 : index
    %c0_7 = arith.constant 0 : index
    %8 = vector.load %arg7[%c0_6, %c0_7] : memref<8x256xf32, #tpu.memory_space<vmem>>, vector<8x256xf32>
    tpu.vector_store %arg7[%c0_6, %c0_7], %7 {strides = array<i32>} : memref<8x256xf32, #tpu.memory_space<vmem>>, vector<8x256xf32>,
    %c0_i32_8 = arith.constant 0 : i32
    %9 = arith.cmpi eq, %arg2, %c0_i32_8 : i32
    %10 = arith.extui %9 : i1 to i32
    %c0_i32_9 = arith.constant 0 : i32
    %11 = arith.cmpi ne, %10, %c0_i32_9 : i32
    scf.if %11 {
      %c0_10 = arith.constant 0 : index
      %c0_11 = arith.constant 0 : index
      %12 = vector.load %arg7[%c0_10, %c0_11] : memref<8x256xf32, #tpu.memory_space<vmem>>, vector<8x256xf32>
      %c0_12 = arith.constant 0 : index
      %c0_13 = arith.constant 0 : index
      %13 = vector.load %arg5[%c0_12, %c0_13] : memref<1x256xf32, #tpu.memory_space<vmem>>, vector<1x256xf32>
      %14 = vector.broadcast %13 : vector<1x256xf32> to vector<8x256xf32>
      %15 = arith.addf %12, %14 : vector<8x256xf32>
      %cst_14 = arith.constant 0.000000e+00 : f32
      %16 = vector.broadcast %cst_14 : f32 to vector<8x256xf32>
      %17 = arith.maximumf %15, %16 : vector<8x256xf32>
      %18 = arith.truncf %17 : vector<8x256xf32> to vector<8x256xbf16>
      %c0_15 = arith.constant 0 : index
      %c0_16 = arith.constant 0 : index
      %19 = vector.load %arg6[%c0_15, %c0_16] : memref<8x256xbf16, #tpu.memory_space<vmem>>, vector<8x256xbf16>
      tpu.vector_store %arg6[%c0_15, %c0_16], %18 {strides = array<i32>} : memref<8x256xbf16, #tpu.memory_space<vmem>>, vector<8x256xbf16>,
    } else {
    }
    return
  }
  func.func @transform_0(%arg0: i32, %arg1: i32, %arg2: i32) -> (i32, i32) {
    %c0_i32 = arith.constant 0 : i32
    return %arg0, %arg2 : i32, i32
  }
  func.func @transform_1(%arg0: i32, %arg1: i32, %arg2: i32) -> (i32, i32) {
    %c0_i32 = arith.constant 0 : i32
    return %arg2, %arg1 : i32, i32
  }
  func.func @transform_2(%arg0: i32, %arg1: i32, %arg2: i32) -> (i32, i32) {
    %c0_i32 = arith.constant 0 : i32
    %c0_i32_0 = arith.constant 0 : i32
    return %c0_i32, %arg1 : i32, i32
  }
  func.func @transform_3(%arg0: i32, %arg1: i32, %arg2: i32) -> (i32, i32) {
    %c0_i32 = arith.constant 0 : i32
    return %arg0, %arg1 : i32, i32
  }
}

module attributes {stable_mosaic.version = 11 : i64} {
  func.func @_resize_kernel(%arg0: i32, %arg1: i32, %arg2: memref<16x8xf32, #tpu.memory_space<vmem>>, %arg3: memref<1x8x8xbf16, #tpu.memory_space<vmem>>, %arg4: memref<8x16xf32, #tpu.memory_space<vmem>>, %arg5: memref<1x16x16xf32, #tpu.memory_space<vmem>>) attributes {dimension_semantics = [#tpu.dimension_semantics<parallel>, #tpu.dimension_semantics<parallel>], iteration_bounds = array<i64: 2, 1>, scalar_prefetch = 0 : i64, scratch_operands = 0 : i64, tpu.core_type = #tpu.core_type<tc>, window_params = [{transform_indices = @transform_0, window_bounds = array<i64: 16, 8>}, {transform_indices = @transform_1, window_bounds = array<i64: 1, 8, 8>}, {pipeline_mode = #tpu.pipeline_mode<synchronous>, transform_indices = @transform_2, window_bounds = array<i64: 8, 16>}, {transform_indices = @transform_3, window_bounds = array<i64: 1, 16, 16>}]} {
    %c0 = arith.constant 0 : index
    %c0_0 = arith.constant 0 : index
    %0 = vector.load %arg2[%c0, %c0_0] : memref<16x8xf32, #tpu.memory_space<vmem>>, vector<16x8xf32>
    %c0_1 = arith.constant 0 : index
    %c0_2 = arith.constant 0 : index
    %c0_3 = arith.constant 0 : index
    %1 = vector.load %arg3[%c0_1, %c0_2, %c0_3] : memref<1x8x8xbf16, #tpu.memory_space<vmem>>, vector<1x8x8xbf16>
    %2 = vector.shape_cast %1 : vector<1x8x8xbf16> to vector<8x8xbf16>
    %3 = arith.extf %2 : vector<8x8xbf16> to vector<8x8xf32>
    %cst = arith.constant dense<0.000000e+00> : vector<16x8xf32>
    %4 = tpu.matmul %0, %3, %cst {dimension_numbers = #tpu.dot_dimension_numbers<[1], [0], [0], [1], [0, 0, 1, 1], [], []>} : vector<16x8xf32>, vector<8x8xf32>, vector<16x8xf32> -> vector<16x8xf32>
    %c0_4 = arith.constant 0 : index
    %c0_5 = arith.constant 0 : index
    %5 = vector.load %arg4[%c0_4, %c0_5] : memref<8x16xf32, #tpu.memory_space<vmem>>, vector<8x16xf32>
    %cst_6 = arith.constant dense<0.000000e+00> : vector<16x16xf32>
    %6 = tpu.matmul %4, %5, %cst_6 {dimension_numbers = #tpu.dot_dimension_numbers<[1], [0], [0], [1], [0, 0, 1, 1], [], []>} : vector<16x8xf32>, vector<8x16xf32>, vector<16x16xf32> -> vector<16x16xf32>
    %c0_7 = arith.constant 0 : index
    %c0_8 = arith.constant 0 : index
    %c0_9 = arith.constant 0 : index
    %7 = vector.load %arg5[%c0_7, %c0_8, %c0_9] : memref<1x16x16xf32, #tpu.memory_space<vmem>>, vector<1x16x16xf32>
    %8 = vector.shape_cast %7 : vector<1x16x16xf32> to vector<16x16xf32>
    %9 = vector.shape_cast %6 : vector<16x16xf32> to vector<1x16x16xf32>
    tpu.vector_store %arg5[%c0_7, %c0_8, %c0_9], %9 {strides = array<i32>} : memref<1x16x16xf32, #tpu.memory_space<vmem>>, vector<1x16x16xf32>,
    return
  }
  func.func @transform_0(%arg0: i32, %arg1: i32) -> (i32, i32) {
    %c0_i32 = arith.constant 0 : i32
    %c0_i32_0 = arith.constant 0 : i32
    return %arg1, %c0_i32 : i32, i32
  }
  func.func @transform_1(%arg0: i32, %arg1: i32) -> (i32, i32, i32) {
    %c0_i32 = arith.constant 0 : i32
    %c0_i32_0 = arith.constant 0 : i32
    %c0_i32_1 = arith.constant 0 : i32
    return %arg0, %c0_i32, %c0_i32_0 : i32, i32, i32
  }
  func.func @transform_2(%arg0: i32, %arg1: i32) -> (i32, i32) {
    %c0_i32 = arith.constant 0 : i32
    %c0_i32_0 = arith.constant 0 : i32
    %c0_i32_1 = arith.constant 0 : i32
    return %c0_i32, %c0_i32_0 : i32, i32
  }
  func.func @transform_3(%arg0: i32, %arg1: i32) -> (i32, i32, i32) {
    %c0_i32 = arith.constant 0 : i32
    %c0_i32_0 = arith.constant 0 : i32
    return %arg0, %arg1, %c0_i32 : i32, i32, i32
  }
}

</mosaic_0001>

<bundles_post_ra>
// kernel: _lambda_.76
= control target key start
LH: loop header
LB: loop body
LE: loop exit
PB: predicated region body
PF: predicated region fallthrough
CT: control target
= control target key end

     0   :  { %s721_s1 = inlined_call_operand.vmem [shape: bf16[128,128], index: 1, kind: input, shape index: {}]   ;;  %s722_s0 = inlined_call_operand.vmem [shape: bf16[128,128], index: 0, kind: input, shape index: {}]   ;;  %s723_s2 = inlined_call_operand.vmem [shape: f32[1,128], index: 2, kind: input, shape index: {}]   ;;  %s724_s3 = inlined_call_operand.vmem [shape: bf16[128,128], index: 3, kind: output, shape index: {}]  }
   0x1   :  { %v610_v0 = vld [vmem:[%s721_s1] sm:$0xff]   ;;  %v611_v1 = vld [vmem:[%s721_s1 + $0x8] sm:$0xff]   ;;  %v612_v2 = vld [vmem:[%s721_s1 + $0x10] sm:$0xff]  }
   0x2   :  { %562 = vmatprep.subr.bf16.mxu0 %v610_v0  ;;  %594 = vmatprep.subr.bf16.mxu1 %v610_v0  ;;  %v613_v3 = vld [vmem:[%s721_s1 + $0x18] sm:$0xff]   ;;  %v618_v4 = vld [vmem:[%s722_s0] sm:$0xff]   ;;  %v615_v7 = vld [vmem:[%s721_s1 + $0x28] sm:$0xff]  }
   0x3   :  { %563 = vmatpush3.bf16.msra.mxu0 %v610_v0  ;;  %602 = vmatpush3.bf16.msra.mxu1 %v610_v0  ;;  %v619_v5 = vld [vmem:[%s722_s0 + $0x20] sm:$0xff]   ;;  %v616_v8 = vld [vmem:[%s721_s1 + $0x30] sm:$0xff]   ;;  %v617_v9 = vld [vmem:[%s721_s1 + $0x38] sm:$0xff]  }
   0x4   :  { %564 = vmatprep.subr.bf16.mxu0 %v611_v1  ;;  %595 = vmatprep.subr.bf16.mxu1 %v611_v1  ;;  %v614_v6 = vld [vmem:[%s721_s1 + $0x20] sm:$0xff]   ;;  %v620_v10 = vld [vmem:[%s722_s0 + $0x8] sm:$0xff]   ;;  %v622_v12 = vld [vmem:[%s722_s0 + $0x10] sm:$0xff]  }
   0x5   :  { %578 = vmatprep.mubr.bf16.mxu0 %v618_v4  ;;  %586 = vmatprep.mubr.bf16.mxu1 %v619_v5  ;;  %v621_v11 = vld [vmem:[%s722_s0 + $0x28] sm:$0xff]   ;;  %v623_v13 = vld [vmem:[%s722_s0 + $0x30] sm:$0xff]   ;;  %v624_v14 = vld [vmem:[%s722_s0 + $0x18] sm:$0xff]  }
   0x6   :  { %v625_v15 = vld [vmem:[%s722_s0 + $0x38] sm:$0xff]   ;;  %v466_v16 = vld [vmem:[%s723_s2] ss:$0 sm:$0xff] }
   0x7   :  { %565 = vmatpush3.bf16.msra.mxu0 %v611_v1  ;;  %603 = vmatpush3.bf16.msra.mxu1 %v611_v1 }
   0x8   :  { %566 = vmatprep.subr.bf16.mxu0 %v612_v2  ;;  %596 = vmatprep.subr.bf16.mxu1 %v612_v2 }
   0xb   :  { %567 = vmatpush3.bf16.msra.mxu0 %v612_v2  ;;  %604 = vmatpush3.bf16.msra.mxu1 %v612_v2 }
   0xc   :  { %568 = vmatprep.subr.bf16.mxu0 %v613_v3  ;;  %597 = vmatprep.subr.bf16.mxu1 %v613_v3 }
   0xf   :  { %569 = vmatpush3.bf16.msra.mxu0 %v613_v3  ;;  %605 = vmatpush3.bf16.msra.mxu1 %v613_v3 }
  0x10   :  { %570 = vmatprep.subr.bf16.mxu0 %v614_v6  ;;  %598 = vmatprep.subr.bf16.mxu1 %v614_v6 }
  0x13   :  { %571 = vmatpush3.bf16.msra.mxu0 %v614_v6  ;;  %606 = vmatpush3.bf16.msra.mxu1 %v614_v6 }
  0x14   :  { %572 = vmatprep.subr.bf16.mxu0 %v615_v7  ;;  %599 = vmatprep.subr.bf16.mxu1 %v615_v7 }
  0x17   :  { %573 = vmatpush3.bf16.msra.mxu0 %v615_v7  ;;  %607 = vmatpush3.bf16.msra.mxu1 %v615_v7 }
  0x18   :  { %574 = vmatprep.subr.bf16.mxu0 %v616_v8  ;;  %600 = vmatprep.subr.bf16.mxu1 %v616_v8 }
  0x1b   :  { %575 = vmatpush3.bf16.msra.mxu0 %v616_v8  ;;  %608 = vmatpush3.bf16.msra.mxu1 %v616_v8 }
  0x1c   :  { %576 = vmatprep.subr.bf16.mxu0 %v617_v9  ;;  %601 = vmatprep.subr.bf16.mxu1 %v617_v9 }
  0x1f   :  { %577 = vmatpush3.bf16.msra.mxu0 %v617_v9  ;;  %609 = vmatpush3.bf16.msra.mxu1 %v617_v9 }
  0x22   :  { %579 = vmatmul.mubr.bf16.vlgmr.msra.gmra.mrb[0].mxu0 %v620_v10  ;;  %587 = vmatmul.mubr.bf16.vlgmr.msra.gmra.mrb[0].mxu1 %v621_v11 }
  0x23   :  { %582 = vmatprep.mubr.bf16.mxu0 %v622_v12  ;;  %590 = vmatprep.mubr.bf16.mxu1 %v623_v13 }
  0x2a   :  { %583 = vmatmul.mubr.bf16.gmra.mrb[4].mxu0 %v624_v14  ;;  %591 = vmatmul.mubr.bf16.gmra.mrb[4].mxu1 %v625_v15 }
  0xf5   :  { %v580_v17 = vpop.f32.mrb[0].mxu0  ;;  %v588_v18 = vpop.f32.mrb[0].mxu1 }
  0xf6   :  { %v336_v19 = vadd.f32 %v580_v17, %v466_v16  ;;  %v344_v20 = vadd.f32 %v588_v18, %v466_v16  ;;  %v213_v21 = vpop.f32.mrb[1].mxu0  ;;  %v245_v22 = vpop.f32.mrb[1].mxu1 }
  0xf7   :  { %v334_v23 = vadd.f32 %v466_v16, %v213_v21  ;;  %v342_v24 = vadd.f32 %v466_v16, %v245_v22  ;;  %v581_v25 = vpop.f32.mrb[2].mxu0  ;;  %v589_v26 = vpop.f32.mrb[2].mxu1 }
  0xf8   :  { %v337_v27 = vadd.f32 %v581_v25, %v466_v16  ;;  %v345_v28 = vadd.f32 %v589_v26, %v466_v16  ;;  %v216_v29 = vpop.f32.mrb[3].mxu0  ;;  %v248_v30 = vpop.f32.mrb[3].mxu1  ;;  %v352_v33 = vmax.f32 %v336_v19, 0.0  ;;  %v360_v34 = vmax.f32 %v344_v20, 0.0 }
  0xf9   :  { %v335_v31 = vadd.f32 %v466_v16, %v216_v29  ;;  %v343_v32 = vadd.f32 %v466_v16, %v248_v30  ;;  %v350_v37 = vmax.f32 %v334_v23, 0.0  ;;  %v358_v38 = vmax.f32 %v342_v24, 0.0 }
  0xfa   :  { %v353_v35 = vmax.f32 %v337_v27, 0.0  ;;  %v361_v36 = vmax.f32 %v345_v28, 0.0 }
  0xfb   :  { %v351_v39 = vmax.f32 %v335_v31, 0.0  ;;  %v359_v40 = vmax.f32 %v343_v32, 0.0 }
  0xfc   :  { %v507_v41 = vpack.c.bf16 %v353_v35, %v352_v33  ;;  %v527_v42 = vpack.c.bf16 %v361_v36, %v360_v34 }
  0xfd   :  { %v502_v43 = vpack.c.bf16 %v351_v39, %v350_v37  ;;  %v522_v44 = vpack.c.bf16 %v359_v40, %v358_v38  ;;  %v584_v45 = vpop.f32.mrb[4].mxu0  ;;  %v592_v46 = vpop.f32.mrb[4].mxu1 }
  0xfe   :  { %539 = vst [vmem:[%s724_s3 + $0x8] sm:$0xff] %v507_v41   ;;  %543 = vst [vmem:[%s724_s3 + $0x28] sm:$0xff] %v527_v42   ;;  %v340_v47 = vadd.f32 %v584_v45, %v466_v16  ;;  %v348_v48 = vadd.f32 %v592_v46, %v466_v16  ;;  %v229_v49 = vpop.f32.mrb[5].mxu0  ;;  %v261_v50 = vpop.f32.mrb[5].mxu1 }
  0xff   :  { %503 = vst [vmem:[%s724_s3] sm:$0xff] %v502_v43   ;;  %542 = vst [vmem:[%s724_s3 + $0x20] sm:$0xff] %v522_v44   ;;  %v338_v51 = vadd.f32 %v466_v16, %v229_v49  ;;  %v346_v52 = vadd.f32 %v466_v16, %v261_v50  ;;  %v585_v53 = vpop.f32.mrb[6].mxu0  ;;  %v593_v54 = vpop.f32.mrb[6].mxu1 }
 0x100   :  { %v341_v55 = vadd.f32 %v585_v53, %v466_v16  ;;  %v349_v56 = vadd.f32 %v593_v54, %v466_v16  ;;  %v232_v57 = vpop.f32.mrb[7].mxu0  ;;  %v264_v58 = vpop.f32.mrb[7].mxu1  ;;  %v356_v61 = vmax.f32 %v340_v47, 0.0  ;;  %v364_v62 = vmax.f32 %v348_v48, 0.0 }
 0x101   :  { %v339_v59 = vadd.f32 %v466_v16, %v232_v57  ;;  %v347_v60 = vadd.f32 %v466_v16, %v264_v58  ;;  %v354_v1 = vmax.f32 %v338_v51, 0.0  ;;  %v362_v2 = vmax.f32 %v346_v52, 0.0 }
 0x102   :  { %v357_v63 = vmax.f32 %v341_v55, 0.0  ;;  %v365_v0 = vmax.f32 %v349_v56, 0.0 }
 0x103   :  { %v355_v3 = vmax.f32 %v339_v59, 0.0  ;;  %v363_v4 = vmax.f32 %v347_v60, 0.0 }
 0x104   :  { %v517_v5 = vpack.c.bf16 %v357_v63, %v356_v61  ;;  %v537_v6 = vpack.c.bf16 %v365_v0, %v364_v62 }
 0x105   :  { %v512_v7 = vpack.c.bf16 %v355_v3, %v354_v1  ;;  %v532_v8 = vpack.c.bf16 %v363_v4, %v362_v2 }
 0x106   :  { %541 = vst [vmem:[%s724_s3 + $0x18] sm:$0xff] %v517_v5   ;;  %545 = vst [vmem:[%s724_s3 + $0x38] sm:$0xff] %v537_v6  }
 0x107   :  { %540 = vst [vmem:[%s724_s3 + $0x10] sm:$0xff] %v512_v7   ;;  %544 = vst [vmem:[%s724_s3 + $0x30] sm:$0xff] %v532_v8  }

// kernel: _lambda_.77
= control target key start
LH: loop header
LB: loop body
LE: loop exit
PB: predicated region body
PF: predicated region fallthrough
CT: control target
= control target key end

     0   :  { %s1081_s15 = smov 0   ;;  %s1083_s16 = smov 0   ;;  %s1382_s0 = inlined_call_operand.vmem [shape: bf16[2,9,9,3], index: 0, kind: input, shape index: {}]   ;;  %s1383_s1 = inlined_call_operand.vmem [shape: bf16[2,9,9,3], index: 1, kind: input, shape index: {}]   ;;  %s1384_s2 = inlined_call_operand.vmem [shape: bf16[2,9,9,3], index: 2, kind: input, shape index: {}]   ;;  %s1385_s3 = inlined_call_operand.vmem [shape: bf16[2,9,9,3], index: 3, kind: input, shape index: {}]   ;;  %s1386_s4 = inlined_call_operand.vmem [shape: bf16[2,8,8,3], index: 4, kind: output, shape index: {}]  }
   0x1   :  { %s1085_s17 = smov 0  }
   0x2 LB: > { %s26_s18 = sadd.s32 1, %s1050_s16  ;;  %p973_p0 = scmp.ge.s32.totalorder %s1054_s17, 1  ;;  %s1054_s17 = sphi %s1085_s17, %s14_s17   ;;  %s1050_s16 = sphi %s1083_s16, %s1390_s16   ;;  %s1046_s15 = sphi %s1081_s15, %s1389_s15  }
   0x3   : > { %p28_p1 = scmp.ge.s32.totalorder %s26_s18, 2  ;;  %p226_p2 = scmp.lt.s32.totalorder %s1054_s17, 3 }
   0x5   : > { %s1392_s18 = smov (%p28_p1, %s26_s18), 0  ;;  %p227_p3 = pnand %p973_p0, %p226_p2 }
   0x6   : > { %p282_p4 = scmp.lt.s32.totalorder (!%p227_p3), %s1046_s15, 1  ;;  %vm354_vm0 = vsmask.f32 (!%p227_p3), 3328  ;;  %vm355_vm1 = vsmask.f32 (!%p227_p3), 7440  ;;  %vm823_vm3 = vcmask (!%p227_p3), 19456  }
   0x7   : > { %230 = sbr.rel (%p227_p3) target bundleno = 101 (0x65), region = 36  ;;  %vm1136_vm2 = vmor (!%p227_p3), %vm354_vm0, %vm355_vm1 }
   0xe   : > { %s1394_s15 = smov (!%p282_p4, %s1046_s15), 1 }
   0xf   : > { %s1102_s19 = smul.u32 72, %s1394_s15  ;;  %s1006_s6 = sshll.u32 %s1394_s15, 5 }
  0x10   : > { %s1201_s9 = scalar_lea.vmem %s1386_s4, %s1006_s6 }
  0x11   : > { %s1108_s22 = scalar_lea.vmem %s1382_s0, %s1102_s19  ;;  %s1114_s25 = scalar_lea.vmem %s1383_s1, %s1102_s19 }
  0x12   : > { %s1120_s28 = scalar_lea.vmem %s1384_s2, %s1102_s19  ;;  %v322_v0 = vld [vmem:[%s1108_s22] sm:$0xf]  ;;  %v346_v1 = vld [vmem:[%s1108_s22 + $0x4] sm:$0x1]  ;;  %v1128_v13 = vld [vmem:[%s1108_s22 + $0x8] sm:$0xf]  ;;  %s1149_s5 = scalar_lea.vmem %s1385_s3, %s1102_s19 }
  0x13   : > { %v358_v2 = vshrl.u32 %v322_v0, 16  ;;  %v361_v3 = vshll.u32 %v322_v0, 16  ;;  %v367_v4 = vshll.u32 %v346_v1, 16  ;;  %v485_v5 = vld [vmem:[%s1120_s28] sm:$0xf]  ;;  %v696_v19 = vshrl.u32 %v1128_v13, 16 }
  0x14   : > { %v330_v6 = vld [vmem:[%s1114_s25] sm:$0xf]  ;;  %v517_v7 = vld [vmem:[%s1120_s28 + $0x4] sm:$0x1]  ;;  %v526_v8 = vshrl.u32 %v485_v5, 16  ;;  %v529_v9 = vshll.u32 %v485_v5, 16 }
  0x15   : > { %v360_v10 = vrot.slane %v358_v2, 4  ;;  %v363_v11 = vrot.slane %v361_v3, 5  ;;  %v535_v12 = vshll.u32 %v517_v7, 16  ;;  %v996_v16 = vld [vmem:[%s1108_s22 + $0xc] sm:$0x1]  ;;  %v369_v18 = vrot.slane %v367_v4, 5 }
  0x16   : > { %v528_v14 = vrot.slane %v526_v8, 4  ;;  %v531_v15 = vrot.slane %v529_v9, 5  ;;  %v699_v20 = vshll.u32 %v1128_v13, 16  ;;  %v323_v21 = vld [vmem:[%s1108_s22 + $0x8] sm:$0xf]  ;;  %v338_v22 = vmax.bf16 %v330_v6, %v322_v0 }
  0x17   : > { %v364_v17 = vor.u32 %v363_v11, %v360_v10  ;;  %v705_v25 = vshll.u32 %v996_v16, 16  ;;  %v331_v26 = vld [vmem:[%s1114_s25 + $0x8] sm:$0xf]  ;;  %v347_v27 = vld [vmem:[%s1108_s22 + $0xc] sm:$0x1]  ;;  %v372_v28 = vshrl.u32 %v323_v21, 16 }
  0x18   : > { %v532_v24 = vor.u32 %v531_v15, %v528_v14  ;;  %v537_v30 = vrot.slane %v535_v12, 5  ;;  %v698_v31 = vrot.slane %v696_v19, 4  ;;  %v701_v32 = vrot.slane %v699_v20, 5  ;;  %v1143_v33 = vld [vmem:[%s1120_s28 + $0x8] sm:$0xf] }
  0x19   : > { %v365_v29 = vrot.slane %v364_v17, 4  ;;  %v339_v35 = vmax.bf16 %v331_v26, %v323_v21  ;;  %v374_v36 = vrot.slane %v372_v28, 4  ;;  %v375_v37 = vshll.u32 %v323_v21, 16  ;;  %v518_v41 = vld [vmem:[%s1120_s28 + $0xc] sm:$0x1] }
  0x1a   : > { %v533_v34 = vrot.slane %v532_v24, 4  ;;  %v702_v39 = vor.u32 %v701_v32, %v698_v31  ;;  %v381_v40 = vshll.u32 %v347_v27, 16  ;;  %v540_v42 = vshrl.u32 %v1143_v33, 16  ;;  %v1156_v43 = vld [vmem:[%s1108_s22 + $0x10] sm:$0xf] }
  0x1b   : > { %v370_v38 = vsel %vm1136_vm2, %v365_v29, %v369_v18  ;;  %v1158_v45 = vrot.slane %v705_v25, 5  ;;  %v377_v46 = vrot.slane %v375_v37, 5  ;;  %v543_v47 = vshll.u32 %v1143_v33, 16  ;;  %v997_v48 = vld [vmem:[%s1108_s22 + $0x14] sm:$0x1] }
  0x1c   : > { %v477_v44 = vmax.bf16 %v370_v38, %v338_v22  ;;  %v501_v49 = vld [vmem:[%s1149_s5] sm:$0xf]  ;;  %v703_v50 = vrot.slane %v702_v39, 4  ;;  %v383_v51 = vrot.slane %v381_v40, 5  ;;  %v542_v52 = vrot.slane %v540_v42, 4 }
  0x1d   : > { %v549_v53 = vshll.u32 %v518_v41, 16  ;;  %v378_v55 = vor.u32 %v377_v46, %v374_v36  ;;  %v545_v56 = vrot.slane %v543_v47, 5  ;;  %v710_v57 = vshrl.u32 %v1156_v43, 16  ;;  %v1165_v58 = vld [vmem:[%s1108_s22 + $0x10] sm:$0xf] }
  0x1e   : > { %v493_v54 = vmax.bf16 %v485_v5, %v477_v44  ;;  %v538_v59 = vsel %vm1136_vm2, %v533_v34, %v537_v30  ;;  %v713_v61 = vshll.u32 %v1156_v43, 16  ;;  %v719_v62 = vshll.u32 %v997_v48, 16  ;;  %v348_v3 = vld [vmem:[%s1108_s22 + $0x14] sm:$0x1]  ;;  %v1178_v8 = vld [vmem:[%s1120_s28 + $0x10] sm:$0xf] }
  0x1f   : > { %v551_v60 = vrot.slane %v549_v53, 5  ;;  %v379_v0 = vrot.slane %v378_v55, 4  ;;  %v546_v1 = vor.u32 %v545_v56, %v542_v52  ;;  %v712_v2 = vrot.slane %v710_v57, 4  ;;  %v988_v10 = vld [vmem:[%s1114_s25 + $0x8] sm:$0xf] }
  0x20   : > { %v509_v63 = vmax.bf16 %v501_v49, %v493_v54  ;;  %v708_v4 = vsel %vm1136_vm2, %v703_v50, %v1158_v45  ;;  %v715_v5 = vrot.slane %v713_v61, 5  ;;  %v1174_v6 = vrot.slane %v719_v62, 5  ;;  %v502_v16 = vld [vmem:[%s1149_s5 + $0x8] sm:$0xf]  ;;  %v519_v20 = vld [vmem:[%s1120_s28 + $0x14] sm:$0x1] }
  0x21   : > { %v386_v7 = vshrl.u32 %v1165_v58, 16  ;;  %v384_v11 = vsel %vm1136_vm2, %v379_v0, %v383_v51  ;;  %v547_v12 = vrot.slane %v546_v1, 4  ;;  %v389_v14 = vshll.u32 %v1165_v58, 16  ;;  %v332_v24 = vld [vmem:[%s1114_s25 + $0x10] sm:$0xf] }
  0x22   : > { %v645_v9 = vmax.bf16 %v538_v59, %v509_v63  ;;  %v478_v15 = vmax.bf16 %v384_v11, %v339_v35  ;;  %v716_v17 = vor.u32 %v715_v5, %v712_v2  ;;  %v395_v19 = vshll.u32 %v348_v3, 16  ;;  %v1193_v27 = vld [vmem:[%s1108_s22 + $0x18] sm:$0xf]  ;;  %v998_v36 = vld [vmem:[%s1108_s22 + $0x1c] sm:$0x1] }
  0x23   : > { %v388_v18 = vrot.slane %v386_v7, 4  ;;  %v552_v22 = vsel %vm1136_vm2, %v547_v12, %v551_v60  ;;  %v391_v25 = vrot.slane %v389_v14, 5  ;;  %v554_v26 = vshrl.u32 %v1178_v8, 16  ;;  %v1206_v40 = vld [vmem:[%s1108_s22 + $0x18] sm:$0xf] }
  0x24   : > { %v662_v21 = vmax.bf16 %v1128_v13, %v645_v9  ;;  %v494_v28 = vmax.bf16 %v1143_v33, %v478_v15  ;;  %v717_v29 = vrot.slane %v716_v17, 4  ;;  %v397_v30 = vrot.slane %v395_v19, 5  ;;  %v1213_v46 = vld [vmem:[%s1114_s25 + $0x18] sm:$0xf]  ;;  %v989_v48 = vld [vmem:[%s1114_s25 + $0x10] sm:$0xf] }
  0x25   : > { %v557_v31 = vshll.u32 %v1178_v8, 16  ;;  %v392_v34 = vor.u32 %v391_v25, %v388_v18  ;;  %v556_v13 = vrot.slane %v554_v26, 4  ;;  %v563_v35 = vshll.u32 %v519_v20, 16  ;;  %v349_v52 = vld [vmem:[%s1108_s22 + $0x1c] sm:$0x1] }
  0x26   : > { %v679_v32 = vmax.bf16 %v988_v10, %v662_v21  ;;  %v510_v37 = vmax.bf16 %v502_v16, %v494_v28  ;;  %v340_v33 = vmax.bf16 %v332_v24, %v1165_v58  ;;  %v724_v39 = vshrl.u32 %v1193_v27, 16  ;;  %v1223_v57 = vld [vmem:[%s1120_s28 + $0x18] sm:$0xf]  ;;  %v503_v60 = vld [vmem:[%s1149_s5 + $0x10] sm:$0xf] }
  0x27   : > { %v559_v38 = vrot.slane %v557_v31, 5  ;;  %v722_v42 = vsel %vm1136_vm2, %v717_v29, %v1174_v6  ;;  %v393_v44 = vrot.slane %v392_v34, 4  ;;  %v727_v45 = vshll.u32 %v1193_v27, 16  ;;  %v520_v3 = vld [vmem:[%s1120_s28 + $0x1c] sm:$0x1] }
  0x28   : > { %v815_v41 = vmax.bf16 %v708_v4, %v679_v32  ;;  %v646_v47 = vmax.bf16 %v552_v22, %v510_v37  ;;  %v726_v50 = vrot.slane %v724_v39, 4  ;;  %v733_v51 = vshll.u32 %v998_v36, 16  ;;  %v1234_v7 = vld [vmem:[%s1108_s22 + $0x20] sm:$0xf]  ;;  %v999_v14 = vld [vmem:[%s1108_s22 + $0x24] sm:$0x1] }
  0x29   : > { %v560_v49 = vor.u32 %v559_v38, %v556_v13  ;;  %v398_v53 = vsel %vm1136_vm2, %v393_v44, %v397_v30  ;;  %v565_v54 = vrot.slane %v563_v35, 5  ;;  %v729_v55 = vrot.slane %v727_v45, 5  ;;  %v1242_v22 = vld [vmem:[%s1108_s22 + $0x20] sm:$0xf]  ;;  %v350_v29 = vld [vmem:[%s1108_s22 + $0x24] sm:$0x1] }
  0x2a   : > { %824 = vst.msk [vmem:[%s1201_s9] sm:$0xf] %vm823_vm3, %v815_v41  ;;  %v400_v56 = vshrl.u32 %v1206_v40, 16  ;;  %v663_v58 = vmax.bf16 %v1156_v43, %v646_v47  ;;  %v479_v59 = vmax.bf16 %v398_v53, %v340_v33  ;;  %v341_v62 = vmax.bf16 %v1213_v46, %v1206_v40  ;;  %v990_v30 = vld [vmem:[%s1114_s25 + $0x18] sm:$0xf] }
  0x2b   : > { %v561_v61 = vrot.slane %v560_v49, 4  ;;  %v730_v63 = vor.u32 %v729_v55, %v726_v50  ;;  %v403_v1 = vshll.u32 %v1206_v40, 16  ;;  %v409_v2 = vshll.u32 %v349_v52, 16  ;;  %v1256_v38 = vld [vmem:[%s1120_s28 + $0x20] sm:$0xf] }
  0x2c   : > { %v402_v0 = vrot.slane %v400_v56, 4  ;;  %v680_v4 = vmax.bf16 %v989_v48, %v663_v58  ;;  %v495_v5 = vmax.bf16 %v1178_v8, %v479_v59  ;;  %v735_v6 = vrot.slane %v733_v51, 5  ;;  %v504_v40 = vld [vmem:[%s1149_s5 + $0x18] sm:$0xf]  ;;  %v521_v48 = vld [vmem:[%s1120_s28 + $0x24] sm:$0x1] }
  0x2d   : > { %v568_v43 = vshrl.u32 %v1223_v57, 16  ;;  %v566_v9 = vsel %vm1136_vm2, %v561_v61, %v565_v54  ;;  %v731_v10 = vrot.slane %v730_v63, 4  ;;  %v405_v11 = vrot.slane %v403_v1, 5  ;;  %v1264_v49 = vld [vmem:[%s1108_s22 + $0x28] sm:$0xf] }
  0x2e   : > { %v571_v12 = vshll.u32 %v1223_v57, 16  ;;  %v816_v15 = vmax.bf16 %v722_v42, %v680_v4  ;;  %v511_v16 = vmax.bf16 %v503_v60, %v495_v5  ;;  %v577_v17 = vshll.u32 %v520_v3, 16  ;;  %v334_v51 = vld [vmem:[%s1114_s25 + $0x20] sm:$0xf]  ;;  %v1000_v63 = vld [vmem:[%s1108_s22 + $0x2c] sm:$0x1] }
  0x2f   : > { %v570_v8 = vrot.slane %v568_v43, 4  ;;  %v406_v18 = vor.u32 %v405_v11, %v402_v0  ;;  %v411_v19 = vrot.slane %v409_v2, 5  ;;  %v738_v21 = vshrl.u32 %v1234_v7, 16  ;;  %v327_v4 = vld [vmem:[%s1108_s22 + $0x28] sm:$0xf] }
  0x30   : > { %v573_v20 = vrot.slane %v571_v12, 5  ;;  %825 = vst.msk [vmem:[%s1201_s9 + $0x4] sm:$0xf] %vm823_vm3, %v816_v15  ;;  %v647_v24 = vmax.bf16 %v566_v9, %v511_v16  ;;  %v736_v25 = vsel %vm1136_vm2, %v731_v10, %v735_v6  ;;  %v741_v26 = vshll.u32 %v1234_v7, 16  ;;  %v335_v5 = vld [vmem:[%s1114_s25 + $0x28] sm:$0xf] }
  0x31   : > { %v747_v28 = vshll.u32 %v999_v14, 16  ;;  %v407_v31 = vrot.slane %v406_v18, 4  ;;  %v579_v34 = vrot.slane %v577_v17, 5  ;;  %v740_v13 = vrot.slane %v738_v21, 4  ;;  %v351_v16 = vld [vmem:[%s1108_s22 + $0x2c] sm:$0x1] }
  0x32   : > { %v574_v32 = vor.u32 %v573_v20, %v570_v8  ;;  %v664_v35 = vmax.bf16 %v1193_v27, %v647_v24  ;;  %v743_v36 = vrot.slane %v741_v26, 5  ;;  %v414_v33 = vshrl.u32 %v1242_v22, 16  ;;  %v1285_v8 = vld [vmem:[%s1120_s28 + $0x28] sm:$0xf]  ;;  %v991_v17 = vld [vmem:[%s1114_s25 + $0x20] sm:$0xf] }
  0x33   : > { %v1252_v37 = vrot.slane %v747_v28, 5  ;;  %v412_v39 = vsel %vm1136_vm2, %v407_v31, %v411_v19  ;;  %v417_v42 = vshll.u32 %v1242_v22, 16  ;;  %v423_v44 = vshll.u32 %v350_v29, 16 }
  0x34   : > { %v575_v41 = vrot.slane %v574_v32, 4  ;;  %v681_v45 = vmax.bf16 %v990_v30, %v664_v35  ;;  %v480_v46 = vmax.bf16 %v412_v39, %v341_v62  ;;  %v744_v47 = vor.u32 %v743_v36, %v740_v13  ;;  %v522_v32 = vld [vmem:[%s1120_s28 + $0x2c] sm:$0x1] }
  0x35   : > { %v416_v27 = vrot.slane %v414_v33, 4  ;;  %v419_v52 = vrot.slane %v417_v42, 5  ;;  %v425_v53 = vrot.slane %v423_v44, 5  ;;  %v582_v54 = vshrl.u32 %v1256_v38, 16  ;;  %v1001_v42 = vld [vmem:[%s1108_s22 + $0x34] sm:$0x1] }
  0x36   : > { %v580_v50 = vsel %vm1136_vm2, %v575_v41, %v579_v34  ;;  %v817_v55 = vmax.bf16 %v736_v25, %v681_v45  ;;  %v496_v56 = vmax.bf16 %v1223_v57, %v480_v46  ;;  %v745_v58 = vrot.slane %v744_v47, 4  ;;  %v505_v25 = vld [vmem:[%s1149_s5 + $0x20] sm:$0xf] }
  0x37   : > { %v585_v59 = vshll.u32 %v1256_v38, 16  ;;  %v420_v60 = vor.u32 %v419_v52, %v416_v27  ;;  %v584_v61 = vrot.slane %v582_v54, 4  ;;  %v591_v62 = vshll.u32 %v521_v48, 16 }
  0x38   : > { %v752_v0 = vshrl.u32 %v1264_v49, 16  ;;  %826 = vst.msk [vmem:[%s1201_s9 + $0x8] sm:$0xf] %vm823_vm3, %v817_v55  ;;  %v512_v1 = vmax.bf16 %v504_v40, %v496_v56  ;;  %v342_v2 = vmax.bf16 %v334_v51, %v1242_v22  ;;  %v755_v57 = vshll.u32 %v1264_v49, 16  ;;  %v1305_v51 = vld [vmem:[%s1108_s22 + $0x30] sm:$0xf] }
  0x39   : > { %v587_v3 = vrot.slane %v585_v59, 5  ;;  %v750_v6 = vsel %vm1136_vm2, %v745_v58, %v1252_v37  ;;  %v421_v43 = vrot.slane %v420_v60, 4  ;;  %v593_v9 = vrot.slane %v591_v62, 5  ;;  %v352_v55 = vld [vmem:[%s1108_s22 + $0x34] sm:$0x1] }
  0x3a   : > { %v754_v10 = vrot.slane %v752_v0, 4  ;;  %v648_v11 = vmax.bf16 %v580_v50, %v512_v1  ;;  %v757_v14 = vrot.slane %v755_v57, 5  ;;  %v761_v15 = vshll.u32 %v1000_v63, 16  ;;  %v992_v56 = vld [vmem:[%s1114_s25 + $0x28] sm:$0xf] }
  0x3b   : > { %v588_v12 = vor.u32 %v587_v3, %v584_v61  ;;  %v426_v18 = vsel %vm1136_vm2, %v421_v43, %v425_v53  ;;  %v343_v19 = vmax.bf16 %v335_v5, %v327_v4  ;;  %v428_v20 = vshrl.u32 %v327_v4, 16  ;;  %v1314_v62 = vld [vmem:[%s1120_s28 + $0x30] sm:$0xf]  ;;  %v506_v3 = vld [vmem:[%s1149_s5 + $0x28] sm:$0xf] }
  0x3c   : > { %v431_v21 = vshll.u32 %v327_v4, 16  ;;  %v665_v22 = vmax.bf16 %v1234_v7, %v648_v11  ;;  %v481_v24 = vmax.bf16 %v426_v18, %v342_v2  ;;  %v758_v28 = vor.u32 %v757_v14, %v754_v10  ;;  %v1298_v7 = vld [vmem:[%s1108_s22 + $0x30] sm:$0xf] }
  0x3d   : > { %v589_v26 = vrot.slane %v588_v12, 4  ;;  %v430_v29 = vrot.slane %v428_v20, 4  ;;  %v437_v31 = vshll.u32 %v351_v16, 16  ;;  %v596_v34 = vshrl.u32 %v1285_v8, 16  ;;  %v1326_v12 = vld [vmem:[%s1108_s22 + $0x38] sm:$0xf] }
  0x3e   : > { %v433_v30 = vrot.slane %v431_v21, 5  ;;  %v682_v13 = vmax.bf16 %v991_v17, %v665_v22  ;;  %v497_v35 = vmax.bf16 %v1256_v38, %v481_v24  ;;  %v763_v37 = vrot.slane %v761_v15, 5  ;;  %v336_v17 = vld [vmem:[%s1114_s25 + $0x30] sm:$0xf]  ;;  %v1002_v22 = vld [vmem:[%s1108_s22 + $0x3c] sm:$0x1] }
  0x3f   : > { %v594_v36 = vsel %vm1136_vm2, %v589_v26, %v593_v9  ;;  %v439_v39 = vrot.slane %v437_v31, 5  ;;  %v598_v40 = vrot.slane %v596_v34, 4  ;;  %v599_v41 = vshll.u32 %v1285_v8, 16  ;;  %v993_v24 = vld [vmem:[%s1114_s25 + $0x30] sm:$0xf] }
  0x40   : > { %v434_v33 = vor.u32 %v433_v30, %v430_v29  ;;  %v818_v44 = vmax.bf16 %v750_v6, %v682_v13  ;;  %v513_v45 = vmax.bf16 %v505_v25, %v497_v35  ;;  %v759_v46 = vrot.slane %v758_v28, 4  ;;  %v329_v13 = vld [vmem:[%s1108_s22 + $0x38] sm:$0xf]  ;;  %v353_v35 = vld [vmem:[%s1108_s22 + $0x3c] sm:$0x1] }
  0x41   : > { %v605_v38 = vshll.u32 %v522_v32, 16  ;;  %v601_v27 = vrot.slane %v599_v41, 5  ;;  %v766_v48 = vshrl.u32 %v1298_v7, 16  ;;  %v769_v50 = vshll.u32 %v1298_v7, 16 }
  0x42   : > { %v435_v47 = vrot.slane %v434_v33, 4  ;;  %827 = vst.msk [vmem:[%s1201_s9 + $0xc] sm:$0xf] %vm823_vm3, %v818_v44  ;;  %v649_v52 = vmax.bf16 %v594_v36, %v513_v45  ;;  %v775_v54 = vshll.u32 %v1001_v42, 16  ;;  %v764_v0 = vsel %vm1136_vm2, %v759_v46, %v763_v37  ;;  %v492_v46 = vld [vmem:[%s1120_s28 + $0x38] sm:$0xf] }
  0x43   : > { %v607_v53 = vrot.slane %v605_v38, 5  ;;  %v602_v59 = vor.u32 %v601_v27, %v598_v40  ;;  %v768_v60 = vrot.slane %v766_v48, 4  ;;  %v771_v61 = vrot.slane %v769_v50, 5  ;;  %v337_v40 = vld [vmem:[%s1114_s25 + $0x38] sm:$0xf] }
  0x44   : > { %v440_v58 = vsel %vm1136_vm2, %v435_v47, %v439_v39  ;;  %v666_v63 = vmax.bf16 %v1264_v49, %v649_v52  ;;  %v442_v2 = vshrl.u32 %v1305_v51, 16  ;;  %v445_v5 = vshll.u32 %v1305_v51, 16  ;;  %v523_v49 = vld [vmem:[%s1120_s28 + $0x34] sm:$0x1]  ;;  %v507_v52 = vld [vmem:[%s1149_s5 + $0x30] sm:$0xf] }
  0x45   : > { %v482_v1 = vmax.bf16 %v440_v58, %v343_v19  ;;  %v603_v57 = vrot.slane %v602_v59, 4  ;;  %v772_v4 = vor.u32 %v771_v61, %v768_v60  ;;  %v451_v6 = vshll.u32 %v352_v55, 16  ;;  %v524_v55 = vld [vmem:[%s1120_s28 + $0x3c] sm:$0x1]  ;;  %v987_v60 = vld [vmem:[%s1108_s22 + $0x40] sm:$0xf] }
  0x46   : > { %v683_v43 = vmax.bf16 %v992_v56, %v666_v63  ;;  %v444_v10 = vrot.slane %v442_v2, 4  ;;  %v610_v11 = vshrl.u32 %v1314_v62, 16  ;;  %v777_v16 = vrot.slane %v775_v54, 5  ;;  %v1003_v2 = vld [vmem:[%s1108_s22 + $0x44] sm:$0x1] }
  0x47   : > { %v498_v9 = vmax.bf16 %v1285_v8, %v482_v1  ;;  %v608_v14 = vsel %vm1136_vm2, %v603_v57, %v607_v53  ;;  %v773_v15 = vrot.slane %v772_v4, 4  ;;  %v447_v18 = vrot.slane %v445_v5, 5 }
  0x48   : > { %v819_v19 = vmax.bf16 %v764_v0, %v683_v43  ;;  %v612_v21 = vrot.slane %v610_v11, 4  ;;  %v613_v8 = vshll.u32 %v1314_v62, 16  ;;  %v453_v26 = vrot.slane %v451_v6, 5 }
  0x49   : > { %v514_v20 = vmax.bf16 %v506_v3, %v498_v9  ;;  %v448_v25 = vor.u32 %v447_v18, %v444_v10  ;;  %v619_v28 = vshll.u32 %v523_v49, 16  ;;  %v780_v29 = vshrl.u32 %v1326_v12, 16  ;;  %v994_v18 = vld [vmem:[%s1114_s25 + $0x38] sm:$0xf] }
  0x4a   : > { %828 = vst.msk [vmem:[%s1201_s9 + $0x10] sm:$0xf] %vm823_vm3, %v819_v19  ;;  %v344_v31 = vmax.bf16 %v336_v17, %v1305_v51  ;;  %v615_v32 = vrot.slane %v613_v8, 5  ;;  %v783_v34 = vshll.u32 %v1326_v12, 16  ;;  %v778_v36 = vsel %vm1136_vm2, %v773_v15, %v777_v16 }
  0x4b   : > { %v650_v30 = vmax.bf16 %v608_v14, %v514_v20  ;;  %v449_v37 = vrot.slane %v448_v25, 4  ;;  %v782_v33 = vrot.slane %v780_v29, 4  ;;  %v789_v39 = vshll.u32 %v1002_v22, 16 }
  0x4c   : > { %v616_v42 = vor.u32 %v615_v32, %v612_v21  ;;  %v621_v44 = vrot.slane %v619_v28, 5  ;;  %v785_v45 = vrot.slane %v783_v34, 5  ;;  %v456_v47 = vshrl.u32 %v329_v13, 16  ;;  %v508_v28 = vld [vmem:[%s1149_s5 + $0x38] sm:$0xf] }
  0x4d   : > { %v667_v41 = vmax.bf16 %v1298_v7, %v650_v30  ;;  %v454_v38 = vsel %vm1136_vm2, %v449_v37, %v453_v26  ;;  %v459_v27 = vshll.u32 %v329_v13, 16  ;;  %v465_v48 = vshll.u32 %v353_v35, 16  ;;  %v995_v37 = vld [vmem:[%s1114_s25 + $0x40] sm:$0xf] }
  0x4e   : > { %v483_v51 = vmax.bf16 %v454_v38, %v344_v31  ;;  %v617_v53 = vrot.slane %v616_v42, 4  ;;  %v345_v54 = vmax.bf16 %v337_v40, %v329_v13  ;;  %v786_v7 = vor.u32 %v785_v45, %v782_v33 }
  0x4f   : > { %v684_v50 = vmax.bf16 %v993_v24, %v667_v41  ;;  %v458_v56 = vrot.slane %v456_v47, 4  ;;  %v461_v58 = vrot.slane %v459_v27, 5  ;;  %v624_v59 = vshrl.u32 %v492_v46, 16 }
  0x50   : > { %v499_v63 = vmax.bf16 %v1314_v62, %v483_v51  ;;  %v622_v0 = vsel %vm1136_vm2, %v617_v53, %v621_v44  ;;  %v467_v1 = vrot.slane %v465_v48, 5  ;;  %v627_v4 = vshll.u32 %v492_v46, 16 }
  0x51   : > { %v820_v61 = vmax.bf16 %v778_v36, %v684_v50  ;;  %v462_v3 = vor.u32 %v461_v58, %v458_v56  ;;  %v626_v57 = vrot.slane %v624_v59, 4  ;;  %v633_v5 = vshll.u32 %v524_v55, 16 }
  0x52   : > { %v515_v6 = vmax.bf16 %v507_v52, %v499_v63  ;;  %v791_v43 = vrot.slane %v789_v39, 5  ;;  %v794_v9 = vshrl.u32 %v987_v60, 16  ;;  %v797_v10 = vshll.u32 %v987_v60, 16 }
  0x53   : > { %829 = vst.msk [vmem:[%s1201_s9 + $0x14] sm:$0xf] %vm823_vm3, %v820_v61  ;;  %v787_v49 = vrot.slane %v786_v7, 4  ;;  %v463_v11 = vrot.slane %v462_v3, 4  ;;  %v629_v62 = vrot.slane %v627_v4, 5  ;;  %v803_v14 = vshll.u32 %v1003_v2, 16 }
  0x54   : > { %v651_v15 = vmax.bf16 %v622_v0, %v515_v6  ;;  %v796_v16 = vrot.slane %v794_v9, 4  ;;  %v799_v17 = vrot.slane %v797_v10, 5  ;;  %v635_v21 = vrot.slane %v633_v5, 5 }
  0x55   : > { %v468_v19 = vsel %vm1136_vm2, %v463_v11, %v467_v1  ;;  %v630_v20 = vor.u32 %v629_v62, %v626_v57  ;;  %v805_v25 = vrot.slane %v803_v14, 5  ;;  %v792_v26 = vsel %vm1136_vm2, %v787_v49, %v791_v43 }
  0x56   : > { %v668_v8 = vmax.bf16 %v1326_v12, %v651_v15  ;;  %v484_v22 = vmax.bf16 %v468_v19, %v345_v54  ;;  %v800_v24 = vor.u32 %v799_v17, %v796_v16 }
  0x57   : > { %v631_v29 = vrot.slane %v630_v20, 4 }
  0x58   : > { %v685_v30 = vmax.bf16 %v994_v18, %v668_v8  ;;  %v500_v31 = vmax.bf16 %v492_v46, %v484_v22  ;;  %v801_v32 = vrot.slane %v800_v24, 4 }
  0x59   : > { %v636_v34 = vsel %vm1136_vm2, %v631_v29, %v635_v21 }
  0x5a   : > { %v821_v13 = vmax.bf16 %v792_v26, %v685_v30  ;;  %v516_v35 = vmax.bf16 %v508_v28, %v500_v31  ;;  %v806_v12 = vsel %vm1136_vm2, %v801_v32, %v805_v25 }
  0x5c   : > { %830 = vst.msk [vmem:[%s1201_s9 + $0x18] sm:$0xf] %vm823_vm3, %v821_v13  ;;  %v652_v36 = vmax.bf16 %v636_v34, %v516_v35 }
  0x5e   : > { %v669_v33 = vmax.bf16 %v987_v60, %v652_v36 }
  0x60   : > { %v686_v39 = vmax.bf16 %v995_v37, %v669_v33 }
  0x62   : > { %v822_v40 = vmax.bf16 %v806_v12, %v686_v39 }
  0x64   : > { %831 = vst.msk [vmem:[%s1201_s9 + $0x1c] sm:$0xf] %vm823_vm3, %v822_v40 }
  0x65 PF: > { %s14_s17 = sadd.s32 1, %s1054_s17   ;;  %s1389_s15 = smov %s1050_s16 }
  0x66   : > { %p11_p5 = scmp.ge.s32.totalorder %s14_s17, 4   ;;  %s1390_s16 = smov %s1392_s18 }
  0x68   :  { %13 = sbr.rel (!%p11_p5) target bundleno = 2 (0x2), region = 77 }

// kernel: _lambda_.74
= control target key start
LH: loop header
LB: loop body
LE: loop exit
PB: predicated region body
PF: predicated region fallthrough
CT: control target
= control target key end

     0   :  { %s477_s1 = inlined_call_operand.vmem [shape: bf16[256,128], index: 1, kind: input, shape index: {}]   ;;  %s478_s0 = inlined_call_operand.vmem [shape: bf16[32,256], index: 0, kind: input, shape index: {}]   ;;  %s479_s2 = inlined_call_operand.vmem [shape: f32[1,128], index: 2, kind: input, shape index: {}]   ;;  %s480_s3 = inlined_call_operand.vmem [shape: bf16[32,128], index: 3, kind: output, shape index: {}]  }
   0x1   :  { %v366_v0 = vld [vmem:[%s477_s1 + $0x40] sm:$0xff]   ;;  %v368_v2 = vld [vmem:[%s477_s1 + $0x48] sm:$0xff]   ;;  %v370_v4 = vld [vmem:[%s477_s1 + $0x50] sm:$0xff]  }
   0x2   :  { %v367_v1 = vld [vmem:[%s477_s1] sm:$0xff]   ;;  %322 = vmatprep.subr.bf16.mxu0 %v366_v0  ;;  %350 = vmatprep.subr.bf16.mxu1 %v366_v0  ;;  %v369_v3 = vld [vmem:[%s477_s1 + $0x8] sm:$0xff]   ;;  %v371_v5 = vld [vmem:[%s477_s1 + $0x10] sm:$0xff]  }
   0x3   :  { %323 = vmatpush3.bf16.msra.mxu0 %v367_v1  ;;  %358 = vmatpush3.bf16.msra.mxu1 %v367_v1  ;;  %v372_v6 = vld [vmem:[%s477_s1 + $0x58] sm:$0xff]   ;;  %v374_v8 = vld [vmem:[%s477_s1 + $0x60] sm:$0xff]   ;;  %v376_v10 = vld [vmem:[%s477_s1 + $0x68] sm:$0xff]  }
   0x4   :  { %324 = vmatprep.subr.bf16.mxu0 %v368_v2  ;;  %351 = vmatprep.subr.bf16.mxu1 %v368_v2  ;;  %v373_v7 = vld [vmem:[%s477_s1 + $0x18] sm:$0xff]   ;;  %v375_v9 = vld [vmem:[%s477_s1 + $0x20] sm:$0xff]   ;;  %v377_v13 = vld [vmem:[%s477_s1 + $0x28] sm:$0xff]  }
   0x5   :  { %v384_v11 = vld [vmem:[%s478_s0 + $0x4] ss:$8 sps:$4 sm:$0xff]   ;;  %v387_v12 = vld [vmem:[%s478_s0 + $0x14] ss:$8 sps:$4 sm:$0xff]   ;;  %v382_v18 = vld [vmem:[%s478_s0] ss:$8 sps:$4 sm:$0xff]  }
   0x6   :  { %v378_v14 = vld [vmem:[%s477_s1 + $0x70] sm:$0xff]   ;;  %211 = vmatprep.mubr.bf16.mxu0 %v384_v11  ;;  %219 = vmatprep.mubr.bf16.mxu1 %v387_v12  ;;  %v380_v16 = vld [vmem:[%s477_s1 + $0x78] sm:$0xff]   ;;  %v302_v23 = vld [vmem:[%s479_s2] ss:$0 sm:$0xff] }
   0x7   :  { %325 = vmatpush3.bf16.msra.mxu0 %v369_v3  ;;  %359 = vmatpush3.bf16.msra.mxu1 %v369_v3  ;;  %v379_v15 = vld [vmem:[%s477_s1 + $0x30] sm:$0xff]   ;;  %v381_v17 = vld [vmem:[%s477_s1 + $0x38] sm:$0xff]  }
   0x8   :  { %326 = vmatprep.subr.bf16.mxu0 %v370_v4  ;;  %352 = vmatprep.subr.bf16.mxu1 %v370_v4  ;;  %v385_v19 = vld [vmem:[%s478_s0 + $0x10] ss:$8 sps:$4 sm:$0xff]  }
   0xb   :  { %327 = vmatpush3.bf16.msra.mxu0 %v371_v5  ;;  %360 = vmatpush3.bf16.msra.mxu1 %v371_v5 }
   0xc   :  { %328 = vmatprep.subr.bf16.mxu0 %v372_v6  ;;  %353 = vmatprep.subr.bf16.mxu1 %v372_v6 }
   0xf   :  { %329 = vmatpush3.bf16.msra.mxu0 %v373_v7  ;;  %361 = vmatpush3.bf16.msra.mxu1 %v373_v7 }
  0x10   :  { %330 = vmatprep.subr.bf16.mxu0 %v374_v8  ;;  %354 = vmatprep.subr.bf16.mxu1 %v374_v8 }
  0x13   :  { %331 = vmatpush3.bf16.msra.mxu0 %v375_v9  ;;  %362 = vmatpush3.bf16.msra.mxu1 %v375_v9 }
  0x14   :  { %332 = vmatprep.subr.bf16.mxu0 %v376_v10  ;;  %355 = vmatprep.subr.bf16.mxu1 %v376_v10 }
  0x17   :  { %333 = vmatpush3.bf16.msra.mxu0 %v377_v13  ;;  %363 = vmatpush3.bf16.msra.mxu1 %v377_v13 }
  0x18   :  { %334 = vmatprep.subr.bf16.mxu0 %v378_v14  ;;  %356 = vmatprep.subr.bf16.mxu1 %v378_v14 }
  0x1b   :  { %335 = vmatpush3.bf16.msra.mxu0 %v379_v15  ;;  %364 = vmatpush3.bf16.msra.mxu1 %v379_v15 }
  0x1c   :  { %336 = vmatprep.subr.bf16.mxu0 %v380_v16  ;;  %357 = vmatprep.subr.bf16.mxu1 %v380_v16 }
  0x1f   :  { %337 = vmatpush3.bf16.msra.mxu0 %v381_v17  ;;  %365 = vmatpush3.bf16.msra.mxu1 %v381_v17 }
  0x22   :  { %212 = vmatmul.mubr.bf16.vlgmr.msra.gmra.mrb[0].mxu0 %v382_v18  ;;  %220 = vmatmul.mubr.bf16.vlgmr.msra.gmra.mrb[0].mxu1 %v385_v19 }
  0xf5   :  { %v338_v20 = vpop.f32.mrb[0].mxu0  ;;  %v344_v21 = vpop.f32.mrb[0].mxu1 }
  0xf6   :  { %v339_v22 = vpop.f32.mrb[1].mxu0  ;;  %v345_v24 = vpop.f32.mrb[1].mxu1 }
  0xf7   :  { %v340_v25 = vadd.f32 %v339_v22, %v338_v20  ;;  %v346_v26 = vadd.f32 %v345_v24, %v344_v21  ;;  %v341_v27 = vpop.f32.mrb[2].mxu0  ;;  %v347_v28 = vpop.f32.mrb[2].mxu1 }
  0xf8   :  { %v342_v29 = vpop.f32.mrb[3].mxu0  ;;  %v348_v30 = vpop.f32.mrb[3].mxu1 }
  0xf9   :  { %v250_v31 = vadd.f32 %v340_v25, %v302_v23  ;;  %v252_v32 = vadd.f32 %v346_v26, %v302_v23  ;;  %v343_v33 = vadd.f32 %v342_v29, %v341_v27  ;;  %v349_v34 = vadd.f32 %v348_v30, %v347_v28 }
  0xfb   :  { %v251_v35 = vadd.f32 %v343_v33, %v302_v23  ;;  %v253_v36 = vadd.f32 %v349_v34, %v302_v23  ;;  %v254_v37 = vmax.f32 %v250_v31, 0.0  ;;  %v256_v38 = vmax.f32 %v252_v32, 0.0 }
  0xfd   :  { %v255_v39 = vmax.f32 %v251_v35, 0.0  ;;  %v257_v40 = vmax.f32 %v253_v36, 0.0 }
  0xff   :  { %v314_v41 = vpack.c.bf16 %v255_v39, %v254_v37  ;;  %v319_v42 = vpack.c.bf16 %v257_v40, %v256_v38 }
 0x101   :  { %315 = vst [vmem:[%s480_s3] sm:$0xff] %v314_v41   ;;  %321 = vst [vmem:[%s480_s3 + $0x8] sm:$0xff] %v319_v42  }

// kernel: _lambda_.75
= control target key start
LH: loop header
LB: loop body
LE: loop exit
PB: predicated region body
PF: predicated region fallthrough
CT: control target
= control target key end

     0   :  { %s754_s15 = smov 0   ;;  %s756_s16 = smov 0   ;;  %s854_s0 = inlined_call_operand.vmem [shape: bf16[2,5,5,16], index: 0, kind: input, shape index: {}]   ;;  %s855_s1 = inlined_call_operand.vmem [shape: bf16[2,5,5,16], index: 1, kind: input, shape index: {}]   ;;  %s856_s2 = inlined_call_operand.vmem [shape: bf16[2,5,5,16], index: 2, kind: input, shape index: {}]   ;;  %s857_s3 = inlined_call_operand.vmem [shape: bf16[2,5,5,16], index: 3, kind: input, shape index: {}]   ;;  %s858_s4 = inlined_call_operand.vmem [shape: bf16[2,4,4,16], index: 4, kind: output, shape index: {}]  }
   0x1   :  { %s758_s17 = smov 0  }
   0x2 LB: > { %s26_s18 = sadd.s32 1, %s723_s16  ;;  %p658_p0 = scmp.ge.s32.totalorder %s727_s17, 1  ;;  %s727_s17 = sphi %s758_s17, %s14_s17   ;;  %s723_s16 = sphi %s756_s16, %s860_s16   ;;  %s719_s15 = sphi %s754_s15, %s859_s15  }
   0x3   : > { %p28_p1 = scmp.ge.s32.totalorder %s26_s18, 2  ;;  %p226_p2 = scmp.lt.s32.totalorder %s727_s17, 3 }
   0x5   : > { %s862_s18 = smov (%p28_p1, %s26_s18), 0  ;;  %p227_p3 = pnand %p658_p0, %p226_p2 }
   0x6   : > { %p282_p4 = scmp.lt.s32.totalorder (!%p227_p3), %s719_s15, 1  ;;  %vm512_vm0 = vcmask (!%p227_p3), 123904  }
   0x7   : > { %230 = sbr.rel (%p227_p3) target bundleno = 58 (0x3a), region = 36 }
   0xe   : > { %s864_s15 = smov (!%p282_p4, %s719_s15), 1 }
   0xf   : > { %s680_s19 = smul.u32 20, %s864_s15  ;;  %s679_s6 = sshll.u32 %s864_s15, 3 }
  0x10   : > { %s826_s9 = scalar_lea.vmem %s858_s4, %s679_s6 }
  0x11   : > { %s778_s22 = scalar_lea.vmem %s854_s0, %s680_s19  ;;  %s783_s25 = scalar_lea.vmem %s855_s1, %s680_s19 }
  0x12   : > { %s788_s28 = scalar_lea.vmem %s856_s2, %s680_s19  ;;  %v334_v0 = vld [vmem:[%s778_s22] sm:$0x7]  ;;  %v673_v10 = vld [vmem:[%s778_s22 + $0x4] sm:$0x7]  ;;  %s801_s5 = scalar_lea.vmem %s857_s3, %s680_s19  ;;  %v674_v35 = vld [vmem:[%s778_s22 + $0x8] sm:$0x7] }
  0x13   : > { %v339_v1 = vshrl.u32 %v334_v0, 16  ;;  %v342_v2 = vshll.u32 %v334_v0, 16  ;;  %v322_v3 = vld [vmem:[%s778_s22] sm:$0x3]  ;;  %v469_v11 = vshrl.u32 %v673_v10, 16  ;;  %v472_v12 = vshll.u32 %v673_v10, 16 }
  0x14   : > { %v326_v4 = vld [vmem:[%s783_s25] sm:$0x3]  ;;  %v323_v17 = vld [vmem:[%s778_s22 + $0x4] sm:$0x3]  ;;  %v478_v40 = vshrl.u32 %v674_v35, 16  ;;  %v481_v43 = vshll.u32 %v674_v35, 16 }
  0x15   : > { %v398_v5 = vld [vmem:[%s788_s28] sm:$0x7]  ;;  %v341_v6 = vrot.slane %v339_v1, 4  ;;  %v344_v7 = vrot.slane %v342_v2, 5  ;;  %v330_v13 = vmax.bf16 %v326_v4, %v322_v3  ;;  %v335_v18 = vld [vmem:[%s778_s22 + $0x4] sm:$0x7] }
  0x16   : > { %v403_v8 = vshrl.u32 %v398_v5, 16  ;;  %v406_v9 = vshll.u32 %v398_v5, 16  ;;  %v471_v19 = vrot.slane %v469_v11, 4  ;;  %v474_v20 = vrot.slane %v472_v12, 5  ;;  %v327_v21 = vld [vmem:[%s783_s25 + $0x4] sm:$0x3] }
  0x17   : > { %v345_v14 = vor.u32 %v344_v7, %v341_v6  ;;  %v348_v22 = vshrl.u32 %v335_v18, 16  ;;  %v351_v23 = vshll.u32 %v335_v18, 16  ;;  %v399_v26 = vld [vmem:[%s788_s28 + $0x4] sm:$0x7]  ;;  %v382_v27 = vld [vmem:[%s788_s28] sm:$0x3]  ;;  %v331_v33 = vmax.bf16 %v327_v21, %v323_v17 }
  0x18   : > { %v405_v15 = vrot.slane %v403_v8, 4  ;;  %v408_v16 = vrot.slane %v406_v9, 5  ;;  %v475_v28 = vor.u32 %v474_v20, %v471_v19  ;;  %v412_v31 = vshrl.u32 %v399_v26, 16  ;;  %v390_v36 = vld [vmem:[%s801_s5] sm:$0x3] }
  0x19   : > { %v346_v24 = vrot.slane %v345_v14, 4  ;;  %v350_v29 = vrot.slane %v348_v22, 4  ;;  %v353_v30 = vrot.slane %v351_v23, 5  ;;  %v415_v34 = vshll.u32 %v399_v26, 16  ;;  %v324_v44 = vld [vmem:[%s778_s22 + $0x8] sm:$0x3] }
  0x1a   : > { %v409_v25 = vor.u32 %v408_v16, %v405_v15  ;;  %v414_v39 = vrot.slane %v412_v31, 4  ;;  %v336_v45 = vld [vmem:[%s778_s22 + $0x8] sm:$0x7]  ;;  %v476_v46 = vrot.slane %v475_v28, 4  ;;  %v383_v52 = vld [vmem:[%s788_s28 + $0x4] sm:$0x3] }
  0x1b   : > { %v378_v32 = vmax.bf16 %v346_v24, %v330_v13  ;;  %v354_v38 = vor.u32 %v353_v30, %v350_v29  ;;  %v417_v42 = vrot.slane %v415_v34, 5  ;;  %v328_v48 = vld [vmem:[%s783_s25 + $0x8] sm:$0x3]  ;;  %v357_v49 = vshrl.u32 %v336_v45, 16  ;;  %v665_v57 = vld [vmem:[%s778_s22 + $0x4] sm:$0x3] }
  0x1c   : > { %v410_v37 = vrot.slane %v409_v25, 4  ;;  %v360_v50 = vshll.u32 %v336_v45, 16  ;;  %v480_v54 = vrot.slane %v478_v40, 4  ;;  %v483_v55 = vrot.slane %v481_v43, 5  ;;  %v400_v56 = vld [vmem:[%s788_s28 + $0x8] sm:$0x7] }
  0x1d   : > { %v386_v41 = vmax.bf16 %v382_v27, %v378_v32  ;;  %v355_v47 = vrot.slane %v354_v38, 4  ;;  %v418_v53 = vor.u32 %v417_v42, %v414_v39  ;;  %v359_v59 = vrot.slane %v357_v49, 4  ;;  %v391_v63 = vld [vmem:[%s801_s5 + $0x4] sm:$0x3]  ;;  %v675_v3 = vld [vmem:[%s778_s22 + $0xc] sm:$0x7] }
  0x1e   : > { %v362_v60 = vrot.slane %v360_v50, 5  ;;  %v421_v61 = vshrl.u32 %v400_v56, 16  ;;  %v332_v1 = vmax.bf16 %v328_v48, %v324_v44  ;;  %v424_v2 = vshll.u32 %v400_v56, 16  ;;  %v669_v4 = vld [vmem:[%s783_s25 + $0x4] sm:$0x3] }
  0x1f   : > { %v394_v51 = vmax.bf16 %v390_v36, %v386_v41  ;;  %v379_v58 = vmax.bf16 %v355_v47, %v331_v33  ;;  %v419_v0 = vrot.slane %v418_v53, 4  ;;  %v487_v8 = vshrl.u32 %v675_v3, 16  ;;  %v337_v9 = vld [vmem:[%s778_s22 + $0xc] sm:$0x7]  ;;  %v666_v21 = vld [vmem:[%s778_s22 + $0x8] sm:$0x3] }
  0x20   : > { %v363_v6 = vor.u32 %v362_v60, %v359_v59  ;;  %v423_v7 = vrot.slane %v421_v61, 4  ;;  %v484_v11 = vor.u32 %v483_v55, %v480_v54  ;;  %v426_v12 = vrot.slane %v424_v2, 5  ;;  %v325_v14 = vld [vmem:[%s778_s22 + $0xc] sm:$0x3]  ;;  %v384_v22 = vld [vmem:[%s788_s28 + $0x8] sm:$0x3] }
  0x21   : > { %v442_v62 = vmax.bf16 %v410_v37, %v394_v51  ;;  %v387_v5 = vmax.bf16 %v383_v52, %v379_v58  ;;  %v490_v13 = vshll.u32 %v675_v3, 16  ;;  %v489_v17 = vrot.slane %v487_v8, 4  ;;  %v329_v18 = vld [vmem:[%s783_s25 + $0xc] sm:$0x3]  ;;  %v676_v30 = vld [vmem:[%s778_s22 + $0x10] sm:$0x7] }
  0x22   : > { %v364_v16 = vrot.slane %v363_v6, 4  ;;  %v401_v19 = vld [vmem:[%s788_s28 + $0xc] sm:$0x7]  ;;  %v427_v23 = vor.u32 %v426_v12, %v423_v7  ;;  %v366_v25 = vshrl.u32 %v337_v9, 16  ;;  %v369_v28 = vshll.u32 %v337_v9, 16 }
  0x23   : > { %v451_v10 = vmax.bf16 %v665_v57, %v442_v62  ;;  %v395_v15 = vmax.bf16 %v391_v63, %v387_v5  ;;  %v492_v24 = vrot.slane %v490_v13, 5  ;;  %v430_v29 = vshrl.u32 %v401_v19, 16  ;;  %v670_v32 = vld [vmem:[%s783_s25 + $0x8] sm:$0x3]  ;;  %v667_v49 = vld [vmem:[%s778_s22 + $0xc] sm:$0x3] }
  0x24   : > { %v380_v27 = vmax.bf16 %v364_v16, %v332_v1  ;;  %v485_v33 = vrot.slane %v484_v11, 4  ;;  %v392_v34 = vld [vmem:[%s801_s5 + $0x8] sm:$0x3]  ;;  %v333_v35 = vmax.bf16 %v329_v18, %v325_v14  ;;  %v368_v36 = vrot.slane %v366_v25, 4  ;;  %v671_v54 = vld [vmem:[%s783_s25 + $0xc] sm:$0x3] }
  0x25   : > { %v460_v20 = vmax.bf16 %v669_v4, %v451_v10  ;;  %v443_v26 = vmax.bf16 %v419_v0, %v395_v15  ;;  %v428_v39 = vrot.slane %v427_v23, 4  ;;  %v371_v40 = vrot.slane %v369_v28, 5  ;;  %v385_v56 = vld [vmem:[%s788_s28 + $0xc] sm:$0x3]  ;;  %v668_v5 = vld [vmem:[%s778_s22 + $0x10] sm:$0x3] }
  0x26   : > { %v388_v38 = vmax.bf16 %v384_v22, %v380_v27  ;;  %v493_v41 = vor.u32 %v492_v24, %v489_v17  ;;  %v432_v42 = vrot.slane %v430_v29, 4  ;;  %v433_v43 = vshll.u32 %v401_v19, 16  ;;  %v393_v62 = vld [vmem:[%s801_s5 + $0xc] sm:$0x3]  ;;  %v672_v7 = vld [vmem:[%s783_s25 + $0x10] sm:$0x3] }
  0x27   : > { %v508_v31 = vmax.bf16 %v476_v46, %v460_v20  ;;  %v452_v37 = vmax.bf16 %v666_v21, %v443_v26  ;;  %v496_v44 = vshrl.u32 %v676_v30, 16  ;;  %v372_v47 = vor.u32 %v371_v40, %v368_v36 }
  0x28   : > { %v396_v46 = vmax.bf16 %v392_v34, %v388_v38  ;;  %v499_v48 = vshll.u32 %v676_v30, 16  ;;  %v435_v50 = vrot.slane %v433_v43, 5  ;;  %v494_v55 = vrot.slane %v493_v41, 4 }
  0x29   : > { %513 = vst.msk [vmem:[%s826_s9] sm:$0x3] %vm512_vm0, %v508_v31  ;;  %v461_v45 = vmax.bf16 %v670_v32, %v452_v37  ;;  %v373_v53 = vrot.slane %v372_v47, 4  ;;  %v498_v60 = vrot.slane %v496_v44, 4 }
  0x2a   : > { %v444_v52 = vmax.bf16 %v428_v39, %v396_v46  ;;  %v436_v57 = vor.u32 %v435_v50, %v432_v42  ;;  %v501_v61 = vrot.slane %v499_v48, 5 }
  0x2b   : > { %v509_v51 = vmax.bf16 %v485_v33, %v461_v45  ;;  %v381_v59 = vmax.bf16 %v373_v53, %v333_v35 }
  0x2c   : > { %v453_v58 = vmax.bf16 %v667_v49, %v444_v52  ;;  %v437_v1 = vrot.slane %v436_v57, 4  ;;  %v502_v4 = vor.u32 %v501_v61, %v498_v60 }
  0x2d   : > { %514 = vst.msk [vmem:[%s826_s9 + $0x2] sm:$0x3] %vm512_vm0, %v509_v51  ;;  %v389_v0 = vmax.bf16 %v385_v56, %v381_v59 }
  0x2e   : > { %v462_v63 = vmax.bf16 %v671_v54, %v453_v58  ;;  %v503_v9 = vrot.slane %v502_v4, 4 }
  0x2f   : > { %v397_v3 = vmax.bf16 %v393_v62, %v389_v0 }
  0x30   : > { %v510_v2 = vmax.bf16 %v494_v55, %v462_v63 }
  0x31   : > { %v445_v6 = vmax.bf16 %v437_v1, %v397_v3 }
  0x32   : > { %515 = vst.msk [vmem:[%s826_s9 + $0x4] sm:$0x3] %vm512_vm0, %v510_v2 }
  0x33   : > { %v454_v8 = vmax.bf16 %v668_v5, %v445_v6 }
  0x35   : > { %v463_v10 = vmax.bf16 %v672_v7, %v454_v8 }
  0x37   : > { %v511_v11 = vmax.bf16 %v503_v9, %v463_v10 }
  0x39   : > { %516 = vst.msk [vmem:[%s826_s9 + $0x6] sm:$0x3] %vm512_vm0, %v511_v11 }
  0x3a PF: > { %s14_s17 = sadd.s32 1, %s727_s17   ;;  %s859_s15 = smov %s723_s16 }
  0x3b   : > { %p11_p5 = scmp.ge.s32.totalorder %s14_s17, 4   ;;  %s860_s16 = smov %s862_s18 }
  0x3d   :  { %13 = sbr.rel (!%p11_p5) target bundleno = 2 (0x2), region = 77 }

// kernel: _lambda_.81
= control target key start
LH: loop header
LB: loop body
LE: loop exit
PB: predicated region body
PF: predicated region fallthrough
CT: control target
= control target key end

     0   :  { %s339_s1 = inlined_call_operand.vmem [shape: bf16[128,128], index: 1, kind: input, shape index: {}]   ;;  %s340_s0 = inlined_call_operand.vmem [shape: bf16[32,128], index: 0, kind: input, shape index: {}]   ;;  %s341_s2 = inlined_call_operand.vmem [shape: f32[1,128], index: 2, kind: input, shape index: {}]   ;;  %s342_s3 = inlined_call_operand.vmem [shape: bf16[32,128], index: 3, kind: output, shape index: {}]  }
   0x1   :  { %v270_v0 = vld [vmem:[%s339_s1] sm:$0xff]   ;;  %v271_v1 = vld [vmem:[%s339_s1 + $0x8] sm:$0xff]   ;;  %v272_v2 = vld [vmem:[%s339_s1 + $0x10] sm:$0xff]  }
   0x2   :  { %250 = vmatprep.subr.bf16.mxu0 %v270_v0  ;;  %v273_v3 = vld [vmem:[%s339_s1 + $0x18] sm:$0xff]   ;;  %v278_v4 = vld [vmem:[%s340_s0] sm:$0xff]   ;;  %v275_v6 = vld [vmem:[%s339_s1 + $0x28] sm:$0xff]  }
   0x3   :  { %251 = vmatpush3.bf16.msra.mxu0 %v270_v0  ;;  %266 = vmatprep.mubr.bf16.mxu0 %v278_v4  ;;  %v274_v5 = vld [vmem:[%s339_s1 + $0x20] sm:$0xff]   ;;  %v276_v7 = vld [vmem:[%s339_s1 + $0x30] sm:$0xff]   ;;  %v277_v8 = vld [vmem:[%s339_s1 + $0x38] sm:$0xff]  }
   0x4   :  { %252 = vmatprep.subr.bf16.mxu0 %v271_v1  ;;  %v279_v9 = vld [vmem:[%s340_s0 + $0x8] sm:$0xff]   ;;  %v220_v10 = vld [vmem:[%s341_s2] ss:$0 sm:$0xff] }
   0x7   :  { %253 = vmatpush3.bf16.msra.mxu0 %v271_v1 }
   0x8   :  { %254 = vmatprep.subr.bf16.mxu0 %v272_v2 }
   0xb   :  { %255 = vmatpush3.bf16.msra.mxu0 %v272_v2 }
   0xc   :  { %256 = vmatprep.subr.bf16.mxu0 %v273_v3 }
   0xf   :  { %257 = vmatpush3.bf16.msra.mxu0 %v273_v3 }
  0x10   :  { %258 = vmatprep.subr.bf16.mxu0 %v274_v5 }
  0x13   :  { %259 = vmatpush3.bf16.msra.mxu0 %v274_v5 }
  0x14   :  { %260 = vmatprep.subr.bf16.mxu0 %v275_v6 }
  0x17   :  { %261 = vmatpush3.bf16.msra.mxu0 %v275_v6 }
  0x18   :  { %262 = vmatprep.subr.bf16.mxu0 %v276_v7 }
  0x1b   :  { %263 = vmatpush3.bf16.msra.mxu0 %v276_v7 }
  0x1c   :  { %264 = vmatprep.subr.bf16.mxu0 %v277_v8 }
  0x1f   :  { %265 = vmatpush3.bf16.msra.mxu0 %v277_v8 }
  0x22   :  { %267 = vmatmul.mubr.bf16.vlgmr.msra.gmra.mrb[0].mxu0 %v279_v9 }
  0xf5   :  { %v268_v11 = vpop.f32.mrb[0].mxu0 }
  0xf6   :  { %v180_v12 = vadd.f32 %v268_v11, %v220_v10  ;;  %v141_v13 = vpop.f32.mrb[1].mxu0 }
  0xf7   :  { %v178_v14 = vadd.f32 %v220_v10, %v141_v13  ;;  %v269_v15 = vpop.f32.mrb[2].mxu0 }
  0xf8   :  { %v181_v16 = vadd.f32 %v269_v15, %v220_v10  ;;  %v144_v17 = vpop.f32.mrb[3].mxu0  ;;  %v184_v19 = vmax.f32 %v180_v12, 0.0 }
  0xf9   :  { %v179_v18 = vadd.f32 %v220_v10, %v144_v17  ;;  %v182_v21 = vmax.f32 %v178_v14, 0.0 }
  0xfa   :  { %v185_v20 = vmax.f32 %v181_v16, 0.0 }
  0xfb   :  { %v183_v22 = vmax.f32 %v179_v18, 0.0 }
  0xfc   :  { %v237_v23 = vpack.c.bf16 %v185_v20, %v184_v19 }
  0xfd   :  { %v232_v24 = vpack.c.bf16 %v183_v22, %v182_v21 }
  0xfe   :  { %239 = vst [vmem:[%s342_s3 + $0x8] sm:$0xff] %v237_v23  }
  0xff   :  { %233 = vst [vmem:[%s342_s3] sm:$0xff] %v232_v24  }

// kernel: _lambda_.80
= control target key start
LH: loop header
LB: loop body
LE: loop exit
PB: predicated region body
PF: predicated region fallthrough
CT: control target
= control target key end

     0   :  { %s771_s12 = smov 0   ;;  %s773_s13 = smov 0   ;;  %s952_s0 = inlined_call_operand.vmem [shape: bf16[2,6,6,64], index: 0, kind: input, shape index: {}]   ;;  %s953_s1 = inlined_call_operand.vmem [shape: f32[9,1,64], index: 1, kind: input, shape index: {}]   ;;  %s954_s2 = inlined_call_operand.vmem [shape: f32[1,64], index: 2, kind: input, shape index: {}]   ;;  %s955_s3 = inlined_call_operand.vmem [shape: bf16[2,4,4,64], index: 3, kind: output, shape index: {}]  }
   0x1   :  { %s775_s14 = smov 0  }
   0x2 LB: > { %s25_s15 = sadd.s32 1, %s745_s13  ;;  %p653_p0 = scmp.ge.s32.totalorder %s749_s14, 1  ;;  %s749_s14 = sphi %s775_s14, %s13_s14   ;;  %s745_s13 = sphi %s773_s13, %s957_s13   ;;  %s741_s12 = sphi %s771_s12, %s956_s12  }
   0x3   : > { %p27_p1 = scmp.ge.s32.totalorder %s25_s15, 2  ;;  %p172_p2 = scmp.lt.s32.totalorder %s749_s14, 3 }
   0x5   : > { %s959_s15 = smov (%p27_p1, %s25_s15), 0  ;;  %p173_p3 = pnand %p653_p0, %p172_p2 }
   0x6   : > { %p208_p4 = scmp.lt.s32.totalorder (!%p173_p3), %s741_s12, 1  ;;  %v795_v0 = vld [vmem:[%s953_s1] ss:$0 sm:$0xff] (!%p173_p3)  ;;  %v800_v1 = vld [vmem:[%s953_s1 + $0x1] ss:$0 sm:$0xff] (!%p173_p3)  ;;  %vm534_vm0 = vcmask (!%p173_p3), 517120  }
   0x7   : > { %176 = sbr.rel (%p173_p3) target bundleno = 69 (0x45), region = 32  ;;  %v810_v2 = vld [vmem:[%s953_s1 + $0x2] ss:$0 sm:$0xff] (!%p173_p3)  ;;  %v815_v3 = vld [vmem:[%s953_s1 + $0x4] ss:$0 sm:$0xff] (!%p173_p3) }
   0x8   : > { %v820_v4 = vld [vmem:[%s953_s1 + $0x5] ss:$0 sm:$0xff] (!%p173_p3)  ;;  %v829_v12 = vld [vmem:[%s953_s1 + $0x3] ss:$0 sm:$0xff] (!%p173_p3)  ;;  %v842_v25 = vld [vmem:[%s953_s1 + $0x6] ss:$0 sm:$0xff] (!%p173_p3) }
   0x9   : > { %v847_v26 = vld [vmem:[%s953_s1 + $0x7] ss:$0 sm:$0xff] (!%p173_p3)  ;;  %v855_v31 = vld [vmem:[%s953_s1 + $0x8] ss:$0 sm:$0xff] (!%p173_p3) }
   0xe   : > { %s961_s12 = smov (!%p208_p4, %s741_s12), 1 }
   0xf   : > { %s702_s16 = smul.u32 24, %s961_s12  ;;  %s701_s17 = sshll.u32 %s961_s12, 3 }
  0x10   : > { %s921_s19 = scalar_lea.vmem %s955_s3, %s701_s17 }
  0x11   : > { %s805_s23 = scalar_lea.vmem %s952_s0, %s702_s16 }
  0x12   : > { %v230_v5 = vld [vmem:[%s805_s23] sm:$0x3]  ;;  %v662_v11 = vld [vmem:[%s805_s23 + $0x4] sm:$0x3]  ;;  %v680_v18 = vld [vmem:[%s805_s23 + $0x8] sm:$0x3] }
  0x13   : > { %v249_v6 = vld [vmem:[%s805_s23] sm:$0x7]  ;;  %v234_v8 = vunpack.c.l.bf16 %v230_v5  ;;  %v668_v13 = vld [vmem:[%s805_s23 + $0x4] sm:$0x7]  ;;  %v326_v15 = vunpack.c.l.bf16 %v662_v11  ;;  %v686_v19 = vld [vmem:[%s805_s23 + $0x8] sm:$0x7]  ;;  %v423_v24 = vunpack.c.l.bf16 %v680_v18 }
  0x14   : > { %v285_v7 = vld [vmem:[%s805_s23] sm:$0x6]  ;;  %v253_v9 = vunpack.c.l.bf16 %v249_v6  ;;  %v674_v14 = vld [vmem:[%s805_s23 + $0x4] sm:$0x6]  ;;  %v350_v16 = vunpack.c.l.bf16 %v668_v13  ;;  %v692_v20 = vld [vmem:[%s805_s23 + $0x8] sm:$0x6]  ;;  %v447_v30 = vunpack.c.l.bf16 %v686_v19 }
  0x15   : > { %v289_v10 = vunpack.c.l.bf16 %v285_v7  ;;  %v386_v17 = vunpack.c.l.bf16 %v674_v14  ;;  %v245_v21 = vmul.f32 %v795_v0, %v234_v8  ;;  %v231_v27 = vld [vmem:[%s805_s23 + $0x4] sm:$0x3]  ;;  %v483_v36 = vunpack.c.l.bf16 %v692_v20  ;;  %v663_v37 = vld [vmem:[%s805_s23 + $0x8] sm:$0x3]  ;;  %v681_v48 = vld [vmem:[%s805_s23 + $0xc] sm:$0x3] }
  0x16   : > { %v265_v22 = vmul.f32 %v800_v1, %v253_v9  ;;  %v362_v28 = vmul.f32 %v815_v3, %v350_v16  ;;  %v250_v32 = vld [vmem:[%s805_s23 + $0x4] sm:$0x7]  ;;  %v669_v38 = vld [vmem:[%s805_s23 + $0x8] sm:$0x7]  ;;  %v338_v39 = vmul.f32 %v829_v12, %v326_v15  ;;  %v435_v40 = vmul.f32 %v842_v25, %v423_v24  ;;  %v687_v53 = vld [vmem:[%s805_s23 + $0xc] sm:$0x7] }
  0x17   : > { %v301_v23 = vmul.f32 %v810_v2, %v289_v10  ;;  %v398_v29 = vmul.f32 %v820_v4, %v386_v17  ;;  %v286_v33 = vld [vmem:[%s805_s23 + $0x4] sm:$0x6]  ;;  %v864_v41 = vmul.f32 %v847_v26, %v447_v30  ;;  %v235_v42 = vunpack.c.l.bf16 %v231_v27  ;;  %v675_v47 = vld [vmem:[%s805_s23 + $0x8] sm:$0x6]  ;;  %v693_v58 = vld [vmem:[%s805_s23 + $0xc] sm:$0x6] }
  0x18   : > { %v273_v34 = vrot.slane %v265_v22, 1  ;;  %v370_v44 = vrot.slane %v362_v28, 1  ;;  %v254_v45 = vunpack.c.l.bf16 %v250_v32  ;;  %v290_v46 = vunpack.c.l.bf16 %v286_v33  ;;  %v232_v63 = vld [vmem:[%s805_s23 + $0x8] sm:$0x3]  ;;  %v664_v20 = vld [vmem:[%s805_s23 + $0xc] sm:$0x3] }
  0x19   : > { %v309_v35 = vrot.slane %v301_v23, 2  ;;  %v406_v49 = vrot.slane %v398_v29, 2  ;;  %v869_v50 = vmul.f32 %v855_v31, %v483_v36  ;;  %v327_v51 = vunpack.c.l.bf16 %v663_v37  ;;  %v251_v9 = vld [vmem:[%s805_s23 + $0x8] sm:$0x7]  ;;  %v670_v27 = vld [vmem:[%s805_s23 + $0xc] sm:$0x7] }
  0x1a   : > { %v281_v43 = vadd.f32 %v273_v34, %v245_v21  ;;  %v351_v52 = vunpack.c.l.bf16 %v669_v38  ;;  %v246_v55 = vmul.f32 %v795_v0, %v235_v42  ;;  %v266_v56 = vmul.f32 %v800_v1, %v254_v45  ;;  %v287_v10 = vld [vmem:[%s805_s23 + $0x8] sm:$0x6]  ;;  %v676_v28 = vld [vmem:[%s805_s23 + $0xc] sm:$0x6]  ;;  %v682_v34 = vld [vmem:[%s805_s23 + $0x10] sm:$0x3] }
  0x1b   : > { %v302_v57 = vmul.f32 %v810_v2, %v290_v46  ;;  %v467_v59 = vrot.slane %v864_v41, 1  ;;  %v387_v61 = vunpack.c.l.bf16 %v675_v47  ;;  %v424_v62 = vunpack.c.l.bf16 %v681_v48  ;;  %v694_v45 = vld [vmem:[%s805_s23 + $0x10] sm:$0x6] }
  0x1c   : > { %v317_v54 = vadd.f32 %v309_v35, %v281_v43  ;;  %v363_v60 = vmul.f32 %v815_v3, %v351_v52  ;;  %v274_v6 = vrot.slane %v266_v56, 1  ;;  %v448_v8 = vunpack.c.l.bf16 %v687_v53 }
  0x1d   : > { %v310_v7 = vrot.slane %v302_v57, 2  ;;  %v503_v11 = vrot.slane %v869_v50, 2  ;;  %v339_v13 = vmul.f32 %v829_v12, %v327_v51  ;;  %v399_v14 = vmul.f32 %v820_v4, %v387_v61 }
  0x1e   : > { %v342_v5 = vadd.f32 %v338_v39, %v317_v54  ;;  %v484_v15 = vunpack.c.l.bf16 %v693_v58  ;;  %v282_v17 = vadd.f32 %v274_v6, %v246_v55  ;;  %v371_v18 = vrot.slane %v363_v60, 1  ;;  %v902_v54 = vld [vmem:[%s954_s2] ss:$0 sm:$0xff]  ;;  %v252_v60 = vld [vmem:[%s805_s23 + $0xc] sm:$0x7] }
  0x1f   : > { %v236_v19 = vunpack.c.l.bf16 %v232_v63  ;;  %v436_v21 = vmul.f32 %v842_v25, %v424_v62  ;;  %v460_v22 = vmul.f32 %v847_v26, %v448_v8  ;;  %v255_v23 = vunpack.c.l.bf16 %v251_v9 }
  0x20   : > { %v378_v16 = vadd.f32 %v370_v44, %v342_v5  ;;  %v291_v24 = vunpack.c.l.bf16 %v287_v10  ;;  %v318_v30 = vadd.f32 %v310_v7, %v282_v17  ;;  %v407_v32 = vrot.slane %v399_v14, 2  ;;  %v688_v44 = vld [vmem:[%s805_s23 + $0x10] sm:$0x7] }
  0x21   : > { %v496_v33 = vmul.f32 %v855_v31, %v484_v15  ;;  %v247_v35 = vmul.f32 %v795_v0, %v236_v19  ;;  %v267_v36 = vmul.f32 %v800_v1, %v255_v23  ;;  %v328_v38 = vunpack.c.l.bf16 %v664_v20  ;;  %v671_v17 = vld [vmem:[%s805_s23 + $0x10] sm:$0x7] }
  0x22   : > { %v414_v29 = vadd.f32 %v406_v49, %v378_v16  ;;  %v303_v37 = vmul.f32 %v810_v2, %v291_v24  ;;  %v343_v41 = vadd.f32 %v339_v13, %v318_v30  ;;  %v352_v42 = vunpack.c.l.bf16 %v670_v27  ;;  %v665_v16 = vld [vmem:[%s805_s23 + $0x10] sm:$0x3] }
  0x23   : > { %v388_v43 = vunpack.c.l.bf16 %v676_v28  ;;  %v468_v46 = vrot.slane %v460_v22, 1  ;;  %v275_v47 = vrot.slane %v267_v36, 1  ;;  %v425_v49 = vunpack.c.l.bf16 %v682_v34 }
  0x24   : > { %v439_v39 = vadd.f32 %v435_v40, %v414_v29  ;;  %v311_v48 = vrot.slane %v303_v37, 2  ;;  %v379_v51 = vadd.f32 %v371_v18, %v343_v41  ;;  %v364_v52 = vmul.f32 %v815_v3, %v352_v42  ;;  %v233_v40 = vld [vmem:[%s805_s23 + $0xc] sm:$0x3]  ;;  %v677_v18 = vld [vmem:[%s805_s23 + $0x10] sm:$0x6] }
  0x25   : > { %v400_v53 = vmul.f32 %v820_v4, %v388_v43  ;;  %v283_v55 = vadd.f32 %v275_v47, %v247_v35  ;;  %v340_v56 = vmul.f32 %v829_v12, %v328_v38  ;;  %v449_v57 = vunpack.c.l.bf16 %v688_v44  ;;  %v683_v37 = vld [vmem:[%s805_s23 + $0x14] sm:$0x3] }
  0x26   : > { %v475_v50 = vadd.f32 %v467_v59, %v439_v39  ;;  %v485_v58 = vunpack.c.l.bf16 %v694_v45  ;;  %v288_v59 = vld [vmem:[%s805_s23 + $0xc] sm:$0x6]  ;;  %v415_v62 = vadd.f32 %v407_v32, %v379_v51  ;;  %v504_v63 = vrot.slane %v496_v33, 2  ;;  %v689_v33 = vld [vmem:[%s805_s23 + $0x14] sm:$0x7] }
  0x27   : > { %v437_v5 = vmul.f32 %v842_v25, %v425_v49  ;;  %v319_v6 = vadd.f32 %v311_v48, %v283_v55  ;;  %v372_v7 = vrot.slane %v364_v52, 1  ;;  %v408_v8 = vrot.slane %v400_v53, 2  ;;  %v695_v41 = vld [vmem:[%s805_s23 + $0x14] sm:$0x6] }
  0x28   : > { %v511_v61 = vadd.f32 %v503_v11, %v475_v50  ;;  %v237_v9 = vunpack.c.l.bf16 %v233_v40  ;;  %v440_v13 = vadd.f32 %v436_v21, %v415_v62  ;;  %v256_v14 = vunpack.c.l.bf16 %v252_v60 }
  0x29   : > { %v292_v15 = vunpack.c.l.bf16 %v288_v59  ;;  %v344_v19 = vadd.f32 %v340_v56, %v319_v6  ;;  %v461_v11 = vmul.f32 %v847_v26, %v449_v57  ;;  %v497_v20 = vmul.f32 %v855_v31, %v485_v58 }
  0x2a   : > { %v522_v10 = vadd.f32 %v902_v54, %v511_v61  ;;  %v248_v22 = vmul.f32 %v795_v0, %v237_v9  ;;  %v476_v24 = vadd.f32 %v468_v46, %v440_v13  ;;  %v268_v27 = vmul.f32 %v800_v1, %v256_v14 }
  0x2b   : > { %v304_v21 = vmul.f32 %v810_v2, %v292_v15  ;;  %v380_v28 = vadd.f32 %v372_v7, %v344_v19  ;;  %v329_v29 = vunpack.c.l.bf16 %v665_v16  ;;  %v353_v30 = vunpack.c.l.bf16 %v671_v17 }
  0x2c   : > { %v526_v23 = vmax.f32 %v522_v10, 0.0  ;;  %v389_v32 = vunpack.c.l.bf16 %v677_v18  ;;  %v512_v0 = vadd.f32 %v504_v63, %v476_v24  ;;  %v276_v35 = vrot.slane %v268_v27, 1 }
  0x2d   : > { %v312_v36 = vrot.slane %v304_v21, 2  ;;  %v416_v1 = vadd.f32 %v408_v8, %v380_v28  ;;  %v469_v38 = vrot.slane %v461_v11, 1  ;;  %v341_v2 = vmul.f32 %v829_v12, %v329_v29 }
  0x2e   : > { %v530_v34 = vpack.c.bf16 %v526_v23, %v526_v23  ;;  %v365_v39 = vmul.f32 %v815_v3, %v353_v30  ;;  %v523_v42 = vadd.f32 %v902_v54, %v512_v0  ;;  %v284_v43 = vadd.f32 %v276_v35, %v248_v22 }
  0x2f   : > { %v401_v44 = vmul.f32 %v820_v4, %v389_v32  ;;  %v450_v45 = vunpack.c.l.bf16 %v689_v33  ;;  %v441_v46 = vadd.f32 %v437_v5, %v416_v1  ;;  %v505_v47 = vrot.slane %v497_v20, 2 }
  0x30   : > { %535 = vst.msk [vmem:[%s921_s19] sm:$0x3] %vm534_vm0, %v530_v34  ;;  %v426_v48 = vunpack.c.l.bf16 %v683_v37  ;;  %v527_v49 = vmax.f32 %v523_v42, 0.0  ;;  %v320_v50 = vadd.f32 %v312_v36, %v284_v43  ;;  %v373_v51 = vrot.slane %v365_v39, 1 }
  0x31   : > { %v486_v52 = vunpack.c.l.bf16 %v695_v41  ;;  %v477_v12 = vadd.f32 %v469_v38, %v441_v46  ;;  %v409_v40 = vrot.slane %v401_v44, 2  ;;  %v462_v55 = vmul.f32 %v847_v26, %v450_v45 }
  0x32   : > { %v531_v53 = vpack.c.bf16 %v527_v49, %v527_v49  ;;  %v345_v3 = vadd.f32 %v341_v2, %v320_v50  ;;  %v438_v4 = vmul.f32 %v842_v25, %v426_v48 }
  0x33   : > { %v513_v56 = vadd.f32 %v505_v47, %v477_v12  ;;  %v498_v58 = vmul.f32 %v855_v31, %v486_v52  ;;  %v470_v61 = vrot.slane %v462_v55, 1 }
  0x34   : > { %536 = vst.msk [vmem:[%s921_s19 + $0x2] sm:$0x3] %vm534_vm0, %v531_v53  ;;  %v381_v57 = vadd.f32 %v373_v51, %v345_v3 }
  0x35   : > { %v524_v60 = vadd.f32 %v902_v54, %v513_v56  ;;  %v506_v5 = vrot.slane %v498_v58, 2 }
  0x36   : > { %v417_v59 = vadd.f32 %v409_v40, %v381_v57 }
  0x37   : > { %v528_v62 = vmax.f32 %v524_v60, 0.0 }
  0x38   : > { %v442_v63 = vadd.f32 %v438_v4, %v417_v59 }
  0x39   : > { %v532_v6 = vpack.c.bf16 %v528_v62, %v528_v62 }
  0x3a   : > { %v478_v7 = vadd.f32 %v470_v61, %v442_v63 }
  0x3b   : > { %537 = vst.msk [vmem:[%s921_s19 + $0x4] sm:$0x3] %vm534_vm0, %v532_v6 }
  0x3c   : > { %v514_v26 = vadd.f32 %v506_v5, %v478_v7 }
  0x3e   : > { %v525_v8 = vadd.f32 %v902_v54, %v514_v26 }
  0x40   : > { %v529_v9 = vmax.f32 %v525_v8, 0.0 }
  0x42   : > { %v533_v10 = vpack.c.bf16 %v529_v9, %v529_v9 }
  0x44   : > { %538 = vst.msk [vmem:[%s921_s19 + $0x6] sm:$0x3] %vm534_vm0, %v533_v10 }
  0x45 PF: > { %s13_s14 = sadd.s32 1, %s749_s14   ;;  %s956_s12 = smov %s745_s13 }
  0x46   : > { %p10_p5 = scmp.ge.s32.totalorder %s13_s14, 4   ;;  %s957_s13 = smov %s959_s15 }
  0x48   :  { %12 = sbr.rel (!%p10_p5) target bundleno = 2 (0x2), region = 78 }

// kernel: _lambda_.103
= control target key start
LH: loop header
LB: loop body
LE: loop exit
PB: predicated region body
PF: predicated region fallthrough
CT: control target
= control target key end

     0   :  { %v195_v0 = vmov 0.0   ;;  %vm196_vm0 = vmmov 0   ;;  %s250_s1 = inlined_call_operand.vmem [shape: bf16[128,128], index: 1, kind: input, shape index: {}]   ;;  %s251_s0 = inlined_call_operand.vmem [shape: bf16[8,128], index: 0, kind: input, shape index: {}]   ;;  %s252_s2 = inlined_call_operand.vmem [shape: f32[1,128], index: 2, kind: input, shape index: {}]   ;;  %s253_s3 = inlined_call_operand.vmem [shape: bf16[8,128], index: 3, kind: output, shape index: {}]  }
   0x1   :  { %165 = vmatprep.subr.bf16.mxu0 %v195_v0  ;;  %v187_v1 = vld [vmem:[%s250_s1] sm:$0xff]   ;;  %181 = vmatprep.mubr.msk.bf16.mxu0 %vm196_vm0, %v195_v0  ;;  %v188_v2 = vld [vmem:[%s250_s1 + $0x8] sm:$0xff]   ;;  %v189_v3 = vld [vmem:[%s250_s1 + $0x10] sm:$0xff]  }
   0x2   :  { %166 = vmatpush3.bf16.msra.mxu0 %v187_v1  ;;  %v190_v4 = vld [vmem:[%s250_s1 + $0x18] sm:$0xff]   ;;  %v191_v5 = vld [vmem:[%s250_s1 + $0x20] sm:$0xff]   ;;  %v192_v6 = vld [vmem:[%s250_s1 + $0x28] sm:$0xff]  }
   0x3   :  { %167 = vmatprep.subr.bf16.mxu0 %v195_v0  ;;  %v193_v7 = vld [vmem:[%s250_s1 + $0x30] sm:$0xff]   ;;  %v194_v8 = vld [vmem:[%s250_s1 + $0x38] sm:$0xff]   ;;  %v21_v9 = vld [vmem:[%s251_s0] sm:$0xf] }
   0x4   :  { %v155_v10 = vld [vmem:[%s252_s2] ss:$0 sm:$0xff] }
   0x6   :  { %168 = vmatpush3.bf16.msra.mxu0 %v188_v2 }
   0x7   :  { %169 = vmatprep.subr.bf16.mxu0 %v195_v0 }
   0xa   :  { %170 = vmatpush3.bf16.msra.mxu0 %v189_v3 }
   0xb   :  { %171 = vmatprep.subr.bf16.mxu0 %v195_v0 }
   0xe   :  { %172 = vmatpush3.bf16.msra.mxu0 %v190_v4 }
   0xf   :  { %173 = vmatprep.subr.bf16.mxu0 %v195_v0 }
  0x12   :  { %174 = vmatpush3.bf16.msra.mxu0 %v191_v5 }
  0x13   :  { %175 = vmatprep.subr.bf16.mxu0 %v195_v0 }
  0x16   :  { %176 = vmatpush3.bf16.msra.mxu0 %v192_v6 }
  0x17   :  { %177 = vmatprep.subr.bf16.mxu0 %v195_v0 }
  0x1a   :  { %178 = vmatpush3.bf16.msra.mxu0 %v193_v7 }
  0x1b   :  { %179 = vmatprep.subr.bf16.mxu0 %v195_v0 }
  0x1e   :  { %180 = vmatpush3.bf16.msra.mxu0 %v194_v8 }
  0x21   :  { %182 = vmatmul.mubr.bf16.vlgmr.msra.gmra.mrb[0].mxu0 %v21_v9 }
  0xf4   :  { %v120_v11 = vpop.f32.mrb[0].mxu0 }
  0xf5   :  { %v139_v12 = vadd.f32 %v155_v10, %v120_v11  ;;  %v183_v13 = vpop.f32.mrb[1].mxu0 }
  0xf6   :  { %v123_v14 = vpop.f32.mrb[2].mxu0 }
  0xf7   :  { %v140_v15 = vmax.f32 %v139_v12, 0.0  ;;  %v184_v16 = vpop.f32.mrb[3].mxu0 }
  0xf9   :  { %v141_v17 = vpack.c.bf16 %v140_v15, %v140_v15 }
  0xfb   :  { %142 = vst [vmem:[%s253_s3] sm:$0xf] %v141_v17 }

// kernel: _lambda_.101
= control target key start
LH: loop header
LB: loop body
LE: loop exit
PB: predicated region body
PF: predicated region fallthrough
CT: control target
= control target key end

     0   :  { %s642_s15 = smov 0   ;;  %s644_s16 = smov 0   ;;  %s716_s0 = inlined_call_operand.vmem [shape: bf16[2,3,3,64], index: 0, kind: input, shape index: {}]   ;;  %s717_s1 = inlined_call_operand.vmem [shape: bf16[2,3,3,64], index: 1, kind: input, shape index: {}]   ;;  %s718_s2 = inlined_call_operand.vmem [shape: bf16[2,3,3,64], index: 2, kind: input, shape index: {}]   ;;  %s719_s3 = inlined_call_operand.vmem [shape: bf16[2,3,3,64], index: 3, kind: input, shape index: {}]   ;;  %s720_s4 = inlined_call_operand.vmem [shape: bf16[2,2,2,64], index: 4, kind: output, shape index: {}]  }
   0x1   :  { %s646_s17 = smov 0  }
   0x2 LB: > { %s26_s18 = sadd.s32 1, %s611_s16  ;;  %p554_p0 = scmp.ge.s32.totalorder %s615_s17, 1  ;;  %s615_s17 = sphi %s646_s17, %s14_s17   ;;  %s611_s16 = sphi %s644_s16, %s722_s16   ;;  %s607_s15 = sphi %s642_s15, %s721_s15  }
   0x3   : > { %p28_p1 = scmp.ge.s32.totalorder %s26_s18, 2  ;;  %p226_p2 = scmp.lt.s32.totalorder %s615_s17, 3 }
   0x5   : > { %s724_s18 = smov (%p28_p1, %s26_s18), 0  ;;  %p227_p3 = pnand %p554_p0, %p226_p2 }
   0x6   : > { %p281_p4 = scmp.lt.s32.totalorder (!%p227_p3), %s607_s15, 1  ;;  %vm416_vm0 = vcmask (!%p227_p3), 516096  }
   0x7   : > { %230 = sbr.rel (%p227_p3) target bundleno = 46 (0x2e), region = 36 }
   0xe   : > { %s726_s15 = smov (!%p281_p4, %s607_s15), 1 }
   0xf   : > { %s663_s19 = smul.u32 6, %s726_s15  ;;  %s559_s6 = sshll.u32 %s726_s15, 1 }
  0x10   : > { %s319_s9 = scalar_lea.vmem %s720_s4, %s559_s6 }
  0x11   : > { %s669_s22 = scalar_lea.vmem %s716_s0, %s663_s19  ;;  %s675_s25 = scalar_lea.vmem %s717_s1, %s663_s19 }
  0x12   : > { %s681_s28 = scalar_lea.vmem %s718_s2, %s663_s19  ;;  %v326_v0 = vld [vmem:[%s669_s22] sm:$0x3]  ;;  %v564_v10 = vld [vmem:[%s669_s22 + $0x2] sm:$0x3]  ;;  %s312_s5 = scalar_lea.vmem %s719_s3, %s663_s19  ;;  %v565_v34 = vld [vmem:[%s669_s22 + $0x4] sm:$0x3] }
  0x13   : > { %v329_v1 = vshrl.u32 %v326_v0, 16  ;;  %v332_v2 = vshll.u32 %v326_v0, 16  ;;  %v358_v3 = vld [vmem:[%s681_s28] sm:$0x3]  ;;  %v327_v11 = vld [vmem:[%s669_s22 + $0x2] sm:$0x3] }
  0x14   : > { %v320_v4 = vld [vmem:[%s669_s22] sm:$0x1]  ;;  %v361_v6 = vshrl.u32 %v358_v3, 16  ;;  %v364_v7 = vshll.u32 %v358_v3, 16  ;;  %v321_v12 = vld [vmem:[%s669_s22 + $0x2] sm:$0x1] }
  0x15   : > { %v322_v5 = vld [vmem:[%s675_s25] sm:$0x1]  ;;  %v331_v8 = vrot.slane %v329_v1, 6  ;;  %v334_v9 = vrot.slane %v332_v2, 7  ;;  %v395_v15 = vshrl.u32 %v564_v10, 16  ;;  %v398_v16 = vshll.u32 %v564_v10, 16 }
  0x16   : > { %v363_v13 = vrot.slane %v361_v6, 6  ;;  %v366_v14 = vrot.slane %v364_v7, 7  ;;  %v323_v17 = vld [vmem:[%s675_s25 + $0x2] sm:$0x1]  ;;  %v324_v18 = vmax.bf16 %v322_v5, %v320_v4  ;;  %v338_v20 = vshrl.u32 %v327_v11, 16 }
  0x17   : > { %v335_v19 = vor.u32 %v334_v9, %v331_v8  ;;  %v341_v21 = vshll.u32 %v327_v11, 16  ;;  %v359_v22 = vld [vmem:[%s681_s28 + $0x2] sm:$0x3]  ;;  %v350_v26 = vld [vmem:[%s681_s28] sm:$0x1]  ;;  %v325_v30 = vmax.bf16 %v323_v17, %v321_v12  ;;  %v397_v31 = vrot.slane %v395_v15, 6 }
  0x18   : > { %v367_v23 = vor.u32 %v366_v14, %v363_v13  ;;  %v370_v24 = vshrl.u32 %v359_v22, 16  ;;  %v340_v27 = vrot.slane %v338_v20, 6  ;;  %v373_v29 = vshll.u32 %v359_v22, 16  ;;  %v354_v39 = vld [vmem:[%s312_s5] sm:$0x1] }
  0x19   : > { %v336_v25 = vrot.slane %v335_v19, 2  ;;  %v343_v28 = vrot.slane %v341_v21, 7  ;;  %v400_v32 = vrot.slane %v398_v16, 7  ;;  %v404_v38 = vshrl.u32 %v565_v34, 16  ;;  %v351_v46 = vld [vmem:[%s681_s28 + $0x2] sm:$0x1] }
  0x1a   : > { %v372_v33 = vrot.slane %v370_v24, 6  ;;  %v375_v37 = vrot.slane %v373_v29, 7  ;;  %v407_v40 = vshll.u32 %v565_v34, 16  ;;  %v368_v42 = vrot.slane %v367_v23, 2  ;;  %v560_v51 = vld [vmem:[%s669_s22 + $0x2] sm:$0x1] }
  0x1b   : > { %v348_v35 = vmax.bf16 %v336_v25, %v324_v18  ;;  %v344_v36 = vor.u32 %v343_v28, %v340_v27  ;;  %v401_v45 = vor.u32 %v400_v32, %v397_v31  ;;  %v406_v49 = vrot.slane %v404_v38, 6  ;;  %v355_v52 = vld [vmem:[%s312_s5 + $0x2] sm:$0x1]  ;;  %v561_v61 = vld [vmem:[%s669_s22 + $0x4] sm:$0x1] }
  0x1c   : > { %v376_v44 = vor.u32 %v375_v37, %v372_v33  ;;  %v409_v50 = vrot.slane %v407_v40, 7  ;;  %v562_v56 = vld [vmem:[%s675_s25 + $0x2] sm:$0x1]  ;;  %v563_v0 = vld [vmem:[%s675_s25 + $0x4] sm:$0x1] }
  0x1d   : > { %v352_v41 = vmax.bf16 %v350_v26, %v348_v35  ;;  %v345_v43 = vrot.slane %v344_v36, 2  ;;  %v402_v58 = vrot.slane %v401_v45, 2 }
  0x1e   : > { %v377_v55 = vrot.slane %v376_v44, 2  ;;  %v410_v60 = vor.u32 %v409_v50, %v406_v49 }
  0x1f   : > { %v356_v47 = vmax.bf16 %v354_v39, %v352_v41  ;;  %v349_v48 = vmax.bf16 %v345_v43, %v325_v30 }
  0x20   : > { %v411_v3 = vrot.slane %v410_v60, 2 }
  0x21   : > { %v380_v53 = vmax.bf16 %v368_v42, %v356_v47  ;;  %v353_v54 = vmax.bf16 %v351_v46, %v349_v48 }
  0x23   : > { %v385_v57 = vmax.bf16 %v560_v51, %v380_v53  ;;  %v357_v59 = vmax.bf16 %v355_v52, %v353_v54 }
  0x25   : > { %v390_v62 = vmax.bf16 %v562_v56, %v385_v57  ;;  %v381_v63 = vmax.bf16 %v377_v55, %v357_v59 }
  0x27   : > { %v414_v1 = vmax.bf16 %v402_v58, %v390_v62  ;;  %v386_v2 = vmax.bf16 %v561_v61, %v381_v63 }
  0x29   : > { %417 = vst.msk [vmem:[%s319_s9] sm:$0x1] %vm416_vm0, %v414_v1  ;;  %v391_v4 = vmax.bf16 %v563_v0, %v386_v2 }
  0x2b   : > { %v415_v5 = vmax.bf16 %v411_v3, %v391_v4 }
  0x2d   : > { %418 = vst.msk [vmem:[%s319_s9 + $0x1] sm:$0x1] %vm416_vm0, %v415_v5 }
  0x2e PF: > { %s14_s17 = sadd.s32 1, %s615_s17   ;;  %s721_s15 = smov %s611_s16 }
  0x2f   : > { %p11_p5 = scmp.ge.s32.totalorder %s14_s17, 4   ;;  %s722_s16 = smov %s724_s18 }
  0x31   :  { %13 = sbr.rel (!%p11_p5) target bundleno = 2 (0x2), region = 77 }

// kernel: _lambda_.100
= control target key start
LH: loop header
LB: loop body
LE: loop exit
PB: predicated region body
PF: predicated region fallthrough
CT: control target
= control target key end

     0   :  { %v669_v36 = vmov 0.0   ;;  %vm670_vm0 = vmmov 0   ;;  %s826_s1 = inlined_call_operand.vmem [shape: bf16[640,128], index: 1, kind: input, shape index: {}]   ;;  %s827_s0 = inlined_call_operand.vmem [shape: bf16[8,640], index: 0, kind: input, shape index: {}]   ;;  %s828_s2 = inlined_call_operand.vmem [shape: f32[1,128], index: 2, kind: input, shape index: {}]   ;;  %s829_s3 = inlined_call_operand.vmem [shape: bf16[8,128], index: 3, kind: output, shape index: {}]  }
   0x1   :  { %v624_v0 = vld [vmem:[%s826_s1 + $0x40] sm:$0xff]   ;;  %v628_v4 = vld [vmem:[%s826_s1 + $0x48] sm:$0xff]   ;;  %v632_v8 = vld [vmem:[%s826_s1 + $0x50] sm:$0xff]  }
   0x2   :  { %v625_v1 = vld [vmem:[%s826_s1 + $0xc0] sm:$0xff]   ;;  %549 = vmatprep.subr.bf16.mxu0 %v624_v0  ;;  %v629_v5 = vld [vmem:[%s826_s1 + $0xc8] sm:$0xff]   ;;  %v633_v9 = vld [vmem:[%s826_s1 + $0xd0] sm:$0xff]  }
   0x3   :  { %v626_v2 = vld [vmem:[%s826_s1] sm:$0xff]   ;;  %571 = vmatprep.subr.bf16.mxu1 %v625_v1  ;;  %v630_v6 = vld [vmem:[%s826_s1 + $0x8] sm:$0xff]   ;;  %v634_v10 = vld [vmem:[%s826_s1 + $0x10] sm:$0xff]  }
   0x4   :  { %v627_v3 = vld [vmem:[%s826_s1 + $0x80] sm:$0xff]   ;;  %550 = vmatpush3.bf16.msra.mxu0 %v626_v2  ;;  %v631_v7 = vld [vmem:[%s826_s1 + $0x88] sm:$0xff]   ;;  %v635_v11 = vld [vmem:[%s826_s1 + $0x90] sm:$0xff]  }
   0x5   :  { %572 = vmatpush3.bf16.msra.mxu1 %v627_v3  ;;  %551 = vmatprep.subr.bf16.mxu0 %v628_v4  ;;  %v636_v12 = vld [vmem:[%s826_s1 + $0x58] sm:$0xff]   ;;  %v640_v16 = vld [vmem:[%s826_s1 + $0x60] sm:$0xff]   ;;  %v644_v20 = vld [vmem:[%s826_s1 + $0x68] sm:$0xff]  }
   0x6   :  { %573 = vmatprep.subr.bf16.mxu1 %v629_v5  ;;  %v637_v13 = vld [vmem:[%s826_s1 + $0xd8] sm:$0xff]   ;;  %v641_v17 = vld [vmem:[%s826_s1 + $0xe0] sm:$0xff]   ;;  %v645_v21 = vld [vmem:[%s826_s1 + $0xe8] sm:$0xff]  }
   0x7   :  { %v638_v14 = vld [vmem:[%s826_s1 + $0x18] sm:$0xff]   ;;  %v642_v18 = vld [vmem:[%s826_s1 + $0x20] sm:$0xff]   ;;  %v646_v22 = vld [vmem:[%s826_s1 + $0x28] sm:$0xff]  }
   0x8   :  { %552 = vmatpush3.bf16.msra.mxu0 %v630_v6  ;;  %v639_v15 = vld [vmem:[%s826_s1 + $0x98] sm:$0xff]   ;;  %v643_v19 = vld [vmem:[%s826_s1 + $0xa0] sm:$0xff]   ;;  %v647_v23 = vld [vmem:[%s826_s1 + $0xa8] sm:$0xff]  }
   0x9   :  { %574 = vmatpush3.bf16.msra.mxu1 %v631_v7  ;;  %553 = vmatprep.subr.bf16.mxu0 %v632_v8  ;;  %v648_v24 = vld [vmem:[%s826_s1 + $0x70] sm:$0xff]   ;;  %v652_v28 = vld [vmem:[%s826_s1 + $0x78] sm:$0xff]   ;;  %v21_v32 = vld [vmem:[%s827_s0] sm:$0xff] }
   0xa   :  { %575 = vmatprep.subr.bf16.mxu1 %v633_v9  ;;  %v649_v25 = vld [vmem:[%s826_s1 + $0xf0] sm:$0xff]   ;;  %v653_v29 = vld [vmem:[%s826_s1 + $0xf8] sm:$0xff]   ;;  %v503_v33 = vcombine.low %v21_v32, %v21_v32  ;;  %v504_v34 = vcombine.high %v21_v32, %v21_v32  ;;  %v22_v35 = vld [vmem:[%s827_s0 + $0x8] sm:$0xff] }
   0xb   :  { %v650_v26 = vld [vmem:[%s826_s1 + $0x30] sm:$0xff]   ;;  %v654_v30 = vld [vmem:[%s826_s1 + $0x38] sm:$0xff]   ;;  %v505_v37 = vcombine.low %v22_v35, %v22_v35  ;;  %v506_v38 = vcombine.high %v22_v35, %v22_v35  ;;  %v661_v39 = vld [vmem:[%s826_s1 + $0x100] sm:$0xff]  }
   0xc   :  { %554 = vmatpush3.bf16.msra.mxu0 %v634_v10  ;;  %v651_v27 = vld [vmem:[%s826_s1 + $0xb0] sm:$0xff]   ;;  %v655_v31 = vld [vmem:[%s826_s1 + $0xb8] sm:$0xff]   ;;  %394 = vmatprep.mubr.bf16.mxu0 %v504_v34  ;;  %v662_v40 = vld [vmem:[%s826_s1 + $0x108] sm:$0xff]  }
   0xd   :  { %576 = vmatpush3.bf16.msra.mxu1 %v635_v11  ;;  %555 = vmatprep.subr.bf16.mxu0 %v636_v12  ;;  %v663_v41 = vld [vmem:[%s826_s1 + $0x110] sm:$0xff]   ;;  %v664_v42 = vld [vmem:[%s826_s1 + $0x118] sm:$0xff]   ;;  %v665_v43 = vld [vmem:[%s826_s1 + $0x120] sm:$0xff]  }
   0xe   :  { %577 = vmatprep.subr.bf16.mxu1 %v637_v13  ;;  %434 = vmatprep.mubr.bf16.mxu1 %v506_v38  ;;  %v666_v44 = vld [vmem:[%s826_s1 + $0x128] sm:$0xff]   ;;  %v667_v45 = vld [vmem:[%s826_s1 + $0x130] sm:$0xff]   ;;  %v668_v46 = vld [vmem:[%s826_s1 + $0x138] sm:$0xff]  }
   0xf   :  { %v658_v47 = vld [vmem:[%s827_s0 + $0x10] ss:$0 sps:$4 sm:$0xff]   ;;  %v548_v60 = vld [vmem:[%s828_s2] ss:$0 sm:$0xff] }
  0x10   :  { %556 = vmatpush3.bf16.msra.mxu0 %v638_v14 }
  0x11   :  { %578 = vmatpush3.bf16.msra.mxu1 %v639_v15  ;;  %557 = vmatprep.subr.bf16.mxu0 %v640_v16 }
  0x12   :  { %579 = vmatprep.subr.bf16.mxu1 %v641_v17 }
  0x14   :  { %558 = vmatpush3.bf16.msra.mxu0 %v642_v18 }
  0x15   :  { %580 = vmatpush3.bf16.msra.mxu1 %v643_v19  ;;  %559 = vmatprep.subr.bf16.mxu0 %v644_v20 }
  0x16   :  { %581 = vmatprep.subr.bf16.mxu1 %v645_v21 }
  0x18   :  { %560 = vmatpush3.bf16.msra.mxu0 %v646_v22 }
  0x19   :  { %582 = vmatpush3.bf16.msra.mxu1 %v647_v23  ;;  %561 = vmatprep.subr.bf16.mxu0 %v648_v24 }
  0x1a   :  { %583 = vmatprep.subr.bf16.mxu1 %v649_v25 }
  0x1c   :  { %562 = vmatpush3.bf16.msra.mxu0 %v650_v26 }
  0x1d   :  { %584 = vmatpush3.bf16.msra.mxu1 %v651_v27  ;;  %563 = vmatprep.subr.bf16.mxu0 %v652_v28 }
  0x1e   :  { %585 = vmatprep.subr.bf16.mxu1 %v653_v29 }
  0x20   :  { %564 = vmatpush3.bf16.msra.mxu0 %v654_v30 }
  0x21   :  { %586 = vmatpush3.bf16.msra.mxu1 %v655_v31  ;;  %602 = vmatprep.subr.bf16.mxu0 %v669_v36 }
  0x23   :  { %395 = vmatmul.mubr.bf16.vlgmr.msra.gmra.mrb[0].mxu0 %v503_v33 }
  0x24   :  { %435 = vmatmul.mubr.bf16.vlgmr.msra.gmra.mrb[0].mxu1 %v505_v37  ;;  %603 = vmatpush3.bf16.msra.mxu0 %v661_v39 }
  0x25   :  { %604 = vmatprep.subr.bf16.mxu0 %v669_v36  ;;  %618 = vmatprep.mubr.msk.bf16.mxu0 %vm670_vm0, %v669_v36 }
  0x28   :  { %605 = vmatpush3.bf16.msra.mxu0 %v662_v40 }
  0x29   :  { %606 = vmatprep.subr.bf16.mxu0 %v669_v36 }
  0x2c   :  { %607 = vmatpush3.bf16.msra.mxu0 %v663_v41 }
  0x2d   :  { %608 = vmatprep.subr.bf16.mxu0 %v669_v36 }
  0x30   :  { %609 = vmatpush3.bf16.msra.mxu0 %v664_v42 }
  0x31   :  { %610 = vmatprep.subr.bf16.mxu0 %v669_v36 }
  0x34   :  { %611 = vmatpush3.bf16.msra.mxu0 %v665_v43 }
  0x35   :  { %612 = vmatprep.subr.bf16.mxu0 %v669_v36 }
  0x38   :  { %613 = vmatpush3.bf16.msra.mxu0 %v666_v44 }
  0x39   :  { %614 = vmatprep.subr.bf16.mxu0 %v669_v36 }
  0x3c   :  { %615 = vmatpush3.bf16.msra.mxu0 %v667_v45 }
  0x3d   :  { %616 = vmatprep.subr.bf16.mxu0 %v669_v36 }
  0x40   :  { %617 = vmatpush3.bf16.msra.mxu0 %v668_v46 }
  0x43   :  { %619 = vmatmul.mubr.bf16.vlgmr.msra.gmra.mrb[4].mxu0 %v658_v47 }
  0xf6   :  { %v565_v48 = vpop.f32.mrb[0].mxu0 }
  0xf7   :  { %v587_v49 = vpop.f32.mrb[0].mxu1  ;;  %v566_v50 = vpop.f32.mrb[1].mxu0 }
  0xf8   :  { %v567_v51 = vadd.f32 %v566_v50, %v565_v48  ;;  %v588_v52 = vpop.f32.mrb[1].mxu1  ;;  %v568_v53 = vpop.f32.mrb[2].mxu0 }
  0xf9   :  { %v589_v54 = vadd.f32 %v588_v52, %v587_v49  ;;  %v569_v55 = vpop.f32.mrb[3].mxu0  ;;  %v590_v56 = vpop.f32.mrb[2].mxu1 }
  0xfa   :  { %v591_v57 = vpop.f32.mrb[3].mxu1 }
  0xfb   :  { %v437_v58 = vadd.f32 %v589_v54, %v567_v51 }
 0x116   :  { %v476_v59 = vpop.f32.mrb[4].mxu0 }
 0x117   :  { %v477_v61 = vadd.f32 %v476_v59, %v437_v58  ;;  %v620_v62 = vpop.f32.mrb[5].mxu0 }
 0x118   :  { %v479_v63 = vpop.f32.mrb[6].mxu0 }
 0x119   :  { %v495_v0 = vadd.f32 %v548_v60, %v477_v61  ;;  %v621_v1 = vpop.f32.mrb[7].mxu0 }
 0x11b   :  { %v496_v2 = vmax.f32 %v495_v0, 0.0 }
 0x11d   :  { %v497_v3 = vpack.c.bf16 %v496_v2, %v496_v2 }
 0x11f   :  { %498 = vst [vmem:[%s829_s3] sm:$0xf] %v497_v3 }

// kernel: _lambda_.102
= control target key start
LH: loop header
LB: loop body
LE: loop exit
PB: predicated region body
PF: predicated region fallthrough
CT: control target
= control target key end

     0   :  { %s659_s12 = smov 0   ;;  %s661_s13 = smov 0   ;;  %s746_s0 = inlined_call_operand.vmem [shape: bf16[2,4,4,128], index: 0, kind: input, shape index: {}]   ;;  %s747_s1 = inlined_call_operand.vmem [shape: f32[9,1,128], index: 1, kind: input, shape index: {}]   ;;  %s748_s2 = inlined_call_operand.vmem [shape: f32[1,128], index: 2, kind: input, shape index: {}]   ;;  %s749_s3 = inlined_call_operand.vmem [shape: bf16[2,2,2,128], index: 3, kind: output, shape index: {}]  }
   0x1   :  { %s663_s14 = smov 0  }
   0x2 LB: > { %s25_s15 = sadd.s32 1, %s633_s13  ;;  %p542_p0 = scmp.ge.s32.totalorder %s637_s14, 1  ;;  %s637_s14 = sphi %s663_s14, %s13_s14   ;;  %s633_s13 = sphi %s661_s13, %s751_s13   ;;  %s629_s12 = sphi %s659_s12, %s750_s12  }
   0x3   : > { %p27_p1 = scmp.ge.s32.totalorder %s25_s15, 2  ;;  %p172_p2 = scmp.lt.s32.totalorder %s637_s14, 3 }
   0x5   : > { %s753_s15 = smov (%p27_p1, %s25_s15), 0  ;;  %p173_p3 = pnand %p542_p0, %p172_p2 }
   0x6   : > { %p207_p4 = scmp.lt.s32.totalorder (!%p173_p3), %s629_s12, 1  ;;  %v546_v0 = vld [vmem:[%s747_s1] ss:$0 sm:$0xff] (!%p173_p3)  ;;  %v548_v1 = vld [vmem:[%s747_s1 + $0x1] ss:$0 sm:$0xff] (!%p173_p3) }
   0x7   : > { %176 = sbr.rel (%p173_p3) target bundleno = 51 (0x33), region = 32  ;;  %v552_v2 = vld [vmem:[%s747_s1 + $0x2] ss:$0 sm:$0xff] (!%p173_p3)  ;;  %v562_v3 = vld [vmem:[%s747_s1 + $0x4] ss:$0 sm:$0xff] (!%p173_p3) }
   0x8   : > { %v558_v13 = vld [vmem:[%s747_s1 + $0x3] ss:$0 sm:$0xff] (!%p173_p3)  ;;  %v568_v16 = vld [vmem:[%s747_s1 + $0x5] ss:$0 sm:$0xff] (!%p173_p3)  ;;  %v578_v38 = vld [vmem:[%s747_s1 + $0x7] ss:$0 sm:$0xff] (!%p173_p3) }
   0x9   : > { %v574_v47 = vld [vmem:[%s747_s1 + $0x6] ss:$0 sm:$0xff] (!%p173_p3)  ;;  %v584_v48 = vld [vmem:[%s747_s1 + $0x8] ss:$0 sm:$0xff] (!%p173_p3) }
   0xe   : > { %s755_s12 = smov (!%p207_p4, %s629_s12), 1 }
   0xf   : > { %s590_s16 = sshll.u32 %s755_s12, 3  ;;  %s545_s17 = sshll.u32 %s755_s12, 1 }
  0x10   : > { %s686_s21 = scalar_lea.vmem %s746_s0, %s590_s16  ;;  %s227_s20 = scalar_lea.vmem %s749_s3, %s545_s17 }
  0x11   : > { %v228_v4 = vld [vmem:[%s686_s21] sm:$0x1]  ;;  %v265_v6 = vld [vmem:[%s686_s21] sm:$0x2]  ;;  %v555_v10 = vld [vmem:[%s686_s21 + $0x2] sm:$0x1] }
  0x12   : > { %v241_v5 = vld [vmem:[%s686_s21] sm:$0x3]  ;;  %v230_v7 = vunpack.c.l.bf16 %v228_v4  ;;  %v267_v9 = vunpack.c.l.bf16 %v265_v6  ;;  %v559_v11 = vld [vmem:[%s686_s21 + $0x2] sm:$0x3]  ;;  %v292_v20 = vunpack.c.l.bf16 %v555_v10  ;;  %v571_v21 = vld [vmem:[%s686_s21 + $0x4] sm:$0x1] }
  0x13   : > { %v243_v8 = vunpack.c.l.bf16 %v241_v5  ;;  %v565_v12 = vld [vmem:[%s686_s21 + $0x2] sm:$0x2]  ;;  %v308_v14 = vunpack.c.l.bf16 %v559_v11  ;;  %v575_v22 = vld [vmem:[%s686_s21 + $0x4] sm:$0x3]  ;;  %v229_v23 = vld [vmem:[%s686_s21 + $0x2] sm:$0x1]  ;;  %v357_v33 = vunpack.c.l.bf16 %v571_v21 }
  0x14   : > { %v332_v15 = vunpack.c.l.bf16 %v565_v12  ;;  %v239_v17 = vmul.f32 %v546_v0, %v230_v7  ;;  %v277_v19 = vmul.f32 %v552_v2, %v267_v9  ;;  %v581_v25 = vld [vmem:[%s686_s21 + $0x4] sm:$0x2]  ;;  %v242_v26 = vld [vmem:[%s686_s21 + $0x2] sm:$0x3]  ;;  %v556_v30 = vld [vmem:[%s686_s21 + $0x4] sm:$0x1]  ;;  %v373_v34 = vunpack.c.l.bf16 %v575_v22 }
  0x15   : > { %v253_v18 = vmul.f32 %v548_v1, %v243_v8  ;;  %v318_v24 = vmul.f32 %v562_v3, %v308_v14  ;;  %v266_v27 = vld [vmem:[%s686_s21 + $0x2] sm:$0x2]  ;;  %v560_v31 = vld [vmem:[%s686_s21 + $0x4] sm:$0x3]  ;;  %v231_v35 = vunpack.c.l.bf16 %v229_v23  ;;  %v302_v37 = vmul.f32 %v558_v13, %v292_v20  ;;  %v576_v55 = vld [vmem:[%s686_s21 + $0x6] sm:$0x3] }
  0x16   : > { %v553_v29 = vrot.slane %v277_v19, 10  ;;  %v342_v32 = vmul.f32 %v568_v16, %v332_v15  ;;  %v244_v39 = vunpack.c.l.bf16 %v242_v26  ;;  %v268_v40 = vunpack.c.l.bf16 %v266_v27  ;;  %v566_v41 = vld [vmem:[%s686_s21 + $0x4] sm:$0x2]  ;;  %v572_v60 = vld [vmem:[%s686_s21 + $0x6] sm:$0x1] }
  0x17   : > { %v549_v28 = vrot.slane %v253_v18, 9  ;;  %v563_v42 = vrot.slane %v318_v24, 9  ;;  %v397_v43 = vunpack.c.l.bf16 %v581_v25  ;;  %v293_v44 = vunpack.c.l.bf16 %v556_v30  ;;  %v582_v4 = vld [vmem:[%s686_s21 + $0x6] sm:$0x2] }
  0x18   : > { %v309_v45 = vunpack.c.l.bf16 %v560_v31  ;;  %v240_v49 = vmul.f32 %v546_v0, %v231_v35  ;;  %v254_v50 = vmul.f32 %v548_v1, %v244_v39  ;;  %v278_v51 = vmul.f32 %v552_v2, %v268_v40 }
  0x19   : > { %v263_v36 = vadd.f32 %v549_v28, %v239_v17  ;;  %v569_v52 = vrot.slane %v342_v32, 10  ;;  %v383_v53 = vmul.f32 %v578_v38, %v373_v34  ;;  %v333_v54 = vunpack.c.l.bf16 %v566_v41 }
  0x1a   : > { %v550_v57 = vrot.slane %v254_v50, 9  ;;  %v554_v58 = vrot.slane %v278_v51, 10  ;;  %v319_v59 = vmul.f32 %v562_v3, %v309_v45  ;;  %v367_v61 = vmul.f32 %v574_v47, %v357_v33 }
  0x1b   : > { %v287_v46 = vadd.f32 %v553_v29, %v263_v36  ;;  %v407_v62 = vmul.f32 %v584_v48, %v397_v43  ;;  %v303_v63 = vmul.f32 %v558_v13, %v293_v44  ;;  %v343_v7 = vmul.f32 %v568_v16, %v333_v54  ;;  %v587_v16 = vld [vmem:[%s748_s2] ss:$0 sm:$0xff] }
  0x1c   : > { %v264_v6 = vadd.f32 %v550_v57, %v240_v49  ;;  %v374_v8 = vunpack.c.l.bf16 %v576_v55  ;;  %v579_v0 = vrot.slane %v383_v53, 9  ;;  %v358_v1 = vunpack.c.l.bf16 %v572_v60 }
  0x1d   : > { %v304_v56 = vadd.f32 %v302_v37, %v287_v46  ;;  %v564_v10 = vrot.slane %v319_v59, 9  ;;  %v398_v11 = vunpack.c.l.bf16 %v582_v4  ;;  %v585_v12 = vrot.slane %v407_v62, 10 }
  0x1e   : > { %v288_v9 = vadd.f32 %v554_v58, %v264_v6  ;;  %v570_v3 = vrot.slane %v343_v7, 10  ;;  %v384_v17 = vmul.f32 %v578_v38, %v374_v8  ;;  %v368_v13 = vmul.f32 %v574_v47, %v358_v1 }
  0x1f   : > { %v328_v5 = vadd.f32 %v563_v42, %v304_v56  ;;  %v408_v20 = vmul.f32 %v584_v48, %v398_v11 }
  0x20   : > { %v305_v15 = vadd.f32 %v303_v63, %v288_v9  ;;  %v580_v23 = vrot.slane %v384_v17, 9 }
  0x21   : > { %v352_v2 = vadd.f32 %v569_v52, %v328_v5  ;;  %v586_v26 = vrot.slane %v408_v20, 10 }
  0x22   : > { %v329_v19 = vadd.f32 %v564_v10, %v305_v15 }
  0x23   : > { %v369_v14 = vadd.f32 %v367_v61, %v352_v2 }
  0x24   : > { %v353_v22 = vadd.f32 %v570_v3, %v329_v19 }
  0x25   : > { %v393_v18 = vadd.f32 %v579_v0, %v369_v14 }
  0x26   : > { %v370_v25 = vadd.f32 %v368_v13, %v353_v22 }
  0x27   : > { %v417_v21 = vadd.f32 %v585_v12, %v393_v18 }
  0x28   : > { %v394_v28 = vadd.f32 %v580_v23, %v370_v25 }
  0x29   : > { %v426_v24 = vadd.f32 %v587_v16, %v417_v21 }
  0x2a   : > { %v418_v30 = vadd.f32 %v586_v26, %v394_v28 }
  0x2b   : > { %v428_v27 = vmax.f32 %v426_v24, 0.0 }
  0x2c   : > { %v427_v31 = vadd.f32 %v587_v16, %v418_v30 }
  0x2d   : > { %v430_v29 = vpack.c.bf16 %v428_v27, %v428_v27 }
  0x2e   : > { %v429_v32 = vmax.f32 %v427_v31, 0.0 }
  0x2f   : > { %432 = vst [vmem:[%s227_s20] sm:$0x1] %v430_v29 }
  0x30   : > { %v431_v33 = vpack.c.bf16 %v429_v32, %v429_v32 }
  0x32   : > { %433 = vst [vmem:[%s227_s20 + $0x1] sm:$0x1] %v431_v33 }
  0x33 PF: > { %s13_s14 = sadd.s32 1, %s637_s14   ;;  %s750_s12 = smov %s633_s13 }
  0x34   : > { %p10_p5 = scmp.ge.s32.totalorder %s13_s14, 4   ;;  %s751_s13 = smov %s753_s15 }
  0x36   :  { %12 = sbr.rel (!%p10_p5) target bundleno = 2 (0x2), region = 78 }

// kernel: _lambda_.104
= control target key start
LH: loop header
LB: loop body
LE: loop exit
PB: predicated region body
PF: predicated region fallthrough
CT: control target
= control target key end

     0   :  { %s1065_s18 = smov 0   ;;  %s1067_s19 = smov 0   ;;  %s1218_s0 = inlined_call_operand.vmem [shape: bf16[2,6,6,128], index: 0, kind: input, shape index: {}]   ;;  %s1219_s1 = inlined_call_operand.vmem [shape: f32[9,1,128], index: 1, kind: input, shape index: {}]   ;;  %s1220_s2 = inlined_call_operand.vmem [shape: f32[1,128], index: 2, kind: input, shape index: {}]   ;;  %s1221_s3 = inlined_call_operand.vmem [shape: f32[9,1,128], index: 3, kind: input, shape index: {}]   ;;  %s1222_s4 = inlined_call_operand.vmem [shape: f32[1,128], index: 4, kind: input, shape index: {}]   ;;  %s1223_s5 = inlined_call_operand.vmem [shape: bf16[2,2,2,128], index: 5, kind: output, shape index: {}]  }
   0x1   :  { %s1069_s20 = smov 0  }
   0x2 LB: > { %s27_s21 = sadd.s32 1, %s1028_s19  ;;  %p913_p0 = scmp.ge.s32.totalorder %s1032_s20, 1  ;;  %s1032_s20 = sphi %s1069_s20, %s15_s20   ;;  %s1028_s19 = sphi %s1067_s19, %s1225_s19   ;;  %s1024_s18 = sphi %s1065_s18, %s1224_s18  }
   0x3   : > { %p29_p1 = scmp.ge.s32.totalorder %s27_s21, 2  ;;  %p238_p2 = scmp.lt.s32.totalorder %s1032_s20, 3 }
   0x5   : > { %s1227_s21 = smov (%p29_p1, %s27_s21), 0  ;;  %p239_p3 = pnand %p913_p0, %p238_p2 }
   0x6   : > { %p283_p4 = scmp.lt.s32.totalorder (!%p239_p3), %s1024_s18, 1  ;;  %v918_v0 = vld [vmem:[%s1219_s1] ss:$0 sm:$0xff] (!%p239_p3)  ;;  %v922_v1 = vld [vmem:[%s1219_s1 + $0x1] ss:$0 sm:$0xff] (!%p239_p3) }
   0x7   : > { %242 = sbr.rel (%p239_p3) target bundleno = 76 (0x4c), region = 40  ;;  %v926_v2 = vld [vmem:[%s1219_s1 + $0x2] ss:$0 sm:$0xff] (!%p239_p3)  ;;  %v930_v22 = vld [vmem:[%s1219_s1 + $0x3] ss:$0 sm:$0xff] (!%p239_p3) }
   0x8   : > { %v934_v28 = vld [vmem:[%s1219_s1 + $0x4] ss:$0 sm:$0xff] (!%p239_p3)  ;;  %v938_v38 = vld [vmem:[%s1219_s1 + $0x5] ss:$0 sm:$0xff] (!%p239_p3)  ;;  %v946_v59 = vld [vmem:[%s1219_s1 + $0x7] ss:$0 sm:$0xff] (!%p239_p3) }
   0x9   : > { %vm742_vm0 = vsmask.f32 (!%p239_p3), 256  ;;  %vm743_vm1 = vsmask.f32 (!%p239_p3), 1284  ;;  %vm745_vm3 = vsmask.f32 (!%p239_p3), 2312 }
   0xa   : > { %vm744_vm2 = vmor (!%p239_p3), %vm742_vm0, %vm743_vm1  ;;  %vm747_vm5 = vsmask.f32 (!%p239_p3), 3340  ;;  %vm749_vm7 = vsmask.f32 (!%p239_p3), 4368  ;;  %vm751_vm9 = vsmask.f32 (!%p239_p3), 5396 }
   0xb   : > { %vm746_vm4 = vmor (!%p239_p3), %vm744_vm2, %vm745_vm3  ;;  %vm753_vm11 = vsmask.f32 (!%p239_p3), 6424  ;;  %vm755_vm12 = vsmask.f32 (!%p239_p3), 7452 }
   0xc   : > { %vm748_vm6 = vmor (!%p239_p3), %vm746_vm4, %vm747_vm5 }
   0xd   : > { %vm750_vm8 = vmor (!%p239_p3), %vm748_vm6, %vm749_vm7 }
   0xe   : > { %s1229_s18 = smov (!%p283_p4, %s1024_s18), 1  ;;  %vm752_vm10 = vmor %vm750_vm8, %vm751_vm9 }
   0xf   : > { %s984_s22 = smul.u32 24, %s1229_s18  ;;  %vm754_vm13 = vmor %vm752_vm10, %vm753_vm11  ;;  %s915_s24 = sshll.u32 %s1229_s18, 1 }
  0x10   : > { %vm756_vm14 = vmor %vm754_vm13, %vm755_vm12  ;;  %s309_s28 = scalar_lea.vmem %s1223_s5, %s915_s24 }
  0x11   : > { %s1089_s25 = scalar_lea.vmem %s1218_s0, %s984_s22 }
  0x12   : > { %v916_v3 = vld [vmem:[%s1089_s25 + $0x4] sm:$0x3]  ;;  %v917_v4 = vld [vmem:[%s1089_s25 + $0x8] sm:$0x3]  ;;  %v928_v16 = vld [vmem:[%s1089_s25 + $0xc] sm:$0x3] }
  0x13   : > { %v919_v5 = vld [vmem:[%s1089_s25 + $0x4] sm:$0x2]  ;;  %v313_v6 = vunpack.c.l.bf16 %v916_v3  ;;  %v314_v7 = vunpack.c.l.bf16 %v917_v4  ;;  %v920_v8 = vld [vmem:[%s1089_s25 + $0x8] sm:$0x2]  ;;  %v1115_v23 = vld [vmem:[%s1089_s25 + $0xc] sm:$0x2]  ;;  %v372_v27 = vunpack.c.l.bf16 %v928_v16 }
  0x14   : > { %v326_v9 = vunpack.c.l.bf16 %v919_v5  ;;  %v923_v10 = vld [vmem:[%s1089_s25 + $0x4] sm:$0x6]  ;;  %v924_v11 = vld [vmem:[%s1089_s25 + $0x8] sm:$0x6]  ;;  %v327_v12 = vunpack.c.l.bf16 %v920_v8  ;;  %v388_v32 = vunpack.c.l.bf16 %v1115_v23  ;;  %v936_v33 = vld [vmem:[%s1089_s25 + $0xc] sm:$0x6] }
  0x15   : > { %v348_v13 = vunpack.c.l.bf16 %v923_v10  ;;  %v349_v14 = vunpack.c.l.bf16 %v924_v11  ;;  %v927_v15 = vld [vmem:[%s1089_s25 + $0x8] sm:$0x3]  ;;  %v322_v18 = vmul.f32 %v918_v0, %v313_v6  ;;  %v323_v19 = vmul.f32 %v918_v0, %v314_v7  ;;  %v939_v43 = vld [vmem:[%s1089_s25 + $0xc] sm:$0x3]  ;;  %v940_v47 = vld [vmem:[%s1089_s25 + $0x10] sm:$0x3] }
  0x16   : > { %v1109_v17 = vld [vmem:[%s1089_s25 + $0x8] sm:$0x2]  ;;  %v336_v20 = vmul.f32 %v922_v1, %v326_v9  ;;  %v371_v21 = vunpack.c.l.bf16 %v927_v15  ;;  %v337_v24 = vmul.f32 %v922_v1, %v327_v12  ;;  %v398_v41 = vmul.f32 %v934_v28, %v388_v32  ;;  %v943_v48 = vld [vmem:[%s1089_s25 + $0xc] sm:$0x2]  ;;  %v944_v49 = vld [vmem:[%s1089_s25 + $0x10] sm:$0x2] }
  0x17   : > { %v358_v25 = vmul.f32 %v926_v2, %v348_v13  ;;  %v359_v26 = vmul.f32 %v926_v2, %v349_v14  ;;  %v935_v29 = vld [vmem:[%s1089_s25 + $0x8] sm:$0x6]  ;;  %v387_v31 = vunpack.c.l.bf16 %v1109_v17  ;;  %v382_v45 = vmul.f32 %v930_v22, %v372_v27  ;;  %v947_v53 = vld [vmem:[%s1089_s25 + $0xc] sm:$0x6]  ;;  %v948_v54 = vld [vmem:[%s1089_s25 + $0x10] sm:$0x6] }
  0x18   : > { %v340_v30 = vrot.slane %v336_v20, 1  ;;  %v341_v34 = vrot.slane %v337_v24, 1  ;;  %v381_v37 = vmul.f32 %v930_v22, %v371_v21  ;;  %v409_v42 = vunpack.c.l.bf16 %v935_v29  ;;  %v501_v0 = vld [vmem:[%s1089_s25] sm:$0x1]  ;;  %v502_v1 = vld [vmem:[%s1089_s25 + $0x4] sm:$0x1] }
  0x19   : > { %v362_v35 = vrot.slane %v358_v25, 2  ;;  %v363_v36 = vrot.slane %v359_v26, 2  ;;  %v397_v40 = vmul.f32 %v934_v28, %v387_v31  ;;  %v410_v46 = vunpack.c.l.bf16 %v936_v33  ;;  %v942_v4 = vld [vmem:[%s1219_s1 + $0x6] ss:$0 sm:$0xff]  ;;  %v950_v10 = vld [vmem:[%s1219_s1 + $0x8] ss:$0 sm:$0xff] }
  0x1a   : > { %v344_v39 = vadd.f32 %v340_v30, %v322_v18  ;;  %v345_v44 = vadd.f32 %v341_v34, %v323_v19  ;;  %v419_v52 = vmul.f32 %v938_v38, %v409_v42  ;;  %v402_v56 = vrot.slane %v398_v41, 1  ;;  %v952_v11 = vld [vmem:[%s1221_s3] ss:$0 sm:$0xff]  ;;  %v514_v15 = vld [vmem:[%s1089_s25] sm:$0x2] }
  0x1b   : > { %v401_v51 = vrot.slane %v397_v40, 1  ;;  %v420_v57 = vmul.f32 %v938_v38, %v410_v46  ;;  %v432_v58 = vunpack.c.l.bf16 %v939_v43  ;;  %v433_v61 = vunpack.c.l.bf16 %v940_v47  ;;  %v515_v16 = vld [vmem:[%s1089_s25 + $0x4] sm:$0x2]  ;;  %v536_v18 = vld [vmem:[%s1089_s25] sm:$0x4] }
  0x1c   : > { %v366_v50 = vadd.f32 %v362_v35, %v344_v39  ;;  %v367_v55 = vadd.f32 %v363_v36, %v345_v44  ;;  %v448_v62 = vunpack.c.l.bf16 %v943_v48  ;;  %v449_v63 = vunpack.c.l.bf16 %v944_v49  ;;  %v954_v22 = vld [vmem:[%s1221_s3 + $0x1] ss:$0 sm:$0xff]  ;;  %v537_v24 = vld [vmem:[%s1089_s25 + $0x4] sm:$0x4]  ;;  %v957_v25 = vld [vmem:[%s1089_s25 + $0x8] sm:$0x1] }
  0x1d   : > { %v423_v3 = vrot.slane %v419_v52, 2  ;;  %v470_v5 = vunpack.c.l.bf16 %v947_v53  ;;  %v471_v6 = vunpack.c.l.bf16 %v948_v54  ;;  %v424_v8 = vrot.slane %v420_v57, 2  ;;  %v956_v30 = vld [vmem:[%s1221_s3 + $0x2] ss:$0 sm:$0xff]  ;;  %v958_v33 = vld [vmem:[%s1089_s25 + $0xc] sm:$0x1] }
  0x1e   : > { %v383_v60 = vadd.f32 %v381_v37, %v366_v50  ;;  %v384_v2 = vadd.f32 %v382_v45, %v367_v55  ;;  %v458_v9 = vmul.f32 %v946_v59, %v448_v62  ;;  %v503_v13 = vunpack.c.l.bf16 %v501_v0  ;;  %v960_v46 = vld [vmem:[%s1221_s3 + $0x3] ss:$0 sm:$0xff]  ;;  %v962_v47 = vld [vmem:[%s1221_s3 + $0x4] ss:$0 sm:$0xff]  ;;  %v963_v52 = vld [vmem:[%s1089_s25 + $0x8] sm:$0x4] }
  0x1f   : > { %v504_v14 = vunpack.c.l.bf16 %v502_v1  ;;  %v442_v19 = vmul.f32 %v942_v4, %v432_v58  ;;  %v443_v20 = vmul.f32 %v942_v4, %v433_v61  ;;  %v459_v21 = vmul.f32 %v946_v59, %v449_v63  ;;  %v964_v57 = vld [vmem:[%s1089_s25 + $0xc] sm:$0x4]  ;;  %v966_v62 = vld [vmem:[%s1221_s3 + $0x5] ss:$0 sm:$0xff]  ;;  %v968_v4 = vld [vmem:[%s1089_s25 + $0x14] sm:$0x1] }
  0x20   : > { %v405_v7 = vadd.f32 %v401_v51, %v383_v60  ;;  %v406_v12 = vadd.f32 %v402_v56, %v384_v2  ;;  %v462_v27 = vrot.slane %v458_v9, 1  ;;  %v1159_v28 = vmul.f32 %v950_v10, %v470_v5 }
  0x21   : > { %v1161_v29 = vmul.f32 %v950_v10, %v471_v6  ;;  %v516_v35 = vunpack.c.l.bf16 %v514_v15  ;;  %v517_v36 = vunpack.c.l.bf16 %v515_v16  ;;  %v538_v37 = vunpack.c.l.bf16 %v536_v18  ;;  %v970_v10 = vld [vmem:[%s1221_s3 + $0x6] ss:$0 sm:$0xff]  ;;  %v974_v16 = vld [vmem:[%s1221_s3 + $0x7] ss:$0 sm:$0xff]  ;;  %v975_v18 = vld [vmem:[%s1089_s25 + $0x10] sm:$0x4] }
  0x22   : > { %v427_v26 = vadd.f32 %v423_v3, %v405_v7  ;;  %v428_v34 = vadd.f32 %v424_v8, %v406_v12  ;;  %v512_v38 = vmul.f32 %v952_v11, %v503_v13  ;;  %v513_v39 = vmul.f32 %v952_v11, %v504_v14  ;;  %v967_v3 = vld [vmem:[%s1089_s25 + $0x10] sm:$0x1]  ;;  %v971_v7 = vld [vmem:[%s1089_s25 + $0x10] sm:$0x2]  ;;  %v972_v11 = vld [vmem:[%s1089_s25 + $0x14] sm:$0x2] }
  0x23   : > { %v539_v40 = vunpack.c.l.bf16 %v537_v24  ;;  %v560_v41 = vunpack.c.l.bf16 %v957_v25  ;;  %v526_v42 = vmul.f32 %v954_v22, %v516_v35  ;;  %v527_v43 = vmul.f32 %v954_v22, %v517_v36  ;;  %v976_v24 = vld [vmem:[%s1089_s25 + $0x14] sm:$0x4] }
  0x24   : > { %v548_v44 = vmul.f32 %v956_v30, %v538_v37  ;;  %v561_v45 = vunpack.c.l.bf16 %v958_v33  ;;  %v444_v48 = vadd.f32 %v442_v19, %v427_v26  ;;  %v463_v49 = vrot.slane %v459_v21, 1 }
  0x25   : > { %v484_v50 = vrot.slane %v1159_v28, 2  ;;  %v549_v51 = vmul.f32 %v956_v30, %v539_v40  ;;  %v445_v53 = vadd.f32 %v443_v20, %v428_v34  ;;  %v530_v54 = vrot.slane %v526_v42, 2 }
  0x26   : > { %v531_v55 = vrot.slane %v527_v43, 2  ;;  %v552_v56 = vrot.slane %v548_v44, 4  ;;  %v570_v59 = vmul.f32 %v960_v46, %v560_v41  ;;  %v582_v60 = vmul.f32 %v962_v47, %v387_v31 }
  0x27   : > { %v553_v58 = vrot.slane %v549_v51, 4  ;;  %v583_v61 = vmul.f32 %v962_v47, %v388_v32  ;;  %v534_v63 = vadd.f32 %v530_v54, %v512_v38  ;;  %v571_v1 = vmul.f32 %v960_v46, %v561_v45  ;;  %v951_v46 = vld [vmem:[%s1220_s2] ss:$0 sm:$0xff] }
  0x28   : > { %v535_v0 = vadd.f32 %v531_v55, %v513_v39  ;;  %v594_v2 = vunpack.c.l.bf16 %v963_v52  ;;  %v466_v5 = vadd.f32 %v462_v27, %v444_v48  ;;  %v485_v6 = vrot.slane %v1161_v29, 2  ;;  %v978_v29 = vld [vmem:[%s1221_s3 + $0x8] ss:$0 sm:$0xff]  ;;  %v979_v54 = vld [vmem:[%s1222_s4] ss:$0 sm:$0xff] }
  0x29   : > { %v586_v17 = vrot.slane %v582_v60, 2  ;;  %v595_v31 = vunpack.c.l.bf16 %v964_v57  ;;  %v556_v23 = vadd.f32 %v552_v56, %v534_v63  ;;  %v587_v8 = vrot.slane %v583_v61, 2 }
  0x2a   : > { %v557_v32 = vadd.f32 %v553_v58, %v535_v0  ;;  %v604_v9 = vmul.f32 %v966_v62, %v594_v2  ;;  %v467_v12 = vadd.f32 %v463_v49, %v445_v53  ;;  %v617_v14 = vunpack.c.l.bf16 %v967_v3 }
  0x2b   : > { %v605_v13 = vmul.f32 %v966_v62, %v595_v31  ;;  %v618_v15 = vunpack.c.l.bf16 %v968_v4  ;;  %v572_v19 = vadd.f32 %v570_v59, %v556_v23  ;;  %v633_v22 = vunpack.c.l.bf16 %v971_v7 }
  0x2c   : > { %v573_v20 = vadd.f32 %v571_v1, %v557_v32  ;;  %v608_v21 = vrot.slane %v604_v9, 4  ;;  %v627_v26 = vmul.f32 %v970_v10, %v617_v14  ;;  %v634_v28 = vunpack.c.l.bf16 %v972_v11 }
  0x2d   : > { %v609_v25 = vrot.slane %v605_v13, 4  ;;  %v628_v27 = vmul.f32 %v970_v10, %v618_v15  ;;  %v590_v30 = vadd.f32 %v586_v17, %v572_v19  ;;  %v643_v34 = vmul.f32 %v974_v16, %v633_v22 }
  0x2e   : > { %v591_v33 = vadd.f32 %v587_v8, %v573_v20  ;;  %v655_v35 = vunpack.c.l.bf16 %v975_v18  ;;  %v488_v36 = vadd.f32 %v484_v50, %v466_v5  ;;  %v644_v37 = vmul.f32 %v974_v16, %v634_v28 }
  0x2f   : > { %v656_v38 = vunpack.c.l.bf16 %v976_v24  ;;  %v612_v39 = vadd.f32 %v608_v21, %v590_v30  ;;  %v647_v41 = vrot.slane %v643_v34, 2  ;;  %v489_v43 = vadd.f32 %v485_v6, %v467_v12 }
  0x30   : > { %v613_v40 = vadd.f32 %v609_v25, %v591_v33  ;;  %v665_v42 = vmul.f32 %v978_v29, %v655_v35  ;;  %v648_v44 = vrot.slane %v644_v37, 2  ;;  %v497_v53 = vadd.f32 %v951_v46, %v488_v36 }
  0x31   : > { %v666_v45 = vmul.f32 %v978_v29, %v656_v38  ;;  %v629_v47 = vadd.f32 %v627_v26, %v612_v39  ;;  %v701_v55 = vlaneseq  ;;  %v498_v56 = vadd.f32 %v951_v46, %v489_v43 }
  0x32   : > { %v630_v48 = vadd.f32 %v628_v27, %v613_v40  ;;  %v669_v49 = vrot.slane %v665_v42, 4  ;;  %v1034_v59 = vmov 1966171168   ;;  %v499_v63 = vmax.f32 %v497_v53, 0.0 }
  0x33   : > { %v670_v51 = vrot.slane %v666_v45, 4  ;;  %v651_v50 = vadd.f32 %v647_v41, %v629_v47  ;;  %v699_v60 = vunpack.c.l.s4 %v1034_v59  ;;  %v702_v0 = vshrl.u32 %v701_v55, 7 }
  0x34   : > { %v652_v52 = vadd.f32 %v648_v44, %v630_v48  ;;  %v500_v1 = vmax.f32 %v498_v56, 0.0 }
  0x35   : > { %v673_v57 = vadd.f32 %v669_v49, %v651_v50  ;;  %v700_v4 = vunpack.c.0.s8 %v699_v60 }
  0x36   : > { %v674_v58 = vadd.f32 %v670_v51, %v652_v52 }
  0x37   : > { %v682_v61 = vadd.f32 %v979_v54, %v673_v57  ;;  %v703_v7 = vsub.s32 %v700_v4, %v702_v0 }
  0x38   : > { %v683_v62 = vadd.f32 %v979_v54, %v674_v58 }
  0x39   : > { %v684_v2 = vmax.f32 %v682_v61, 0.0 }
  0x3a   : > { %v685_v3 = vmax.f32 %v683_v62, 0.0 }
  0x3b   : > { %v688_v5 = vrot.slane %v684_v2, 7 }
  0x3c   : > { %v689_v6 = vrot.slane %v685_v3, 7 }
  0x3d   : > { %v692_v17 = vadd.f32 %v688_v5, %v499_v63 }
  0x3e   : > { %v693_v31 = vadd.f32 %v689_v6, %v500_v1 }
  0x3f   : > { %v694_v23 = vpack.c.bf16 %v692_v17, %v692_v17 }
  0x40   : > { %v695_v32 = vpack.c.bf16 %v693_v31, %v693_v31 }
  0x41   : > { %v704_v8 = vrot.slane %v694_v23, %v703_v7 }
  0x42   : > { %v726_v9 = vrot.slane %v695_v32, %v703_v7 }
  0x43   : > { %v705_v10 = vcombine.high %v704_v8, %v704_v8  ;;  %v712_v11 = vrot.slane %v704_v8, %v703_v7 }
  0x44   : > { %v727_v12 = vcombine.high %v726_v9, %v726_v9  ;;  %v734_v13 = vrot.slane %v726_v9, %v703_v7 }
  0x45   : > { %v719_v14 = vrot.slane %v705_v10, %v703_v7  ;;  %v758_v16 = vshrl.u32 %v712_v11, 16 }
  0x46   : > { %v741_v15 = vrot.slane %v727_v12, %v703_v7  ;;  %v767_v18 = vshrl.u32 %v734_v13, 16 }
  0x47   : > { %v763_v19 = vshll.u32 %v719_v14, 16 }
  0x48   : > { %v772_v20 = vshll.u32 %v741_v15, 16 }
  0x49   : > { %v765_v21 = vsel %vm756_vm14, %v758_v16, %v763_v19 }
  0x4a   : > { %v774_v22 = vsel %vm756_vm14, %v767_v18, %v772_v20  ;;  %777 = vst [vmem:[%s309_s28] sm:$0x1] %v765_v21 }
  0x4b   : > { %778 = vst [vmem:[%s309_s28 + $0x1] sm:$0x1] %v774_v22 }
  0x4c PF: > { %s15_s20 = sadd.s32 1, %s1032_s20   ;;  %s1224_s18 = smov %s1028_s19 }
  0x4d   : > { %p12_p5 = scmp.ge.s32.totalorder %s15_s20, 4   ;;  %s1225_s19 = smov %s1227_s21 }
  0x4f   :  { %14 = sbr.rel (!%p12_p5) target bundleno = 2 (0x2), region = 102 }

// kernel: _lambda_.108
= control target key start
LH: loop header
LB: loop body
LE: loop exit
PB: predicated region body
PF: predicated region fallthrough
CT: control target
= control target key end

     0   :  { %s1049_s18 = smov 0   ;;  %s1051_s19 = smov 0   ;;  %s1202_s0 = inlined_call_operand.vmem [shape: bf16[2,10,10,128], index: 0, kind: input, shape index: {}]   ;;  %s1203_s1 = inlined_call_operand.vmem [shape: f32[9,1,128], index: 1, kind: input, shape index: {}]   ;;  %s1204_s2 = inlined_call_operand.vmem [shape: f32[1,128], index: 2, kind: input, shape index: {}]   ;;  %s1205_s3 = inlined_call_operand.vmem [shape: f32[9,1,128], index: 3, kind: input, shape index: {}]   ;;  %s1206_s4 = inlined_call_operand.vmem [shape: f32[1,128], index: 4, kind: input, shape index: {}]   ;;  %s1207_s5 = inlined_call_operand.vmem [shape: bf16[2,2,2,128], index: 5, kind: output, shape index: {}]  }
   0x1   :  { %s1053_s20 = smov 0  }
   0x2 LB: > { %s27_s21 = sadd.s32 1, %s1012_s19  ;;  %p897_p0 = scmp.ge.s32.totalorder %s1016_s20, 1  ;;  %s1016_s20 = sphi %s1053_s20, %s15_s20   ;;  %s1012_s19 = sphi %s1051_s19, %s1209_s19   ;;  %s1008_s18 = sphi %s1049_s18, %s1208_s18  }
   0x3   : > { %p29_p1 = scmp.ge.s32.totalorder %s27_s21, 2  ;;  %p238_p2 = scmp.lt.s32.totalorder %s1016_s20, 3 }
   0x5   : > { %s1211_s21 = smov (%p29_p1, %s27_s21), 0  ;;  %p239_p3 = pnand %p897_p0, %p238_p2 }
   0x6   : > { %p283_p4 = scmp.lt.s32.totalorder (!%p239_p3), %s1008_s18, 1  ;;  %v902_v0 = vld [vmem:[%s1203_s1] ss:$0 sm:$0xff] (!%p239_p3)  ;;  %v906_v1 = vld [vmem:[%s1203_s1 + $0x1] ss:$0 sm:$0xff] (!%p239_p3) }
   0x7   : > { %242 = sbr.rel (%p239_p3) target bundleno = 75 (0x4b), region = 40  ;;  %v910_v2 = vld [vmem:[%s1203_s1 + $0x2] ss:$0 sm:$0xff] (!%p239_p3)  ;;  %v914_v22 = vld [vmem:[%s1203_s1 + $0x3] ss:$0 sm:$0xff] (!%p239_p3) }
   0x8   : > { %v918_v28 = vld [vmem:[%s1203_s1 + $0x4] ss:$0 sm:$0xff] (!%p239_p3)  ;;  %v922_v38 = vld [vmem:[%s1203_s1 + $0x5] ss:$0 sm:$0xff] (!%p239_p3)  ;;  %v926_v63 = vld [vmem:[%s1203_s1 + $0x6] ss:$0 sm:$0xff] (!%p239_p3) }
   0x9   : > { %vm726_vm0 = vsmask.f32 (!%p239_p3), 256  ;;  %vm727_vm1 = vsmask.f32 (!%p239_p3), 1284  ;;  %vm729_vm3 = vsmask.f32 (!%p239_p3), 2312 }
   0xa   : > { %vm728_vm2 = vmor (!%p239_p3), %vm726_vm0, %vm727_vm1  ;;  %vm731_vm5 = vsmask.f32 (!%p239_p3), 3340  ;;  %vm733_vm7 = vsmask.f32 (!%p239_p3), 4368  ;;  %vm735_vm9 = vsmask.f32 (!%p239_p3), 5396 }
   0xb   : > { %vm730_vm4 = vmor (!%p239_p3), %vm728_vm2, %vm729_vm3  ;;  %vm737_vm11 = vsmask.f32 (!%p239_p3), 6424  ;;  %vm739_vm12 = vsmask.f32 (!%p239_p3), 7452 }
   0xc   : > { %vm732_vm6 = vmor (!%p239_p3), %vm730_vm4, %vm731_vm5 }
   0xd   : > { %vm734_vm8 = vmor (!%p239_p3), %vm732_vm6, %vm733_vm7 }
   0xe   : > { %s1213_s18 = smov (!%p283_p4, %s1008_s18), 1  ;;  %vm736_vm10 = vmor %vm734_vm8, %vm735_vm9 }
   0xf   : > { %s968_s22 = smul.u32 80, %s1213_s18  ;;  %vm738_vm13 = vmor %vm736_vm10, %vm737_vm11  ;;  %s899_s24 = sshll.u32 %s1213_s18, 1 }
  0x10   : > { %vm740_vm14 = vmor %vm738_vm13, %vm739_vm12  ;;  %s309_s28 = scalar_lea.vmem %s1207_s5, %s899_s24 }
  0x11   : > { %s1073_s25 = scalar_lea.vmem %s1202_s0, %s968_s22 }
  0x12   : > { %v900_v3 = vld [vmem:[%s1073_s25 + $0x18] sm:$0x6]  ;;  %v901_v4 = vld [vmem:[%s1073_s25 + $0x20] sm:$0x6]  ;;  %v912_v16 = vld [vmem:[%s1073_s25 + $0x28] sm:$0x6] }
  0x13   : > { %v903_v5 = vld [vmem:[%s1073_s25 + $0x18] sm:$0x4]  ;;  %v313_v6 = vunpack.c.l.bf16 %v900_v3  ;;  %v314_v7 = vunpack.c.l.bf16 %v901_v4  ;;  %v904_v8 = vld [vmem:[%s1073_s25 + $0x20] sm:$0x4]  ;;  %v1099_v23 = vld [vmem:[%s1073_s25 + $0x28] sm:$0x4]  ;;  %v372_v27 = vunpack.c.l.bf16 %v912_v16 }
  0x14   : > { %v326_v9 = vunpack.c.l.bf16 %v903_v5  ;;  %v907_v10 = vld [vmem:[%s1073_s25 + $0x18] sm:$0xc]  ;;  %v908_v11 = vld [vmem:[%s1073_s25 + $0x20] sm:$0xc]  ;;  %v327_v12 = vunpack.c.l.bf16 %v904_v8  ;;  %v388_v32 = vunpack.c.l.bf16 %v1099_v23  ;;  %v920_v33 = vld [vmem:[%s1073_s25 + $0x28] sm:$0xc] }
  0x15   : > { %v348_v13 = vunpack.c.l.bf16 %v907_v10  ;;  %v349_v14 = vunpack.c.l.bf16 %v908_v11  ;;  %v911_v15 = vld [vmem:[%s1073_s25 + $0x20] sm:$0x6]  ;;  %v322_v18 = vmul.f32 %v902_v0, %v313_v6  ;;  %v323_v19 = vmul.f32 %v902_v0, %v314_v7  ;;  %v923_v46 = vld [vmem:[%s1073_s25 + $0x28] sm:$0x6]  ;;  %v924_v47 = vld [vmem:[%s1073_s25 + $0x30] sm:$0x6] }
  0x16   : > { %v1093_v17 = vld [vmem:[%s1073_s25 + $0x20] sm:$0x4]  ;;  %v336_v20 = vmul.f32 %v906_v1, %v326_v9  ;;  %v371_v21 = vunpack.c.l.bf16 %v911_v15  ;;  %v337_v24 = vmul.f32 %v906_v1, %v327_v12  ;;  %v398_v41 = vmul.f32 %v918_v28, %v388_v32  ;;  %v927_v48 = vld [vmem:[%s1073_s25 + $0x28] sm:$0x4]  ;;  %v928_v52 = vld [vmem:[%s1073_s25 + $0x30] sm:$0x4] }
  0x17   : > { %v358_v25 = vmul.f32 %v910_v2, %v348_v13  ;;  %v359_v26 = vmul.f32 %v910_v2, %v349_v14  ;;  %v919_v29 = vld [vmem:[%s1073_s25 + $0x20] sm:$0xc]  ;;  %v387_v31 = vunpack.c.l.bf16 %v1093_v17  ;;  %v382_v44 = vmul.f32 %v914_v22, %v372_v27  ;;  %v931_v53 = vld [vmem:[%s1073_s25 + $0x28] sm:$0xc]  ;;  %v932_v57 = vld [vmem:[%s1073_s25 + $0x30] sm:$0xc] }
  0x18   : > { %v340_v30 = vrot.slane %v336_v20, 1  ;;  %v341_v34 = vrot.slane %v337_v24, 1  ;;  %v381_v37 = vmul.f32 %v914_v22, %v371_v21  ;;  %v409_v42 = vunpack.c.l.bf16 %v919_v29  ;;  %v501_v3 = vld [vmem:[%s1073_s25] sm:$0x1]  ;;  %v502_v4 = vld [vmem:[%s1073_s25 + $0x8] sm:$0x1] }
  0x19   : > { %v362_v35 = vrot.slane %v358_v25, 2  ;;  %v363_v36 = vrot.slane %v359_v26, 2  ;;  %v397_v40 = vmul.f32 %v918_v28, %v387_v31  ;;  %v410_v45 = vunpack.c.l.bf16 %v920_v33  ;;  %v930_v6 = vld [vmem:[%s1203_s1 + $0x7] ss:$0 sm:$0xff]  ;;  %v934_v8 = vld [vmem:[%s1203_s1 + $0x8] ss:$0 sm:$0xff] }
  0x1a   : > { %v344_v39 = vadd.f32 %v340_v30, %v322_v18  ;;  %v345_v43 = vadd.f32 %v341_v34, %v323_v19  ;;  %v419_v51 = vmul.f32 %v922_v38, %v409_v42  ;;  %v402_v55 = vrot.slane %v398_v41, 1  ;;  %v514_v9 = vld [vmem:[%s1073_s25] sm:$0x4]  ;;  %v515_v12 = vld [vmem:[%s1073_s25 + $0x8] sm:$0x4] }
  0x1b   : > { %v401_v50 = vrot.slane %v397_v40, 1  ;;  %v420_v56 = vmul.f32 %v922_v38, %v410_v45  ;;  %v432_v60 = vunpack.c.l.bf16 %v923_v46  ;;  %v433_v61 = vunpack.c.l.bf16 %v924_v47  ;;  %v536_v13 = vld [vmem:[%s1073_s25 + $0x4] sm:$0x1]  ;;  %v537_v19 = vld [vmem:[%s1073_s25 + $0xc] sm:$0x1] }
  0x1c   : > { %v366_v49 = vadd.f32 %v362_v35, %v344_v39  ;;  %v367_v54 = vadd.f32 %v363_v36, %v345_v43  ;;  %v423_v59 = vrot.slane %v419_v51, 2  ;;  %v448_v0 = vunpack.c.l.bf16 %v927_v48  ;;  %v941_v20 = vld [vmem:[%s1073_s25 + $0x20] sm:$0x1]  ;;  %v942_v21 = vld [vmem:[%s1073_s25 + $0x28] sm:$0x1] }
  0x1d   : > { %v449_v1 = vunpack.c.l.bf16 %v928_v52  ;;  %v470_v2 = vunpack.c.l.bf16 %v931_v53  ;;  %v471_v7 = vunpack.c.l.bf16 %v932_v57  ;;  %v424_v11 = vrot.slane %v420_v56, 2  ;;  %v936_v27 = vld [vmem:[%s1205_s3] ss:$0 sm:$0xff]  ;;  %v938_v28 = vld [vmem:[%s1205_s3 + $0x1] ss:$0 sm:$0xff] }
  0x1e   : > { %v383_v58 = vadd.f32 %v381_v37, %v366_v49  ;;  %v384_v62 = vadd.f32 %v382_v44, %v367_v54  ;;  %v442_v14 = vmul.f32 %v926_v63, %v432_v60  ;;  %v443_v15 = vmul.f32 %v926_v63, %v433_v61  ;;  %v940_v35 = vld [vmem:[%s1205_s3 + $0x2] ss:$0 sm:$0xff]  ;;  %v946_v40 = vld [vmem:[%s1205_s3 + $0x4] ss:$0 sm:$0xff]  ;;  %v944_v45 = vld [vmem:[%s1205_s3 + $0x3] ss:$0 sm:$0xff] }
  0x1f   : > { %v503_v16 = vunpack.c.l.bf16 %v501_v3  ;;  %v504_v18 = vunpack.c.l.bf16 %v502_v4  ;;  %v458_v24 = vmul.f32 %v930_v6, %v448_v0  ;;  %v459_v25 = vmul.f32 %v930_v6, %v449_v1  ;;  %v948_v51 = vld [vmem:[%s1073_s25 + $0x2c] sm:$0x1]  ;;  %v950_v60 = vld [vmem:[%s1205_s3 + $0x5] ss:$0 sm:$0xff]  ;;  %v951_v61 = vld [vmem:[%s1073_s25 + $0x40] sm:$0x1] }
  0x20   : > { %v405_v5 = vadd.f32 %v401_v50, %v383_v58  ;;  %v406_v10 = vadd.f32 %v402_v55, %v384_v62  ;;  %v1138_v26 = vmul.f32 %v934_v8, %v470_v2  ;;  %v1146_v29 = vmul.f32 %v934_v8, %v471_v7  ;;  %v947_v50 = vld [vmem:[%s1073_s25 + $0x24] sm:$0x1]  ;;  %v952_v2 = vld [vmem:[%s1073_s25 + $0x48] sm:$0x1]  ;;  %v955_v17 = vld [vmem:[%s1073_s25 + $0x40] sm:$0x4] }
  0x21   : > { %v516_v30 = vunpack.c.l.bf16 %v514_v9  ;;  %v517_v33 = vunpack.c.l.bf16 %v515_v12  ;;  %v538_v34 = vunpack.c.l.bf16 %v536_v13  ;;  %v539_v37 = vunpack.c.l.bf16 %v537_v19 }
  0x22   : > { %v427_v22 = vadd.f32 %v423_v59, %v405_v5  ;;  %v428_v36 = vadd.f32 %v424_v11, %v406_v10  ;;  %v554_v38 = vunpack.c.l.bf16 %v941_v20  ;;  %v555_v39 = vunpack.c.l.bf16 %v942_v21  ;;  %v958_v5 = vld [vmem:[%s1205_s3 + $0x7] ss:$0 sm:$0xff]  ;;  %v959_v10 = vld [vmem:[%s1073_s25 + $0x44] sm:$0x1]  ;;  %v960_v11 = vld [vmem:[%s1073_s25 + $0x4c] sm:$0x1] }
  0x23   : > { %v512_v41 = vmul.f32 %v936_v27, %v503_v16  ;;  %v513_v42 = vmul.f32 %v936_v27, %v504_v18  ;;  %v526_v43 = vmul.f32 %v938_v28, %v516_v30  ;;  %v527_v44 = vmul.f32 %v938_v28, %v517_v33  ;;  %v962_v33 = vld [vmem:[%s1205_s3 + $0x8] ss:$0 sm:$0xff] }
  0x24   : > { %v444_v46 = vadd.f32 %v442_v14, %v427_v22  ;;  %v462_v47 = vrot.slane %v458_v24, 1  ;;  %v463_v48 = vrot.slane %v459_v25, 1  ;;  %v548_v49 = vmul.f32 %v940_v35, %v538_v34  ;;  %v954_v14 = vld [vmem:[%s1205_s3 + $0x6] ss:$0 sm:$0xff] }
  0x25   : > { %v530_v52 = vrot.slane %v526_v43, 4  ;;  %v531_v53 = vrot.slane %v527_v44, 4  ;;  %v549_v54 = vmul.f32 %v940_v35, %v539_v37  ;;  %v576_v55 = vmul.f32 %v946_v40, %v387_v31  ;;  %v956_v31 = vld [vmem:[%s1073_s25 + $0x48] sm:$0x4] }
  0x26   : > { %v445_v56 = vadd.f32 %v443_v15, %v428_v36  ;;  %v564_v57 = vmul.f32 %v944_v45, %v554_v38  ;;  %v565_v58 = vmul.f32 %v944_v45, %v555_v39  ;;  %v577_v59 = vmul.f32 %v946_v40, %v388_v32 }
  0x27   : > { %v534_v62 = vadd.f32 %v530_v52, %v512_v41  ;;  %v535_v63 = vadd.f32 %v531_v53, %v513_v42  ;;  %v588_v0 = vunpack.c.l.bf16 %v947_v50  ;;  %v589_v1 = vunpack.c.l.bf16 %v948_v51  ;;  %v935_v42 = vld [vmem:[%s1204_s2] ss:$0 sm:$0xff] }
  0x28   : > { %v466_v3 = vadd.f32 %v462_v47, %v444_v46  ;;  %v484_v4 = vrot.slane %v1138_v26, 2  ;;  %v485_v23 = vrot.slane %v1146_v29, 2  ;;  %v580_v32 = vrot.slane %v576_v55, 4 }
  0x29   : > { %v550_v6 = vadd.f32 %v548_v49, %v534_v62  ;;  %v551_v7 = vadd.f32 %v549_v54, %v535_v63  ;;  %v581_v8 = vrot.slane %v577_v59, 4  ;;  %v605_v9 = vunpack.c.l.bf16 %v951_v61 }
  0x2a   : > { %v467_v12 = vadd.f32 %v463_v48, %v445_v56  ;;  %v606_v13 = vunpack.c.l.bf16 %v952_v2  ;;  %v621_v15 = vunpack.c.l.bf16 %v955_v17  ;;  %v622_v16 = vunpack.c.l.bf16 %v956_v31  ;;  %v963_v48 = vld [vmem:[%s1206_s4] ss:$0 sm:$0xff] }
  0x2b   : > { %v566_v18 = vadd.f32 %v564_v57, %v550_v6  ;;  %v567_v19 = vadd.f32 %v565_v58, %v551_v7  ;;  %v598_v20 = vmul.f32 %v950_v60, %v588_v0  ;;  %v599_v21 = vmul.f32 %v950_v60, %v589_v1 }
  0x2c   : > { %v631_v22 = vmul.f32 %v958_v5, %v621_v15  ;;  %v632_v24 = vmul.f32 %v958_v5, %v622_v16  ;;  %v643_v25 = vunpack.c.l.bf16 %v959_v10  ;;  %v644_v26 = vunpack.c.l.bf16 %v960_v11 }
  0x2d   : > { %v584_v27 = vadd.f32 %v580_v32, %v566_v18  ;;  %v585_v28 = vadd.f32 %v581_v8, %v567_v19  ;;  %v615_v29 = vmul.f32 %v954_v14, %v605_v9  ;;  %v616_v30 = vmul.f32 %v954_v14, %v606_v13 }
  0x2e   : > { %v635_v36 = vrot.slane %v631_v22, 4  ;;  %v636_v37 = vrot.slane %v632_v24, 4  ;;  %v488_v38 = vadd.f32 %v484_v4, %v466_v3  ;;  %v489_v39 = vadd.f32 %v485_v23, %v467_v12 }
  0x2f   : > { %v600_v34 = vadd.f32 %v598_v20, %v584_v27  ;;  %v601_v35 = vadd.f32 %v599_v21, %v585_v28  ;;  %v653_v40 = vmul.f32 %v962_v33, %v643_v25  ;;  %v654_v41 = vmul.f32 %v962_v33, %v644_v26 }
  0x30   : > { %v497_v47 = vadd.f32 %v935_v42, %v488_v38  ;;  %v683_v49 = vlaneseq  ;;  %v498_v50 = vadd.f32 %v935_v42, %v489_v39  ;;  %v1018_v53 = vmov 1966171168  }
  0x31   : > { %v617_v43 = vadd.f32 %v615_v29, %v600_v34  ;;  %v618_v44 = vadd.f32 %v616_v30, %v601_v35  ;;  %v681_v54 = vunpack.c.l.s4 %v1018_v53 }
  0x32   : > { %v499_v57 = vmax.f32 %v497_v47, 0.0  ;;  %v684_v58 = vshrl.u32 %v683_v49, 7  ;;  %v500_v59 = vmax.f32 %v498_v50, 0.0 }
  0x33   : > { %v639_v45 = vadd.f32 %v635_v36, %v617_v43  ;;  %v640_v46 = vadd.f32 %v636_v37, %v618_v44  ;;  %v682_v62 = vunpack.c.0.s8 %v681_v54 }
  0x35   : > { %v655_v51 = vadd.f32 %v653_v40, %v639_v45  ;;  %v656_v52 = vadd.f32 %v654_v41, %v640_v46  ;;  %v685_v17 = vsub.s32 %v682_v62, %v684_v58 }
  0x37   : > { %v664_v55 = vadd.f32 %v963_v48, %v655_v51  ;;  %v665_v56 = vadd.f32 %v963_v48, %v656_v52 }
  0x39   : > { %v666_v60 = vmax.f32 %v664_v55, 0.0  ;;  %v667_v61 = vmax.f32 %v665_v56, 0.0 }
  0x3b   : > { %v670_v63 = vrot.slane %v666_v60, 5  ;;  %v671_v0 = vrot.slane %v667_v61, 5 }
  0x3d   : > { %v674_v1 = vadd.f32 %v670_v63, %v499_v57  ;;  %v675_v2 = vadd.f32 %v671_v0, %v500_v59 }
  0x3f   : > { %v676_v31 = vpack.c.bf16 %v674_v1, %v674_v1  ;;  %v677_v3 = vpack.c.bf16 %v675_v2, %v675_v2 }
  0x41   : > { %v686_v4 = vrot.slane %v676_v31, %v685_v17  ;;  %v709_v23 = vrot.slane %v677_v3, %v685_v17 }
  0x43   : > { %v687_v32 = vcombine.high %v686_v4, %v686_v4  ;;  %v694_v5 = vrot.slane %v686_v4, %v685_v17  ;;  %v710_v6 = vcombine.high %v709_v23, %v709_v23  ;;  %v717_v7 = vrot.slane %v709_v23, %v685_v17 }
  0x45   : > { %v701_v8 = vrot.slane %v687_v32, %v685_v17  ;;  %v702_v9 = vcombine.high %v694_v5, %v694_v5  ;;  %v724_v10 = vrot.slane %v710_v6, %v685_v17  ;;  %v725_v11 = vcombine.high %v717_v7, %v717_v7 }
  0x47   : > { %v742_v12 = vshrl.u32 %v701_v8, 16  ;;  %v747_v13 = vshll.u32 %v702_v9, 16  ;;  %v751_v14 = vshrl.u32 %v724_v10, 16  ;;  %v756_v15 = vshll.u32 %v725_v11, 16 }
  0x49   : > { %v749_v16 = vsel %vm740_vm14, %v742_v12, %v747_v13  ;;  %v758_v18 = vsel %vm740_vm14, %v751_v14, %v756_v15 }
  0x4a   : > { %761 = vst [vmem:[%s309_s28] sm:$0x1] %v749_v16  ;;  %762 = vst [vmem:[%s309_s28 + $0x1] sm:$0x1] %v758_v18 }
  0x4b PF: > { %s15_s20 = sadd.s32 1, %s1016_s20   ;;  %s1208_s18 = smov %s1012_s19 }
  0x4c   : > { %p12_p5 = scmp.ge.s32.totalorder %s15_s20, 4   ;;  %s1209_s19 = smov %s1211_s21 }
  0x4e   :  { %14 = sbr.rel (!%p12_p5) target bundleno = 2 (0x2), region = 102 }

// kernel: _lambda_.112
= control target key start
LH: loop header
LB: loop body
LE: loop exit
PB: predicated region body
PF: predicated region fallthrough
CT: control target
= control target key end

     0   :  { %s1077_s18 = smov 0   ;;  %s1079_s19 = smov 0   ;;  %s1220_s0 = inlined_call_operand.vmem [shape: bf16[2,18,18,128], index: 0, kind: input, shape index: {}]   ;;  %s1221_s1 = inlined_call_operand.vmem [shape: f32[9,1,128], index: 1, kind: input, shape index: {}]   ;;  %s1222_s2 = inlined_call_operand.vmem [shape: f32[1,128], index: 2, kind: input, shape index: {}]   ;;  %s1223_s3 = inlined_call_operand.vmem [shape: f32[9,1,128], index: 3, kind: input, shape index: {}]   ;;  %s1224_s4 = inlined_call_operand.vmem [shape: f32[1,128], index: 4, kind: input, shape index: {}]   ;;  %s1225_s5 = inlined_call_operand.vmem [shape: bf16[2,2,2,128], index: 5, kind: output, shape index: {}]  }
   0x1   :  { %s1081_s20 = smov 0  }
   0x2 LB: > { %s27_s21 = sadd.s32 1, %s1040_s19  ;;  %p923_p0 = scmp.ge.s32.totalorder %s1044_s20, 1  ;;  %s1044_s20 = sphi %s1081_s20, %s15_s20   ;;  %s1040_s19 = sphi %s1079_s19, %s1227_s19   ;;  %s1036_s18 = sphi %s1077_s18, %s1226_s18  }
   0x3   : > { %p29_p1 = scmp.ge.s32.totalorder %s27_s21, 2  ;;  %p238_p2 = scmp.lt.s32.totalorder %s1044_s20, 3 }
   0x5   : > { %s1229_s21 = smov (%p29_p1, %s27_s21), 0  ;;  %p239_p3 = pnand %p923_p0, %p238_p2 }
   0x6   : > { %p283_p4 = scmp.lt.s32.totalorder (!%p239_p3), %s1036_s18, 1  ;;  %v930_v0 = vld [vmem:[%s1221_s1] ss:$0 sm:$0xff] (!%p239_p3)  ;;  %v932_v1 = vld [vmem:[%s1221_s1 + $0x1] ss:$0 sm:$0xff] (!%p239_p3) }
   0x7   : > { %242 = sbr.rel (%p239_p3) target bundleno = 80 (0x50), region = 40  ;;  %v936_v2 = vld [vmem:[%s1221_s1 + $0x2] ss:$0 sm:$0xff] (!%p239_p3)  ;;  %v942_v27 = vld [vmem:[%s1221_s1 + $0x3] ss:$0 sm:$0xff] (!%p239_p3) }
   0x8   : > { %v944_v36 = vld [vmem:[%s1221_s1 + $0x4] ss:$0 sm:$0xff] (!%p239_p3)  ;;  %v948_v51 = vld [vmem:[%s1221_s1 + $0x5] ss:$0 sm:$0xff] (!%p239_p3)  ;;  %vm752_vm0 = vsmask.f32 (!%p239_p3), 256 }
   0x9   : > { %vm753_vm1 = vsmask.f32 (!%p239_p3), 1284  ;;  %vm755_vm3 = vsmask.f32 (!%p239_p3), 2312  ;;  %vm757_vm5 = vsmask.f32 (!%p239_p3), 3340 }
   0xa   : > { %vm754_vm2 = vmor (!%p239_p3), %vm752_vm0, %vm753_vm1  ;;  %vm759_vm7 = vsmask.f32 (!%p239_p3), 4368  ;;  %vm761_vm8 = vsmask.f32 (!%p239_p3), 5396  ;;  %vm763_vm11 = vsmask.f32 (!%p239_p3), 6424 }
   0xb   : > { %vm756_vm4 = vmor (!%p239_p3), %vm754_vm2, %vm755_vm3  ;;  %vm765_vm13 = vsmask.f32 (!%p239_p3), 7452 }
   0xc   : > { %vm758_vm6 = vmor (!%p239_p3), %vm756_vm4, %vm757_vm5 }
   0xd   : > { %vm760_vm9 = vmor (!%p239_p3), %vm758_vm6, %vm759_vm7 }
   0xe   : > { %s1231_s18 = smov (!%p283_p4, %s1036_s18), 1  ;;  %vm762_vm10 = vmor %vm760_vm9, %vm761_vm8 }
   0xf   : > { %s996_s22 = smul.u32 216, %s1231_s18  ;;  %vm764_vm12 = vmor %vm762_vm10, %vm763_vm11  ;;  %s925_s24 = sshll.u32 %s1231_s18, 1 }
  0x10   : > { %vm766_vm14 = vmor %vm764_vm12, %vm765_vm13  ;;  %s309_s28 = scalar_lea.vmem %s1225_s5, %s925_s24 }
  0x11   : > { %s1101_s25 = scalar_lea.vmem %s1220_s0, %s996_s22 }
  0x12   : > { %v926_v3 = vld [vmem:[%s1101_s25 + $0x54] sm:$0x8]  ;;  %v927_v4 = vld [vmem:[%s1101_s25 + $0x58] sm:$0x1]  ;;  %v928_v5 = vld [vmem:[%s1101_s25 + $0x60] sm:$0x8] }
  0x13   : > { %v929_v6 = vld [vmem:[%s1101_s25 + $0x64] sm:$0x1]  ;;  %v315_v7 = vunpack.c.l.bf16 %v926_v3  ;;  %v316_v8 = vunpack.c.l.bf16 %v927_v4  ;;  %v317_v9 = vunpack.c.l.bf16 %v928_v5  ;;  %v933_v10 = vld [vmem:[%s1101_s25 + $0x58] sm:$0x3]  ;;  %v937_v15 = vld [vmem:[%s1101_s25 + $0x60] sm:$0x8] }
  0x14   : > { %v934_v11 = vld [vmem:[%s1101_s25 + $0x64] sm:$0x3]  ;;  %v318_v12 = vunpack.c.l.bf16 %v929_v6  ;;  %v352_v13 = vunpack.c.l.bf16 %v933_v10  ;;  %v939_v17 = vld [vmem:[%s1101_s25 + $0x6c] sm:$0x8]  ;;  %v940_v22 = vld [vmem:[%s1101_s25 + $0x70] sm:$0x1]  ;;  %v379_v29 = vunpack.c.l.bf16 %v937_v15 }
  0x15   : > { %v353_v14 = vunpack.c.l.bf16 %v934_v11  ;;  %v938_v16 = vld [vmem:[%s1101_s25 + $0x64] sm:$0x1]  ;;  %v326_v18 = vmul.f32 %v930_v0, %v315_v7  ;;  %v327_v19 = vmul.f32 %v930_v0, %v316_v8  ;;  %v328_v20 = vmul.f32 %v930_v0, %v317_v9  ;;  %v946_v42 = vld [vmem:[%s1101_s25 + $0x70] sm:$0x3]  ;;  %v949_v56 = vld [vmem:[%s1101_s25 + $0x6c] sm:$0x8] }
  0x16   : > { %v338_v21 = vmul.f32 %v932_v1, %v316_v8  ;;  %v329_v23 = vmul.f32 %v930_v0, %v318_v12  ;;  %v339_v24 = vmul.f32 %v932_v1, %v318_v12  ;;  %v362_v25 = vmul.f32 %v936_v2, %v352_v13  ;;  %v945_v41 = vld [vmem:[%s1101_s25 + $0x64] sm:$0x3]  ;;  %v950_v57 = vld [vmem:[%s1101_s25 + $0x70] sm:$0x1]  ;;  %v952_v3 = vld [vmem:[%s1101_s25 + $0x7c] sm:$0x1] }
  0x17   : > { %v363_v26 = vmul.f32 %v936_v2, %v353_v14  ;;  %v1125_v30 = vunpack.c.l.bf16 %v938_v16  ;;  %v381_v31 = vunpack.c.l.bf16 %v939_v17  ;;  %v1127_v35 = vunpack.c.l.bf16 %v940_v22  ;;  %v951_v2 = vld [vmem:[%s1101_s25 + $0x78] sm:$0x8]  ;;  %v954_v11 = vld [vmem:[%s1221_s1 + $0x6] ss:$0 sm:$0xff]  ;;  %v956_v15 = vld [vmem:[%s1221_s1 + $0x7] ss:$0 sm:$0xff] }
  0x18   : > { %v342_v28 = vrot.slane %v338_v21, 1  ;;  %v343_v32 = vrot.slane %v339_v24, 1  ;;  %v366_v33 = vrot.slane %v362_v25, 2  ;;  %v391_v39 = vmul.f32 %v942_v27, %v379_v29  ;;  %v957_v16 = vld [vmem:[%s1101_s25 + $0x70] sm:$0x3] }
  0x19   : > { %v367_v34 = vrot.slane %v363_v26, 2  ;;  %v392_v40 = vmul.f32 %v942_v27, %v1125_v30  ;;  %v393_v45 = vmul.f32 %v942_v27, %v381_v31  ;;  %v394_v46 = vmul.f32 %v942_v27, %v1127_v35  ;;  %v958_v21 = vld [vmem:[%s1101_s25 + $0x7c] sm:$0x3]  ;;  %v527_v22 = vld [vmem:[%s1101_s25] sm:$0x1] }
  0x1a   : > { %v346_v37 = vadd.f32 %v342_v28, %v326_v18  ;;  %v347_v38 = vadd.f32 %v342_v28, %v327_v19  ;;  %v348_v43 = vadd.f32 %v343_v32, %v328_v20  ;;  %v349_v44 = vadd.f32 %v343_v32, %v329_v23  ;;  %v528_v23 = vld [vmem:[%s1101_s25 + $0xc] sm:$0x1]  ;;  %v962_v31 = vld [vmem:[%s1223_s3] ss:$0 sm:$0xff]  ;;  %v540_v32 = vld [vmem:[%s1101_s25 + $0x4] sm:$0x1] }
  0x1b   : > { %v407_v49 = vmul.f32 %v944_v36, %v1125_v30  ;;  %v408_v50 = vmul.f32 %v944_v36, %v1127_v35  ;;  %v421_v54 = vunpack.c.l.bf16 %v945_v41  ;;  %v422_v55 = vunpack.c.l.bf16 %v946_v42 }
  0x1c   : > { %v370_v47 = vadd.f32 %v366_v33, %v346_v37  ;;  %v371_v48 = vadd.f32 %v366_v33, %v347_v38  ;;  %v372_v52 = vadd.f32 %v367_v34, %v348_v43  ;;  %v373_v53 = vadd.f32 %v367_v34, %v349_v44  ;;  %v541_v38 = vld [vmem:[%s1101_s25 + $0x10] sm:$0x1]  ;;  %v960_v43 = vld [vmem:[%s1221_s1 + $0x8] ss:$0 sm:$0xff] }
  0x1d   : > { %v411_v60 = vrot.slane %v407_v49, 1  ;;  %v412_v61 = vrot.slane %v408_v50, 1  ;;  %v431_v0 = vmul.f32 %v948_v51, %v421_v54  ;;  %v432_v1 = vmul.f32 %v948_v51, %v422_v55  ;;  %v966_v49 = vld [vmem:[%s1223_s3 + $0x2] ss:$0 sm:$0xff] }
  0x1e   : > { %v395_v58 = vadd.f32 %v391_v39, %v370_v47  ;;  %v396_v59 = vadd.f32 %v392_v40, %v371_v48  ;;  %v397_v62 = vadd.f32 %v393_v45, %v372_v52  ;;  %v398_v63 = vadd.f32 %v394_v46, %v373_v53  ;;  %v556_v39 = vld [vmem:[%s1101_s25 + $0x8] sm:$0x1]  ;;  %v557_v40 = vld [vmem:[%s1101_s25 + $0x14] sm:$0x1]  ;;  %v964_v48 = vld [vmem:[%s1223_s3 + $0x1] ss:$0 sm:$0xff] }
  0x1f   : > { %v448_v6 = vunpack.c.l.bf16 %v949_v56  ;;  %v449_v7 = vunpack.c.l.bf16 %v950_v57  ;;  %v435_v9 = vrot.slane %v431_v0, 2  ;;  %v436_v10 = vrot.slane %v432_v1, 2 }
  0x20   : > { %v415_v4 = vadd.f32 %v411_v60, %v395_v58  ;;  %v416_v5 = vadd.f32 %v411_v60, %v396_v59  ;;  %v417_v8 = vadd.f32 %v412_v61, %v397_v62  ;;  %v418_v12 = vadd.f32 %v412_v61, %v398_v63  ;;  %v967_v58 = vld [vmem:[%s1101_s25 + $0x60] sm:$0x1]  ;;  %v968_v59 = vld [vmem:[%s1101_s25 + $0x6c] sm:$0x1] }
  0x21   : > { %v450_v13 = vunpack.c.l.bf16 %v951_v2  ;;  %v451_v14 = vunpack.c.l.bf16 %v952_v3  ;;  %v460_v19 = vmul.f32 %v954_v11, %v448_v6  ;;  %v461_v20 = vmul.f32 %v954_v11, %v449_v7  ;;  %v970_v2 = vld [vmem:[%s1223_s3 + $0x3] ss:$0 sm:$0xff] }
  0x22   : > { %v439_v17 = vadd.f32 %v435_v9, %v415_v4  ;;  %v440_v18 = vadd.f32 %v435_v9, %v416_v5  ;;  %v441_v24 = vadd.f32 %v436_v10, %v417_v8  ;;  %v476_v26 = vmul.f32 %v956_v15, %v449_v7  ;;  %v972_v7 = vld [vmem:[%s1223_s3 + $0x4] ss:$0 sm:$0xff]  ;;  %v973_v8 = vld [vmem:[%s1101_s25 + $0x68] sm:$0x1]  ;;  %v974_v9 = vld [vmem:[%s1101_s25 + $0x74] sm:$0x1] }
  0x23   : > { %v462_v25 = vmul.f32 %v954_v11, %v450_v13  ;;  %v442_v27 = vadd.f32 %v436_v10, %v418_v12  ;;  %v463_v28 = vmul.f32 %v954_v11, %v451_v14  ;;  %v477_v29 = vmul.f32 %v956_v15, %v451_v14  ;;  %v977_v14 = vld [vmem:[%s1101_s25 + $0xc0] sm:$0x1]  ;;  %v978_v15 = vld [vmem:[%s1101_s25 + $0xcc] sm:$0x1] }
  0x24   : > { %v490_v33 = vunpack.c.l.bf16 %v957_v16  ;;  %v491_v34 = vunpack.c.l.bf16 %v958_v21  ;;  %v529_v36 = vunpack.c.l.bf16 %v527_v22  ;;  %v530_v37 = vunpack.c.l.bf16 %v528_v23  ;;  %v981_v21 = vld [vmem:[%s1101_s25 + $0xc4] sm:$0x1]  ;;  %v982_v22 = vld [vmem:[%s1101_s25 + $0xd0] sm:$0x1] }
  0x25   : > { %v464_v41 = vadd.f32 %v460_v19, %v439_v17  ;;  %v465_v42 = vadd.f32 %v461_v20, %v440_v18  ;;  %v466_v44 = vadd.f32 %v462_v25, %v441_v24  ;;  %v480_v45 = vrot.slane %v476_v26, 1  ;;  %v976_v20 = vld [vmem:[%s1223_s3 + $0x5] ss:$0 sm:$0xff] }
  0x26   : > { %v538_v46 = vmul.f32 %v962_v31, %v529_v36  ;;  %v539_v47 = vmul.f32 %v962_v31, %v530_v37  ;;  %v542_v50 = vunpack.c.l.bf16 %v540_v32  ;;  %v543_v51 = vunpack.c.l.bf16 %v541_v38 }
  0x27   : > { %v558_v52 = vunpack.c.l.bf16 %v556_v39  ;;  %v559_v53 = vunpack.c.l.bf16 %v557_v40  ;;  %v467_v54 = vadd.f32 %v463_v28, %v442_v27  ;;  %v481_v55 = vrot.slane %v477_v29, 1  ;;  %v980_v27 = vld [vmem:[%s1223_s3 + $0x6] ss:$0 sm:$0xff] }
  0x28   : > { %v500_v56 = vmul.f32 %v960_v43, %v490_v33  ;;  %v501_v57 = vmul.f32 %v960_v43, %v491_v34  ;;  %v552_v60 = vmul.f32 %v964_v48, %v542_v50  ;;  %v553_v61 = vmul.f32 %v964_v48, %v543_v51  ;;  %v985_v33 = vld [vmem:[%s1101_s25 + $0xc8] sm:$0x1]  ;;  %v986_v34 = vld [vmem:[%s1101_s25 + $0xd4] sm:$0x1] }
  0x29   : > { %v568_v62 = vmul.f32 %v966_v49, %v558_v52  ;;  %v569_v63 = vmul.f32 %v966_v49, %v559_v53  ;;  %v484_v0 = vadd.f32 %v480_v45, %v464_v41  ;;  %v485_v1 = vadd.f32 %v480_v45, %v465_v42 }
  0x2a   : > { %v554_v3 = vadd.f32 %v552_v60, %v538_v46  ;;  %v555_v4 = vadd.f32 %v553_v61, %v539_v47  ;;  %v574_v5 = vunpack.c.l.bf16 %v967_v58  ;;  %v575_v6 = vunpack.c.l.bf16 %v968_v59  ;;  %v988_v46 = vld [vmem:[%s1223_s3 + $0x8] ss:$0 sm:$0xff] }
  0x2b   : > { %v486_v10 = vadd.f32 %v481_v55, %v466_v44  ;;  %v487_v11 = vadd.f32 %v481_v55, %v467_v54  ;;  %v504_v12 = vrot.slane %v500_v56, 2  ;;  %v505_v13 = vrot.slane %v501_v57, 2  ;;  %v961_v54 = vld [vmem:[%s1222_s2] ss:$0 sm:$0xff] }
  0x2c   : > { %v570_v16 = vadd.f32 %v568_v62, %v554_v3  ;;  %v571_v17 = vadd.f32 %v569_v63, %v555_v4  ;;  %v584_v18 = vmul.f32 %v970_v2, %v574_v5  ;;  %v585_v19 = vmul.f32 %v970_v2, %v575_v6 }
  0x2d   : > { %v596_v23 = vmul.f32 %v972_v7, %v1125_v30  ;;  %v597_v24 = vmul.f32 %v972_v7, %v1127_v35  ;;  %v602_v25 = vunpack.c.l.bf16 %v973_v8  ;;  %v603_v26 = vunpack.c.l.bf16 %v974_v9  ;;  %v984_v30 = vld [vmem:[%s1223_s3 + $0x7] ss:$0 sm:$0xff] }
  0x2e   : > { %v586_v28 = vadd.f32 %v584_v18, %v570_v16  ;;  %v587_v29 = vadd.f32 %v585_v19, %v571_v17  ;;  %v619_v31 = vunpack.c.l.bf16 %v977_v14  ;;  %v620_v32 = vunpack.c.l.bf16 %v978_v15 }
  0x2f   : > { %v612_v36 = vmul.f32 %v976_v20, %v602_v25  ;;  %v613_v37 = vmul.f32 %v976_v20, %v603_v26  ;;  %v635_v38 = vunpack.c.l.bf16 %v981_v21  ;;  %v636_v39 = vunpack.c.l.bf16 %v982_v22 }
  0x30   : > { %v598_v35 = vadd.f32 %v596_v23, %v586_v28  ;;  %v599_v40 = vadd.f32 %v597_v24, %v587_v29  ;;  %v629_v41 = vmul.f32 %v980_v27, %v619_v31  ;;  %v630_v42 = vmul.f32 %v980_v27, %v620_v32 }
  0x31   : > { %v508_v43 = vadd.f32 %v504_v12, %v484_v0  ;;  %v651_v44 = vunpack.c.l.bf16 %v985_v33  ;;  %v652_v45 = vunpack.c.l.bf16 %v986_v34  ;;  %v645_v49 = vmul.f32 %v984_v30, %v635_v38 }
  0x32   : > { %v614_v47 = vadd.f32 %v612_v36, %v598_v35  ;;  %v615_v48 = vadd.f32 %v613_v37, %v599_v40  ;;  %v646_v50 = vmul.f32 %v984_v30, %v636_v39  ;;  %v509_v51 = vadd.f32 %v504_v12, %v485_v1  ;;  %v989_v1 = vld [vmem:[%s1224_s4] ss:$0 sm:$0xff] }
  0x33   : > { %v510_v52 = vadd.f32 %v505_v13, %v486_v10  ;;  %v511_v53 = vadd.f32 %v505_v13, %v487_v11  ;;  %v661_v57 = vmul.f32 %v988_v46, %v651_v44  ;;  %v662_v58 = vmul.f32 %v988_v46, %v652_v45 }
  0x34   : > { %v631_v55 = vadd.f32 %v629_v41, %v614_v47  ;;  %v632_v56 = vadd.f32 %v630_v42, %v615_v48  ;;  %v694_v59 = vlaneseq  ;;  %v519_v62 = vadd.f32 %v961_v54, %v508_v43 }
  0x35   : > { %v520_v63 = vadd.f32 %v961_v54, %v509_v51  ;;  %v521_v0 = vadd.f32 %v961_v54, %v510_v52  ;;  %v1046_v2 = vmov 1966171168   ;;  %v522_v4 = vadd.f32 %v961_v54, %v511_v53 }
  0x36   : > { %v647_v60 = vadd.f32 %v645_v49, %v631_v55  ;;  %v648_v61 = vadd.f32 %v646_v50, %v632_v56  ;;  %v692_v3 = vunpack.c.l.s4 %v1046_v2  ;;  %v695_v9 = vshrl.u32 %v694_v59, 7 }
  0x37   : > { %v523_v10 = vmax.f32 %v519_v62, 0.0  ;;  %v524_v11 = vmax.f32 %v520_v63, 0.0  ;;  %v525_v12 = vmax.f32 %v521_v0, 0.0  ;;  %v526_v14 = vmax.f32 %v522_v4, 0.0 }
  0x38   : > { %v663_v5 = vadd.f32 %v661_v57, %v647_v60  ;;  %v664_v6 = vadd.f32 %v662_v58, %v648_v61  ;;  %v693_v13 = vunpack.c.0.s8 %v692_v3 }
  0x3a   : > { %v672_v7 = vadd.f32 %v989_v1, %v663_v5  ;;  %v673_v8 = vadd.f32 %v989_v1, %v664_v6  ;;  %v696_v19 = vsub.s32 %v693_v13, %v695_v9 }
  0x3c   : > { %v674_v15 = vmax.f32 %v672_v7, 0.0  ;;  %v675_v16 = vmax.f32 %v673_v8, 0.0 }
  0x3e   : > { %v678_v17 = vrot.slane %v674_v15, 1  ;;  %v679_v18 = vrot.slane %v675_v16, 1 }
  0x40   : > { %v682_v20 = vadd.f32 %v678_v17, %v523_v10  ;;  %v683_v21 = vadd.f32 %v678_v17, %v524_v11  ;;  %v684_v22 = vadd.f32 %v679_v18, %v525_v12  ;;  %v685_v23 = vadd.f32 %v679_v18, %v526_v14 }
  0x42   : > { %v686_v24 = vpack.c.bf16 %v683_v21, %v682_v20  ;;  %v687_v25 = vpack.c.bf16 %v685_v23, %v684_v22  ;;  %v990_v26 = vpack.c.bf16 %v683_v21, %v683_v21  ;;  %v991_v27 = vpack.c.bf16 %v685_v23, %v685_v23 }
  0x44   : > { %v697_v28 = vrot.slane %v686_v24, %v696_v19  ;;  %v704_v29 = vrot.slane %v990_v26, %v696_v19  ;;  %v728_v31 = vrot.slane %v687_v25, %v696_v19  ;;  %v735_v32 = vrot.slane %v991_v27, %v696_v19 }
  0x46   : > { %v705_v33 = vcombine.high %v697_v28, %v697_v28  ;;  %v712_v34 = vrot.slane %v704_v29, %v696_v19  ;;  %v736_v36 = vcombine.high %v728_v31, %v728_v31  ;;  %v743_v37 = vrot.slane %v735_v32, %v696_v19 }
  0x48   : > { %v719_v38 = vrot.slane %v705_v33, %v696_v19  ;;  %v750_v39 = vrot.slane %v736_v36, %v696_v19  ;;  %v773_v40 = vshll.u32 %v712_v34, 16  ;;  %v782_v41 = vshll.u32 %v743_v37, 16 }
  0x4a   : > { %v720_v30 = vcombine.high %v719_v38, %v719_v38  ;;  %v751_v35 = vcombine.high %v750_v39, %v750_v39 }
  0x4c   : > { %v768_v42 = vshrl.u32 %v720_v30, 16  ;;  %v777_v43 = vshrl.u32 %v751_v35, 16 }
  0x4e   : > { %v775_v44 = vsel %vm766_vm14, %v768_v42, %v773_v40  ;;  %v784_v45 = vsel %vm766_vm14, %v777_v43, %v782_v41 }
  0x4f   : > { %787 = vst [vmem:[%s309_s28] sm:$0x1] %v775_v44  ;;  %788 = vst [vmem:[%s309_s28 + $0x1] sm:$0x1] %v784_v45 }
  0x50 PF: > { %s15_s20 = sadd.s32 1, %s1044_s20   ;;  %s1226_s18 = smov %s1040_s19 }
  0x51   : > { %p12_p5 = scmp.ge.s32.totalorder %s15_s20, 4   ;;  %s1227_s19 = smov %s1229_s21 }
  0x53   :  { %14 = sbr.rel (!%p12_p5) target bundleno = 2 (0x2), region = 102 }

// kernel: _lambda_.116
= control target key start
LH: loop header
LB: loop body
LE: loop exit
PB: predicated region body
PF: predicated region fallthrough
CT: control target
= control target key end

     0   :  { %s1077_s18 = smov 0   ;;  %s1079_s19 = smov 0   ;;  %s1220_s0 = inlined_call_operand.vmem [shape: bf16[2,34,34,128], index: 0, kind: input, shape index: {}]   ;;  %s1221_s1 = inlined_call_operand.vmem [shape: f32[9,1,128], index: 1, kind: input, shape index: {}]   ;;  %s1222_s2 = inlined_call_operand.vmem [shape: f32[1,128], index: 2, kind: input, shape index: {}]   ;;  %s1223_s3 = inlined_call_operand.vmem [shape: f32[9,1,128], index: 3, kind: input, shape index: {}]   ;;  %s1224_s4 = inlined_call_operand.vmem [shape: f32[1,128], index: 4, kind: input, shape index: {}]   ;;  %s1225_s5 = inlined_call_operand.vmem [shape: bf16[2,2,2,128], index: 5, kind: output, shape index: {}]  }
   0x1   :  { %s1081_s20 = smov 0  }
   0x2 LB: > { %s27_s21 = sadd.s32 1, %s1040_s19  ;;  %p923_p0 = scmp.ge.s32.totalorder %s1044_s20, 1  ;;  %s1044_s20 = sphi %s1081_s20, %s15_s20   ;;  %s1040_s19 = sphi %s1079_s19, %s1227_s19   ;;  %s1036_s18 = sphi %s1077_s18, %s1226_s18  }
   0x3   : > { %p29_p1 = scmp.ge.s32.totalorder %s27_s21, 2  ;;  %p238_p2 = scmp.lt.s32.totalorder %s1044_s20, 3 }
   0x5   : > { %s1229_s21 = smov (%p29_p1, %s27_s21), 0  ;;  %p239_p3 = pnand %p923_p0, %p238_p2 }
   0x6   : > { %p283_p4 = scmp.lt.s32.totalorder (!%p239_p3), %s1036_s18, 1  ;;  %v930_v0 = vld [vmem:[%s1221_s1] ss:$0 sm:$0xff] (!%p239_p3)  ;;  %v932_v1 = vld [vmem:[%s1221_s1 + $0x1] ss:$0 sm:$0xff] (!%p239_p3) }
   0x7   : > { %242 = sbr.rel (%p239_p3) target bundleno = 80 (0x50), region = 40  ;;  %v936_v2 = vld [vmem:[%s1221_s1 + $0x2] ss:$0 sm:$0xff] (!%p239_p3)  ;;  %v942_v27 = vld [vmem:[%s1221_s1 + $0x3] ss:$0 sm:$0xff] (!%p239_p3) }
   0x8   : > { %v944_v36 = vld [vmem:[%s1221_s1 + $0x4] ss:$0 sm:$0xff] (!%p239_p3)  ;;  %v948_v51 = vld [vmem:[%s1221_s1 + $0x5] ss:$0 sm:$0xff] (!%p239_p3)  ;;  %vm752_vm0 = vsmask.f32 (!%p239_p3), 256 }
   0x9   : > { %vm753_vm1 = vsmask.f32 (!%p239_p3), 1284  ;;  %vm755_vm3 = vsmask.f32 (!%p239_p3), 2312  ;;  %vm757_vm5 = vsmask.f32 (!%p239_p3), 3340 }
   0xa   : > { %vm754_vm2 = vmor (!%p239_p3), %vm752_vm0, %vm753_vm1  ;;  %vm759_vm7 = vsmask.f32 (!%p239_p3), 4368  ;;  %vm761_vm8 = vsmask.f32 (!%p239_p3), 5396  ;;  %vm763_vm11 = vsmask.f32 (!%p239_p3), 6424 }
   0xb   : > { %vm756_vm4 = vmor (!%p239_p3), %vm754_vm2, %vm755_vm3  ;;  %vm765_vm13 = vsmask.f32 (!%p239_p3), 7452 }
   0xc   : > { %vm758_vm6 = vmor (!%p239_p3), %vm756_vm4, %vm757_vm5 }
   0xd   : > { %vm760_vm9 = vmor (!%p239_p3), %vm758_vm6, %vm759_vm7 }
   0xe   : > { %s1231_s18 = smov (!%p283_p4, %s1036_s18), 1  ;;  %vm762_vm10 = vmor %vm760_vm9, %vm761_vm8 }
   0xf   : > { %s996_s22 = smul.u32 680, %s1231_s18  ;;  %vm764_vm12 = vmor %vm762_vm10, %vm763_vm11  ;;  %s925_s24 = sshll.u32 %s1231_s18, 1 }
  0x10   : > { %vm766_vm14 = vmor %vm764_vm12, %vm765_vm13  ;;  %s309_s28 = scalar_lea.vmem %s1225_s5, %s925_s24 }
  0x11   : > { %s1101_s25 = scalar_lea.vmem %s1220_s0, %s996_s22 }
  0x12   : > { %v926_v3 = vld [vmem:[%s1101_s25 + $0x130] sm:$0x8]  ;;  %v927_v4 = vld [vmem:[%s1101_s25 + $0x134] sm:$0x1]  ;;  %v928_v5 = vld [vmem:[%s1101_s25 + $0x144] sm:$0x8] }
  0x13   : > { %v929_v6 = vld [vmem:[%s1101_s25 + $0x148] sm:$0x1]  ;;  %v315_v7 = vunpack.c.l.bf16 %v926_v3  ;;  %v316_v8 = vunpack.c.l.bf16 %v927_v4  ;;  %v317_v9 = vunpack.c.l.bf16 %v928_v5  ;;  %v933_v10 = vld [vmem:[%s1101_s25 + $0x134] sm:$0x3]  ;;  %v937_v15 = vld [vmem:[%s1101_s25 + $0x144] sm:$0x8] }
  0x14   : > { %v934_v11 = vld [vmem:[%s1101_s25 + $0x148] sm:$0x3]  ;;  %v318_v12 = vunpack.c.l.bf16 %v929_v6  ;;  %v352_v13 = vunpack.c.l.bf16 %v933_v10  ;;  %v939_v17 = vld [vmem:[%s1101_s25 + $0x158] sm:$0x8]  ;;  %v940_v22 = vld [vmem:[%s1101_s25 + $0x15c] sm:$0x1]  ;;  %v379_v29 = vunpack.c.l.bf16 %v937_v15 }
  0x15   : > { %v353_v14 = vunpack.c.l.bf16 %v934_v11  ;;  %v938_v16 = vld [vmem:[%s1101_s25 + $0x148] sm:$0x1]  ;;  %v326_v18 = vmul.f32 %v930_v0, %v315_v7  ;;  %v327_v19 = vmul.f32 %v930_v0, %v316_v8  ;;  %v328_v20 = vmul.f32 %v930_v0, %v317_v9  ;;  %v946_v42 = vld [vmem:[%s1101_s25 + $0x15c] sm:$0x3]  ;;  %v949_v56 = vld [vmem:[%s1101_s25 + $0x158] sm:$0x8] }
  0x16   : > { %v338_v21 = vmul.f32 %v932_v1, %v316_v8  ;;  %v329_v23 = vmul.f32 %v930_v0, %v318_v12  ;;  %v339_v24 = vmul.f32 %v932_v1, %v318_v12  ;;  %v362_v25 = vmul.f32 %v936_v2, %v352_v13  ;;  %v945_v41 = vld [vmem:[%s1101_s25 + $0x148] sm:$0x3]  ;;  %v950_v57 = vld [vmem:[%s1101_s25 + $0x15c] sm:$0x1]  ;;  %v952_v3 = vld [vmem:[%s1101_s25 + $0x170] sm:$0x1] }
  0x17   : > { %v363_v26 = vmul.f32 %v936_v2, %v353_v14  ;;  %v1125_v30 = vunpack.c.l.bf16 %v938_v16  ;;  %v381_v31 = vunpack.c.l.bf16 %v939_v17  ;;  %v1127_v35 = vunpack.c.l.bf16 %v940_v22  ;;  %v951_v2 = vld [vmem:[%s1101_s25 + $0x16c] sm:$0x8]  ;;  %v954_v11 = vld [vmem:[%s1221_s1 + $0x6] ss:$0 sm:$0xff]  ;;  %v956_v15 = vld [vmem:[%s1221_s1 + $0x7] ss:$0 sm:$0xff] }
  0x18   : > { %v342_v28 = vrot.slane %v338_v21, 1  ;;  %v343_v32 = vrot.slane %v339_v24, 1  ;;  %v366_v33 = vrot.slane %v362_v25, 2  ;;  %v391_v39 = vmul.f32 %v942_v27, %v379_v29  ;;  %v957_v16 = vld [vmem:[%s1101_s25 + $0x15c] sm:$0x3] }
  0x19   : > { %v367_v34 = vrot.slane %v363_v26, 2  ;;  %v392_v40 = vmul.f32 %v942_v27, %v1125_v30  ;;  %v393_v45 = vmul.f32 %v942_v27, %v381_v31  ;;  %v394_v46 = vmul.f32 %v942_v27, %v1127_v35  ;;  %v958_v21 = vld [vmem:[%s1101_s25 + $0x170] sm:$0x3]  ;;  %v527_v22 = vld [vmem:[%s1101_s25] sm:$0x1] }
  0x1a   : > { %v346_v37 = vadd.f32 %v342_v28, %v326_v18  ;;  %v347_v38 = vadd.f32 %v342_v28, %v327_v19  ;;  %v348_v43 = vadd.f32 %v343_v32, %v328_v20  ;;  %v349_v44 = vadd.f32 %v343_v32, %v329_v23  ;;  %v528_v23 = vld [vmem:[%s1101_s25 + $0x14] sm:$0x1]  ;;  %v962_v31 = vld [vmem:[%s1223_s3] ss:$0 sm:$0xff]  ;;  %v540_v32 = vld [vmem:[%s1101_s25 + $0x8] sm:$0x1] }
  0x1b   : > { %v407_v49 = vmul.f32 %v944_v36, %v1125_v30  ;;  %v408_v50 = vmul.f32 %v944_v36, %v1127_v35  ;;  %v421_v54 = vunpack.c.l.bf16 %v945_v41  ;;  %v422_v55 = vunpack.c.l.bf16 %v946_v42 }
  0x1c   : > { %v370_v47 = vadd.f32 %v366_v33, %v346_v37  ;;  %v371_v48 = vadd.f32 %v366_v33, %v347_v38  ;;  %v372_v52 = vadd.f32 %v367_v34, %v348_v43  ;;  %v373_v53 = vadd.f32 %v367_v34, %v349_v44  ;;  %v541_v38 = vld [vmem:[%s1101_s25 + $0x1c] sm:$0x1]  ;;  %v960_v43 = vld [vmem:[%s1221_s1 + $0x8] ss:$0 sm:$0xff] }
  0x1d   : > { %v411_v60 = vrot.slane %v407_v49, 1  ;;  %v412_v61 = vrot.slane %v408_v50, 1  ;;  %v431_v0 = vmul.f32 %v948_v51, %v421_v54  ;;  %v432_v1 = vmul.f32 %v948_v51, %v422_v55  ;;  %v966_v49 = vld [vmem:[%s1223_s3 + $0x2] ss:$0 sm:$0xff] }
  0x1e   : > { %v395_v58 = vadd.f32 %v391_v39, %v370_v47  ;;  %v396_v59 = vadd.f32 %v392_v40, %v371_v48  ;;  %v397_v62 = vadd.f32 %v393_v45, %v372_v52  ;;  %v398_v63 = vadd.f32 %v394_v46, %v373_v53  ;;  %v556_v39 = vld [vmem:[%s1101_s25 + $0x10] sm:$0x1]  ;;  %v557_v40 = vld [vmem:[%s1101_s25 + $0x24] sm:$0x1]  ;;  %v964_v48 = vld [vmem:[%s1223_s3 + $0x1] ss:$0 sm:$0xff] }
  0x1f   : > { %v448_v6 = vunpack.c.l.bf16 %v949_v56  ;;  %v449_v7 = vunpack.c.l.bf16 %v950_v57  ;;  %v435_v9 = vrot.slane %v431_v0, 2  ;;  %v436_v10 = vrot.slane %v432_v1, 2 }
  0x20   : > { %v415_v4 = vadd.f32 %v411_v60, %v395_v58  ;;  %v416_v5 = vadd.f32 %v411_v60, %v396_v59  ;;  %v417_v8 = vadd.f32 %v412_v61, %v397_v62  ;;  %v418_v12 = vadd.f32 %v412_v61, %v398_v63  ;;  %v967_v58 = vld [vmem:[%s1101_s25 + $0x140] sm:$0x1]  ;;  %v968_v59 = vld [vmem:[%s1101_s25 + $0x154] sm:$0x1] }
  0x21   : > { %v450_v13 = vunpack.c.l.bf16 %v951_v2  ;;  %v451_v14 = vunpack.c.l.bf16 %v952_v3  ;;  %v460_v19 = vmul.f32 %v954_v11, %v448_v6  ;;  %v461_v20 = vmul.f32 %v954_v11, %v449_v7  ;;  %v970_v2 = vld [vmem:[%s1223_s3 + $0x3] ss:$0 sm:$0xff] }
  0x22   : > { %v439_v17 = vadd.f32 %v435_v9, %v415_v4  ;;  %v440_v18 = vadd.f32 %v435_v9, %v416_v5  ;;  %v441_v24 = vadd.f32 %v436_v10, %v417_v8  ;;  %v476_v26 = vmul.f32 %v956_v15, %v449_v7  ;;  %v972_v7 = vld [vmem:[%s1223_s3 + $0x4] ss:$0 sm:$0xff]  ;;  %v973_v8 = vld [vmem:[%s1101_s25 + $0x150] sm:$0x1] }
  0x23   : > { %v462_v25 = vmul.f32 %v954_v11, %v450_v13  ;;  %v442_v27 = vadd.f32 %v436_v10, %v418_v12  ;;  %v463_v28 = vmul.f32 %v954_v11, %v451_v14  ;;  %v477_v29 = vmul.f32 %v956_v15, %v451_v14  ;;  %v974_v9 = vld [vmem:[%s1101_s25 + $0x164] sm:$0x1]  ;;  %v977_v14 = vld [vmem:[%s1101_s25 + $0x280] sm:$0x1]  ;;  %v978_v15 = vld [vmem:[%s1101_s25 + $0x294] sm:$0x1] }
  0x24   : > { %v490_v33 = vunpack.c.l.bf16 %v957_v16  ;;  %v491_v34 = vunpack.c.l.bf16 %v958_v21  ;;  %v529_v36 = vunpack.c.l.bf16 %v527_v22  ;;  %v530_v37 = vunpack.c.l.bf16 %v528_v23  ;;  %v981_v21 = vld [vmem:[%s1101_s25 + $0x288] sm:$0x1]  ;;  %v982_v22 = vld [vmem:[%s1101_s25 + $0x29c] sm:$0x1] }
  0x25   : > { %v464_v41 = vadd.f32 %v460_v19, %v439_v17  ;;  %v465_v42 = vadd.f32 %v461_v20, %v440_v18  ;;  %v466_v44 = vadd.f32 %v462_v25, %v441_v24  ;;  %v480_v45 = vrot.slane %v476_v26, 1  ;;  %v976_v20 = vld [vmem:[%s1223_s3 + $0x5] ss:$0 sm:$0xff] }
  0x26   : > { %v538_v46 = vmul.f32 %v962_v31, %v529_v36  ;;  %v539_v47 = vmul.f32 %v962_v31, %v530_v37  ;;  %v542_v50 = vunpack.c.l.bf16 %v540_v32  ;;  %v543_v51 = vunpack.c.l.bf16 %v541_v38 }
  0x27   : > { %v558_v52 = vunpack.c.l.bf16 %v556_v39  ;;  %v559_v53 = vunpack.c.l.bf16 %v557_v40  ;;  %v467_v54 = vadd.f32 %v463_v28, %v442_v27  ;;  %v481_v55 = vrot.slane %v477_v29, 1  ;;  %v980_v27 = vld [vmem:[%s1223_s3 + $0x6] ss:$0 sm:$0xff] }
  0x28   : > { %v500_v56 = vmul.f32 %v960_v43, %v490_v33  ;;  %v501_v57 = vmul.f32 %v960_v43, %v491_v34  ;;  %v552_v60 = vmul.f32 %v964_v48, %v542_v50  ;;  %v553_v61 = vmul.f32 %v964_v48, %v543_v51  ;;  %v985_v33 = vld [vmem:[%s1101_s25 + $0x290] sm:$0x1]  ;;  %v986_v34 = vld [vmem:[%s1101_s25 + $0x2a4] sm:$0x1] }
  0x29   : > { %v568_v62 = vmul.f32 %v966_v49, %v558_v52  ;;  %v569_v63 = vmul.f32 %v966_v49, %v559_v53  ;;  %v484_v0 = vadd.f32 %v480_v45, %v464_v41  ;;  %v485_v1 = vadd.f32 %v480_v45, %v465_v42 }
  0x2a   : > { %v554_v3 = vadd.f32 %v552_v60, %v538_v46  ;;  %v555_v4 = vadd.f32 %v553_v61, %v539_v47  ;;  %v574_v5 = vunpack.c.l.bf16 %v967_v58  ;;  %v575_v6 = vunpack.c.l.bf16 %v968_v59  ;;  %v988_v46 = vld [vmem:[%s1223_s3 + $0x8] ss:$0 sm:$0xff] }
  0x2b   : > { %v486_v10 = vadd.f32 %v481_v55, %v466_v44  ;;  %v487_v11 = vadd.f32 %v481_v55, %v467_v54  ;;  %v504_v12 = vrot.slane %v500_v56, 2  ;;  %v505_v13 = vrot.slane %v501_v57, 2  ;;  %v961_v54 = vld [vmem:[%s1222_s2] ss:$0 sm:$0xff] }
  0x2c   : > { %v570_v16 = vadd.f32 %v568_v62, %v554_v3  ;;  %v571_v17 = vadd.f32 %v569_v63, %v555_v4  ;;  %v584_v18 = vmul.f32 %v970_v2, %v574_v5  ;;  %v585_v19 = vmul.f32 %v970_v2, %v575_v6 }
  0x2d   : > { %v596_v23 = vmul.f32 %v972_v7, %v1125_v30  ;;  %v597_v24 = vmul.f32 %v972_v7, %v1127_v35  ;;  %v602_v25 = vunpack.c.l.bf16 %v973_v8  ;;  %v603_v26 = vunpack.c.l.bf16 %v974_v9  ;;  %v984_v30 = vld [vmem:[%s1223_s3 + $0x7] ss:$0 sm:$0xff] }
  0x2e   : > { %v586_v28 = vadd.f32 %v584_v18, %v570_v16  ;;  %v587_v29 = vadd.f32 %v585_v19, %v571_v17  ;;  %v619_v31 = vunpack.c.l.bf16 %v977_v14  ;;  %v620_v32 = vunpack.c.l.bf16 %v978_v15 }
  0x2f   : > { %v612_v36 = vmul.f32 %v976_v20, %v602_v25  ;;  %v613_v37 = vmul.f32 %v976_v20, %v603_v26  ;;  %v635_v38 = vunpack.c.l.bf16 %v981_v21  ;;  %v636_v39 = vunpack.c.l.bf16 %v982_v22 }
  0x30   : > { %v598_v35 = vadd.f32 %v596_v23, %v586_v28  ;;  %v599_v40 = vadd.f32 %v597_v24, %v587_v29  ;;  %v629_v41 = vmul.f32 %v980_v27, %v619_v31  ;;  %v630_v42 = vmul.f32 %v980_v27, %v620_v32 }
  0x31   : > { %v508_v43 = vadd.f32 %v504_v12, %v484_v0  ;;  %v651_v44 = vunpack.c.l.bf16 %v985_v33  ;;  %v652_v45 = vunpack.c.l.bf16 %v986_v34  ;;  %v645_v49 = vmul.f32 %v984_v30, %v635_v38 }
  0x32   : > { %v614_v47 = vadd.f32 %v612_v36, %v598_v35  ;;  %v615_v48 = vadd.f32 %v613_v37, %v599_v40  ;;  %v646_v50 = vmul.f32 %v984_v30, %v636_v39  ;;  %v509_v51 = vadd.f32 %v504_v12, %v485_v1  ;;  %v989_v1 = vld [vmem:[%s1224_s4] ss:$0 sm:$0xff] }
  0x33   : > { %v510_v52 = vadd.f32 %v505_v13, %v486_v10  ;;  %v511_v53 = vadd.f32 %v505_v13, %v487_v11  ;;  %v661_v57 = vmul.f32 %v988_v46, %v651_v44  ;;  %v662_v58 = vmul.f32 %v988_v46, %v652_v45 }
  0x34   : > { %v631_v55 = vadd.f32 %v629_v41, %v614_v47  ;;  %v632_v56 = vadd.f32 %v630_v42, %v615_v48  ;;  %v694_v59 = vlaneseq  ;;  %v519_v62 = vadd.f32 %v961_v54, %v508_v43 }
  0x35   : > { %v520_v63 = vadd.f32 %v961_v54, %v509_v51  ;;  %v521_v0 = vadd.f32 %v961_v54, %v510_v52  ;;  %v1046_v2 = vmov 1966171168   ;;  %v522_v4 = vadd.f32 %v961_v54, %v511_v53 }
  0x36   : > { %v647_v60 = vadd.f32 %v645_v49, %v631_v55  ;;  %v648_v61 = vadd.f32 %v646_v50, %v632_v56  ;;  %v692_v3 = vunpack.c.l.s4 %v1046_v2  ;;  %v695_v9 = vshrl.u32 %v694_v59, 7 }
  0x37   : > { %v523_v10 = vmax.f32 %v519_v62, 0.0  ;;  %v524_v11 = vmax.f32 %v520_v63, 0.0  ;;  %v525_v12 = vmax.f32 %v521_v0, 0.0  ;;  %v526_v14 = vmax.f32 %v522_v4, 0.0 }
  0x38   : > { %v663_v5 = vadd.f32 %v661_v57, %v647_v60  ;;  %v664_v6 = vadd.f32 %v662_v58, %v648_v61  ;;  %v693_v13 = vunpack.c.0.s8 %v692_v3 }
  0x3a   : > { %v672_v7 = vadd.f32 %v989_v1, %v663_v5  ;;  %v673_v8 = vadd.f32 %v989_v1, %v664_v6  ;;  %v696_v19 = vsub.s32 %v693_v13, %v695_v9 }
  0x3c   : > { %v674_v15 = vmax.f32 %v672_v7, 0.0  ;;  %v675_v16 = vmax.f32 %v673_v8, 0.0 }
  0x3e   : > { %v678_v17 = vrot.slane %v674_v15, 1  ;;  %v679_v18 = vrot.slane %v675_v16, 1 }
  0x40   : > { %v682_v20 = vadd.f32 %v678_v17, %v523_v10  ;;  %v683_v21 = vadd.f32 %v678_v17, %v524_v11  ;;  %v684_v22 = vadd.f32 %v679_v18, %v525_v12  ;;  %v685_v23 = vadd.f32 %v679_v18, %v526_v14 }
  0x42   : > { %v686_v24 = vpack.c.bf16 %v683_v21, %v682_v20  ;;  %v687_v25 = vpack.c.bf16 %v685_v23, %v684_v22  ;;  %v990_v26 = vpack.c.bf16 %v683_v21, %v683_v21  ;;  %v991_v27 = vpack.c.bf16 %v685_v23, %v685_v23 }
  0x44   : > { %v697_v28 = vrot.slane %v686_v24, %v696_v19  ;;  %v704_v29 = vrot.slane %v990_v26, %v696_v19  ;;  %v728_v31 = vrot.slane %v687_v25, %v696_v19  ;;  %v735_v32 = vrot.slane %v991_v27, %v696_v19 }
  0x46   : > { %v705_v33 = vcombine.high %v697_v28, %v697_v28  ;;  %v712_v34 = vrot.slane %v704_v29, %v696_v19  ;;  %v736_v36 = vcombine.high %v728_v31, %v728_v31  ;;  %v743_v37 = vrot.slane %v735_v32, %v696_v19 }
  0x48   : > { %v719_v38 = vrot.slane %v705_v33, %v696_v19  ;;  %v750_v39 = vrot.slane %v736_v36, %v696_v19  ;;  %v773_v40 = vshll.u32 %v712_v34, 16  ;;  %v782_v41 = vshll.u32 %v743_v37, 16 }
  0x4a   : > { %v720_v30 = vcombine.high %v719_v38, %v719_v38  ;;  %v751_v35 = vcombine.high %v750_v39, %v750_v39 }
  0x4c   : > { %v768_v42 = vshrl.u32 %v720_v30, 16  ;;  %v777_v43 = vshrl.u32 %v751_v35, 16 }
  0x4e   : > { %v775_v44 = vsel %vm766_vm14, %v768_v42, %v773_v40  ;;  %v784_v45 = vsel %vm766_vm14, %v777_v43, %v782_v41 }
  0x4f   : > { %787 = vst [vmem:[%s309_s28] sm:$0x1] %v775_v44  ;;  %788 = vst [vmem:[%s309_s28 + $0x1] sm:$0x1] %v784_v45 }
  0x50 PF: > { %s15_s20 = sadd.s32 1, %s1044_s20   ;;  %s1226_s18 = smov %s1040_s19 }
  0x51   : > { %p12_p5 = scmp.ge.s32.totalorder %s15_s20, 4   ;;  %s1227_s19 = smov %s1229_s21 }
  0x53   :  { %14 = sbr.rel (!%p12_p5) target bundleno = 2 (0x2), region = 102 }

// kernel: _lambda_.134
= control target key start
LH: loop header
LB: loop body
LE: loop exit
PB: predicated region body
PF: predicated region fallthrough
CT: control target
= control target key end

     0   :  { %s936_s1 = inlined_call_operand.vmem [shape: bf16[512,256], index: 1, kind: input, shape index: {}]   ;;  %s937_s0 = inlined_call_operand.vmem [shape: bf16[8,512], index: 0, kind: input, shape index: {}]   ;;  %s938_s2 = inlined_call_operand.vmem [shape: f32[1,256], index: 2, kind: input, shape index: {}]   ;;  %s939_s3 = inlined_call_operand.vmem [shape: bf16[8,256], index: 3, kind: output, shape index: {}]  }
   0x1   :  { %v612_v0 = vld [vmem:[%s936_s1 + $0x4] ss:$8 sps:$4 sm:$0xff]   ;;  %v616_v2 = vld [vmem:[%s936_s1] ss:$8 sps:$4 sm:$0xff]   ;;  %v618_v4 = vld [vmem:[%s936_s1 + $0x14] ss:$8 sps:$4 sm:$0xff]  }
   0x2   :  { %v614_v1 = vld [vmem:[%s936_s1 + $0x104] ss:$8 sps:$4 sm:$0xff]   ;;  %422 = vmatprep.subr.bf16.mxu0 %v612_v0  ;;  %v617_v3 = vld [vmem:[%s936_s1 + $0x100] ss:$8 sps:$4 sm:$0xff]   ;;  %v620_v5 = vld [vmem:[%s936_s1 + $0x114] ss:$8 sps:$4 sm:$0xff]  }
   0x3   :  { %463 = vmatprep.subr.bf16.mxu1 %v614_v1  ;;  %423 = vmatpush1.bf16.msra.mxu0 %v616_v2  ;;  %v622_v6 = vld [vmem:[%s936_s1 + $0x10] ss:$8 sps:$4 sm:$0xff]   ;;  %v624_v8 = vld [vmem:[%s936_s1 + $0x24] ss:$8 sps:$4 sm:$0xff]   ;;  %v628_v10 = vld [vmem:[%s936_s1 + $0x20] ss:$8 sps:$4 sm:$0xff]  }
   0x4   :  { %464 = vmatpush1.bf16.msra.mxu1 %v617_v3  ;;  %424 = vmatprep.subr.bf16.mxu0 %v618_v4  ;;  %v623_v7 = vld [vmem:[%s936_s1 + $0x110] ss:$8 sps:$4 sm:$0xff]   ;;  %v626_v9 = vld [vmem:[%s936_s1 + $0x124] ss:$8 sps:$4 sm:$0xff]   ;;  %v629_v11 = vld [vmem:[%s936_s1 + $0x120] ss:$8 sps:$4 sm:$0xff]  }
   0x5   :  { %465 = vmatprep.subr.bf16.mxu1 %v620_v5  ;;  %v630_v12 = vld [vmem:[%s936_s1 + $0x34] ss:$8 sps:$4 sm:$0xff]   ;;  %v634_v14 = vld [vmem:[%s936_s1 + $0x30] ss:$8 sps:$4 sm:$0xff]   ;;  %v636_v16 = vld [vmem:[%s936_s1 + $0x44] ss:$8 sps:$4 sm:$0xff]  }
   0x6   :  { %v632_v13 = vld [vmem:[%s936_s1 + $0x134] ss:$8 sps:$4 sm:$0xff]   ;;  %v635_v15 = vld [vmem:[%s936_s1 + $0x130] ss:$8 sps:$4 sm:$0xff]   ;;  %v638_v17 = vld [vmem:[%s936_s1 + $0x144] ss:$8 sps:$4 sm:$0xff]  }
   0x7   :  { %425 = vmatpush1.bf16.msra.mxu0 %v622_v6  ;;  %v640_v18 = vld [vmem:[%s936_s1 + $0x40] ss:$8 sps:$4 sm:$0xff]   ;;  %v642_v20 = vld [vmem:[%s936_s1 + $0x54] ss:$8 sps:$4 sm:$0xff]   ;;  %v646_v22 = vld [vmem:[%s936_s1 + $0x50] ss:$8 sps:$4 sm:$0xff]   ;;  %v515_v6 = vlaneseq }
   0x8   :  { %466 = vmatpush1.bf16.msra.mxu1 %v623_v7  ;;  %426 = vmatprep.subr.bf16.mxu0 %v624_v8  ;;  %v641_v19 = vld [vmem:[%s936_s1 + $0x140] ss:$8 sps:$4 sm:$0xff]   ;;  %v644_v21 = vld [vmem:[%s936_s1 + $0x154] ss:$8 sps:$4 sm:$0xff]   ;;  %v647_v23 = vld [vmem:[%s936_s1 + $0x150] ss:$8 sps:$4 sm:$0xff]  }
   0x9   :  { %467 = vmatprep.subr.bf16.mxu1 %v626_v9  ;;  %v648_v24 = vld [vmem:[%s936_s1 + $0x64] ss:$8 sps:$4 sm:$0xff]   ;;  %v652_v26 = vld [vmem:[%s936_s1 + $0x60] ss:$8 sps:$4 sm:$0xff]   ;;  %v654_v28 = vld [vmem:[%s936_s1 + $0x74] ss:$8 sps:$4 sm:$0xff]  }
   0xa   :  { %v650_v25 = vld [vmem:[%s936_s1 + $0x164] ss:$8 sps:$4 sm:$0xff]   ;;  %v653_v27 = vld [vmem:[%s936_s1 + $0x160] ss:$8 sps:$4 sm:$0xff]   ;;  %v656_v29 = vld [vmem:[%s936_s1 + $0x174] ss:$8 sps:$4 sm:$0xff]  }
   0xb   :  { %427 = vmatpush1.bf16.msra.mxu0 %v628_v10  ;;  %v658_v30 = vld [vmem:[%s936_s1 + $0x70] ss:$8 sps:$4 sm:$0xff]   ;;  %v660_v32 = vld [vmem:[%s936_s1 + $0x84] ss:$8 sps:$4 sm:$0xff]   ;;  %v664_v34 = vld [vmem:[%s936_s1 + $0x80] ss:$8 sps:$4 sm:$0xff]  }
   0xc   :  { %468 = vmatpush1.bf16.msra.mxu1 %v629_v11  ;;  %428 = vmatprep.subr.bf16.mxu0 %v630_v12  ;;  %v659_v31 = vld [vmem:[%s936_s1 + $0x170] ss:$8 sps:$4 sm:$0xff]   ;;  %v662_v33 = vld [vmem:[%s936_s1 + $0x184] ss:$8 sps:$4 sm:$0xff]   ;;  %v665_v35 = vld [vmem:[%s936_s1 + $0x180] ss:$8 sps:$4 sm:$0xff]  }
   0xd   :  { %469 = vmatprep.subr.bf16.mxu1 %v632_v13  ;;  %v666_v36 = vld [vmem:[%s936_s1 + $0x94] ss:$8 sps:$4 sm:$0xff]   ;;  %v670_v38 = vld [vmem:[%s936_s1 + $0x90] ss:$8 sps:$4 sm:$0xff]   ;;  %v672_v40 = vld [vmem:[%s936_s1 + $0xa4] ss:$8 sps:$4 sm:$0xff]  }
   0xe   :  { %v668_v37 = vld [vmem:[%s936_s1 + $0x194] ss:$8 sps:$4 sm:$0xff]   ;;  %v671_v39 = vld [vmem:[%s936_s1 + $0x190] ss:$8 sps:$4 sm:$0xff]   ;;  %v674_v41 = vld [vmem:[%s936_s1 + $0x1a4] ss:$8 sps:$4 sm:$0xff]  }
   0xf   :  { %429 = vmatpush1.bf16.msra.mxu0 %v634_v14  ;;  %v676_v42 = vld [vmem:[%s936_s1 + $0xa0] ss:$8 sps:$4 sm:$0xff]   ;;  %v678_v44 = vld [vmem:[%s936_s1 + $0xb4] ss:$8 sps:$4 sm:$0xff]   ;;  %v682_v49 = vld [vmem:[%s936_s1 + $0xb0] ss:$8 sps:$4 sm:$0xff]  }
  0x10   :  { %470 = vmatpush1.bf16.msra.mxu1 %v635_v15  ;;  %430 = vmatprep.subr.bf16.mxu0 %v636_v16  ;;  %v677_v43 = vld [vmem:[%s936_s1 + $0x1a0] ss:$8 sps:$4 sm:$0xff]   ;;  %v680_v45 = vld [vmem:[%s936_s1 + $0x1b4] ss:$8 sps:$4 sm:$0xff]   ;;  %v683_v50 = vld [vmem:[%s936_s1 + $0x1b0] ss:$8 sps:$4 sm:$0xff]  }
  0x11   :  { %471 = vmatprep.subr.bf16.mxu1 %v638_v17  ;;  %v22_v46 = vld [vmem:[%s937_s0] sm:$0xff]  ;;  %v23_v48 = vld [vmem:[%s937_s0 + $0x8] sm:$0xff]  ;;  %v690_v56 = vld [vmem:[%s936_s1 + $0xd4] ss:$8 sps:$4 sm:$0xff]   ;;  %v516_v7 = vshrl.u32 %v515_v6, 7 }
  0x12   :  { %v543_v47 = vcombine.high %v22_v46, %v22_v46  ;;  %v545_v51 = vcombine.high %v23_v48, %v23_v48  ;;  %v684_v52 = vld [vmem:[%s936_s1 + $0xc4] ss:$8 sps:$4 sm:$0xff]   ;;  %v688_v54 = vld [vmem:[%s936_s1 + $0xc0] ss:$8 sps:$4 sm:$0xff]   ;;  %v692_v57 = vld [vmem:[%s936_s1 + $0x1d4] ss:$8 sps:$4 sm:$0xff]   ;;  %v542_v4 = vcombine.low %v22_v46, %v22_v46  ;;  %v544_v5 = vcombine.low %v23_v48, %v23_v48 }
  0x13   :  { %431 = vmatpush1.bf16.msra.mxu0 %v640_v18  ;;  %v686_v53 = vld [vmem:[%s936_s1 + $0x1c4] ss:$8 sps:$4 sm:$0xff]   ;;  %v689_v55 = vld [vmem:[%s936_s1 + $0x1c0] ss:$8 sps:$4 sm:$0xff]   ;;  %v694_v58 = vld [vmem:[%s936_s1 + $0xd0] ss:$8 sps:$4 sm:$0xff]  }
  0x14   :  { %472 = vmatpush1.bf16.msra.mxu1 %v641_v19  ;;  %432 = vmatprep.subr.bf16.mxu0 %v642_v20  ;;  %v695_v59 = vld [vmem:[%s936_s1 + $0x1d0] ss:$8 sps:$4 sm:$0xff]   ;;  %v696_v60 = vld [vmem:[%s936_s1 + $0xe4] ss:$8 sps:$4 sm:$0xff]   ;;  %v700_v62 = vld [vmem:[%s936_s1 + $0xe0] ss:$8 sps:$4 sm:$0xff]  }
  0x15   :  { %473 = vmatprep.subr.bf16.mxu1 %v644_v21  ;;  %454 = vmatprep.mubr.bf16.mxu0 %v543_v47  ;;  %v698_v61 = vld [vmem:[%s936_s1 + $0x1e4] ss:$8 sps:$4 sm:$0xff]   ;;  %v701_v63 = vld [vmem:[%s936_s1 + $0x1e0] ss:$8 sps:$4 sm:$0xff]   ;;  %v702_v0 = vld [vmem:[%s936_s1 + $0xf4] ss:$8 sps:$4 sm:$0xff]  }
  0x16   :  { %495 = vmatprep.mubr.bf16.mxu1 %v545_v51  ;;  %v704_v1 = vld [vmem:[%s936_s1 + $0x1f4] ss:$8 sps:$4 sm:$0xff]   ;;  %v706_v2 = vld [vmem:[%s936_s1 + $0xf0] ss:$8 sps:$4 sm:$0xff]   ;;  %v517_v8 = vsub.s32 0, %v516_v7  ;;  %v521_v10 = vsub.s32 1, %v516_v7 }
  0x17   :  { %433 = vmatpush1.bf16.msra.mxu0 %v646_v22  ;;  %v707_v3 = vld [vmem:[%s936_s1 + $0x1f0] ss:$8 sps:$4 sm:$0xff]   ;;  %v513_v9 = vld [vmem:[%s938_s2] sm:$0x3] }
  0x18   :  { %474 = vmatpush1.bf16.msra.mxu1 %v647_v23  ;;  %434 = vmatprep.subr.bf16.mxu0 %v648_v24  ;;  %v518_v11 = vrot.slane %v513_v9, %v517_v8  ;;  %v522_v14 = vrot.slane %v513_v9, %v521_v10 }
  0x19   :  { %475 = vmatprep.subr.bf16.mxu1 %v650_v25 }
  0x1b   :  { %435 = vmatpush1.bf16.msra.mxu0 %v652_v26 }
  0x1c   :  { %476 = vmatpush1.bf16.msra.mxu1 %v653_v27  ;;  %436 = vmatprep.subr.bf16.mxu0 %v654_v28 }
  0x1d   :  { %477 = vmatprep.subr.bf16.mxu1 %v656_v29 }
  0x1f   :  { %437 = vmatpush1.bf16.msra.mxu0 %v658_v30 }
  0x20   :  { %478 = vmatpush1.bf16.msra.mxu1 %v659_v31  ;;  %438 = vmatprep.subr.bf16.mxu0 %v660_v32 }
  0x21   :  { %479 = vmatprep.subr.bf16.mxu1 %v662_v33 }
  0x23   :  { %439 = vmatpush1.bf16.msra.mxu0 %v664_v34 }
  0x24   :  { %480 = vmatpush1.bf16.msra.mxu1 %v665_v35  ;;  %440 = vmatprep.subr.bf16.mxu0 %v666_v36 }
  0x25   :  { %481 = vmatprep.subr.bf16.mxu1 %v668_v37 }
  0x27   :  { %441 = vmatpush1.bf16.msra.mxu0 %v670_v38 }
  0x28   :  { %482 = vmatpush1.bf16.msra.mxu1 %v671_v39  ;;  %442 = vmatprep.subr.bf16.mxu0 %v672_v40 }
  0x29   :  { %483 = vmatprep.subr.bf16.mxu1 %v674_v41 }
  0x2b   :  { %443 = vmatpush1.bf16.msra.mxu0 %v676_v42 }
  0x2c   :  { %484 = vmatpush1.bf16.msra.mxu1 %v677_v43  ;;  %444 = vmatprep.subr.bf16.mxu0 %v678_v44 }
  0x2d   :  { %485 = vmatprep.subr.bf16.mxu1 %v680_v45 }
  0x2f   :  { %445 = vmatpush1.bf16.msra.mxu0 %v682_v49 }
  0x30   :  { %486 = vmatpush1.bf16.msra.mxu1 %v683_v50  ;;  %446 = vmatprep.subr.bf16.mxu0 %v684_v52 }
  0x31   :  { %487 = vmatprep.subr.bf16.mxu1 %v686_v53 }
  0x33   :  { %447 = vmatpush1.bf16.msra.mxu0 %v688_v54 }
  0x34   :  { %488 = vmatpush1.bf16.msra.mxu1 %v689_v55  ;;  %448 = vmatprep.subr.bf16.mxu0 %v690_v56 }
  0x35   :  { %489 = vmatprep.subr.bf16.mxu1 %v692_v57 }
  0x37   :  { %449 = vmatpush1.bf16.msra.mxu0 %v694_v58 }
  0x38   :  { %490 = vmatpush1.bf16.msra.mxu1 %v695_v59  ;;  %450 = vmatprep.subr.bf16.mxu0 %v696_v60 }
  0x39   :  { %491 = vmatprep.subr.bf16.mxu1 %v698_v61 }
  0x3b   :  { %451 = vmatpush1.bf16.msra.mxu0 %v700_v62 }
  0x3c   :  { %492 = vmatpush1.bf16.msra.mxu1 %v701_v63  ;;  %452 = vmatprep.subr.bf16.mxu0 %v702_v0 }
  0x3d   :  { %493 = vmatprep.subr.bf16.mxu1 %v704_v1 }
  0x3f   :  { %453 = vmatpush1.bf16.msra.mxu0 %v706_v2 }
  0x40   :  { %494 = vmatpush1.bf16.msra.mxu1 %v707_v3 }
  0x42   :  { %455 = vmatmul.mubr.bf16.vlgmr.msra.gmra.mrb[0].mxu0 %v542_v4 }
  0x43   :  { %496 = vmatmul.mubr.bf16.vlgmr.msra.gmra.mrb[0].mxu1 %v544_v5 }
 0x115   :  { %v456_v12 = vpop.f32.mrb[0].mxu0 }
 0x116   :  { %v497_v13 = vpop.f32.mrb[0].mxu1  ;;  %v458_v16 = vpop.f32.mrb[1].mxu0 }
 0x117   :  { %v498_v15 = vadd.f32 %v497_v13, %v456_v12  ;;  %v499_v17 = vpop.f32.mrb[1].mxu1  ;;  %v460_v19 = vpop.f32.mrb[2].mxu0 }
 0x118   :  { %v500_v18 = vadd.f32 %v499_v17, %v458_v16  ;;  %v501_v20 = vpop.f32.mrb[2].mxu1  ;;  %v461_v22 = vpop.f32.mrb[3].mxu0 }
 0x119   :  { %v525_v21 = vadd.f32 %v518_v11, %v498_v15  ;;  %v502_v23 = vpop.f32.mrb[3].mxu1 }
 0x11a   :  { %v526_v24 = vadd.f32 %v522_v14, %v500_v18 }
 0x11b   :  { %v527_v25 = vmax.f32 %v525_v21, 0.0 }
 0x11c   :  { %v528_v26 = vmax.f32 %v526_v24, 0.0 }
 0x11e   :  { %v611_v27 = vpack.c.bf16 %v528_v26, %v527_v25 }
 0x120   :  { %537 = vst [vmem:[%s939_s3] sm:$0xff] %v611_v27 }

// kernel: _lambda_.144
= control target key start
LH: loop header
LB: loop body
LE: loop exit
PB: predicated region body
PF: predicated region fallthrough
CT: control target
= control target key end

     0   :  { %8 = vsyncpa [#allocation3], 0  ;;  %s800_s0 = inlined_call_operand.vmem [shape: f32[16,8], index: 0, kind: input, shape index: {}]   ;;  %s801_s1 = inlined_call_operand.vmem [shape: bf16[2,8,8], index: 1, kind: input, shape index: {}]   ;;  %s802_s2 = inlined_call_operand.vmem [shape: f32[8,16], index: 2, kind: input, shape index: {}]   ;;  %s803_s3 = inlined_call_operand.hbm [shape: f32[2,16,16], index: 3, kind: output, shape index: {}]  }
   0x1   :  { %10 = vsyncpa [#allocation3 + $0x1], 0  ;;  %s672_s12 = smov 0   ;;  %s674_s13 = smov 0  }
   0x2   :  { %s676_s14 = smov 0   ;;  %s678_s15 = smov 0  }
   0x3   :  { %s680_s16 = smov 0   ;;  %s682_s17 = smov 0  }
   0x4 LB: > { %s478_s18 = sadd.s32 4294967295, %s647_s17   ;;  %s479_s19 = sadd.s32 4294967294, %s647_s17   ;;  %s647_s17 = sphi %s682_s17, %s16_s17   ;;  %s643_s16 = sphi %s680_s16, %s810_s16   ;;  %s639_s15 = sphi %s678_s15, %s809_s15   ;;  %s635_s14 = sphi %s676_s14, %s808_s14   ;;  %s631_s13 = sphi %s674_s13, %s807_s13   ;;  %s627_s12 = sphi %s672_s12, %s806_s12  }
   0x5   : > { %s28_s20 = sadd.s32 1, %s643_s16  ;;  %s110_s21 = sadd.s32 1, %s635_s14 }
   0x6   : > { %p30_p0 = scmp.ge.s32.totalorder %s28_s20, 2  ;;  %p120_p1 = scmp.ne.s32.totalorder %s635_s14, %s631_s13 }
   0x7   : > { %p121_p2 = scmp.eq.s32.totalorder %s478_s18, 1  ;;  %p126_p3 = scmp.ne.s32.totalorder %s631_s13, %s627_s12 }
   0x8   : > { %s812_s20 = smov (%p30_p0, %s28_s20), 0  ;;  %p127_p5 = scmp.eq.s32.totalorder %s479_s19, 1 }
   0x9   : > { %p712_p4 = por %p121_p2, %p120_p1  ;;  %s105_s23 = ssub.s32 %s643_s16, %s812_s20 }
   0xa   : > { %p483_p6 = scmp.ge.s32.totalorder %s647_s17, 1  ;;  %p108_p7 = scmp.eq.s32.totalorder %s105_s23, 0 }
   0xb   : > { %p719_p8 = por %p127_p5, %p126_p3  ;;  %p164_p9 = scmp.lt.s32.totalorder %s647_s17, 3 }
   0xc   : > { %s725_s25 = scalar_select %p108_p7, %s635_s14, %s110_s21  }
   0xd   : > { %p165_p10 = pnand %p483_p6, %p164_p9 }
   0xe   : > { %p198_p11 = scmp.lt.s32.totalorder (!%p165_p10), %s639_s15, 1  ;;  %v203_v0 = vld [vmem:[%s800_s0] sm:$0xff] (!%p165_p10)  ;;  %vm207_vm0 = vcmask (!%p165_p10), 64512   ;;  %v204_v3 = vld [vmem:[%s800_s0 + $0x8] sm:$0xff] (!%p165_p10)  ;;  %s189_s10 = sand.u32 (!%p165_p10), 1, %s631_s13   ;;  %vm371_vm1 = vcmask (!%p165_p10), 130048  }
   0xf   : > { %168 = sbr.rel (%p165_p10) target bundleno = 473 (0x1d9), region = 32  ;;  %504 = vmatprep.mubr.msk.f32.mxu0 (!%p165_p10), %vm207_vm0, %v203_v0  ;;  %v289_v4 = vld [vmem:[%s802_s2] sm:$0xff] (!%p165_p10)  ;;  %s484_s11 = sshll.u32 (!%p165_p10), %s189_s10, 4 }
  0x10   : > { %507 = vmatprep.subr.mxu1 (!%p165_p10), %v289_v4  ;;  %s191_s18 = scalar_lea.vmem (!%p165_p10), [#allocation2], %s484_s11  ;;  %s495_s21 = sshll.u32 (!%p165_p10), %s639_s15, 8 }
  0x11   : > { %508 = vmatpush3.msra.mxu1 (!%p165_p10), %v289_v4  ;;  %s390_s19 = sshll.u32 (!%p165_p10), %s191_s18, 4  ;;  %s752_s27 = scalar_lea.hbm (!%p165_p10), %s803_s3, %s495_s21  ;;  %s747_s19 = int_to_ptr.vmem [resolvable:$true] %s390_s19 }
  0x16   : > { %s199_s28 = scalar_select %p198_p11, %s639_s15, 1 }
  0x17   : > { %s649_s15 = smov [#allocation2]  }
  0x18   : > { %s485_s29 = sshll.u32 %s199_s28, 2  ;;  %s754_s28 = scalar_lea.sflag [#allocation3], %s189_s10 }
  0x19   : > { %s201_s5 = scalar_lea.vmem %s801_s1, %s485_s29  ;;  %s569_s29 = scalar_lea.vmem %s747_s19, 256 }
  0x1a   : > { %v205_v1 = vld [vmem:[%s201_s5] sm:$0xf]  ;;  %p570_p12 = scmp.ne.s32.totalorder %s747_s19, %s569_s29  ;;  %s573_s30 = sshll.u32 %s649_s15, 4  ;;  %s574_s30 = int_to_ptr.vmem [resolvable:$false] %s573_s30 }
  0x1b   : > { %v206_v2 = vunpack.c.l.bf16 %v205_v1  ;;  %s575_s4 = scalar_lea.vmem %s574_s30, 512  ;;  %p576_p1 = scmp.lt.s32.totalorder %s747_s19, %s574_s30 }
  0x1c   : > { %p571_p13 = pnand %p570_p12, %p712_p4  ;;  %p577_p2 = scmp.lt.s32.totalorder %s575_s4, %s569_s29 }
  0x1d   : > { %502 = vmatprep.subr.mxu0 %v206_v2 }
  0x1e   : > { %503 = vmatpush3.msra.mxu0 %v206_v2  ;;  %p572_p0 = pneg %p571_p13  ;;  %p578_p3 = por %p577_p2, %p576_p1 }
  0x1f   : > { %505 = vmatmul.mubr.msk.f32.vlgmr.msra.gmra.mrb[0].mxu0 %vm207_vm0, %v204_v3 }
  0x20   : > { %p579_p5 = pnand %p578_p3, %p572_p0 }
  0xf2   : > { %v506_v5 = vpop.f32.mrb[0].mxu0 }
  0xf3   : > { %v280_v6 = vpop.f32.mrb[1].mxu0 }
  0xf4   : > { %509 = vmatprep.mubr.msk.f32.mxu1 %vm207_vm0, %v280_v6 }
  0xf5   : > { %510 = vmatmul.mubr.msk.f32.vlgmr.msra.gmra.mrb[0].mxu1 %vm207_vm0, %v506_v5 }
 0x1c8   : > { %v511_v7 = vpop.f32.mrb[0].mxu1 }
 0x1c9   : > { %373 = vst.msk [vmem:[%s191_s18 + $0x8] sm:$0xff] %vm371_vm1, %v511_v7  ;;  %v362_v8 = vpop.f32.mrb[1].mxu1 }
 0x1ca   : > { %372 = vst.msk [vmem:[%s191_s18] sm:$0xff] %vm371_vm1, %v362_v8 }
 0x1cb   : > { %582 = shalt.err (!%p579_p5)
}
 0x1cc   : > { %s583_s5 = scalar_lea.hbm %s752_s27, 256  ;;  %s587_s8 = scalar_lea.hbm %s803_s3, 512 }
 0x1cd   : > { %p584_p6 = scmp.ne.s32.totalorder %s752_s27, %s583_s5  ;;  %p588_p10 = scmp.lt.u32.totalorder %s752_s27, %s803_s3 }
 0x1ce   : > { %p589_p11 = scmp.lt.u32.totalorder %s587_s8, %s583_s5  ;;  %p591_p13 = scmp.lt.u32.totalorder %s583_s5, %s752_s27 }
 0x1cf   : > { %p585_p7 = pnand %p584_p6, %p712_p4 }
 0x1d0   : > { %p590_p12 = por %p589_p11, %p588_p10 }
 0x1d1   : > { %p586_p9 = pneg %p585_p7 }
 0x1d2   : > { %p592_p0 = por %p591_p13, %p590_p12 }
 0x1d4   : > { %p593_p1 = pnand %p592_p0, %p586_p9 }
 0x1d6   : > { %596 = shalt.err (!%p593_p1)
}
 0x1d7   : > { %s650_s11 = smov 128   ;;  %s651_s18 = smov 8  }
 0x1d8   : > { %512 = dma.vmem_to_hbm [thread:$0]  (%p712_p4), %s747_s19, 256, %s752_s27, %s754_s28, %s650_s11, %s650_s11, %s651_s18  }
 0x1d9 PF: > { %p518_p2 = scmp.ge.s32.totalorder %s647_s17, 2  ;;  %s405_s21 = sand.u32 1, %s627_s12  }
 0x1da   : > { %s406_s23 = scalar_lea.sflag [#allocation3], %s405_s21 }
 0x1db   : > { %p515_p3 = pnand %p518_p2, %p719_p8 }
 0x1dd   : > { %622 = dma.done.wait (!%p515_p3), %s406_s23, 256  }
 0x1de   : > { %624 = vsyncadd (!%p515_p3), %s406_s23, 4294967040  ;;  %s16_s17 = sadd.s32 1, %s647_s17   ;;  %s806_s12 = smov %s631_s13 }
 0x1df   : > { %p13_p5 = scmp.ge.s32.totalorder %s16_s17, 4   ;;  %s807_s13 = smov %s635_s14 }
 0x1e0   : > { %s808_s14 = smov %s725_s25  ;;  %s809_s15 = smov %s643_s16 }
 0x1e1   : > { %s810_s16 = smov %s812_s20  ;;  %15 = sbr.rel (!%p13_p5) target bundleno = 4 (0x4), region = 70 }
 0x1e8   :  { %411 = vsyncpa [#allocation3], 1 }
 0x1e9   :  { %413 = vsyncpa [#allocation3 + $0x1], 1 }

</bundles_post_ra>
